<compile_context>
chip_gen: v5e
topology: v5e:2x2
jax: 0.10.0
libtpu: 0.0.40
codegen_flags: <defaults>
</compile_context>

<pallas_src>
import numpy as np
import jax
import jax.numpy as jnp
from jax import lax
from jax.experimental import pallas as pl
from jax.experimental.pallas import tpu as pltpu


def loss_header_kernel(x_ref, pool_ref, wc_ref, bc_ref, wf_ref, bf_ref,
                       wh_ref, bh_ref, out_ref):
    # x_ref:   (N*HW, C)        f32   flattened NHWC input pixels
    # pool_ref:(NS*NP, N*HW)    f32   avg-pool matrix, s-major, NP (=8-padded batch) rows per s
    # wc_ref:  (C, 128)         f32   1x1 conv weight
    # bc_ref:  (1, 128)         f32   conv bias
    # wf_ref:  (NS, 128, 1024)  bf16  fc weight [s, c, m] (PyTorch channel-major Flatten folded in)
    # bf_ref:  (1, 1024)        f32   fc bias
    # wh_ref:  (1024, 128)      f32   concat + zero-padded xyz/wpqr head weights
    # bh_ref:  (1, 128)         f32   concat + zero-padded head biases
    # out_ref: (NP, 128)        f32   [:, 0:3] = xyz, [:, 3:7] = wpqr
    NS = wf_ref.shape[0]
    NP = out_ref.shape[0]

    # 1x1 conv over every pixel first (lane-dense, 128-wide intermediate),
    # then avg-pool; conv and avg-pool commute and the pool window is always
    # full, so the conv bias can be added after pooling.
    conv_all = jnp.dot(x_ref[...], wc_ref[...],
                       preferred_element_type=jnp.float32)              # (N*HW, 128)
    pooled = jnp.dot(pool_ref[...], conv_all,
                     preferred_element_type=jnp.float32)                # (NS*NP, 128)
    act = jnp.maximum(pooled + bc_ref[...], 0.0).astype(jnp.bfloat16)   # ReLU, bf16 for MXU

    # fc: h[n, m] = sum_{s, c} act[s*NP + n, c] * wf[s, c, m]
    # Static loop over NS keeps every slice 8-sublane aligned and every matmul
    # a plain 2-D bf16 MXU dot with f32 accumulation.
    h = jnp.zeros((NP, 1024), jnp.float32)
    for s in range(NS):
        h = h + jnp.dot(act[s * NP:(s + 1) * NP, :], wf_ref[s],
                        preferred_element_type=jnp.float32)
    h = jnp.maximum(h + bf_ref[...], 0.0)
    # TODO(synk): Dropout(0.7) is inference-mode identity here; training-mode
    # stochastic masking is omitted.

    # Both heads fused into one lane-dense (NP, 128) output matmul.
    out_ref[...] = jnp.dot(h, wh_ref[...],
                           preferred_element_type=jnp.float32) + bh_ref[...]


def _avgpool_matrix(H, W, k, s):
    """(OH*OW, H*W) matrix M such that M @ vec(img) == AvgPool2d(k, s)(img) flattened."""
    OH = (H - k) // s + 1
    OW = (W - k) // s + 1
    P = np.zeros((OH * OW, H * W), np.float32)
    inv = 1.0 / (k * k)
    for oh in range(OH):
        for ow in range(OW):
            for kh in range(k):
                for kw in range(k):
                    P[oh * OW + ow, (oh * s + kh) * W + (ow * s + kw)] = inv
    return P


def prepare_params(params, N, C, H, W):
    """One-time parameter / constant preprocessing (hoisted out of the forward pass)."""
    K, S = 5, 3
    OH = (H - K) // S + 1
    OW = (W - K) // S + 1
    NS = OH * OW
    assert 128 * NS == 2048, "pooled spatial dims must flatten to fc in_features=2048"
    HW = H * W
    NP = ((N + 7) // 8) * 8   # batch rows per spatial position padded to a sublane tile

    pool = _avgpool_matrix(H, W, K, S)                      # (NS, HW)
    pool_pad = np.zeros((NS * NP, N * HW), np.float32)      # row s*NP + n holds pool row s for batch n
    for s in range(NS):
        for n in range(N):
            pool_pad[s * NP + n, n * HW:(n + 1) * HW] = pool[s]

    # fc weight: fold PyTorch's channel-major Flatten order into the layout:
    #   wf3[s, c, m] = fc_w[m, c*NS + s];  stored as bf16 to halve HBM traffic.
    wf3 = np.asarray(params["fc_w"]).reshape(1024, 128, NS).transpose(2, 1, 0)

    # Heads: concatenate + zero-pad to 128 lanes for a single lane-dense output.
    wh = np.zeros((1024, 128), np.float32)
    wh[:, 0:3] = np.asarray(params["xyz_w"]).T
    wh[:, 3:7] = np.asarray(params["wpqr_w"]).T
    bh = np.zeros((1, 128), np.float32)
    bh[0, 0:3] = np.asarray(params["xyz_b"])
    bh[0, 3:7] = np.asarray(params["wpqr_b"])

    return {
        "N": N, "NP": NP, "NS": NS, "C": C, "H": H, "W": W,
        "pool_pad": jnp.asarray(pool_pad),
        "wc": jnp.asarray(params["conv_w"]).reshape(128, C).T,   # (C, 128)
        "bc": jnp.asarray(params["conv_b"]).reshape(1, 128),
        "wf3": jnp.asarray(wf3, dtype=jnp.bfloat16),             # (NS, 128, 1024) bf16
        "bf": jnp.asarray(params["fc_b"]).reshape(1, 1024),
        "wh": jnp.asarray(wh),
        "bh": jnp.asarray(bh),
    }


def loss_header_forward(x_nchw, prep):
    N, C, H, W = x_nchw.shape
    assert (N, C, H, W) == (prep["N"], prep["C"], prep["H"], prep["W"])
    NP, NS = prep["NP"], prep["NS"]
    HW = H * W

    # glue: NCHW -> (N*HW, C) pixel matrix (tiny, done by XLA)
    x_flat = jnp.transpose(x_nchw, (0, 2, 3, 1)).reshape(N * HW, C)

    flops = 2 * (N * HW * C * 128            # 1x1 conv
                 + NS * NP * N * HW * 128    # pooling matmul (dense count)
                 + NS * NP * 128 * 1024      # fc
                 + NP * 1024 * 128)          # heads
    bytes_accessed = (x_flat.size * 4 + prep["pool_pad"].size * 4
                      + prep["wc"].size * 4 + prep["wf3"].size * 2
                      + prep["wh"].size * 4
                      + (128 + 1024 + 128) * 4 + NP * 128 * 4)

    out = pl.pallas_call(
        loss_header_kernel,
        out_shape=jax.ShapeDtypeStruct((NP, 128), jnp.float32),
        compiler_params=pltpu.CompilerParams(vmem_limit_bytes=24 * 1024 * 1024),
        cost_estimate=pl.CostEstimate(flops=flops, transcendentals=0,
                                      bytes_accessed=bytes_accessed),
    )(x_flat, prep["pool_pad"], prep["wc"], prep["bc"],
      prep["wf3"], prep["bf"], prep["wh"], prep["bh"])

    return out[:N, 0:3], out[:N, 3:7]


def init_params(key, inchannel):
    ks = jax.random.split(key, 8)
    return {
        "conv_w": jax.random.normal(ks[0], (128, inchannel, 1, 1), jnp.float32) * 0.05,
        "conv_b": jax.random.normal(ks[1], (128,), jnp.float32) * 0.05,
        "fc_w":   jax.random.normal(ks[2], (1024, 2048), jnp.float32) * 0.02,
        "fc_b":   jax.random.normal(ks[3], (1024,), jnp.float32) * 0.02,
        "xyz_w":  jax.random.normal(ks[4], (3, 1024), jnp.float32) * 0.05,
        "xyz_b":  jax.random.normal(ks[5], (3,), jnp.float32) * 0.05,
        "wpqr_w": jax.random.normal(ks[6], (4, 1024), jnp.float32) * 0.05,
        "wpqr_b": jax.random.normal(ks[7], (4,), jnp.float32) * 0.05,
    }


def reference_forward(x, p):
    # Pure-JAX f32 reference mirroring the PyTorch forward (NCHW).
    N, C, H, W = x.shape
    pooled = lax.reduce_window(x, 0.0, lax.add, (1, 1, 5, 5), (1, 1, 3, 3), "VALID") / 25.0
    conv = jnp.einsum("nchw,oc->nohw", pooled, p["conv_w"].reshape(128, C))
    conv = jnp.maximum(conv + p["conv_b"][None, :, None, None], 0.0)
    f = conv.reshape(N, -1)                      # channel-major flatten, like nn.Flatten
    h = jnp.maximum(f @ p["fc_w"].T + p["fc_b"], 0.0)
    return h @ p["xyz_w"].T + p["xyz_b"], h @ p["wpqr_w"].T + p["wpqr_b"]


if __name__ == "__main__":
    # After AvgPool2d(5, stride=3) a 14x14 input becomes 4x4 -> 128*4*4 = 2048 fc features.
    N, C, H, W = 2, 32, 14, 14
    key = jax.random.PRNGKey(0)
    kx, kp = jax.random.split(key)
    x = jax.random.normal(kx, (N, C, H, W), jnp.float32)
    params = init_params(kp, C)

    prep = prepare_params(params, N, C, H, W)   # one-time preprocessing (not per-forward)
    xyz, wpqr = loss_header_forward(x, prep)
    jax.block_until_ready((xyz, wpqr))

    xyz_ref, wpqr_ref = reference_forward(x, params)
    assert xyz.shape == (N, 3) and wpqr.shape == (N, 4)
    # bf16 fc weights -> slightly looser tolerance than the pure-f32 path.
    assert np.allclose(np.asarray(xyz), np.asarray(xyz_ref), rtol=2e-2, atol=5e-3), "xyz mismatch"
    assert np.allclose(np.asarray(wpqr), np.asarray(wpqr_ref), rtol=2e-2, atol=5e-3), "wpqr mismatch"
    print("KERNEL_OK")
</pallas_src>

<mosaic_0001>
module attributes {stable_mosaic.version = 11 : i64} {
  func.func @loss_header_kernel(%arg0: memref<392x32xf32, #tpu.memory_space<vmem>>, %arg1: memref<128x392xf32, #tpu.memory_space<vmem>>, %arg2: memref<32x128xf32, #tpu.memory_space<vmem>>, %arg3: memref<1x128xf32, #tpu.memory_space<vmem>>, %arg4: memref<16x128x1024xbf16, #tpu.memory_space<vmem>>, %arg5: memref<1x1024xf32, #tpu.memory_space<vmem>>, %arg6: memref<1024x128xf32, #tpu.memory_space<vmem>>, %arg7: memref<1x128xf32, #tpu.memory_space<vmem>>, %arg8: memref<8x128xf32, #tpu.memory_space<vmem>>) attributes {dimension_semantics = [], scalar_prefetch = 0 : i64, scratch_operands = 0 : i64, tpu.core_type = #tpu.core_type<tc>} {
    %c0 = arith.constant 0 : index
    %c0_0 = arith.constant 0 : index
    %0 = vector.load %arg0[%c0, %c0_0] : memref<392x32xf32, #tpu.memory_space<vmem>>, vector<392x32xf32>
    %c0_1 = arith.constant 0 : index
    %c0_2 = arith.constant 0 : index
    %1 = vector.load %arg2[%c0_1, %c0_2] : memref<32x128xf32, #tpu.memory_space<vmem>>, vector<32x128xf32>
    %cst = arith.constant dense<0.000000e+00> : vector<392x128xf32>
    %2 = tpu.matmul %0, %1, %cst {dimension_numbers = #tpu.dot_dimension_numbers<[1], [0], [0], [1], [0, 0, 1, 1], [], []>} : vector<392x32xf32>, vector<32x128xf32>, vector<392x128xf32> -> vector<392x128xf32>
    %c0_3 = arith.constant 0 : index
    %c0_4 = arith.constant 0 : index
    %3 = vector.load %arg1[%c0_3, %c0_4] : memref<128x392xf32, #tpu.memory_space<vmem>>, vector<128x392xf32>
    %cst_5 = arith.constant dense<0.000000e+00> : vector<128x128xf32>
    %4 = tpu.matmul %3, %2, %cst_5 {dimension_numbers = #tpu.dot_dimension_numbers<[1], [0], [0], [1], [0, 0, 1, 1], [], []>} : vector<128x392xf32>, vector<392x128xf32>, vector<128x128xf32> -> vector<128x128xf32>
    %c0_6 = arith.constant 0 : index
    %c0_7 = arith.constant 0 : index
    %5 = vector.load %arg3[%c0_6, %c0_7] : memref<1x128xf32, #tpu.memory_space<vmem>>, vector<1x128xf32>
    %6 = vector.broadcast %5 : vector<1x128xf32> to vector<128x128xf32>
    %7 = arith.addf %4, %6 : vector<128x128xf32>
    %cst_8 = arith.constant 0.000000e+00 : f32
    %8 = vector.broadcast %cst_8 : f32 to vector<128x128xf32>
    %9 = arith.maximumf %7, %8 : vector<128x128xf32>
    %10 = arith.truncf %9 : vector<128x128xf32> to vector<128x128xbf16>
    %cst_9 = arith.constant 0.000000e+00 : f32
    %11 = vector.broadcast %cst_9 : f32 to vector<8x1024xf32>
    %12 = vector.extract_strided_slice %10 {offsets = [0, 0], sizes = [8, 128], strides = [1, 1]} : vector<128x128xbf16> to vector<8x128xbf16>
    %c0_10 = arith.constant 0 : index
    %c0_11 = arith.constant 0 : index
    %c0_12 = arith.constant 0 : index
    %13 = vector.load %arg4[%c0_10, %c0_11, %c0_12] : memref<16x128x1024xbf16, #tpu.memory_space<vmem>>, vector<1x128x1024xbf16>
    %14 = vector.shape_cast %13 : vector<1x128x1024xbf16> to vector<128x1024xbf16>
    %cst_13 = arith.constant dense<0.000000e+00> : vector<8x1024xf32>
    %15 = tpu.matmul %12, %14, %cst_13 {dimension_numbers = #tpu.dot_dimension_numbers<[1], [0], [0], [1], [0, 0, 1, 1], [], []>} : vector<8x128xbf16>, vector<128x1024xbf16>, vector<8x1024xf32> -> vector<8x1024xf32>
    %16 = arith.addf %11, %15 : vector<8x1024xf32>
    %17 = vector.extract_strided_slice %10 {offsets = [8, 0], sizes = [8, 128], strides = [1, 1]} : vector<128x128xbf16> to vector<8x128xbf16>
    %c1 = arith.constant 1 : index
    %c0_14 = arith.constant 0 : index
    %c0_15 = arith.constant 0 : index
    %18 = vector.load %arg4[%c1, %c0_14, %c0_15] : memref<16x128x1024xbf16, #tpu.memory_space<vmem>>, vector<1x128x1024xbf16>
    %19 = vector.shape_cast %18 : vector<1x128x1024xbf16> to vector<128x1024xbf16>
    %cst_16 = arith.constant dense<0.000000e+00> : vector<8x1024xf32>
    %20 = tpu.matmul %17, %19, %cst_16 {dimension_numbers = #tpu.dot_dimension_numbers<[1], [0], [0], [1], [0, 0, 1, 1], [], []>} : vector<8x128xbf16>, vector<128x1024xbf16>, vector<8x1024xf32> -> vector<8x1024xf32>
    %21 = arith.addf %16, %20 : vector<8x1024xf32>
    %22 = vector.extract_strided_slice %10 {offsets = [16, 0], sizes = [8, 128], strides = [1, 1]} : vector<128x128xbf16> to vector<8x128xbf16>
    %c2 = arith.constant 2 : index
    %c0_17 = arith.constant 0 : index
    %c0_18 = arith.constant 0 : index
    %23 = vector.load %arg4[%c2, %c0_17, %c0_18] : memref<16x128x1024xbf16, #tpu.memory_space<vmem>>, vector<1x128x1024xbf16>
    %24 = vector.shape_cast %23 : vector<1x128x1024xbf16> to vector<128x1024xbf16>
    %cst_19 = arith.constant dense<0.000000e+00> : vector<8x1024xf32>
    %25 = tpu.matmul %22, %24, %cst_19 {dimension_numbers = #tpu.dot_dimension_numbers<[1], [0], [0], [1], [0, 0, 1, 1], [], []>} : vector<8x128xbf16>, vector<128x1024xbf16>, vector<8x1024xf32> -> vector<8x1024xf32>
    %26 = arith.addf %21, %25 : vector<8x1024xf32>
    %27 = vector.extract_strided_slice %10 {offsets = [24, 0], sizes = [8, 128], strides = [1, 1]} : vector<128x128xbf16> to vector<8x128xbf16>
    %c3 = arith.constant 3 : index
    %c0_20 = arith.constant 0 : index
    %c0_21 = arith.constant 0 : index
    %28 = vector.load %arg4[%c3, %c0_20, %c0_21] : memref<16x128x1024xbf16, #tpu.memory_space<vmem>>, vector<1x128x1024xbf16>
    %29 = vector.shape_cast %28 : vector<1x128x1024xbf16> to vector<128x1024xbf16>
    %cst_22 = arith.constant dense<0.000000e+00> : vector<8x1024xf32>
    %30 = tpu.matmul %27, %29, %cst_22 {dimension_numbers = #tpu.dot_dimension_numbers<[1], [0], [0], [1], [0, 0, 1, 1], [], []>} : vector<8x128xbf16>, vector<128x1024xbf16>, vector<8x1024xf32> -> vector<8x1024xf32>
    %31 = arith.addf %26, %30 : vector<8x1024xf32>
    %32 = vector.extract_strided_slice %10 {offsets = [32, 0], sizes = [8, 128], strides = [1, 1]} : vector<128x128xbf16> to vector<8x128xbf16>
    %c4 = arith.constant 4 : index
    %c0_23 = arith.constant 0 : index
    %c0_24 = arith.constant 0 : index
    %33 = vector.load %arg4[%c4, %c0_23, %c0_24] : memref<16x128x1024xbf16, #tpu.memory_space<vmem>>, vector<1x128x1024xbf16>
    %34 = vector.shape_cast %33 : vector<1x128x1024xbf16> to vector<128x1024xbf16>
    %cst_25 = arith.constant dense<0.000000e+00> : vector<8x1024xf32>
    %35 = tpu.matmul %32, %34, %cst_25 {dimension_numbers = #tpu.dot_dimension_numbers<[1], [0], [0], [1], [0, 0, 1, 1], [], []>} : vector<8x128xbf16>, vector<128x1024xbf16>, vector<8x1024xf32> -> vector<8x1024xf32>
    %36 = arith.addf %31, %35 : vector<8x1024xf32>
    %37 = vector.extract_strided_slice %10 {offsets = [40, 0], sizes = [8, 128], strides = [1, 1]} : vector<128x128xbf16> to vector<8x128xbf16>
    %c5 = arith.constant 5 : index
    %c0_26 = arith.constant 0 : index
    %c0_27 = arith.constant 0 : index
    %38 = vector.load %arg4[%c5, %c0_26, %c0_27] : memref<16x128x1024xbf16, #tpu.memory_space<vmem>>, vector<1x128x1024xbf16>
    %39 = vector.shape_cast %38 : vector<1x128x1024xbf16> to vector<128x1024xbf16>
    %cst_28 = arith.constant dense<0.000000e+00> : vector<8x1024xf32>
    %40 = tpu.matmul %37, %39, %cst_28 {dimension_numbers = #tpu.dot_dimension_numbers<[1], [0], [0], [1], [0, 0, 1, 1], [], []>} : vector<8x128xbf16>, vector<128x1024xbf16>, vector<8x1024xf32> -> vector<8x1024xf32>
    %41 = arith.addf %36, %40 : vector<8x1024xf32>
    %42 = vector.extract_strided_slice %10 {offsets = [48, 0], sizes = [8, 128], strides = [1, 1]} : vector<128x128xbf16> to vector<8x128xbf16>
    %c6 = arith.constant 6 : index
    %c0_29 = arith.constant 0 : index
    %c0_30 = arith.constant 0 : index
    %43 = vector.load %arg4[%c6, %c0_29, %c0_30] : memref<16x128x1024xbf16, #tpu.memory_space<vmem>>, vector<1x128x1024xbf16>
    %44 = vector.shape_cast %43 : vector<1x128x1024xbf16> to vector<128x1024xbf16>
    %cst_31 = arith.constant dense<0.000000e+00> : vector<8x1024xf32>
    %45 = tpu.matmul %42, %44, %cst_31 {dimension_numbers = #tpu.dot_dimension_numbers<[1], [0], [0], [1], [0, 0, 1, 1], [], []>} : vector<8x128xbf16>, vector<128x1024xbf16>, vector<8x1024xf32> -> vector<8x1024xf32>
    %46 = arith.addf %41, %45 : vector<8x1024xf32>
    %47 = vector.extract_strided_slice %10 {offsets = [56, 0], sizes = [8, 128], strides = [1, 1]} : vector<128x128xbf16> to vector<8x128xbf16>
    %c7 = arith.constant 7 : index
    %c0_32 = arith.constant 0 : index
    %c0_33 = arith.constant 0 : index
    %48 = vector.load %arg4[%c7, %c0_32, %c0_33] : memref<16x128x1024xbf16, #tpu.memory_space<vmem>>, vector<1x128x1024xbf16>
    %49 = vector.shape_cast %48 : vector<1x128x1024xbf16> to vector<128x1024xbf16>
    %cst_34 = arith.constant dense<0.000000e+00> : vector<8x1024xf32>
    %50 = tpu.matmul %47, %49, %cst_34 {dimension_numbers = #tpu.dot_dimension_numbers<[1], [0], [0], [1], [0, 0, 1, 1], [], []>} : vector<8x128xbf16>, vector<128x1024xbf16>, vector<8x1024xf32> -> vector<8x1024xf32>
    %51 = arith.addf %46, %50 : vector<8x1024xf32>
    %52 = vector.extract_strided_slice %10 {offsets = [64, 0], sizes = [8, 128], strides = [1, 1]} : vector<128x128xbf16> to vector<8x128xbf16>
    %c8 = arith.constant 8 : index
    %c0_35 = arith.constant 0 : index
    %c0_36 = arith.constant 0 : index
    %53 = vector.load %arg4[%c8, %c0_35, %c0_36] : memref<16x128x1024xbf16, #tpu.memory_space<vmem>>, vector<1x128x1024xbf16>
    %54 = vector.shape_cast %53 : vector<1x128x1024xbf16> to vector<128x1024xbf16>
    %cst_37 = arith.constant dense<0.000000e+00> : vector<8x1024xf32>
    %55 = tpu.matmul %52, %54, %cst_37 {dimension_numbers = #tpu.dot_dimension_numbers<[1], [0], [0], [1], [0, 0, 1, 1], [], []>} : vector<8x128xbf16>, vector<128x1024xbf16>, vector<8x1024xf32> -> vector<8x1024xf32>
    %56 = arith.addf %51, %55 : vector<8x1024xf32>
    %57 = vector.extract_strided_slice %10 {offsets = [72, 0], sizes = [8, 128], strides = [1, 1]} : vector<128x128xbf16> to vector<8x128xbf16>
    %c9 = arith.constant 9 : index
    %c0_38 = arith.constant 0 : index
    %c0_39 = arith.constant 0 : index
    %58 = vector.load %arg4[%c9, %c0_38, %c0_39] : memref<16x128x1024xbf16, #tpu.memory_space<vmem>>, vector<1x128x1024xbf16>
    %59 = vector.shape_cast %58 : vector<1x128x1024xbf16> to vector<128x1024xbf16>
    %cst_40 = arith.constant dense<0.000000e+00> : vector<8x1024xf32>
    %60 = tpu.matmul %57, %59, %cst_40 {dimension_numbers = #tpu.dot_dimension_numbers<[1], [0], [0], [1], [0, 0, 1, 1], [], []>} : vector<8x128xbf16>, vector<128x1024xbf16>, vector<8x1024xf32> -> vector<8x1024xf32>
    %61 = arith.addf %56, %60 : vector<8x1024xf32>
    %62 = vector.extract_strided_slice %10 {offsets = [80, 0], sizes = [8, 128], strides = [1, 1]} : vector<128x128xbf16> to vector<8x128xbf16>
    %c10 = arith.constant 10 : index
    %c0_41 = arith.constant 0 : index
    %c0_42 = arith.constant 0 : index
    %63 = vector.load %arg4[%c10, %c0_41, %c0_42] : memref<16x128x1024xbf16, #tpu.memory_space<vmem>>, vector<1x128x1024xbf16>
    %64 = vector.shape_cast %63 : vector<1x128x1024xbf16> to vector<128x1024xbf16>
    %cst_43 = arith.constant dense<0.000000e+00> : vector<8x1024xf32>
    %65 = tpu.matmul %62, %64, %cst_43 {dimension_numbers = #tpu.dot_dimension_numbers<[1], [0], [0], [1], [0, 0, 1, 1], [], []>} : vector<8x128xbf16>, vector<128x1024xbf16>, vector<8x1024xf32> -> vector<8x1024xf32>
    %66 = arith.addf %61, %65 : vector<8x1024xf32>
    %67 = vector.extract_strided_slice %10 {offsets = [88, 0], sizes = [8, 128], strides = [1, 1]} : vector<128x128xbf16> to vector<8x128xbf16>
    %c11 = arith.constant 11 : index
    %c0_44 = arith.constant 0 : index
    %c0_45 = arith.constant 0 : index
    %68 = vector.load %arg4[%c11, %c0_44, %c0_45] : memref<16x128x1024xbf16, #tpu.memory_space<vmem>>, vector<1x128x1024xbf16>
    %69 = vector.shape_cast %68 : vector<1x128x1024xbf16> to vector<128x1024xbf16>
    %cst_46 = arith.constant dense<0.000000e+00> : vector<8x1024xf32>
    %70 = tpu.matmul %67, %69, %cst_46 {dimension_numbers = #tpu.dot_dimension_numbers<[1], [0], [0], [1], [0, 0, 1, 1], [], []>} : vector<8x128xbf16>, vector<128x1024xbf16>, vector<8x1024xf32> -> vector<8x1024xf32>
    %71 = arith.addf %66, %70 : vector<8x1024xf32>
    %72 = vector.extract_strided_slice %10 {offsets = [96, 0], sizes = [8, 128], strides = [1, 1]} : vector<128x128xbf16> to vector<8x128xbf16>
    %c12 = arith.constant 12 : index
    %c0_47 = arith.constant 0 : index
    %c0_48 = arith.constant 0 : index
    %73 = vector.load %arg4[%c12, %c0_47, %c0_48] : memref<16x128x1024xbf16, #tpu.memory_space<vmem>>, vector<1x128x1024xbf16>
    %74 = vector.shape_cast %73 : vector<1x128x1024xbf16> to vector<128x1024xbf16>
    %cst_49 = arith.constant dense<0.000000e+00> : vector<8x1024xf32>
    %75 = tpu.matmul %72, %74, %cst_49 {dimension_numbers = #tpu.dot_dimension_numbers<[1], [0], [0], [1], [0, 0, 1, 1], [], []>} : vector<8x128xbf16>, vector<128x1024xbf16>, vector<8x1024xf32> -> vector<8x1024xf32>
    %76 = arith.addf %71, %75 : vector<8x1024xf32>
    %77 = vector.extract_strided_slice %10 {offsets = [104, 0], sizes = [8, 128], strides = [1, 1]} : vector<128x128xbf16> to vector<8x128xbf16>
    %c13 = arith.constant 13 : index
    %c0_50 = arith.constant 0 : index
    %c0_51 = arith.constant 0 : index
    %78 = vector.load %arg4[%c13, %c0_50, %c0_51] : memref<16x128x1024xbf16, #tpu.memory_space<vmem>>, vector<1x128x1024xbf16>
    %79 = vector.shape_cast %78 : vector<1x128x1024xbf16> to vector<128x1024xbf16>
    %cst_52 = arith.constant dense<0.000000e+00> : vector<8x1024xf32>
    %80 = tpu.matmul %77, %79, %cst_52 {dimension_numbers = #tpu.dot_dimension_numbers<[1], [0], [0], [1], [0, 0, 1, 1], [], []>} : vector<8x128xbf16>, vector<128x1024xbf16>, vector<8x1024xf32> -> vector<8x1024xf32>
    %81 = arith.addf %76, %80 : vector<8x1024xf32>
    %82 = vector.extract_strided_slice %10 {offsets = [112, 0], sizes = [8, 128], strides = [1, 1]} : vector<128x128xbf16> to vector<8x128xbf16>
    %c14 = arith.constant 14 : index
    %c0_53 = arith.constant 0 : index
    %c0_54 = arith.constant 0 : index
    %83 = vector.load %arg4[%c14, %c0_53, %c0_54] : memref<16x128x1024xbf16, #tpu.memory_space<vmem>>, vector<1x128x1024xbf16>
    %84 = vector.shape_cast %83 : vector<1x128x1024xbf16> to vector<128x1024xbf16>
    %cst_55 = arith.constant dense<0.000000e+00> : vector<8x1024xf32>
    %85 = tpu.matmul %82, %84, %cst_55 {dimension_numbers = #tpu.dot_dimension_numbers<[1], [0], [0], [1], [0, 0, 1, 1], [], []>} : vector<8x128xbf16>, vector<128x1024xbf16>, vector<8x1024xf32> -> vector<8x1024xf32>
    %86 = arith.addf %81, %85 : vector<8x1024xf32>
    %87 = vector.extract_strided_slice %10 {offsets = [120, 0], sizes = [8, 128], strides = [1, 1]} : vector<128x128xbf16> to vector<8x128xbf16>
    %c15 = arith.constant 15 : index
    %c0_56 = arith.constant 0 : index
    %c0_57 = arith.constant 0 : index
    %88 = vector.load %arg4[%c15, %c0_56, %c0_57] : memref<16x128x1024xbf16, #tpu.memory_space<vmem>>, vector<1x128x1024xbf16>
    %89 = vector.shape_cast %88 : vector<1x128x1024xbf16> to vector<128x1024xbf16>
    %cst_58 = arith.constant dense<0.000000e+00> : vector<8x1024xf32>
    %90 = tpu.matmul %87, %89, %cst_58 {dimension_numbers = #tpu.dot_dimension_numbers<[1], [0], [0], [1], [0, 0, 1, 1], [], []>} : vector<8x128xbf16>, vector<128x1024xbf16>, vector<8x1024xf32> -> vector<8x1024xf32>
    %91 = arith.addf %86, %90 : vector<8x1024xf32>
    %c0_59 = arith.constant 0 : index
    %c0_60 = arith.constant 0 : index
    %92 = vector.load %arg5[%c0_59, %c0_60] : memref<1x1024xf32, #tpu.memory_space<vmem>>, vector<1x1024xf32>
    %93 = vector.broadcast %92 : vector<1x1024xf32> to vector<8x1024xf32>
    %94 = arith.addf %91, %93 : vector<8x1024xf32>
    %cst_61 = arith.constant 0.000000e+00 : f32
    %95 = vector.broadcast %cst_61 : f32 to vector<8x1024xf32>
    %96 = arith.maximumf %94, %95 : vector<8x1024xf32>
    %c0_62 = arith.constant 0 : index
    %c0_63 = arith.constant 0 : index
    %97 = vector.load %arg6[%c0_62, %c0_63] : memref<1024x128xf32, #tpu.memory_space<vmem>>, vector<1024x128xf32>
    %cst_64 = arith.constant dense<0.000000e+00> : vector<8x128xf32>
    %98 = tpu.matmul %96, %97, %cst_64 {dimension_numbers = #tpu.dot_dimension_numbers<[1], [0], [0], [1], [0, 0, 1, 1], [], []>} : vector<8x1024xf32>, vector<1024x128xf32>, vector<8x128xf32> -> vector<8x128xf32>
    %c0_65 = arith.constant 0 : index
    %c0_66 = arith.constant 0 : index
    %99 = vector.load %arg7[%c0_65, %c0_66] : memref<1x128xf32, #tpu.memory_space<vmem>>, vector<1x128xf32>
    %100 = vector.broadcast %99 : vector<1x128xf32> to vector<8x128xf32>
    %101 = arith.addf %98, %100 : vector<8x128xf32>
    %c0_67 = arith.constant 0 : index
    %c0_68 = arith.constant 0 : index
    %102 = vector.load %arg8[%c0_67, %c0_68] : memref<8x128xf32, #tpu.memory_space<vmem>>, vector<8x128xf32>
    tpu.vector_store %arg8[%c0_67, %c0_68], %101 {strides = array<i32>} : memref<8x128xf32, #tpu.memory_space<vmem>>, vector<8x128xf32>,
    return
  }
}

</mosaic_0001>

<bundles_post_ra>
// kernel: tpu_custom_call.1
= control target key start
LH: loop header
LB: loop body
LE: loop exit
PB: predicated region body
PF: predicated region fallthrough
CT: control target
= control target key end

     0   :  { %13 = vsyncpa [#allocation3], 0  ;;  %s15780_s0 = inlined_call_operand.vmem [shape: f32[392,32], index: 0, kind: input, shape index: {}]   ;;  %s15781_s1 = inlined_call_operand.vmem [shape: f32[128,392], index: 1, kind: input, shape index: {}]   ;;  %s15782_s2 = inlined_call_operand.hbm [shape: f32[32,128], index: 2, kind: input, shape index: {}]   ;;  %s15783_s3 = inlined_call_operand.hbm [shape: f32[1,128], index: 3, kind: input, shape index: {}]   ;;  %s15784_s4 = inlined_call_operand.hbm [shape: bf16[16,128,1024], index: 4, kind: input, shape index: {}]   ;;  %s15785_s5 = inlined_call_operand.hbm [shape: f32[1,1024], index: 5, kind: input, shape index: {}]   ;;  %s15786_s6 = inlined_call_operand.hbm [shape: f32[1024,128], index: 6, kind: input, shape index: {}]   ;;  %s15787_s7 = inlined_call_operand.hbm [shape: f32[1,128], index: 7, kind: input, shape index: {}]   ;;  %s15788_s8 = inlined_call_operand.hbm [shape: f32[8,128], index: 8, kind: output, shape index: {}]  }
   0x1   :  { %14 = vsyncpa [#allocation6], 0 }
   0x2   :  { %15 = vsyncpa [#allocation9], 0 }
   0x3   :  { %16 = vsyncpa [#allocation12], 0  ;;  %s40_s29 = sshll.u32 %s15783_s3, 4  ;;  %s41_s29 = int_to_ptr.hbm [resolvable:$true] %s40_s29 }
   0x4   :  { %17 = vsyncpa [#allocation4], 0  ;;  %s14557_s30 = smov [#allocation5]   ;;  %s64_s12 = sshll.u32 %s15785_s5, 4  ;;  %s65_s12 = int_to_ptr.hbm [resolvable:$true] %s64_s12 }
   0x5   :  { %s42_s9 = sshll.u32 %s14557_s30, 4  ;;  %s14558_s13 = smov [#allocation8]   ;;  %s43_s9 = int_to_ptr.vmem [resolvable:$true] %s42_s9 }
   0x6   :  { %45 = dma.hbm_to_vmem [thread:$0]  %s41_s29, 16, %s43_s9, [#allocation6]  }
   0x7   :  { %s66_s14 = sshll.u32 %s14558_s13, 4  ;;  %s26_s17 = sshll.u32 %s15782_s2, 4  ;;  %s67_s14 = int_to_ptr.vmem [resolvable:$true] %s66_s14  ;;  %s27_s17 = int_to_ptr.hbm [resolvable:$true] %s26_s17 }
   0x8   :  { %69 = dma.hbm_to_vmem [thread:$0]  %s65_s12, 128, %s67_s14, [#allocation9]  }
   0x9   :  { %s14559_s3 = smov [#allocation2]   ;;  %s50_s21 = sshll.u32 %s15784_s4, 4  ;;  %s51_s21 = int_to_ptr.hbm [resolvable:$true] %s50_s21 }
   0xa   :  { %s28_s18 = sshll.u32 %s14559_s3, 4  ;;  %s14560_s22 = smov 128   ;;  %s29_s18 = int_to_ptr.vmem [resolvable:$true] %s28_s18 }
   0xb   :  { %s14561_s5 = smov 8   ;;  %s14562_s23 = smov [#allocation7]  }
   0xc   :  { %34 = dma.hbm_to_vmem [thread:$0]  %s27_s17, 512, %s29_s18, [#allocation3], %s14560_s22, %s14560_s22, %s14561_s5  }
   0xd   :  { %s52_s24 = sshll.u32 %s14562_s23, 4  ;;  %s14563_s25 = smov 512   ;;  %s53_s24 = int_to_ptr.vmem [resolvable:$true] %s52_s24 }
   0xe   :  { %s14564_s26 = smov 32   ;;  %s74_s28 = sshll.u32 %s15786_s6, 4  ;;  %s75_s28 = int_to_ptr.hbm [resolvable:$true] %s74_s28 }
   0xf   :  { %58 = dma.hbm_to_vmem [thread:$0]  %s51_s21, 131072, %s53_s24, [#allocation6], %s14563_s25, %s14563_s25, %s14564_s26  }
  0x10   :  { %s14565_s29 = smov [#allocation10]   ;;  %s88_s10 = sshll.u32 %s15787_s7, 4  ;;  %s89_s10 = int_to_ptr.hbm [resolvable:$true] %s88_s10 }
  0x11   :  { %s76_s30 = sshll.u32 %s14565_s29, 4  ;;  %s14566_s11 = smov [#allocation11]   ;;  %s77_s30 = int_to_ptr.vmem [resolvable:$true] %s76_s30 }
  0x12   :  { %82 = dma.hbm_to_vmem [thread:$0]  %s75_s28, 16384, %s77_s30, [#allocation9], %s14560_s22, %s14560_s22, %s14561_s5  }
  0x13   :  { %s90_s12 = sshll.u32 %s14566_s11, 4  ;;  %s91_s12 = int_to_ptr.vmem [resolvable:$true] %s90_s12 }
  0x14   :  { %93 = dma.hbm_to_vmem [thread:$0]  %s89_s10, 16, %s91_s12, [#allocation12]  }
  0x15   :  { %14547 = dma.done.wait [#allocation3], 512  }
  0x16   :  { %14548 = vsyncadd [#allocation3], 4294966784 }
  0x17   :  { %14549 = dma.done.wait [#allocation6], 131088  }
  0x18   :  { %14550 = vsyncadd [#allocation6], 4294836208 }
  0x19   :  { %14551 = dma.done.wait [#allocation9], 16512  }
  0x1a   :  { %14552 = vsyncadd [#allocation9], 4294950784 }
  0x1b   :  { %14553 = dma.done.wait [#allocation12], 16  }
  0x1c   :  { %14554 = vsyncadd [#allocation12], 4294967280  ;;  %v170_v0 = vld [vmem:[#allocation2 + $0x18] sm:$0xff]  ;;  %v169_v1 = vld [vmem:[#allocation2 + $0x10] sm:$0xff]  ;;  %vm171_vm0 = vcmask 261120   ;;  %vm551_vm1 = vcmask 64512  }
  0x1d   :  { %331 = vmatpush.msra.mxu0 %v170_v0  ;;  %v168_v2 = vld [vmem:[#allocation2 + $0x8] sm:$0xff]  ;;  %v167_v3 = vld [vmem:[#allocation2] sm:$0xff]  ;;  %v120_v6 = vld [vmem:[%s15780_s0 + $0x10] sm:$0xff]  ;;  %s9161_s6 = sshll.u32 %s15788_s8, 4  ;;  %s9162_s6 = int_to_ptr.hbm [resolvable:$true] %s9161_s6 }
  0x1e   :  { %v118_v4 = vld [vmem:[%s15780_s0] sm:$0xff]  ;;  %v119_v5 = vld [vmem:[%s15780_s0 + $0x8] sm:$0xff]  ;;  %v121_v7 = vld [vmem:[%s15780_s0 + $0x18] sm:$0xff] }
  0x1f   :  { %332 = vmatpush.msra.mxu0 %v169_v1  ;;  %v122_v8 = vld [vmem:[%s15780_s0 + $0x20] sm:$0xff]  ;;  %v123_v9 = vld [vmem:[%s15780_s0 + $0x28] sm:$0xff]  ;;  %v124_v10 = vld [vmem:[%s15780_s0 + $0x30] sm:$0xff] }
  0x20   :  { %v125_v11 = vld [vmem:[%s15780_s0 + $0x38] sm:$0xff]  ;;  %v126_v12 = vld [vmem:[%s15780_s0 + $0x40] sm:$0xff]  ;;  %v127_v13 = vld [vmem:[%s15780_s0 + $0x48] sm:$0xff] }
  0x21   :  { %333 = vmatpush.msra.mxu0 %v168_v2  ;;  %v128_v14 = vld [vmem:[%s15780_s0 + $0x50] sm:$0xff]  ;;  %v129_v15 = vld [vmem:[%s15780_s0 + $0x58] sm:$0xff]  ;;  %v130_v16 = vld [vmem:[%s15780_s0 + $0x60] sm:$0xff] }
  0x22   :  { %v131_v17 = vld [vmem:[%s15780_s0 + $0x68] sm:$0xff]  ;;  %v132_v18 = vld [vmem:[%s15780_s0 + $0x70] sm:$0xff]  ;;  %v133_v19 = vld [vmem:[%s15780_s0 + $0x78] sm:$0xff] }
  0x23   :  { %334 = vmatpush.msra.mxu0 %v167_v3  ;;  %v134_v21 = vld [vmem:[%s15780_s0 + $0x80] sm:$0xff]  ;;  %v135_v23 = vld [vmem:[%s15780_s0 + $0x88] sm:$0xff]  ;;  %v136_v25 = vld [vmem:[%s15780_s0 + $0x90] sm:$0xff] }
  0x24   :  { %9174 = vmatmul.msk.f32.vlgmr.msra.gmra.mxu0 %vm171_vm0, %v118_v4  ;;  %v137_v27 = vld [vmem:[%s15780_s0 + $0x98] sm:$0xff]  ;;  %v138_v29 = vld [vmem:[%s15780_s0 + $0xa0] sm:$0xff]  ;;  %v139_v31 = vld [vmem:[%s15780_s0 + $0xa8] sm:$0xff] }
  0x25   :  { %v140_v33 = vld [vmem:[%s15780_s0 + $0xb0] sm:$0xff]  ;;  %v141_v35 = vld [vmem:[%s15780_s0 + $0xb8] sm:$0xff]  ;;  %v142_v37 = vld [vmem:[%s15780_s0 + $0xc0] sm:$0xff] }
  0x26   :  { %v143_v39 = vld [vmem:[%s15780_s0 + $0xc8] sm:$0xff]  ;;  %v144_v41 = vld [vmem:[%s15780_s0 + $0xd0] sm:$0xff]  ;;  %v145_v43 = vld [vmem:[%s15780_s0 + $0xd8] sm:$0xff] }
  0x27   :  { %v146_v45 = vld [vmem:[%s15780_s0 + $0xe0] sm:$0xff]  ;;  %v147_v47 = vld [vmem:[%s15780_s0 + $0xe8] sm:$0xff]  ;;  %v148_v49 = vld [vmem:[%s15780_s0 + $0xf0] sm:$0xff] }
  0x28   :  { %v149_v51 = vld [vmem:[%s15780_s0 + $0xf8] sm:$0xff]  ;;  %v150_v53 = vld [vmem:[%s15780_s0 + $0x100] sm:$0xff]  ;;  %v151_v55 = vld [vmem:[%s15780_s0 + $0x108] sm:$0xff] }
  0x29   :  { %v152_v57 = vld [vmem:[%s15780_s0 + $0x110] sm:$0xff]  ;;  %v153_v59 = vld [vmem:[%s15780_s0 + $0x118] sm:$0xff]  ;;  %v154_v61 = vld [vmem:[%s15780_s0 + $0x120] sm:$0xff] }
  0x2a   :  { %v155_v63 = vld [vmem:[%s15780_s0 + $0x128] sm:$0xff]  ;;  %v156_v1 = vld [vmem:[%s15780_s0 + $0x130] sm:$0xff]  ;;  %v157_v3 = vld [vmem:[%s15780_s0 + $0x138] sm:$0xff] }
  0x2c   :  { %9175 = vmatmul.msk.f32.gmra.mxu0 %vm171_vm0, %v119_v5  ;;  %v158_v5 = vld [vmem:[%s15780_s0 + $0x140] sm:$0xff] }
  0x34   :  { %9176 = vmatmul.msk.f32.gmra.mxu0 %vm171_vm0, %v120_v6 }
  0x3c   :  { %9177 = vmatmul.msk.f32.gmra.mxu0 %vm171_vm0, %v121_v7  ;;  %v159_v7 = vld [vmem:[%s15780_s0 + $0x148] sm:$0xff] }
  0x44   :  { %9178 = vmatmul.msk.f32.gmra.mxu0 %vm171_vm0, %v122_v8 }
  0x4c   :  { %9179 = vmatmul.msk.f32.gmra.mxu0 %vm171_vm0, %v123_v9  ;;  %v160_v9 = vld [vmem:[%s15780_s0 + $0x150] sm:$0xff] }
  0x54   :  { %9180 = vmatmul.msk.f32.gmra.mxu0 %vm171_vm0, %v124_v10 }
  0x5c   :  { %9181 = vmatmul.msk.f32.gmra.mxu0 %vm171_vm0, %v125_v11  ;;  %v161_v11 = vld [vmem:[%s15780_s0 + $0x158] sm:$0xff] }
  0x64   :  { %9182 = vmatmul.msk.f32.gmra.mxu0 %vm171_vm0, %v126_v12 }
  0x6c   :  { %9183 = vmatmul.msk.f32.gmra.mxu0 %vm171_vm0, %v127_v13  ;;  %v162_v13 = vld [vmem:[%s15780_s0 + $0x160] sm:$0xff] }
  0x74   :  { %9184 = vmatmul.msk.f32.gmra.mxu0 %vm171_vm0, %v128_v14 }
  0x7c   :  { %9185 = vmatmul.msk.f32.gmra.mxu0 %vm171_vm0, %v129_v15  ;;  %v163_v15 = vld [vmem:[%s15780_s0 + $0x168] sm:$0xff] }
  0x84   :  { %9186 = vmatmul.msk.f32.gmra.mxu0 %vm171_vm0, %v130_v16 }
  0x8c   :  { %9187 = vmatmul.msk.f32.gmra.mxu0 %vm171_vm0, %v131_v17  ;;  %v164_v17 = vld [vmem:[%s15780_s0 + $0x170] sm:$0xff] }
  0x94   :  { %9188 = vmatmul.msk.f32.gmra.mxu0 %vm171_vm0, %v132_v18 }
  0x9c   :  { %9189 = vmatmul.msk.f32.gmra.mxu0 %vm171_vm0, %v133_v19  ;;  %v165_v19 = vld [vmem:[%s15780_s0 + $0x178] sm:$0xff] }
  0xa1   :  { %v14695_v20 = vpop.f32.mrf.mxu0 }
  0xa4   :  { %9190 = vmatmul.msk.f32.gmra.mxu0 %vm171_vm0, %v134_v21 }
  0xa9   :  { %v14701_v22 = vpop.f32.mrf.mxu0 }
  0xac   :  { %9191 = vmatmul.msk.f32.gmra.mxu0 %vm171_vm0, %v135_v23  ;;  %v487_v23 = vld [vmem:[%s15781_s1 + $0x20] sm:$0xff] }
  0xb1   :  { %v14707_v24 = vpop.f32.mrf.mxu0 }
  0xb4   :  { %9192 = vmatmul.msk.f32.gmra.mxu0 %vm171_vm0, %v136_v25  ;;  %v491_v25 = vld [vmem:[%s15781_s1 + $0x40] sm:$0xff] }
  0xb9   :  { %v345_v26 = vpop.f32.mrf.mxu0 }
  0xbc   :  { %9193 = vmatmul.msk.f32.gmra.mxu0 %vm171_vm0, %v137_v27  ;;  %v484_v27 = vld [vmem:[%s15781_s1 + $0x8] sm:$0xff] }
  0xc1   :  { %v348_v28 = vpop.f32.mrf.mxu0 }
  0xc4   :  { %9194 = vmatmul.msk.f32.gmra.mxu0 %vm171_vm0, %v138_v29 }
  0xc9   :  { %v351_v30 = vpop.f32.mrf.mxu0 }
  0xcc   :  { %9195 = vmatmul.msk.f32.gmra.mxu0 %vm171_vm0, %v139_v31  ;;  %v499_v31 = vld [vmem:[%s15781_s1 + $0x80] sm:$0xff] }
  0xd1   :  { %v354_v32 = vpop.f32.mrf.mxu0 }
  0xd4   :  { %9196 = vmatmul.msk.f32.gmra.mxu0 %vm171_vm0, %v140_v33  ;;  %v492_v33 = vld [vmem:[%s15781_s1 + $0x48] sm:$0xff] }
  0xd9   :  { %v357_v34 = vpop.f32.mrf.mxu0 }
  0xdc   :  { %9197 = vmatmul.msk.f32.gmra.mxu0 %vm171_vm0, %v141_v35 }
  0xe1   :  { %v360_v36 = vpop.f32.mrf.mxu0 }
  0xe4   :  { %9198 = vmatmul.msk.f32.gmra.mxu0 %vm171_vm0, %v142_v37  ;;  %v507_v37 = vld [vmem:[%s15781_s1 + $0xc0] sm:$0xff] }
  0xe9   :  { %v363_v38 = vpop.f32.mrf.mxu0 }
  0xec   :  { %9199 = vmatmul.msk.f32.gmra.mxu0 %vm171_vm0, %v143_v39  ;;  %v500_v39 = vld [vmem:[%s15781_s1 + $0x88] sm:$0xff] }
  0xf1   :  { %v366_v40 = vpop.f32.mrf.mxu0 }
  0xf4   :  { %9200 = vmatmul.msk.f32.gmra.mxu0 %vm171_vm0, %v144_v41 }
  0xf9   :  { %v369_v42 = vpop.f32.mrf.mxu0 }
  0xfc   :  { %9201 = vmatmul.msk.f32.gmra.mxu0 %vm171_vm0, %v145_v43  ;;  %v515_v43 = vld [vmem:[%s15781_s1 + $0x100] sm:$0xff] }
 0x101   :  { %v372_v44 = vpop.f32.mrf.mxu0 }
 0x104   :  { %9202 = vmatmul.msk.f32.gmra.mxu0 %vm171_vm0, %v146_v45  ;;  %v508_v45 = vld [vmem:[%s15781_s1 + $0xc8] sm:$0xff] }
 0x109   :  { %v375_v46 = vpop.f32.mrf.mxu0 }
 0x10c   :  { %9203 = vmatmul.msk.f32.gmra.mxu0 %vm171_vm0, %v147_v47 }
 0x111   :  { %v378_v48 = vpop.f32.mrf.mxu0 }
 0x114   :  { %9204 = vmatmul.msk.f32.gmra.mxu0 %vm171_vm0, %v148_v49  ;;  %v523_v49 = vld [vmem:[%s15781_s1 + $0x140] sm:$0xff] }
 0x119   :  { %v381_v50 = vpop.f32.mrf.mxu0 }
 0x11a   :  { %600 = vmatpush.msra.mxu1 %v381_v50 }
 0x11c   :  { %9205 = vmatmul.msk.f32.gmra.mxu0 %vm171_vm0, %v149_v51  ;;  %601 = vmatpush.msra.mxu1 %v378_v48  ;;  %v512_v48 = vld [vmem:[%s15781_s1 + $0xe8] sm:$0xff] }
 0x11d   :  { %v516_v51 = vld [vmem:[%s15781_s1 + $0x108] sm:$0xff] }
 0x11e   :  { %602 = vmatpush.msra.mxu1 %v375_v46  ;;  %v519_v46 = vld [vmem:[%s15781_s1 + $0x120] sm:$0xff] }
 0x120   :  { %603 = vmatpush.msra.mxu1 %v372_v44 }
 0x121   :  { %v14765_v52 = vpop.f32.mrf.mxu0 }
 0x122   :  { %604 = vmatpush.msra.mxu1 %v369_v42  ;;  %v504_v42 = vld [vmem:[%s15781_s1 + $0xa8] sm:$0xff] }
 0x124   :  { %9206 = vmatmul.msk.f32.gmra.mxu0 %vm171_vm0, %v150_v53  ;;  %605 = vmatpush.msra.mxu1 %v366_v40  ;;  %v511_v40 = vld [vmem:[%s15781_s1 + $0xe0] sm:$0xff] }
 0x126   :  { %606 = vmatpush.msra.mxu1 %v363_v38 }
 0x128   :  { %607 = vmatpush.msra.mxu1 %v360_v36  ;;  %v496_v36 = vld [vmem:[%s15781_s1 + $0x68] sm:$0xff] }
 0x129   :  { %v14771_v54 = vpop.f32.mrf.mxu0 }
 0x12a   :  { %608 = vmatpush.msra.mxu1 %v357_v34  ;;  %v503_v34 = vld [vmem:[%s15781_s1 + $0xa0] sm:$0xff] }
 0x12c   :  { %9207 = vmatmul.msk.f32.gmra.mxu0 %vm171_vm0, %v151_v55  ;;  %609 = vmatpush.msra.mxu1 %v354_v32  ;;  %v531_v55 = vld [vmem:[%s15781_s1 + $0x180] sm:$0xff] }
 0x12e   :  { %610 = vmatpush.msra.mxu1 %v351_v30  ;;  %v488_v30 = vld [vmem:[%s15781_s1 + $0x28] sm:$0xff] }
 0x130   :  { %611 = vmatpush.msra.mxu1 %v348_v28  ;;  %v495_v28 = vld [vmem:[%s15781_s1 + $0x60] sm:$0xff] }
 0x131   :  { %v14777_v56 = vpop.f32.mrf.mxu0 }
 0x132   :  { %612 = vmatpush.msra.mxu1 %v345_v26 }
 0x134   :  { %9208 = vmatmul.msk.f32.gmra.mxu0 %vm171_vm0, %v152_v57  ;;  %613 = vmatpush.msra.mxu1 %v14707_v24  ;;  %v524_v57 = vld [vmem:[%s15781_s1 + $0x148] sm:$0xff] }
 0x136   :  { %614 = vmatpush.msra.mxu1 %v14701_v22  ;;  %v166_v22 = vld [vmem:[%s15780_s0 + $0x180] sm:$0xff] }
 0x138   :  { %615 = vmatpush.msra.mxu1 %v14695_v20  ;;  %v483_v20 = vld [vmem:[%s15781_s1] sm:$0xff] }
 0x139   :  { %v393_v58 = vpop.f32.mrf.mxu0  ;;  %616 = vmatmul.f32.vlgmr.msra.gmra.mxu1 %v483_v20  ;;  %v493_v20 = vld [vmem:[%s15781_s1 + $0x50] sm:$0xff] }
 0x13c   :  { %9209 = vmatmul.msk.f32.gmra.mxu0 %vm171_vm0, %v153_v59 }
 0x141   :  { %v396_v60 = vpop.f32.mrf.mxu0  ;;  %619 = vmatmul.f32.gmra.mxu1 %v487_v23 }
 0x144   :  { %9210 = vmatmul.msk.f32.gmra.mxu0 %vm171_vm0, %v154_v61  ;;  %v539_v61 = vld [vmem:[%s15781_s1 + $0x1c0] sm:$0xff] }
 0x149   :  { %v399_v62 = vpop.f32.mrf.mxu0  ;;  %622 = vmatmul.f32.gmra.mxu1 %v491_v25 }
 0x14c   :  { %9211 = vmatmul.msk.f32.gmra.mxu0 %vm171_vm0, %v155_v63  ;;  %v532_v63 = vld [vmem:[%s15781_s1 + $0x188] sm:$0xff] }
 0x151   :  { %v402_v0 = vpop.f32.mrf.mxu0  ;;  %625 = vmatmul.f32.gmra.mxu1 %v495_v28  ;;  %v501_v28 = vld [vmem:[%s15781_s1 + $0x90] sm:$0xff] }
 0x154   :  { %9212 = vmatmul.msk.f32.gmra.mxu0 %vm171_vm0, %v156_v1 }
 0x159   :  { %v405_v2 = vpop.f32.mrf.mxu0  ;;  %628 = vmatmul.f32.gmra.mxu1 %v499_v31 }
 0x15c   :  { %9213 = vmatmul.msk.f32.gmra.mxu0 %vm171_vm0, %v157_v3 }
 0x161   :  { %v408_v4 = vpop.f32.mrf.mxu0  ;;  %631 = vmatmul.f32.gmra.mxu1 %v503_v34  ;;  %v518_v34 = vld [vmem:[%s15781_s1 + $0x118] sm:$0xff] }
 0x164   :  { %9214 = vmatmul.msk.f32.gmra.mxu0 %vm171_vm0, %v158_v5 }
 0x169   :  { %v411_v6 = vpop.f32.mrf.mxu0  ;;  %634 = vmatmul.f32.gmra.mxu1 %v507_v37 }
 0x16c   :  { %9215 = vmatmul.msk.f32.gmra.mxu0 %vm171_vm0, %v159_v7 }
 0x171   :  { %v414_v8 = vpop.f32.mrf.mxu0  ;;  %637 = vmatmul.f32.gmra.mxu1 %v511_v40  ;;  %v13395_v40 = vld [vmem:[#allocation7 + $0x1dc] sm:$0xf0] }
 0x174   :  { %9216 = vmatmul.msk.f32.gmra.mxu0 %vm171_vm0, %v160_v9  ;;  %v544_v9 = vld [vmem:[%s15781_s1 + $0x1e8] sm:$0xff] }
 0x179   :  { %v417_v10 = vpop.f32.mrf.mxu0  ;;  %640 = vmatmul.f32.gmra.mxu1 %v515_v43  ;;  %v13387_v43 = vld [vmem:[#allocation7 + $0x19c] sm:$0xf0] }
 0x17c   :  { %9217 = vmatmul.msk.f32.gmra.mxu0 %vm171_vm0, %v161_v11  ;;  %v494_v11 = vld [vmem:[%s15781_s1 + $0x58] sm:$0xff] }
 0x181   :  { %v420_v12 = vpop.f32.mrf.mxu0  ;;  %643 = vmatmul.f32.gmra.mxu1 %v519_v46  ;;  %v513_v46 = vld [vmem:[%s15781_s1 + $0xf0] sm:$0xff] }
 0x184   :  { %9218 = vmatmul.msk.f32.gmra.mxu0 %vm171_vm0, %v162_v13 }
 0x189   :  { %v423_v14 = vpop.f32.mrf.mxu0  ;;  %646 = vmatmul.f32.gmra.mxu1 %v523_v49  ;;  %v9465_v49 = vld [vmem:[#allocation7 + $0x3c0] sm:$0xf] }
 0x18c   :  { %9219 = vmatmul.msk.f32.gmra.mxu0 %vm171_vm0, %v163_v15 }
 0x191   :  { %v426_v16 = vpop.f32.mrf.mxu0 }
 0x194   :  { %9220 = vmatmul.msk.f32.gmra.mxu0 %vm171_vm0, %v164_v17 }
 0x199   :  { %v429_v18 = vpop.f32.mrf.mxu0 }
 0x19a   :  { %665 = vmatpush.msra.mxu2 %v429_v18  ;;  %v502_v18 = vld [vmem:[%s15781_s1 + $0x98] sm:$0xff] }
 0x19c   :  { %9221 = vmatmul.msk.f32.gmra.mxu0 %vm171_vm0, %v165_v19  ;;  %666 = vmatpush.msra.mxu2 %v426_v16  ;;  %v489_v16 = vld [vmem:[%s15781_s1 + $0x30] sm:$0xff] }
 0x19e   :  { %667 = vmatpush.msra.mxu2 %v423_v14  ;;  %v498_v14 = vld [vmem:[%s15781_s1 + $0x78] sm:$0xff] }
 0x1a0   :  { %668 = vmatpush.msra.mxu2 %v420_v12  ;;  %v485_v12 = vld [vmem:[%s15781_s1 + $0x10] sm:$0xff] }
 0x1a1   :  { %v14841_v21 = vpop.f32.mrf.mxu0 }
 0x1a2   :  { %669 = vmatpush.msra.mxu2 %v417_v10 }
 0x1a4   :  { %670 = vmatpush.msra.mxu2 %v414_v8  ;;  %9222 = vmatmul.msk.f32.gmra.mxu0 %vm171_vm0, %v166_v22  ;;  %v490_v8 = vld [vmem:[%s15781_s1 + $0x38] sm:$0xff] }
 0x1a5   :  { %v506_v22 = vld [vmem:[%s15781_s1 + $0xb8] sm:$0xff] }
 0x1a6   :  { %671 = vmatpush.msra.mxu2 %v411_v6  ;;  %v540_v6 = vld [vmem:[%s15781_s1 + $0x1c8] sm:$0xff] }
 0x1a8   :  { %672 = vmatpush.msra.mxu2 %v408_v4  ;;  %v486_v4 = vld [vmem:[%s15781_s1 + $0x18] sm:$0xff] }
 0x1a9   :  { %v14850_v24 = vpop.f32.mrf.mxu0 }
 0x1aa   :  { %673 = vmatpush.msra.mxu2 %v405_v2  ;;  %v536_v2 = vld [vmem:[%s15781_s1 + $0x1a8] sm:$0xff] }
 0x1ac   :  { %674 = vmatpush.msra.mxu2 %v402_v0  ;;  %v543_v0 = vld [vmem:[%s15781_s1 + $0x1e0] sm:$0xff] }
 0x1ae   :  { %675 = vmatpush.msra.mxu2 %v399_v62 }
 0x1b0   :  { %676 = vmatpush.msra.mxu2 %v396_v60  ;;  %v528_v60 = vld [vmem:[%s15781_s1 + $0x168] sm:$0xff] }
 0x1b1   :  { %v14855_v26 = vpop.f32.mrf.mxu0 }
 0x1b2   :  { %677 = vmatpush.msra.mxu2 %v393_v58  ;;  %v535_v58 = vld [vmem:[%s15781_s1 + $0x1a0] sm:$0xff] }
 0x1b4   :  { %678 = vmatpush.msra.mxu2 %v14777_v56 }
 0x1b6   :  { %679 = vmatpush.msra.mxu2 %v14771_v54  ;;  %v520_v54 = vld [vmem:[%s15781_s1 + $0x128] sm:$0xff]  ;;  %v14949_v3 = vpop.f32.mrf.mxu1 }
 0x1b8   :  { %680 = vmatpush.msra.mxu2 %v14765_v52  ;;  %v527_v52 = vld [vmem:[%s15781_s1 + $0x160] sm:$0xff] }
 0x1b9   :  { %v14866_v29 = vpop.f32.mrf.mxu0  ;;  %681 = vmatmul.f32.vlgmr.msra.gmra.mxu2 %v484_v27  ;;  %649 = vmatmul.f32.gmra.mxu1 %v527_v52  ;;  %v13455_v52 = vld [vmem:[#allocation7 + $0x3c4] sm:$0xf] }
 0x1be   :  { %v14958_v7 = vpop.f32.mrf.mxu1 }
 0x1c1   :  { %v14874_v32 = vpop.f32.mrf.mxu0  ;;  %684 = vmatmul.f32.gmra.mxu2 %v488_v30  ;;  %652 = vmatmul.f32.gmra.mxu1 %v531_v55  ;;  %v514_v30 = vld [vmem:[%s15781_s1 + $0xf8] sm:$0xff] }
 0x1c6   :  { %v14969_v10 = vpop.f32.mrf.mxu1 }
 0x1c9   :  { %v14882_v35 = vpop.f32.mrf.mxu0  ;;  %687 = vmatmul.f32.gmra.mxu2 %v492_v33  ;;  %655 = vmatmul.f32.gmra.mxu1 %v535_v58  ;;  %v13451_v58 = vld [vmem:[#allocation7 + $0x39c] sm:$0xf0] }
 0x1ce   :  { %v14982_v13 = vpop.f32.mrf.mxu1 }
 0x1d1   :  { %v14890_v38 = vpop.f32.mrf.mxu0  ;;  %690 = vmatmul.f32.gmra.mxu2 %v496_v36  ;;  %658 = vmatmul.f32.gmra.mxu1 %v539_v61  ;;  %v509_v36 = vld [vmem:[%s15781_s1 + $0xd0] sm:$0xff]  ;;  %v13447_v61 = vld [vmem:[#allocation7 + $0x384] sm:$0xf] }
 0x1d6   :  { %v14994_v17 = vpop.f32.mrf.mxu1 }
 0x1d9   :  { %v453_v41 = vpop.f32.mrf.mxu0  ;;  %693 = vmatmul.f32.gmra.mxu2 %v500_v39  ;;  %661 = vmatmul.f32.gmra.mxu1 %v543_v0  ;;  %v9721_v39 = vld [vmem:[#allocation7 + $0x1c0] sm:$0xf] }
 0x1e1   :  { %v456_v44 = vpop.f32.mrf.mxu0  ;;  %696 = vmatmul.f32.gmra.mxu2 %v504_v42  ;;  %v9689_v42 = vld [vmem:[#allocation7 + $0x180] sm:$0xf] }
 0x1e9   :  { %v459_v47 = vpop.f32.mrf.mxu0  ;;  %699 = vmatmul.f32.gmra.mxu2 %v508_v45  ;;  %v9690_v45 = vor.u32 %v13387_v43, %v9689_v42  ;;  %v9561_v42 = vld [vmem:[#allocation7 + $0x80] sm:$0xf] }
 0x1ea   :  { %v13355_v43 = vld [vmem:[#allocation7 + $0x9c] sm:$0xf0] }
 0x1f1   :  { %v462_v50 = vpop.f32.mrf.mxu0  ;;  %702 = vmatmul.f32.gmra.mxu2 %v512_v48  ;;  %v526_v48 = vld [vmem:[%s15781_s1 + $0x158] sm:$0xff] }
 0x1f9   :  { %v465_v53 = vpop.f32.mrf.mxu0  ;;  %705 = vmatmul.f32.gmra.mxu2 %v516_v51 }
 0x201   :  { %v468_v56 = vpop.f32.mrf.mxu0  ;;  %708 = vmatmul.f32.gmra.mxu2 %v520_v54  ;;  %v9657_v54 = vld [vmem:[#allocation7 + $0x140] sm:$0xf] }
 0x209   :  { %v471_v59 = vpop.f32.mrf.mxu0  ;;  %711 = vmatmul.f32.gmra.mxu2 %v524_v57  ;;  %v9433_v57 = vld [vmem:[#allocation7 + $0x380] sm:$0xf] }
 0x211   :  { %v474_v62 = vpop.f32.mrf.mxu0  ;;  %714 = vmatmul.f32.gmra.mxu2 %v528_v60  ;;  %v9434_v60 = vor.u32 %v13451_v58, %v9433_v57  ;;  %v13423_v58 = vld [vmem:[#allocation7 + $0x2c4] sm:$0xf] }
 0x219   :  { %v477_v1 = vpop.f32.mrf.mxu0  ;;  %717 = vmatmul.f32.gmra.mxu2 %v532_v63  ;;  %v9625_v63 = vld [vmem:[#allocation7 + $0x100] sm:$0xf] }
 0x21a   :  { %730 = vmatpush.msra.mxu3 %v477_v1 }
 0x21c   :  { %731 = vmatpush.msra.mxu3 %v474_v62  ;;  %v9435_v62 = vld [vmem:[#allocation7 + $0x3a0] sm:$0xf0] }
 0x21d   :  { %v9438_v1 = vor.u32 %v13447_v61, %v9435_v62  ;;  %v13347_v62 = vld [vmem:[#allocation7 + $0x5c] sm:$0xf0] }
 0x21e   :  { %732 = vmatpush.msra.mxu3 %v471_v59 }
 0x220   :  { %733 = vmatpush.msra.mxu3 %v468_v56  ;;  %v13379_v56 = vld [vmem:[#allocation7 + $0x15c] sm:$0xf0] }
 0x221   :  { %720 = vmatmul.f32.gmra.mxu2 %v536_v2  ;;  %v480_v5 = vpop.f32.mrf.mxu0  ;;  %v9658_v59 = vor.u32 %v13379_v56, %v9657_v54  ;;  %v13371_v2 = vld [vmem:[#allocation7 + $0x11c] sm:$0xf0]  ;;  %v534_v54 = vld [vmem:[%s15781_s1 + $0x198] sm:$0xff] }
 0x222   :  { %734 = vmatpush.msra.mxu3 %v465_v53  ;;  %810 = vmatpush.msrb.mxu1 %v480_v5  ;;  %v9467_v53 = vld [vmem:[#allocation7 + $0x3e0] sm:$0xf0]  ;;  %v517_v5 = vld [vmem:[%s15781_s1 + $0x110] sm:$0xff]  ;;  %v13427_v56 = vld [vmem:[#allocation7 + $0x2dc] sm:$0xf0] }
 0x223   :  { %9223 = vmatmul.msk.f32.vlgmr.msrb.gmra.mxu1 %vm551_vm1, %v486_v4  ;;  %v9470_v55 = vor.u32 %v13455_v52, %v9467_v53  ;;  %v9626_v4 = vor.u32 %v13371_v2, %v9625_v63  ;;  %v9929_v63 = vld [vmem:[#allocation7 + $0x550] sm:$0xf] }
 0x224   :  { %735 = vmatpush.msra.mxu3 %v462_v50  ;;  %v13459_v50 = vld [vmem:[#allocation7 + $0x3dc] sm:$0xf0] }
 0x225   :  { %v9466_v51 = vor.u32 %v13459_v50, %v9465_v49  ;;  %v9961_v49 = vld [vmem:[#allocation7 + $0x590] sm:$0xf] }
 0x226   :  { %736 = vmatpush.msra.mxu3 %v459_v47  ;;  %v13517_v50 = vld [vmem:[#allocation7 + $0x5ac] sm:$0xf0] }
 0x227   :  { %1341 = vmatpush.bf16.msrb.mxu2 %v9466_v51  ;;  %v521_v51 = vld [vmem:[%s15781_s1 + $0x130] sm:$0xff]  ;;  %v9962_v53 = vor.u32 %v13517_v50, %v9961_v49 }
 0x228   :  { %737 = vmatpush.msra.mxu3 %v456_v44  ;;  %v9865_v49 = vld [vmem:[#allocation7 + $0x4d0] sm:$0xf] }
 0x229   :  { %723 = vmatmul.f32.gmra.mxu2 %v540_v6 }
 0x22a   :  { %738 = vmatpush.msra.mxu3 %v453_v41  ;;  %v9722_v41 = vor.u32 %v13395_v40, %v9721_v39  ;;  %v13431_v39 = vld [vmem:[#allocation7 + $0x304] sm:$0xf] }
 0x22b   :  { %9224 = vmatmul.msk.f32.gmra.mxu1 %vm551_vm1, %v490_v8  ;;  %v15071_v8 = vld [vmem:[#allocation5] ss:$0 sm:$0xff]  ;;  %1342 = vmatpush.bf16.msrb.mxu2 %v9434_v60  ;;  %v9529_v60 = vld [vmem:[#allocation7 + $0x40] sm:$0xf] }
 0x22c   :  { %739 = vmatpush.msra.mxu3 %v14890_v38  ;;  %v522_v38 = vld [vmem:[%s15781_s1 + $0x138] sm:$0xff]  ;;  %1765 = vmatpush.bf16.msra.mxu1 %v9722_v41  ;;  %v9371_v41 = vld [vmem:[#allocation7 + $0x320] sm:$0xf0]  ;;  %v9530_v2 = vor.u32 %v13347_v62, %v9529_v60  ;;  %v529_v60 = vld [vmem:[%s15781_s1 + $0x170] sm:$0xff] }
 0x22d   :  { %v9243_v62 = vld [vmem:[#allocation7 + $0x220] sm:$0xf0] }
 0x22e   :  { %740 = vmatpush.msra.mxu3 %v14882_v35 }
 0x230   :  { %741 = vmatpush.msra.mxu3 %v14874_v32  ;;  %v505_v32 = vld [vmem:[%s15781_s1 + $0xb0] sm:$0xff]  ;;  %1766 = vmatpush.bf16.msra.mxu1 %v9690_v45 }
 0x231   :  { %726 = vmatmul.f32.gmra.mxu2 %v544_v9  ;;  %v530_v9 = vld [vmem:[%s15781_s1 + $0x178] sm:$0xff] }
 0x232   :  { %742 = vmatpush.msra.mxu3 %v14866_v29 }
 0x233   :  { %9225 = vmatmul.msk.f32.gmra.mxu1 %vm551_vm1, %v494_v11  ;;  %v9401_v11 = vld [vmem:[#allocation7 + $0x340] sm:$0xf] }
 0x234   :  { %743 = vmatpush.msra.mxu3 %v14855_v26  ;;  %v510_v26 = vld [vmem:[%s15781_s1 + $0xd8] sm:$0xff]  ;;  %1767 = vmatpush.bf16.msra.mxu1 %v9658_v59  ;;  %v9339_v59 = vld [vmem:[#allocation7 + $0x2e0] sm:$0xf0] }
 0x235   :  { %v9342_v61 = vor.u32 %v13423_v58, %v9339_v59  ;;  %v13403_v58 = vld [vmem:[#allocation7 + $0x21c] sm:$0xf0]  ;;  %v13399_v59 = vld [vmem:[#allocation7 + $0x204] sm:$0xf] }
 0x236   :  { %744 = vmatpush.msra.mxu3 %v14850_v24  ;;  %v497_v24 = vld [vmem:[%s15781_s1 + $0x70] sm:$0xff] }
 0x238   :  { %745 = vmatpush.msra.mxu3 %v14841_v21  ;;  %v15005_v21 = vpop.f32.mrf.mxu1  ;;  %1768 = vmatpush.bf16.msra.mxu1 %v9626_v4 }
 0x239   :  { %746 = vmatmul.f32.vlgmr.msra.gmra.mxu3 %v485_v12  ;;  %v13443_v12 = vld [vmem:[#allocation7 + $0x35c] sm:$0xf0] }
 0x23a   :  { %1354 = vmatpush.bf16.msrb.mxu3 %v9470_v55  ;;  %v9337_v55 = vld [vmem:[#allocation7 + $0x2c0] sm:$0xf] }
 0x23b   :  { %9226 = vmatmul.msk.f32.gmra.mxu1 %vm551_vm1, %v498_v14  ;;  %v9338_v57 = vor.u32 %v13427_v56, %v9337_v55 }
 0x23c   :  { %v14989_v15 = vpop.f32.mrf.mxu2 }
 0x23e   :  { %1355 = vmatpush.bf16.msrb.mxu3 %v9438_v1  ;;  %v13509_v1 = vld [vmem:[#allocation7 + $0x56c] sm:$0xf0] }
 0x23f   :  { %v9930_v4 = vor.u32 %v13509_v1, %v9929_v63  ;;  %v9833_v63 = vld [vmem:[#allocation7 + $0x490] sm:$0xf] }
 0x240   :  { %v15016_v25 = vpop.f32.mrf.mxu1  ;;  %v13485_v1 = vld [vmem:[#allocation7 + $0x4ac] sm:$0xf0] }
 0x241   :  { %749 = vmatmul.f32.gmra.mxu3 %v489_v16  ;;  %v9402_v16 = vor.u32 %v13443_v12, %v9401_v11  ;;  %v13415_v11 = vld [vmem:[#allocation7 + $0x284] sm:$0xf] }
 0x243   :  { %9227 = vmatmul.msk.f32.gmra.mxu1 %vm551_vm1, %v502_v18  ;;  %v13439_v18 = vld [vmem:[#allocation7 + $0x344] sm:$0xf]  ;;  %1343 = vmatpush.bf16.msrb.mxu2 %v9402_v16 }
 0x244   :  { %v15000_v19 = vpop.f32.mrf.mxu2  ;;  %v9307_v16 = vld [vmem:[#allocation7 + $0x2a0] sm:$0xf0] }
 0x248   :  { %v15027_v29 = vpop.f32.mrf.mxu1 }
 0x249   :  { %752 = vmatmul.f32.gmra.mxu3 %v493_v20  ;;  %v9403_v20 = vld [vmem:[#allocation7 + $0x360] sm:$0xf0] }
 0x24b   :  { %9228 = vmatmul.msk.f32.gmra.mxu1 %vm551_vm1, %v506_v22  ;;  %v9593_v22 = vld [vmem:[#allocation7 + $0xc0] sm:$0xf] }
 0x24c   :  { %v15011_v23 = vpop.f32.mrf.mxu2 }
 0x250   :  { %v641_v33 = vpop.f32.mrf.mxu1 }
 0x251   :  { %755 = vmatmul.f32.gmra.mxu3 %v497_v24  ;;  %v642_v14 = vadd.f32 %v15071_v8, %v641_v33  ;;  %v9406_v24 = vor.u32 %v13439_v18, %v9403_v20  ;;  %v9497_v18 = vld [vmem:[#allocation7] sm:$0xf] }
 0x252   :  { %v13339_v20 = vld [vmem:[#allocation7 + $0x1c] sm:$0xf0] }
 0x253   :  { %9229 = vmatmul.msk.f32.gmra.mxu1 %vm551_vm1, %v510_v26  ;;  %v13363_v26 = vld [vmem:[#allocation7 + $0xdc] sm:$0xf0]  ;;  %1356 = vmatpush.bf16.msrb.mxu3 %v9406_v24  ;;  %v9498_v24 = vor.u32 %v13339_v20, %v9497_v18  ;;  %v9475_v20 = vld [vmem:[#allocation7 + $0x3e8] sm:$0xf0] }
 0x254   :  { %v15022_v27 = vpop.f32.mrf.mxu2 }
 0x258   :  { %v15047_v37 = vpop.f32.mrf.mxu1 }
 0x259   :  { %758 = vmatmul.f32.gmra.mxu3 %v501_v28  ;;  %v9993_v28 = vld [vmem:[#allocation7 + $0x5d0] sm:$0xf] }
 0x25b   :  { %9230 = vmatmul.msk.f32.gmra.mxu1 %vm551_vm1, %v514_v30  ;;  %v13525_v30 = vld [vmem:[#allocation7 + $0x5ec] sm:$0xf0] }
 0x25c   :  { %v15033_v31 = vpop.f32.mrf.mxu2 }
 0x260   :  { %v15058_v47 = vpop.f32.mrf.mxu1 }
 0x261   :  { %761 = vmatmul.f32.gmra.mxu3 %v505_v32  ;;  %v9594_v32 = vor.u32 %v13363_v26, %v9593_v22  ;;  %v9310_v22 = vor.u32 %v13415_v11, %v9307_v16  ;;  %v9897_v26 = vld [vmem:[#allocation7 + $0x510] sm:$0xf]  ;;  %v13456_v11 = vld [vmem:[#allocation7 + $0x3cc] sm:$0xf]  ;;  %v9834_v16 = vor.u32 %v13485_v1, %v9833_v63 }
 0x263   :  { %9231 = vmatmul.msk.f32.gmra.mxu1 %vm551_vm1, %v518_v34  ;;  %v9994_v34 = vor.u32 %v13525_v30, %v9993_v28  ;;  %v13501_v28 = vld [vmem:[#allocation7 + $0x52c] sm:$0xf0]  ;;  %v13392_v30 = vld [vmem:[#allocation7 + $0x1cc] sm:$0xf] }
 0x264   :  { %v15042_v35 = vpop.f32.mrf.mxu2  ;;  %1769 = vmatpush.bf16.msra.mxu1 %v9594_v32  ;;  %v525_v32 = vld [vmem:[%s15781_s1 + $0x150] sm:$0xff] }
 0x265   :  { %2306 = vmatpush.bf16.msrb.mxu0 %v9994_v34 }
 0x268   :  { %v15069_v6 = vpop.f32.mrf.mxu1 }
 0x269   :  { %764 = vmatmul.f32.gmra.mxu3 %v509_v36  ;;  %v9369_v36 = vld [vmem:[#allocation7 + $0x300] sm:$0xf]  ;;  %2307 = vmatpush.bf16.msrb.mxu0 %v9962_v53  ;;  %v13384_v53 = vld [vmem:[#allocation7 + $0x18c] sm:$0xf] }
 0x26b   :  { %9232 = vmatmul.msk.f32.gmra.mxu1 %vm551_vm1, %v522_v38  ;;  %v13435_v38 = vld [vmem:[#allocation7 + $0x31c] sm:$0xf0] }
 0x26c   :  { %v15053_v44 = vpop.f32.mrf.mxu2  ;;  %v9370_v33 = vor.u32 %v13435_v38, %v9369_v36  ;;  %v9898_v36 = vor.u32 %v13501_v28, %v9897_v26  ;;  %v9731_v38 = vld [vmem:[#allocation7 + $0x1e8] sm:$0xf0]  ;;  %v9478_v26 = vor.u32 %v13456_v11, %v9475_v20  ;;  %v546_v11 = vld [vmem:[%s15781_s1 + $0x1f8] sm:$0xff]  ;;  %v13436_v20 = vld [vmem:[#allocation7 + $0x324] sm:$0xf0] }
 0x26d   :  { %2308 = vmatpush.bf16.msrb.mxu0 %v9930_v4  ;;  %v9246_v4 = vor.u32 %v13399_v59, %v9243_v62  ;;  %v9603_v62 = vld [vmem:[#allocation7 + $0xe8] sm:$0xf0] }
 0x26e   :  { %1344 = vmatpush.bf16.msrb.mxu2 %v9370_v33  ;;  %v9273_v33 = vld [vmem:[#allocation7 + $0x240] sm:$0xf] }
 0x270   :  { %v15083_v52 = vpop.f32.mrf.mxu1 }
 0x271   :  { %767 = vmatmul.f32.gmra.mxu3 %v513_v46  ;;  %v9374_v46 = vor.u32 %v13431_v39, %v9371_v41  ;;  %v9734_v39 = vor.u32 %v13392_v30, %v9731_v38  ;;  %v13411_v41 = vld [vmem:[#allocation7 + $0x25c] sm:$0xf0]  ;;  %2309 = vmatpush.bf16.msrb.mxu0 %v9898_v36  ;;  %v542_v30 = vld [vmem:[%s15781_s1 + $0x1d8] sm:$0xff]  ;;  %v13477_v36 = vld [vmem:[#allocation7 + $0x46c] sm:$0xf0] }
 0x272   :  { %1345 = vmatpush.bf16.msrb.mxu2 %v9338_v57  ;;  %v9241_v57 = vld [vmem:[#allocation7 + $0x200] sm:$0xf]  ;;  %v9441_v38 = vld [vmem:[#allocation7 + $0x388] sm:$0xf] }
 0x273   :  { %9233 = vmatmul.msk.f32.gmra.mxu1 %vm551_vm1, %v526_v48  ;;  %v9562_v48 = vor.u32 %v13355_v43, %v9561_v42  ;;  %1357 = vmatpush.bf16.msrb.mxu3 %v9374_v46  ;;  %v648_v42 = vadd.f32 %v15071_v8, %v15058_v47  ;;  %v9274_v43 = vor.u32 %v13411_v41, %v9273_v33  ;;  %v13407_v46 = vld [vmem:[#allocation7 + $0x244] sm:$0xf] }
 0x274   :  { %v15064_v0 = vpop.f32.mrf.mxu2 }
 0x275   :  { %1770 = vmatpush.bf16.msra.mxu1 %v9562_v48  ;;  %v9275_v48 = vld [vmem:[#allocation7 + $0x260] sm:$0xf0] }
 0x276   :  { %v9278_v50 = vor.u32 %v13407_v46, %v9275_v48  ;;  %v9635_v46 = vld [vmem:[#allocation7 + $0x128] sm:$0xf0] }
 0x277   :  { %1358 = vmatpush.bf16.msrb.mxu3 %v9342_v61  ;;  %v9242_v61 = vor.u32 %v13403_v58, %v9241_v57  ;;  %v13440_v57 = vld [vmem:[#allocation7 + $0x34c] sm:$0xf] }
 0x278   :  { %v15094_v34 = vpop.f32.mrf.mxu1 }
 0x279   :  { %770 = vmatmul.f32.gmra.mxu3 %v517_v5  ;;  %v9305_v5 = vld [vmem:[#allocation7 + $0x280] sm:$0xf]  ;;  %1771 = vmatpush.bf16.msra.mxu1 %v9530_v2 }
 0x27b   :  { %9234 = vmatmul.msk.f32.gmra.mxu1 %vm551_vm1, %v530_v9  ;;  %v13419_v9 = vld [vmem:[#allocation7 + $0x29c] sm:$0xf0]  ;;  %1359 = vmatpush.bf16.msrb.mxu3 %v9310_v22  ;;  %v13376_v22 = vld [vmem:[#allocation7 + $0x14c] sm:$0xf] }
 0x27c   :  { %v706_v40 = vpop.f32.mrf.mxu2 }
 0x27d   :  { %v15078_v45 = vadd.f32 %v706_v40, %v642_v14  ;;  %v9306_v14 = vor.u32 %v13419_v9, %v9305_v5  ;;  %v538_v40 = vld [vmem:[%s15781_s1 + $0x1b8] sm:$0xff]  ;;  %1772 = vmatpush.bf16.msra.mxu1 %v9498_v24  ;;  %v9473_v5 = vld [vmem:[#allocation7 + $0x3c8] sm:$0xf]  ;;  %v9667_v24 = vld [vmem:[#allocation7 + $0x168] sm:$0xf0] }
 0x27e   :  { %v13460_v9 = vld [vmem:[#allocation7 + $0x3e4] sm:$0xf0]  ;;  %v9670_v28 = vor.u32 %v13376_v22, %v9667_v24  ;;  %v13432_v22 = vld [vmem:[#allocation7 + $0x30c] sm:$0xf] }
 0x27f   :  { %1346 = vmatpush.bf16.msrb.mxu2 %v9306_v14  ;;  %1360 = vmatpush.bf16.msrb.mxu3 %v9278_v50  ;;  %v9474_v18 = vor.u32 %v13460_v9, %v9473_v5  ;;  %v9769_v50 = vld [vmem:[#allocation7 + $0x410] sm:$0xf]  ;;  %v13587_v5 = vld [vmem:[#allocation7 + $0x7dc] sm:$0xf0] }
 0x280   :  { %v15107_v14 = vpop.f32.mrf.mxu1 }
 0x281   :  { %773 = vmatmul.f32.gmra.mxu3 %v521_v51  ;;  %1804 = vmatpush.bf16.msrb.mxu1 %v9734_v39  ;;  %v13493_v51 = vld [vmem:[#allocation7 + $0x4ec] sm:$0xf0]  ;;  %v13452_v39 = vld [vmem:[#allocation7 + $0x3a4] sm:$0xf0] }
 0x282   :  { %v9866_v55 = vor.u32 %v13493_v51, %v9865_v49  ;;  %v9442_v41 = vor.u32 %v13452_v39, %v9441_v38  ;;  %v13469_v51 = vld [vmem:[#allocation7 + $0x42c] sm:$0xf0]  ;;  %v10201_v38 = vld [vmem:[#allocation7 + $0x780] sm:$0xf] }
 0x283   :  { %9235 = vmatmul.msk.f32.gmra.mxu1 %vm551_vm1, %v534_v54  ;;  %v9699_v54 = vld [vmem:[#allocation7 + $0x1a8] sm:$0xf0]  ;;  %1347 = vmatpush.bf16.msrb.mxu2 %v9274_v43  ;;  %v9770_v59 = vor.u32 %v13469_v51, %v9769_v50  ;;  %v13579_v39 = vld [vmem:[#allocation7 + $0x79c] sm:$0xf0] }
 0x284   :  { %v15089_v12 = vpop.f32.mrf.mxu2  ;;  %v9702_v56 = vor.u32 %v13384_v53, %v9699_v54  ;;  %2310 = vmatpush.bf16.msrb.mxu0 %v9866_v55  ;;  %1361 = vmatpush.bf16.msrb.mxu3 %v9246_v4  ;;  %v13368_v43 = vld [vmem:[#allocation7 + $0x10c] sm:$0xf]  ;;  %v9409_v55 = vld [vmem:[#allocation7 + $0x348] sm:$0xf]  ;;  %v10233_v4 = vld [vmem:[#allocation7 + $0x7c0] sm:$0xf] }
 0x285   :  { %v9638_v49 = vor.u32 %v13368_v43, %v9635_v46  ;;  %v533_v54 = vld [vmem:[%s15781_s1 + $0x190] sm:$0xff]  ;;  %v10234_v9 = vor.u32 %v13587_v5, %v10233_v4  ;;  %v13428_v43 = vld [vmem:[#allocation7 + $0x2e4] sm:$0xf0] }
 0x286   :  { %1805 = vmatpush.bf16.msrb.mxu1 %v9702_v56  ;;  %v13444_v56 = vld [vmem:[#allocation7 + $0x364] sm:$0xf0]  ;;  %v13424_v46 = vld [vmem:[#allocation7 + $0x2cc] sm:$0xf] }
 0x287   :  { %1348 = vmatpush.bf16.msrb.mxu2 %v9242_v61  ;;  %v13360_v61 = vld [vmem:[#allocation7 + $0xcc] sm:$0xf] }
 0x288   :  { %2311 = vmatpush.bf16.msrb.mxu0 %v9834_v16  ;;  %1380 = vmatpush.bf16.msra.mxu3 %v9478_v26  ;;  %v15118_v58 = vpop.f32.mrf.mxu1  ;;  %v9606_v1 = vor.u32 %v13360_v61, %v9603_v62  ;;  %v654_v16 = vadd.f32 %v15071_v8, %v15083_v52  ;;  %v9379_v26 = vld [vmem:[#allocation7 + $0x328] sm:$0xf0]  ;;  %v13420_v61 = vld [vmem:[#allocation7 + $0x2a4] sm:$0xf0] }
 0x289   :  { %776 = vmatmul.f32.gmra.mxu3 %v525_v32  ;;  %v9801_v32 = vld [vmem:[#allocation7 + $0x450] sm:$0xf]  ;;  %15789 = vst [vmem:[#allocation19_spill] sm:$0xff] %v15118_v58  ;;  %v13344_v50 = vld [vmem:[#allocation7 + $0x4c] sm:$0xf] }
 0x28a   :  { %v9802_v33 = vor.u32 %v13477_v36, %v9801_v32  ;;  %1806 = vmatpush.bf16.msrb.mxu1 %v9670_v28  ;;  %v13352_v28 = vld [vmem:[#allocation7 + $0x8c] sm:$0xf]  ;;  %v9382_v32 = vor.u32 %v13432_v22, %v9379_v26  ;;  %v9281_v26 = vld [vmem:[#allocation7 + $0x248] sm:$0xf]  ;;  %v13625_v58 = vld [vmem:[#allocation7 + $0x914] sm:$0xf] }
 0x28b   :  { %9236 = vmatmul.msk.f32.gmra.mxu1 %vm551_vm1, %v538_v40  ;;  %1367 = vmatpush.bf16.msra.mxu2 %v9474_v18  ;;  %v13448_v40 = vld [vmem:[#allocation7 + $0x38c] sm:$0xf]  ;;  %v9377_v18 = vld [vmem:[#allocation7 + $0x308] sm:$0xf] }
 0x28c   :  { %v712_v47 = vpop.f32.mrf.mxu2  ;;  %2312 = vmatpush.bf16.msrb.mxu0 %v9802_v33  ;;  %v9378_v24 = vor.u32 %v13436_v20, %v9377_v18  ;;  %v537_v52 = vld [vmem:[%s15781_s1 + $0x1b0] sm:$0xff]  ;;  %v10202_v33 = vor.u32 %v13579_v39, %v10201_v38  ;;  %v13563_v18 = vld [vmem:[#allocation7 + $0x71c] sm:$0xf0] }
 0x28d   :  { %v15105_v2 = vadd.f32 %v712_v47, %v648_v42  ;;  %v9443_v42 = vld [vmem:[#allocation7 + $0x3a8] sm:$0xf0]  ;;  %v9410_v47 = vor.u32 %v13444_v56, %v9409_v55  ;;  %v10169_v56 = vld [vmem:[#allocation7 + $0x740] sm:$0xf] }
 0x28e   :  { %v9446_v48 = vor.u32 %v13448_v40, %v9443_v42  ;;  %1807 = vmatpush.bf16.msrb.mxu1 %v9638_v49  ;;  %v9345_v42 = vld [vmem:[#allocation7 + $0x2c8] sm:$0xf]  ;;  %v9347_v49 = vld [vmem:[#allocation7 + $0x2e8] sm:$0xf0]  ;;  %v10105_v38 = vld [vmem:[#allocation7 + $0x6c0] sm:$0xf] }
 0x28f   :  { %1368 = vmatpush.bf16.msra.mxu2 %v9442_v41  ;;  %v9539_v51 = vld [vmem:[#allocation7 + $0x68] sm:$0xf0]  ;;  %v13555_v39 = vld [vmem:[#allocation7 + $0x6dc] sm:$0xf0] }
 0x290   :  { %1381 = vmatpush.bf16.msra.mxu3 %v9446_v48  ;;  %2313 = vmatpush.bf16.msrb.mxu0 %v9770_v59  ;;  %v9346_v48 = vor.u32 %v13428_v43, %v9345_v42  ;;  %v9542_v55 = vor.u32 %v13344_v50, %v9539_v51  ;;  %v13416_v62 = vld [vmem:[#allocation7 + $0x28c] sm:$0xf]  ;;  %v9249_v43 = vld [vmem:[#allocation7 + $0x208] sm:$0xf]  ;;  %v10073_v51 = vld [vmem:[#allocation7 + $0x680] sm:$0xf] }
 0x291   :  { %779 = vmatmul.f32.gmra.mxu3 %v529_v60  ;;  %v9411_v60 = vld [vmem:[#allocation7 + $0x368] sm:$0xf0] }
 0x292   :  { %v9414_v63 = vor.u32 %v13440_v57, %v9411_v60  ;;  %1808 = vmatpush.bf16.msrb.mxu1 %v9606_v1  ;;  %v13571_v57 = vld [vmem:[#allocation7 + $0x75c] sm:$0xf0]  ;;  %v9313_v60 = vld [vmem:[#allocation7 + $0x288] sm:$0xf]  ;;  %v9315_v1 = vld [vmem:[#allocation7 + $0x2a8] sm:$0xf0] }
 0x293   :  { %9237 = vmatmul.msk.f32.gmra.mxu1 %vm551_vm1, %v542_v30  ;;  %1369 = vmatpush.bf16.msra.mxu2 %v9410_v47  ;;  %v9571_v30 = vld [vmem:[#allocation7 + $0xa8] sm:$0xf0]  ;;  %v10170_v47 = vor.u32 %v13571_v57, %v10169_v56 }
 0x294   :  { %v15112_v53 = vpop.f32.mrf.mxu2  ;;  %1382 = vmatpush.bf16.msra.mxu3 %v9414_v63  ;;  %2751 = vmatpush.bf16.msra.mxu0 %v10234_v9  ;;  %v9574_v36 = vor.u32 %v13352_v28, %v9571_v30  ;;  %v9314_v63 = vor.u32 %v13420_v61, %v9313_v60  ;;  %v13336_v4 = vld [vmem:[#allocation7 + $0xc] sm:$0xf]  ;;  %v9318_v9 = vor.u32 %v13416_v62, %v9315_v1  ;;  %v13412_v28 = vld [vmem:[#allocation7 + $0x264] sm:$0xf0]  ;;  %v10041_v60 = vld [vmem:[#allocation7 + $0x640] sm:$0xf] }
 0x295   :  { %v9507_v5 = vld [vmem:[#allocation7 + $0x28] sm:$0xf0]  ;;  %v13539_v61 = vld [vmem:[#allocation7 + $0x65c] sm:$0xf0] }
 0x296   :  { %1809 = vmatpush.bf16.msrb.mxu1 %v9574_v36  ;;  %v13408_v30 = vld [vmem:[#allocation7 + $0x24c] sm:$0xf]  ;;  %v10042_v62 = vor.u32 %v13539_v61, %v10041_v60  ;;  %v13531_v1 = vld [vmem:[#allocation7 + $0x61c] sm:$0xf0] }
 0x297   :  { %1370 = vmatpush.bf16.msra.mxu2 %v9378_v24  ;;  %v541_v24 = vld [vmem:[%s15781_s1 + $0x1d0] sm:$0xff] }
 0x298   :  { %1383 = vmatpush.bf16.msra.mxu3 %v9382_v32  ;;  %2752 = vmatpush.bf16.msra.mxu0 %v10202_v33  ;;  %v9282_v32 = vor.u32 %v13412_v28, %v9281_v26  ;;  %v9283_v36 = vld [vmem:[#allocation7 + $0x268] sm:$0xf0]  ;;  %v660_v33 = vadd.f32 %v15071_v8, %v15107_v14  ;;  %v9745_v28 = vld [vmem:[#allocation7 + $0x1d8] sm:$0xf] }
 0x299   :  { %782 = vmatmul.f32.gmra.mxu3 %v533_v54  ;;  %v9350_v54 = vor.u32 %v13424_v46, %v9347_v49  ;;  %v13404_v46 = vld [vmem:[#allocation7 + $0x224] sm:$0xf0]  ;;  %v9251_v50 = vld [vmem:[#allocation7 + $0x228] sm:$0xf0] }
 0x29a   :  { %1810 = vmatpush.bf16.msrb.mxu1 %v9542_v55  ;;  %v9250_v49 = vor.u32 %v13404_v46, %v9249_v43  ;;  %v545_v14 = vld [vmem:[%s15781_s1 + $0x1f0] sm:$0xff]  ;;  %s14567_s1 = smov [#allocation13]  }
 0x29b   :  { %9238 = vmatmul.msk.f32.gmra.mxu1 %vm551_vm1, %v546_v11  ;;  %1371 = vmatpush.bf16.msra.mxu2 %v9346_v48  ;;  %v9510_v11 = vor.u32 %v13336_v4, %v9507_v5  ;;  %v13400_v48 = vld [vmem:[#allocation7 + $0x20c] sm:$0xf]  ;;  %v9481_v43 = vld [vmem:[#allocation7 + $0x3d0] sm:$0xf]  ;;  %s9159_s10 = sshll.u32 %s14567_s1, 4  ;;  %s9160_s10 = int_to_ptr.vmem [resolvable:$true] %s9159_s10 }
 0x29c   :  { %v718_v40 = vpop.f32.mrf.mxu2  ;;  %1384 = vmatpush.bf16.msra.mxu3 %v9350_v54  ;;  %2753 = vmatpush.bf16.msra.mxu0 %v10170_v47  ;;  %v13547_v54 = vld [vmem:[#allocation7 + $0x69c] sm:$0xf0]  ;;  %v9254_v56 = vor.u32 %v13400_v48, %v9251_v50  ;;  %v13461_v46 = vld [vmem:[#allocation7 + $0x3ec] sm:$0xf0]  ;;  %v13457_v48 = vld [vmem:[#allocation7 + $0x3d4] sm:$0xf] }
 0x29d   :  { %v15129_v41 = vadd.f32 %v718_v40, %v654_v16  ;;  %v10137_v16 = vld [vmem:[#allocation7 + $0x700] sm:$0xf]  ;;  %v9286_v40 = vor.u32 %v13408_v30, %v9283_v36  ;;  %v10074_v57 = vor.u32 %v13547_v54, %v10073_v51  ;;  %v13398_v30 = vld [vmem:[#allocation7 + $0x1f4] sm:$0xf0] }
 0x29e   :  { %v10138_v22 = vor.u32 %v13563_v18, %v10137_v16  ;;  %1811 = vmatpush.bf16.msrb.mxu1 %v9510_v11  ;;  %v9746_v36 = vor.u32 %v13398_v30, %v9745_v28  ;;  %v9681_v50 = vld [vmem:[#allocation7 + $0x158] sm:$0xf]  ;;  %v13441_v28 = vld [vmem:[#allocation7 + $0x354] sm:$0xf] }
 0x29f   :  { %1372 = vmatpush.bf16.msra.mxu2 %v9314_v63  ;;  %v10009_v63 = vld [vmem:[#allocation7 + $0x600] sm:$0xf]  ;;  %v9419_v30 = vld [vmem:[#allocation7 + $0x370] sm:$0xf0] }
 0x2a0   :  { %v15131_v59 = vpop.f32.mrf.mxu1  ;;  %1385 = vmatpush.bf16.msra.mxu3 %v9318_v9  ;;  %2754 = vmatpush.bf16.msra.mxu0 %v10138_v22  ;;  %v10010_v5 = vor.u32 %v13531_v1, %v10009_v63  ;;  %v618_v9 = vadd.f32 %v15071_v8, %v14949_v3  ;;  %v9713_v3 = vld [vmem:[#allocation7 + $0x198] sm:$0xf] }
 0x2a1   :  { %785 = vmatmul.f32.gmra.mxu3 %v537_v52  ;;  %v10106_v52 = vor.u32 %v13555_v39, %v10105_v38  ;;  %v9649_v1 = vld [vmem:[#allocation7 + $0x118] sm:$0xf] }
 0x2a2   :  { %v683_v11 = vadd.f32 %v14989_v15, %v618_v9 }
 0x2a3   :  { %1373 = vmatpush.bf16.msra.mxu2 %v9282_v32 }
 0x2a4   :  { %v15133_v20 = vpop.f32.mrf.mxu2  ;;  %1386 = vmatpush.bf16.msra.mxu3 %v9286_v40  ;;  %2755 = vmatpush.bf16.msra.mxu0 %v10106_v52  ;;  %v13390_v40 = vld [vmem:[#allocation7 + $0x1b4] sm:$0xf0] }
 0x2a5   :  { %15790 = vst [vmem:[#allocation20_spill] sm:$0xff] %v15133_v20 }
 0x2a7   :  { %1374 = vmatpush.bf16.msra.mxu2 %v9250_v49  ;;  %v9483_v49 = vld [vmem:[#allocation7 + $0x3f0] sm:$0xf0] }
 0x2a8   :  { %v815_v42 = vpop.f32.mrf.mxu1  ;;  %1387 = vmatpush.bf16.msra.mxu3 %v9254_v56  ;;  %2756 = vmatpush.bf16.msra.mxu0 %v10074_v57  ;;  %v9486_v56 = vor.u32 %v13457_v48, %v9483_v49  ;;  %v9449_v57 = vld [vmem:[#allocation7 + $0x390] sm:$0xf]  ;;  %v13433_v49 = vld [vmem:[#allocation7 + $0x314] sm:$0xf] }
 0x2a9   :  { %788 = vmatmul.f32.gmra.mxu3 %v541_v24  ;;  %v621_v24 = vadd.f32 %v15071_v8, %v14958_v7  ;;  %v624_v7 = vadd.f32 %v15071_v8, %v14969_v10  ;;  %v13449_v10 = vld [vmem:[#allocation7 + $0x394] sm:$0xf] }
 0x2ab   :  { %v686_v38 = vadd.f32 %v15000_v19, %v621_v24  ;;  %v13382_v19 = vld [vmem:[#allocation7 + $0x174] sm:$0xf0] }
 0x2ac   :  { %v724_v55 = vpop.f32.mrf.mxu2  ;;  %2757 = vmatpush.bf16.msra.mxu0 %v10042_v62  ;;  %v9682_v61 = vor.u32 %v13382_v19, %v9681_v50  ;;  %v13453_v62 = vld [vmem:[#allocation7 + $0x3ac] sm:$0xf0]  ;;  %v9387_v50 = vld [vmem:[#allocation7 + $0x330] sm:$0xf0]  ;;  %v9585_v19 = vld [vmem:[#allocation7 + $0x98] sm:$0xf] }
 0x2ad   :  { %v15140_v47 = vadd.f32 %v724_v55, %v660_v33  ;;  %v9714_v33 = vor.u32 %v13390_v40, %v9713_v3  ;;  %v9482_v55 = vor.u32 %v13461_v46, %v9481_v43  ;;  %v13589_v3 = vld [vmem:[#allocation7 + $0x7ec] sm:$0xf0]  ;;  %v627_v40 = vadd.f32 %v15071_v8, %v14982_v13 }
 0x2ae   :  { %v9385_v43 = vld [vmem:[#allocation7 + $0x310] sm:$0xf] }
 0x2af   :  { %v10217_v13 = vld [vmem:[#allocation7 + $0x790] sm:$0xf] }
 0x2b0   :  { %v818_v4 = vpop.f32.mrf.mxu1  ;;  %2758 = vmatpush.bf16.msra.mxu0 %v10010_v5  ;;  %v13374_v5 = vld [vmem:[#allocation7 + $0x134] sm:$0xf0] }
 0x2b1   :  { %791 = vmatmul.f32.gmra.mxu3 %v545_v14  ;;  %v689_v14 = vadd.f32 %v15011_v23, %v624_v7  ;;  %v13445_v23 = vld [vmem:[#allocation7 + $0x36c] sm:$0xf0] }
 0x2b2   :  { %v13437_v7 = vld [vmem:[#allocation7 + $0x32c] sm:$0xf0] }
 0x2b8   :  { %v15148_v22 = vpop.f32.mrf.mxu1 }
 0x2bc   :  { %v747_v16 = vpop.f32.mrf.mxu3 }
 0x2bd   :  { %v748_v18 = vadd.f32 %v747_v16, %v683_v11  ;;  %v9450_v11 = vor.u32 %v13453_v62, %v9449_v57  ;;  %v692_v57 = vadd.f32 %v15022_v27, %v627_v40  ;;  %v9353_v62 = vld [vmem:[#allocation7 + $0x2d0] sm:$0xf]  ;;  %v9521_v40 = vld [vmem:[#allocation7 + $0x18] sm:$0xf] }
 0x2be   :  { %v10185_v27 = vld [vmem:[#allocation7 + $0x750] sm:$0xf] }
 0x2bf   :  { %v813_v26 = vadd.f32 %v15131_v59, %v748_v18  ;;  %v9417_v18 = vld [vmem:[#allocation7 + $0x350] sm:$0xf] }
 0x2c0   :  { %v15159_v51 = vpop.f32.mrf.mxu1 }
 0x2c1   :  { %v860_v32 = vmax.f32 %v813_v26, 0.0  ;;  %v9650_v26 = vor.u32 %v13374_v5, %v9649_v1  ;;  %v13425_v5 = vld [vmem:[#allocation7 + $0x2d4] sm:$0xf] }
 0x2c3   :  { %v15154_v39 = vpack.c.bf16 %v860_v32, %v860_v32  ;;  %v9617_v32 = vld [vmem:[#allocation7 + $0xd8] sm:$0xf] }
 0x2c4   :  { %v750_v15 = vpop.f32.mrf.mxu3 }
 0x2c5   :  { %v751_v52 = vadd.f32 %v750_v15, %v686_v38  ;;  %1773 = vmatmul.bf16.vlgmr.msra.gmra.mxu1 %v15154_v39  ;;  %v10249_v38 = vld [vmem:[#allocation7 + $0x7d0] sm:$0xf] }
 0x2c6   :  { %1843 = vmatpush.bf16.msra.mxu1 %v9746_v36  ;;  %v13366_v36 = vld [vmem:[#allocation7 + $0xf4] sm:$0xf0]  ;;  %v10250_v48 = vor.u32 %v13589_v3, %v10249_v38  ;;  %v13417_v38 = vld [vmem:[#allocation7 + $0x294] sm:$0xf] }
 0x2c7   :  { %v816_v59 = vadd.f32 %v815_v42, %v751_v52  ;;  %v9451_v42 = vld [vmem:[#allocation7 + $0x3b0] sm:$0xf0]  ;;  %v9418_v52 = vor.u32 %v13445_v23, %v9417_v18  ;;  %v9618_v46 = vor.u32 %v13366_v36, %v9617_v32  ;;  %v13573_v18 = vld [vmem:[#allocation7 + $0x76c] sm:$0xf0] }
 0x2c8   :  { %v9454_v16 = vor.u32 %v13449_v10, %v9451_v42  ;;  %v13429_v10 = vld [vmem:[#allocation7 + $0x2ec] sm:$0xf0]  ;;  %v10186_v36 = vor.u32 %v13573_v18, %v10185_v27  ;;  %v9323_v3 = vld [vmem:[#allocation7 + $0x2b0] sm:$0xf0] }
 0x2c9   :  { %v861_v54 = vmax.f32 %v816_v59, 0.0  ;;  %v15168_v59 = vpop.f32.mrf.mxu1  ;;  %v9354_v23 = vor.u32 %v13429_v10, %v9353_v62  ;;  %v13557_v62 = vld [vmem:[#allocation7 + $0x6ec] sm:$0xf0]  ;;  %v13511_v10 = vld [vmem:[#allocation7 + $0x584] sm:$0xf] }
 0x2ca   :  { %1844 = vmatpush.bf16.msra.mxu1 %v9714_v33  ;;  %v9422_v33 = vor.u32 %v13441_v28, %v9419_v30  ;;  %v13421_v28 = vld [vmem:[#allocation7 + $0x2ac] sm:$0xf0]  ;;  %v9259_v18 = vld [vmem:[#allocation7 + $0x230] sm:$0xf0] }
 0x2cb   :  { %v15162_v60 = vpack.c.bf16 %v861_v54, %v861_v54 }
 0x2cc   :  { %v753_v63 = vpop.f32.mrf.mxu3 }
 0x2cd   :  { %v754_v9 = vadd.f32 %v753_v63, %v689_v14  ;;  %1349 = vmatmul.bf16.vlgmr.msrb.gmra.mxu2 %v15162_v60  ;;  %1362 = vmatmul.bf16.vlgmr.msrb.gmra.mxu3 %v15162_v60  ;;  %v9386_v14 = vor.u32 %v13437_v7, %v9385_v43  ;;  %v13565_v43 = vld [vmem:[#allocation7 + $0x72c] sm:$0xf0] }
 0x2ce   :  { %1393 = vmatpush.bf16.msrb.mxu2 %v9482_v55  ;;  %1406 = vmatpush.bf16.msrb.mxu3 %v9486_v56  ;;  %v13358_v55 = vld [vmem:[#allocation7 + $0xb4] sm:$0xf0]  ;;  %v13581_v56 = vld [vmem:[#allocation7 + $0x7ac] sm:$0xf0] }
 0x2cf   :  { %1845 = vmatpush.bf16.msra.mxu1 %v9682_v61  ;;  %v819_v24 = vadd.f32 %v818_v4, %v754_v9  ;;  %v9390_v61 = vor.u32 %v13433_v49, %v9387_v50  ;;  %v9586_v63 = vor.u32 %v13358_v55, %v9585_v19  ;;  %v10218_v1 = vor.u32 %v13581_v56, %v10217_v13  ;;  %v9355_v9 = vld [vmem:[#allocation7 + $0x2f0] sm:$0xf0]  ;;  %v9289_v50 = vld [vmem:[#allocation7 + $0x250] sm:$0xf] }
 0x2d0   :  { %v9326_v49 = vor.u32 %v13417_v38, %v9323_v3  ;;  %v13413_v19 = vld [vmem:[#allocation7 + $0x26c] sm:$0xf0]  ;;  %v13409_v56 = vld [vmem:[#allocation7 + $0x254] sm:$0xf]  ;;  %v9491_v38 = vld [vmem:[#allocation7 + $0x3f8] sm:$0xf0] }
 0x2d1   :  { %v862_v15 = vmax.f32 %v819_v24, 0.0  ;;  %v9358_v24 = vor.u32 %v13425_v5, %v9355_v9  ;;  %v15178_v7 = vpop.f32.mrf.mxu1  ;;  %v9257_v5 = vld [vmem:[#allocation7 + $0x210] sm:$0xf]  ;;  %v13503_v3 = vld [vmem:[#allocation7 + $0x544] sm:$0xf] }
 0x2d2   :  { %1394 = vmatpush.bf16.msrb.mxu2 %v9450_v11  ;;  %1407 = vmatpush.bf16.msrb.mxu3 %v9454_v16  ;;  %v9553_v11 = vld [vmem:[#allocation7 + $0x58] sm:$0xf]  ;;  %v13405_v9 = vld [vmem:[#allocation7 + $0x22c] sm:$0xf0] }
 0x2d3   :  { %v15170_v4 = vpack.c.bf16 %v862_v15, %v862_v15  ;;  %1846 = vmatpush.bf16.msra.mxu1 %v9650_v26  ;;  %v13350_v16 = vld [vmem:[#allocation7 + $0x74] sm:$0xf0]  ;;  %v9321_v26 = vld [vmem:[#allocation7 + $0x290] sm:$0xf] }
 0x2d4   :  { %v756_v54 = vpop.f32.mrf.mxu3  ;;  %v9554_v32 = vor.u32 %v13350_v16, %v9553_v11  ;;  %v13401_v11 = vld [vmem:[#allocation7 + $0x214] sm:$0xf] }
 0x2d5   :  { %1812 = vmatmul.bf16.vlgmr.msrb.gmra.mxu1 %v15154_v39  ;;  %2314 = vmatmul.bf16.vlgmr.msrb.gmra.mxu0 %v15170_v4  ;;  %v757_v42 = vadd.f32 %v756_v54, %v692_v57  ;;  %v9291_v57 = vld [vmem:[#allocation7 + $0x270] sm:$0xf0] }
 0x2d6   :  { %1395 = vmatpush.bf16.msrb.mxu2 %v9418_v52  ;;  %1408 = vmatpush.bf16.msrb.mxu3 %v9422_v33  ;;  %v13342_v52 = vld [vmem:[#allocation7 + $0x34] sm:$0xf0]  ;;  %v10153_v33 = vld [vmem:[#allocation7 + $0x710] sm:$0xf] }
 0x2d7   :  { %1847 = vmatpush.bf16.msra.mxu1 %v9618_v46  ;;  %2803 = vmatpush.bf16.msrb.mxu0 %v10250_v48  ;;  %v822_v30 = vadd.f32 %v15148_v22, %v757_v42  ;;  %v13519_v46 = vld [vmem:[#allocation7 + $0x5c4] sm:$0xf]  ;;  %v9322_v48 = vor.u32 %v13421_v28, %v9321_v26  ;;  %v9522_v55 = vor.u32 %v13342_v52, %v9521_v40 }
 0x2d8   :  { %v9979_v22 = vld [vmem:[#allocation7 + $0x5e0] sm:$0xf0]  ;;  %v10154_v13 = vor.u32 %v13565_v43, %v10153_v33  ;;  %v9258_v52 = vor.u32 %v13405_v9, %v9257_v5  ;;  %v9262_v33 = vor.u32 %v13401_v11, %v9259_v18  ;;  %v9425_v9 = vld [vmem:[#allocation7 + $0x358] sm:$0xf] }
 0x2d9   :  { %v863_v54 = vmax.f32 %v822_v30, 0.0  ;;  %v9947_v42 = vld [vmem:[#allocation7 + $0x5a0] sm:$0xf0]  ;;  %v9489_v30 = vld [vmem:[#allocation7 + $0x3d8] sm:$0xf]  ;;  %v15187_v43 = vpop.f32.mrf.mxu1 }
 0x2da   :  { %1396 = vmatpush.bf16.msrb.mxu2 %v9386_v14  ;;  %1409 = vmatpush.bf16.msrb.mxu3 %v9390_v61  ;;  %v9982_v14 = vor.u32 %v13519_v46, %v9979_v22  ;;  %v10121_v61 = vld [vmem:[#allocation7 + $0x6d0] sm:$0xf]  ;;  %v9950_v28 = vor.u32 %v13511_v10, %v9947_v42  ;;  %v9915_v40 = vld [vmem:[#allocation7 + $0x560] sm:$0xf0]  ;;  %v636_v46 = vadd.f32 %v15071_v8, %v15016_v25  ;;  %v13446_v11 = vld [vmem:[#allocation7 + $0x374] sm:$0xf0] }
 0x2db   :  { %1848 = vmatpush.bf16.msra.mxu1 %v9586_v63  ;;  %2804 = vmatpush.bf16.msrb.mxu0 %v10218_v1  ;;  %v9290_v63 = vor.u32 %v13413_v19, %v9289_v50  ;;  %v9294_v1 = vor.u32 %v13409_v56, %v9291_v57  ;;  %v15182_v16 = vpack.c.bf16 %v863_v54, %v863_v54  ;;  %v13541_v50 = vld [vmem:[#allocation7 + $0x66c] sm:$0xf0]  ;;  %v13450_v56 = vld [vmem:[#allocation7 + $0x39c] sm:$0xf] }
 0x2dc   :  { %v15176_v15 = vpop.f32.mrf.mxu3  ;;  %v10122_v27 = vor.u32 %v13557_v62, %v10121_v61  ;;  %v9918_v54 = vor.u32 %v13503_v3, %v9915_v40  ;;  %v9459_v57 = vld [vmem:[#allocation7 + $0x3b8] sm:$0xf0]  ;;  %v9883_v61 = vld [vmem:[#allocation7 + $0x520] sm:$0xf0]  ;;  %v701_v25 = vadd.f32 %v15053_v44, %v636_v46  ;;  %v10025_v10 = vld [vmem:[#allocation7 + $0x610] sm:$0xf] }
 0x2dd   :  { %1375 = vmatmul.bf16.vlgmr.msra.gmra.mxu2 %v15162_v60  ;;  %1388 = vmatmul.bf16.vlgmr.msra.gmra.mxu3 %v15162_v60  ;;  %v13533_v42 = vld [vmem:[#allocation7 + $0x62c] sm:$0xf0]  ;;  %v9427_v44 = vld [vmem:[#allocation7 + $0x378] sm:$0xf0] }
 0x2de   :  { %1397 = vmatpush.bf16.msrb.mxu2 %v9354_v23  ;;  %1410 = vmatpush.bf16.msrb.mxu3 %v9358_v24  ;;  %v10089_v23 = vld [vmem:[#allocation7 + $0x690] sm:$0xf]  ;;  %v13434_v46 = vld [vmem:[#allocation7 + $0x31c] sm:$0xf] }
 0x2df   :  { %1849 = vmatpush.bf16.msra.mxu1 %v9554_v32  ;;  %2805 = vmatpush.bf16.msrb.mxu0 %v10186_v36  ;;  %v13549_v24 = vld [vmem:[#allocation7 + $0x6ac] sm:$0xf0]  ;;  %v13462_v32 = vld [vmem:[#allocation7 + $0x3f4] sm:$0xf0]  ;;  %v13458_v36 = vld [vmem:[#allocation7 + $0x3dc] sm:$0xf] }
 0x2e0   :  { %v10090_v22 = vor.u32 %v13549_v24, %v10089_v23  ;;  %v9494_v19 = vor.u32 %v13458_v36, %v9491_v38  ;;  %v13487_v23 = vld [vmem:[#allocation7 + $0x4c4] sm:$0xf]  ;;  %v10026_v36 = vor.u32 %v13533_v42, %v10025_v10  ;;  %v9426_v38 = vor.u32 %v13446_v11, %v9425_v9  ;;  %v9329_v9 = vld [vmem:[#allocation7 + $0x298] sm:$0xf] }
 0x2e1   :  { %v9851_v24 = vld [vmem:[#allocation7 + $0x4e0] sm:$0xf0] }
 0x2e2   :  { %1398 = vmatpush.bf16.msrb.mxu2 %v9322_v48  ;;  %1411 = vmatpush.bf16.msrb.mxu3 %v9326_v49  ;;  %v9490_v48 = vor.u32 %v13462_v32, %v9489_v30  ;;  %v10057_v49 = vld [vmem:[#allocation7 + $0x650] sm:$0xf]  ;;  %v13651_v30 = vld [vmem:[#allocation7 + $0x9dc] sm:$0xf0]  ;;  %v9854_v40 = vor.u32 %v13487_v23, %v9851_v24  ;;  %v13471_v10 = vld [vmem:[#allocation7 + $0x444] sm:$0xf] }
 0x2e3   :  { %1850 = vmatpush.bf16.msra.mxu1 %v9522_v55  ;;  %2806 = vmatpush.bf16.msrb.mxu0 %v10154_v13  ;;  %v9457_v55 = vld [vmem:[#allocation7 + $0x398] sm:$0xf]  ;;  %v10058_v8 = vor.u32 %v13541_v50, %v10057_v49  ;;  %v9395_v49 = vld [vmem:[#allocation7 + $0x338] sm:$0xf0]  ;;  %v13479_v50 = vld [vmem:[#allocation7 + $0x484] sm:$0xf] }
 0x2e4   :  { %v15184_v26 = vpop.f32.mrf.mxu3  ;;  %v13454_v13 = vld [vmem:[#allocation7 + $0x3b4] sm:$0xf0]  ;;  %v9787_v42 = vld [vmem:[#allocation7 + $0x460] sm:$0xf0]  ;;  %v9331_v23 = vld [vmem:[#allocation7 + $0x2b8] sm:$0xf0] }
 0x2e5   :  { %2759 = vmatmul.bf16.vlgmr.msra.gmra.mxu0 %v15182_v16  ;;  %v9458_v62 = vor.u32 %v13454_v13, %v9457_v55  ;;  %v13643_v55 = vld [vmem:[#allocation7 + $0x99c] sm:$0xf0] }
 0x2e6   :  { %1399 = vmatpush.bf16.msrb.mxu2 %v9290_v63  ;;  %1412 = vmatpush.bf16.msrb.mxu3 %v9294_v1  ;;  %v9462_v1 = vor.u32 %v13450_v56, %v9459_v57  ;;  %v9398_v56 = vor.u32 %v13434_v46, %v9395_v49 }
 0x2e7   :  { %2267 = vmatpush.bf16.msrb.mxu1 %v9982_v14  ;;  %2807 = vmatpush.bf16.msrb.mxu0 %v10122_v27  ;;  %v13495_v14 = vld [vmem:[#allocation7 + $0x504] sm:$0xf]  ;;  %v13442_v27 = vld [vmem:[#allocation7 + $0x35c] sm:$0xf] }
 0x2e8   :  { %1851 = vmatmul.bf16.vlgmr.msra.gmra.mxu1 %v15154_v39  ;;  %v9886_v5 = vor.u32 %v13495_v14, %v9883_v61  ;;  %v9430_v3 = vor.u32 %v13442_v27, %v9427_v44  ;;  %v9361_v14 = vld [vmem:[#allocation7 + $0x2d8] sm:$0xf]  ;;  %v9790_v27 = vor.u32 %v13471_v10, %v9787_v42  ;;  %v13418_v44 = vld [vmem:[#allocation7 + $0x29c] sm:$0xf] }
 0x2e9   :  { %v13430_v61 = vld [vmem:[#allocation7 + $0x2f4] sm:$0xf0] }
 0x2ea   :  { %1400 = vmatpush.bf16.msrb.mxu2 %v9258_v52  ;;  %1413 = vmatpush.bf16.msrb.mxu3 %v9262_v33  ;;  %v9393_v52 = vld [vmem:[#allocation7 + $0x318] sm:$0xf] }
 0x2eb   :  { %2268 = vmatpush.bf16.msrb.mxu1 %v9950_v28  ;;  %2808 = vmatpush.bf16.msrb.mxu0 %v10090_v22  ;;  %v10489_v28 = vld [vmem:[#allocation7 + $0x9c0] sm:$0xf]  ;;  %v13438_v33 = vld [vmem:[#allocation7 + $0x334] sm:$0xf0]  ;;  %v15198_v22 = vpop.f32.mrf.mxu1 }
 0x2ec   :  { %v765_v63 = vpop.f32.mrf.mxu3 }
 0x2ed   :  { %v766_v18 = vadd.f32 %v765_v63, %v701_v25  ;;  %1401 = vmatmul.bf16.vlgmr.msrb.gmra.mxu2 %v15162_v60  ;;  %1414 = vmatmul.bf16.vlgmr.msrb.gmra.mxu3 %v15162_v60  ;;  %v13426_v25 = vld [vmem:[#allocation7 + $0x2dc] sm:$0xf]  ;;  %v10425_v63 = vld [vmem:[#allocation7 + $0x940] sm:$0xf] }
 0x2ee   :  { %1419 = vmatpush.bf16.msra.mxu2 %v9490_v48  ;;  %1432 = vmatpush.bf16.msra.mxu3 %v9494_v19  ;;  %v10490_v48 = vor.u32 %v13651_v30, %v10489_v28  ;;  %v9819_v19 = vld [vmem:[#allocation7 + $0x4a0] sm:$0xf0] }
 0x2ef   :  { %2269 = vmatpush.bf16.msrb.mxu1 %v9918_v54  ;;  %2809 = vmatpush.bf16.msrb.mxu0 %v10058_v8  ;;  %v15196_v32 = vadd.f32 %v15178_v7, %v766_v18  ;;  %v10457_v54 = vld [vmem:[#allocation7 + $0x980] sm:$0xf]  ;;  %v9394_v7 = vor.u32 %v13438_v33, %v9393_v52  ;;  %v9822_v57 = vor.u32 %v13479_v50, %v9819_v19  ;;  %v13422_v18 = vld [vmem:[#allocation7 + $0x2b4] sm:$0xf0]  ;;  %v13463_v28 = vld [vmem:[#allocation7 + $0x404] sm:$0xf] }
 0x2f0   :  { %v10458_v8 = vor.u32 %v13643_v55, %v10457_v54  ;;  %v9755_v30 = vld [vmem:[#allocation7 + $0x420] sm:$0xf0]  ;;  %v9330_v33 = vor.u32 %v13422_v18, %v9329_v9  ;;  %v9297_v50 = vld [vmem:[#allocation7 + $0x258] sm:$0xf]  ;;  %v13402_v9 = vld [vmem:[#allocation7 + $0x21c] sm:$0xf] }
 0x2f1   :  { %v9758_v49 = vor.u32 %v13463_v28, %v9755_v30  ;;  %v13414_v19 = vld [vmem:[#allocation7 + $0x274] sm:$0xf0]  ;;  %v9729_v28 = vld [vmem:[#allocation7 + $0x1c8] sm:$0xf] }
 0x2f2   :  { %1420 = vmatpush.bf16.msra.mxu2 %v9458_v62  ;;  %1433 = vmatpush.bf16.msra.mxu3 %v9462_v1  ;;  %v9363_v62 = vld [vmem:[#allocation7 + $0x2f8] sm:$0xf0]  ;;  %v13635_v1 = vld [vmem:[#allocation7 + $0x95c] sm:$0xf0] }
 0x2f3   :  { %2270 = vmatpush.bf16.msrb.mxu1 %v9886_v5  ;;  %2810 = vmatpush.bf16.msrb.mxu0 %v10026_v36  ;;  %v9362_v5 = vor.u32 %v13430_v61, %v9361_v14  ;;  %v9366_v11 = vor.u32 %v13426_v25, %v9363_v62  ;;  %v10426_v24 = vor.u32 %v13635_v1, %v10425_v63  ;;  %v10393_v36 = vld [vmem:[#allocation7 + $0x900] sm:$0xf]  ;;  %v15203_v52 = vpop.f32.mrf.mxu1  ;;  %v13513_v25 = vld [vmem:[#allocation7 + $0x594] sm:$0xf]  ;;  %v15206_v62 = vld [vmem:[#allocation5] ss:$0 sm:$0xff] }
 0x2f4   :  { %v15200_v13 = vpop.f32.mrf.mxu3  ;;  %v10361_v14 = vld [vmem:[#allocation7 + $0x8c0] sm:$0xf]  ;;  %v630_v10 = vadd.f32 %v15206_v62, %v14994_v17  ;;  %v9298_v63 = vor.u32 %v13414_v19, %v9297_v50  ;;  %v9265_v1 = vld [vmem:[#allocation7 + $0x218] sm:$0xf] }
 0x2f5   :  { %v13619_v61 = vld [vmem:[#allocation7 + $0x8dc] sm:$0xf0] }
 0x2f6   :  { %1421 = vmatpush.bf16.msra.mxu2 %v9426_v38  ;;  %1434 = vmatpush.bf16.msra.mxu3 %v9430_v3  ;;  %v13627_v38 = vld [vmem:[#allocation7 + $0x91c] sm:$0xf0]  ;;  %v13521_v3 = vld [vmem:[#allocation7 + $0x5d4] sm:$0xf]  ;;  %v695_v30 = vadd.f32 %v15033_v31, %v630_v10  ;;  %v13383_v31 = vld [vmem:[#allocation7 + $0x184] sm:$0xf] }
 0x2f7   :  { %2271 = vmatpush.bf16.msrb.mxu1 %v9854_v40  ;;  %3248 = vmatpush.bf16.msra.mxu0 %v10490_v48  ;;  %v9995_v40 = vld [vmem:[#allocation7 + $0x5f0] sm:$0xf0]  ;;  %v9334_v48 = vor.u32 %v13418_v44, %v9331_v23  ;;  %v10394_v55 = vor.u32 %v13627_v38, %v10393_v36  ;;  %v10329_v44 = vld [vmem:[#allocation7 + $0x880] sm:$0xf]  ;;  %v13391_v23 = vld [vmem:[#allocation7 + $0x1c4] sm:$0xf] }
 0x2f8   :  { %2811 = vmatmul.bf16.vlgmr.msrb.gmra.mxu0 %v15182_v16  ;;  %v13611_v17 = vld [vmem:[#allocation7 + $0x89c] sm:$0xf0]  ;;  %v13505_v38 = vld [vmem:[#allocation7 + $0x554] sm:$0xf] }
 0x2f9   :  { %v10330_v50 = vor.u32 %v13611_v17, %v10329_v44  ;;  %v10265_v10 = vld [vmem:[#allocation7 + $0x800] sm:$0xf]  ;;  %v13489_v44 = vld [vmem:[#allocation7 + $0x4d4] sm:$0xf]  ;;  %v13653_v17 = vld [vmem:[#allocation7 + $0x9ec] sm:$0xf0] }
 0x2fa   :  { %1422 = vmatpush.bf16.msra.mxu2 %v9394_v7  ;;  %1435 = vmatpush.bf16.msra.mxu3 %v9398_v56  ;;  %v9998_v7 = vor.u32 %v13521_v3, %v9995_v40  ;;  %v13410_v56 = vld [vmem:[#allocation7 + $0x25c] sm:$0xf]  ;;  %v9931_v3 = vld [vmem:[#allocation7 + $0x570] sm:$0xf0] }
 0x2fb   :  { %2272 = vmatpush.bf16.msrb.mxu1 %v9822_v57  ;;  %3249 = vmatpush.bf16.msra.mxu0 %v10458_v8  ;;  %v9299_v57 = vld [vmem:[#allocation7 + $0x278] sm:$0xf0]  ;;  %v9963_v8 = vld [vmem:[#allocation7 + $0x5b0] sm:$0xf0] }
 0x2fc   :  { %v771_v46 = vpop.f32.mrf.mxu3  ;;  %v9966_v18 = vor.u32 %v13513_v25, %v9963_v8  ;;  %v9899_v25 = vld [vmem:[#allocation7 + $0x530] sm:$0xf0] }
 0x2fd   :  { %v772_v54 = vadd.f32 %v771_v46, %v15078_v45  ;;  %v9302_v45 = vor.u32 %v13410_v56, %v9299_v57  ;;  %v13603_v56 = vld [vmem:[#allocation7 + $0x85c] sm:$0xf0]  ;;  %v9697_v57 = vld [vmem:[#allocation7 + $0x188] sm:$0xf] }
 0x2fe   :  { %1423 = vmatpush.bf16.msra.mxu2 %v9362_v5  ;;  %1436 = vmatpush.bf16.msra.mxu3 %v9366_v11  ;;  %v13406_v5 = vld [vmem:[#allocation7 + $0x234] sm:$0xf0]  ;;  %v9267_v11 = vld [vmem:[#allocation7 + $0x238] sm:$0xf0] }
 0x2ff   :  { %2273 = vmatpush.bf16.msrb.mxu1 %v9790_v27  ;;  %3250 = vmatpush.bf16.msra.mxu0 %v10426_v24  ;;  %v15211_v42 = vadd.f32 %v15198_v22, %v772_v54  ;;  %v10362_v27 = vor.u32 %v13619_v61, %v10361_v14  ;;  %v9723_v24 = vld [vmem:[#allocation7 + $0x1e0] sm:$0xf0]  ;;  %v13396_v22 = vld [vmem:[#allocation7 + $0x1e4] sm:$0xf0]  ;;  %v9266_v36 = vor.u32 %v13406_v5, %v9265_v1  ;;  %v10297_v54 = vld [vmem:[#allocation7 + $0x840] sm:$0xf] }
 0x300   :  { %v9726_v46 = vor.u32 %v13391_v23, %v9723_v24  ;;  %v9730_v19 = vor.u32 %v13396_v22, %v9729_v28  ;;  %v13388_v14 = vld [vmem:[#allocation7 + $0x1a4] sm:$0xf0]  ;;  %v13497_v61 = vld [vmem:[#allocation7 + $0x514] sm:$0xf]  ;;  %v13375_v5 = vld [vmem:[#allocation7 + $0x144] sm:$0xf] }
 0x301   :  { %v9698_v1 = vor.u32 %v13388_v14, %v9697_v57  ;;  %v9867_v23 = vld [vmem:[#allocation7 + $0x4f0] sm:$0xf0]  ;;  %v10505_v24 = vld [vmem:[#allocation7 + $0x9d0] sm:$0xf]  ;;  %v13359_v14 = vld [vmem:[#allocation7 + $0xc4] sm:$0xf] }
 0x302   :  { %1424 = vmatpush.bf16.msra.mxu2 %v9330_v33  ;;  %1437 = vmatpush.bf16.msra.mxu3 %v9334_v48  ;;  %v9270_v33 = vor.u32 %v13402_v9, %v9267_v11  ;;  %v842_v48 = vpop.f32.mrf.mxu1  ;;  %v9659_v9 = vld [vmem:[#allocation7 + $0x160] sm:$0xf0]  ;;  %v9902_v11 = vor.u32 %v13497_v61, %v9899_v25 }
 0x303   :  { %2274 = vmatpush.bf16.msrb.mxu1 %v9758_v49  ;;  %3251 = vmatpush.bf16.msra.mxu0 %v10394_v55  ;;  %v760_v49 = vadd.f32 %v15176_v15, %v695_v30  ;;  %v9691_v55 = vld [vmem:[#allocation7 + $0x1a0] sm:$0xf0]  ;;  %v9662_v28 = vor.u32 %v13375_v5, %v9659_v9  ;;  %v13637_v5 = vld [vmem:[#allocation7 + $0x96c] sm:$0xf0] }
 0x304   :  { %v15215_v40 = vpop.f32.mrf.mxu3  ;;  %v9694_v8 = vor.u32 %v13383_v31, %v9691_v55  ;;  %v9835_v55 = vld [vmem:[#allocation7 + $0x4b0] sm:$0xf0]  ;;  %v9595_v61 = vld [vmem:[#allocation7 + $0xe0] sm:$0xf0] }
 0x305   :  { %v825_v15 = vadd.f32 %v15159_v51, %v760_v49  ;;  %v10506_v49 = vor.u32 %v13653_v17, %v10505_v24  ;;  %v9569_v17 = vld [vmem:[#allocation7 + $0x88] sm:$0xf] }
 0x306   :  { %2275 = vmatmul.bf16.vlgmr.msrb.gmra.mxu1 %v15170_v4  ;;  %1425 = vmatpush.bf16.msra.mxu2 %v9298_v63  ;;  %v10298_v63 = vor.u32 %v13603_v56, %v10297_v54  ;;  %v13645_v56 = vld [vmem:[#allocation7 + $0x9ac] sm:$0xf0] }
 0x307   :  { %2319 = vmatpush.bf16.msra.mxu1 %v9998_v7  ;;  %1438 = vmatpush.bf16.msra.mxu3 %v9302_v45  ;;  %v9934_v7 = vor.u32 %v13505_v38, %v9931_v3  ;;  %v13595_v45 = vld [vmem:[#allocation7 + $0x81c] sm:$0xf0]  ;;  %v864_v22 = vmax.f32 %v825_v15, 0.0  ;;  %v13367_v3 = vld [vmem:[#allocation7 + $0x104] sm:$0xf] }
 0x308   :  { %3252 = vmatpush.bf16.msra.mxu0 %v10362_v27  ;;  %v9665_v27 = vld [vmem:[#allocation7 + $0x148] sm:$0xf] }
 0x309   :  { %v15226_v25 = vpack.c.bf16 %v864_v22, %v864_v22  ;;  %v9601_v15 = vld [vmem:[#allocation7 + $0xc8] sm:$0xf]  ;;  %v9771_v22 = vld [vmem:[#allocation7 + $0x430] sm:$0xf0] }
 0x30a   :  { %1426 = vmatpush.bf16.msra.mxu2 %v9266_v36  ;;  %v10266_v36 = vor.u32 %v13595_v45, %v10265_v10  ;;  %v15222_v54 = vpop.f32.mrf.mxu1  ;;  %v10441_v45 = vld [vmem:[#allocation7 + $0x950] sm:$0xf] }
 0x30b   :  { %2320 = vmatpush.bf16.msra.mxu1 %v9966_v18  ;;  %1439 = vmatpush.bf16.msra.mxu3 %v9270_v33  ;;  %v13380_v18 = vld [vmem:[#allocation7 + $0x164] sm:$0xf0]  ;;  %v9627_v33 = vld [vmem:[#allocation7 + $0x120] sm:$0xf0]  ;;  %v10442_v24 = vor.u32 %v13637_v5, %v10441_v45 }
 0x30c   :  { %3253 = vmatpush.bf16.msra.mxu0 %v10330_v50  ;;  %v777_v51 = vpop.f32.mrf.mxu3  ;;  %v9666_v38 = vor.u32 %v13380_v18, %v9665_v27  ;;  %v9633_v50 = vld [vmem:[#allocation7 + $0x108] sm:$0xf]  ;;  %v9630_v57 = vor.u32 %v13367_v3, %v9627_v33  ;;  %v13351_v18 = vld [vmem:[#allocation7 + $0x84] sm:$0xf] }
 0x30d   :  { %1427 = vmatmul.bf16.vlgmr.msra.gmra.mxu2 %v15162_v60  ;;  %v778_v30 = vadd.f32 %v777_v51, %v15105_v2  ;;  %v13356_v51 = vld [vmem:[#allocation7 + $0xa4] sm:$0xf0]  ;;  %v13583_v3 = vld [vmem:[#allocation7 + $0x7c4] sm:$0xf] }
 0x30e   :  { %1778 = vmatpush.bf16.msrb.mxu2 %v9726_v46  ;;  %1440 = vmatmul.bf16.vlgmr.msra.gmra.mxu3 %v15162_v60  ;;  %v9870_v46 = vor.u32 %v13489_v44, %v9867_v23  ;;  %v13372_v60 = vld [vmem:[#allocation7 + $0x124] sm:$0xf0]  ;;  %v9563_v44 = vld [vmem:[#allocation7 + $0xa0] sm:$0xf0] }
 0x30f   :  { %1791 = vmatpush.bf16.msrb.mxu3 %v9730_v19  ;;  %2321 = vmatpush.bf16.msra.mxu1 %v9934_v7  ;;  %v13481_v19 = vld [vmem:[#allocation7 + $0x494] sm:$0xf]  ;;  %v15224_v31 = vadd.f32 %v842_v48, %v778_v30  ;;  %v10473_v7 = vld [vmem:[#allocation7 + $0x990] sm:$0xf]  ;;  %v9634_v2 = vor.u32 %v13372_v60, %v9633_v50  ;;  %v10235_v33 = vld [vmem:[#allocation7 + $0x7e0] sm:$0xf0] }
 0x310   :  { %3254 = vmatpush.bf16.msra.mxu0 %v10298_v63  ;;  %v10474_v10 = vor.u32 %v13645_v56, %v10473_v7  ;;  %v13364_v63 = vld [vmem:[#allocation7 + $0xe4] sm:$0xf0]  ;;  %v13473_v48 = vld [vmem:[#allocation7 + $0x454] sm:$0xf]  ;;  %v10409_v30 = vld [vmem:[#allocation7 + $0x910] sm:$0xf] }
 0x311   :  { %v9602_v27 = vor.u32 %v13364_v63, %v9601_v15  ;;  %v13343_v50 = vld [vmem:[#allocation7 + $0x44] sm:$0xf]  ;;  %v9537_v7 = vld [vmem:[#allocation7 + $0x48] sm:$0xf] }
 0x312   :  { %1779 = vmatpush.bf16.msrb.mxu2 %v9694_v8  ;;  %v9838_v8 = vor.u32 %v13481_v19, %v9835_v55  ;;  %v9531_v60 = vld [vmem:[#allocation7 + $0x60] sm:$0xf0]  ;;  %v13348_v56 = vld [vmem:[#allocation7 + $0x64] sm:$0xf0] }
 0x313   :  { %1792 = vmatpush.bf16.msrb.mxu3 %v9698_v1  ;;  %2322 = vmatpush.bf16.msra.mxu1 %v9902_v11  ;;  %v9803_v1 = vld [vmem:[#allocation7 + $0x470] sm:$0xf0]  ;;  %v9598_v11 = vor.u32 %v13359_v14, %v9595_v61  ;;  %v13621_v14 = vld [vmem:[#allocation7 + $0x8ec] sm:$0xf0]  ;;  %v10203_v15 = vld [vmem:[#allocation7 + $0x7a0] sm:$0xf0] }
 0x314   :  { %3255 = vmatpush.bf16.msra.mxu0 %v10266_v36  ;;  %v15229_v9 = vpop.f32.mrf.mxu3  ;;  %v9806_v23 = vor.u32 %v13473_v48, %v9803_v1  ;;  %v13629_v36 = vld [vmem:[#allocation7 + $0x92c] sm:$0xf0]  ;;  %v13335_v63 = vld [vmem:[#allocation7 + $0x4] sm:$0xf]  ;;  %v9538_v1 = vor.u32 %v13348_v56, %v9537_v7  ;;  %v9505_v5 = vld [vmem:[#allocation7 + $0x8] sm:$0xf] }
 0x315   :  { %v10410_v55 = vor.u32 %v13629_v36, %v10409_v30  ;;  %v9499_v45 = vld [vmem:[#allocation7 + $0x20] sm:$0xf0]  ;;  %v13605_v7 = vld [vmem:[#allocation7 + $0x86c] sm:$0xf0]  ;;  %v13385_v56 = vld [vmem:[#allocation7 + $0x194] sm:$0xf] }
 0x316   :  { %1780 = vmatpush.bf16.msrb.mxu2 %v9662_v28  ;;  %v13465_v28 = vld [vmem:[#allocation7 + $0x414] sm:$0xf]  ;;  %v9502_v30 = vor.u32 %v13335_v63, %v9499_v45  ;;  %v10171_v36 = vld [vmem:[#allocation7 + $0x760] sm:$0xf0]  ;;  %v13381_v45 = vld [vmem:[#allocation7 + $0x16c] sm:$0xf0] }
 0x317   :  { %1793 = vmatpush.bf16.msrb.mxu3 %v9666_v38  ;;  %2323 = vmatpush.bf16.msra.mxu1 %v9870_v46  ;;  %v9566_v38 = vor.u32 %v13351_v18, %v9563_v44  ;;  %v848_v46 = vpop.f32.mrf.mxu1  ;;  %v9774_v19 = vor.u32 %v13465_v28, %v9771_v22  ;;  %v10345_v18 = vld [vmem:[#allocation7 + $0x890] sm:$0xf]  ;;  %v13393_v28 = vld [vmem:[#allocation7 + $0x1d4] sm:$0xf] }
 0x318   :  { %3300 = vmatpush.bf16.msrb.mxu0 %v10506_v49  ;;  %v9570_v49 = vor.u32 %v13356_v51, %v9569_v17  ;;  %v9737_v44 = vld [vmem:[#allocation7 + $0x1d0] sm:$0xf]  ;;  %v9739_v22 = vld [vmem:[#allocation7 + $0x1f0] sm:$0xf0] }
 0x319   :  { %3256 = vmatmul.bf16.vlgmr.msra.gmra.mxu0 %v15226_v25  ;;  %v13613_v51 = vld [vmem:[#allocation7 + $0x8ac] sm:$0xf0] }
 0x31a   :  { %1781 = vmatpush.bf16.msrb.mxu2 %v9630_v57  ;;  %v10238_v57 = vor.u32 %v13583_v3, %v10235_v33  ;;  %v10346_v33 = vor.u32 %v13613_v51, %v10345_v18  ;;  %v13551_v18 = vld [vmem:[#allocation7 + $0x6c4] sm:$0xf] }
 0x31b   :  { %1794 = vmatpush.bf16.msrb.mxu3 %v9634_v2  ;;  %2324 = vmatpush.bf16.msra.mxu1 %v9838_v8  ;;  %v10377_v2 = vld [vmem:[#allocation7 + $0x8d0] sm:$0xf]  ;;  %v9534_v8 = vor.u32 %v13343_v50, %v9531_v60 }
 0x31c   :  { %3301 = vmatpush.bf16.msrb.mxu0 %v10474_v10  ;;  %v783_v61 = vpop.f32.mrf.mxu3  ;;  %v13575_v10 = vld [vmem:[#allocation7 + $0x784] sm:$0xf]  ;;  %v9705_v60 = vld [vmem:[#allocation7 + $0x190] sm:$0xf] }
 0x31d   :  { %v784_v48 = vadd.f32 %v783_v61, %v15129_v41  ;;  %v10206_v17 = vor.u32 %v13575_v10, %v10203_v15  ;;  %v13567_v41 = vld [vmem:[#allocation7 + $0x744] sm:$0xf]  ;;  %v10281_v10 = vld [vmem:[#allocation7 + $0x810] sm:$0xf] }
 0x31e   :  { %1782 = vmatpush.bf16.msrb.mxu2 %v9598_v11  ;;  %v13340_v11 = vld [vmem:[#allocation7 + $0x24] sm:$0xf0]  ;;  %v10139_v61 = vld [vmem:[#allocation7 + $0x720] sm:$0xf0] }
 0x31f   :  { %1795 = vmatpush.bf16.msrb.mxu3 %v9602_v27  ;;  %2325 = vmatpush.bf16.msra.mxu1 %v9806_v23  ;;  %v10378_v27 = vor.u32 %v13621_v14, %v10377_v2  ;;  %v13397_v23 = vld [vmem:[#allocation7 + $0x1ec] sm:$0xf0]  ;;  %v15235_v50 = vpop.f32.mrf.mxu1  ;;  %v13559_v14 = vld [vmem:[#allocation7 + $0x704] sm:$0xf] }
 0x320   :  { %3302 = vmatpush.bf16.msrb.mxu0 %v10442_v24  ;;  %v15232_v24 = vadd.f32 %v848_v46, %v784_v48  ;;  %v9738_v3 = vor.u32 %v13397_v23, %v9737_v44  ;;  %15791 = vst [vmem:[#allocation21_spill] sm:$0xff] %v15235_v50  ;;  %v10313_v46 = vld [vmem:[#allocation7 + $0x850] sm:$0xf]  ;;  %v10107_v44 = vld [vmem:[#allocation7 + $0x6e0] sm:$0xf0] }
 0x321   :  { %v10314_v15 = vor.u32 %v13605_v7, %v10313_v46  ;;  %v13597_v48 = vld [vmem:[#allocation7 + $0x82c] sm:$0xf0]  ;;  %v10745_v23 = vld [vmem:[#allocation7 + $0xbc0] sm:$0xf] }
 0x322   :  { %1783 = vmatpush.bf16.msrb.mxu2 %v9566_v38  ;;  %v9506_v38 = vor.u32 %v13340_v11, %v9505_v5  ;;  %v10142_v5 = vor.u32 %v13559_v14, %v10139_v61  ;;  %v13377_v11 = vld [vmem:[#allocation7 + $0x154] sm:$0xf]  ;;  %v13707_v7 = vld [vmem:[#allocation7 + $0xb9c] sm:$0xf0]  ;;  %v9609_v61 = vld [vmem:[#allocation7 + $0xd0] sm:$0xf] }
 0x323   :  { %1796 = vmatpush.bf16.msrb.mxu3 %v9570_v49  ;;  %2326 = vmatpush.bf16.msra.mxu1 %v9774_v19  ;;  %v9742_v49 = vor.u32 %v13393_v28, %v9739_v22  ;;  %v13389_v19 = vld [vmem:[#allocation7 + $0x1ac] sm:$0xf0]  ;;  %v10282_v28 = vor.u32 %v13597_v48, %v10281_v10  ;;  %v13361_v48 = vld [vmem:[#allocation7 + $0xd4] sm:$0xf] }
 0x324   :  { %3303 = vmatpush.bf16.msrb.mxu0 %v10410_v55  ;;  %v10174_v55 = vor.u32 %v13567_v41, %v10171_v36  ;;  %v15237_v2 = vpop.f32.mrf.mxu3  ;;  %v13373_v41 = vld [vmem:[#allocation7 + $0x12c] sm:$0xf0]  ;;  %v10110_v36 = vor.u32 %v13551_v18, %v10107_v44 }
 0x325   :  { %15792 = vst [vmem:[#allocation22_spill] sm:$0xff] %v15237_v2  ;;  %v9577_v44 = vld [vmem:[#allocation7 + $0x90] sm:$0xf]  ;;  %v10651_v2 = vld [vmem:[#allocation7 + $0xb20] sm:$0xf0] }
 0x326   :  { %1784 = vmatpush.bf16.msrb.mxu2 %v9534_v8  ;;  %2327 = vmatmul.bf16.vlgmr.msra.gmra.mxu1 %v15170_v4  ;;  %v9706_v8 = vor.u32 %v13389_v19, %v9705_v60  ;;  %v10075_v19 = vld [vmem:[#allocation7 + $0x6a0] sm:$0xf0]  ;;  %v13733_v50 = vld [vmem:[#allocation7 + $0xc6c] sm:$0xf0] }
 0x327   :  { %2764 = vmatpush.bf16.msrb.mxu1 %v10238_v57  ;;  %1797 = vmatpush.bf16.msrb.mxu3 %v9538_v1  ;;  %v9707_v57 = vld [vmem:[#allocation7 + $0x1b0] sm:$0xf0]  ;;  %v9673_v1 = vld [vmem:[#allocation7 + $0x150] sm:$0xf]  ;;  %v854_v60 = vpop.f32.mrf.mxu1 }
 0x328   :  { %3304 = vmatpush.bf16.msrb.mxu0 %v10378_v27  ;;  %v9710_v63 = vor.u32 %v13385_v56, %v9707_v57  ;;  %v9675_v27 = vld [vmem:[#allocation7 + $0x170] sm:$0xf0]  ;;  %v9674_v51 = vor.u32 %v13381_v45, %v9673_v1  ;;  %v13535_v45 = vld [vmem:[#allocation7 + $0x644] sm:$0xf] }
 0x329   :  { %v9678_v22 = vor.u32 %v13377_v11, %v9675_v27  ;;  %v9611_v1 = vld [vmem:[#allocation7 + $0xf0] sm:$0xf0]  ;;  %v10681_v11 = vld [vmem:[#allocation7 + $0xb40] sm:$0xf] }
 0x32a   :  { %1785 = vmatpush.bf16.msrb.mxu2 %v9502_v30  ;;  %v9641_v30 = vld [vmem:[#allocation7 + $0x110] sm:$0xf]  ;;  %v13699_v27 = vld [vmem:[#allocation7 + $0xb5c] sm:$0xf0]  ;;  %v9614_v18 = vor.u32 %v13361_v48, %v9611_v1  ;;  %v13577_v48 = vld [vmem:[#allocation7 + $0x794] sm:$0xf] }
 0x32b   :  { %2765 = vmatpush.bf16.msrb.mxu1 %v10206_v17  ;;  %1798 = vmatpush.bf16.msrb.mxu3 %v9506_v38  ;;  %v13715_v17 = vld [vmem:[#allocation7 + $0xbdc] sm:$0xf0]  ;;  %v9642_v57 = vor.u32 %v13373_v41, %v9641_v30  ;;  %v13527_v30 = vld [vmem:[#allocation7 + $0x604] sm:$0xf]  ;;  %v10219_v1 = vld [vmem:[#allocation7 + $0x7b0] sm:$0xf0] }
 0x32c   :  { %3305 = vmatpush.bf16.msrb.mxu0 %v10346_v33  ;;  %v10746_v38 = vor.u32 %v13715_v17, %v10745_v23  ;;  %v9643_v33 = vld [vmem:[#allocation7 + $0x130] sm:$0xf0]  ;;  %v789_v46 = vpop.f32.mrf.mxu3  ;;  %v13357_v23 = vld [vmem:[#allocation7 + $0xac] sm:$0xf0]  ;;  %v10011_v41 = vld [vmem:[#allocation7 + $0x620] sm:$0xf0] }
 0x32d   :  { %1786 = vmatmul.bf16.vlgmr.msrb.gmra.mxu2 %v15154_v39  ;;  %v790_v56 = vadd.f32 %v789_v46, %v15140_v47 }
 0x32e   :  { %1817 = vmatpush.bf16.msra.mxu2 %v9738_v3  ;;  %1799 = vmatmul.bf16.vlgmr.msrb.gmra.mxu3 %v15154_v39  ;;  %v13369_v3 = vld [vmem:[#allocation7 + $0x114] sm:$0xf] }
 0x32f   :  { %1830 = vmatpush.bf16.msra.mxu3 %v9742_v49  ;;  %2766 = vmatpush.bf16.msrb.mxu1 %v10174_v55  ;;  %v13543_v49 = vld [vmem:[#allocation7 + $0x684] sm:$0xf]  ;;  %v10713_v55 = vld [vmem:[#allocation7 + $0xb80] sm:$0xf]  ;;  %v9646_v14 = vor.u32 %v13369_v3, %v9643_v33  ;;  %v15242_v10 = vadd.f32 %v854_v60, %v790_v56  ;;  %v9578_v3 = vor.u32 %v13357_v23, %v9577_v44  ;;  %v13585_v33 = vld [vmem:[#allocation7 + $0x7d4] sm:$0xf] }
 0x330   :  { %3306 = vmatpush.bf16.msrb.mxu0 %v10314_v15  ;;  %v10078_v15 = vor.u32 %v13543_v49, %v10075_v19  ;;  %v10251_v49 = vld [vmem:[#allocation7 + $0x7f0] sm:$0xf0]  ;;  %v9545_v60 = vld [vmem:[#allocation7 + $0x50] sm:$0xf]  ;;  %v10585_v23 = vld [vmem:[#allocation7 + $0xa80] sm:$0xf] }
 0x331   :  { %15793 = vst [vmem:[#allocation23_spill] sm:$0xff] %v15242_v10  ;;  %v13349_v19 = vld [vmem:[#allocation7 + $0x6c] sm:$0xf0]  ;;  %v13345_v56 = vld [vmem:[#allocation7 + $0x54] sm:$0xf] }
 0x332   :  { %1818 = vmatpush.bf16.msra.mxu2 %v9706_v8  ;;  %v13365_v8 = vld [vmem:[#allocation7 + $0xec] sm:$0xf0]  ;;  %v10411_v10 = vld [vmem:[#allocation7 + $0x930] sm:$0xf0] }
 0x333   :  { %1831 = vmatpush.bf16.msra.mxu3 %v9710_v63  ;;  %2767 = vmatpush.bf16.msrb.mxu1 %v10142_v5  ;;  %v10714_v63 = vor.u32 %v13707_v7, %v10713_v55  ;;  %v10043_v5 = vld [vmem:[#allocation7 + $0x660] sm:$0xf0]  ;;  %v9610_v47 = vor.u32 %v13365_v8, %v9609_v61  ;;  %v10014_v55 = vor.u32 %v13527_v30, %v10011_v41  ;;  %v10617_v61 = vld [vmem:[#allocation7 + $0xac0] sm:$0xf] }
 0x334   :  { %3307 = vmatpush.bf16.msrb.mxu0 %v10282_v28  ;;  %v10046_v17 = vor.u32 %v13535_v45, %v10043_v5  ;;  %v13353_v28 = vld [vmem:[#allocation7 + $0x94] sm:$0xf]  ;;  %v13683_v8 = vld [vmem:[#allocation7 + $0xadc] sm:$0xf0]  ;;  %v9513_v45 = vld [vmem:[#allocation7 + $0x10] sm:$0xf]  ;;  %v15247_v5 = vpop.f32.mrf.mxu1 }
 0x335   :  { %15794 = vst [vmem:[#allocation24_spill] sm:$0xff] %v15247_v5  ;;  %v10618_v44 = vor.u32 %v13683_v8, %v10617_v61  ;;  %v13561_v61 = vld [vmem:[#allocation7 + $0x714] sm:$0xf]  ;;  %v13464_v5 = vld [vmem:[#allocation7 + $0x40c] sm:$0xf] }
 0x336   :  { %1819 = vmatpush.bf16.msra.mxu2 %v9674_v51  ;;  %v10682_v51 = vor.u32 %v13699_v27, %v10681_v11  ;;  %v13341_v27 = vld [vmem:[#allocation7 + $0x2c] sm:$0xf0]  ;;  %v10155_v8 = vld [vmem:[#allocation7 + $0x730] sm:$0xf0] }
 0x337   :  { %1832 = vmatpush.bf16.msra.mxu3 %v9678_v22  ;;  %2768 = vmatpush.bf16.msrb.mxu1 %v10110_v36  ;;  %v9579_v22 = vld [vmem:[#allocation7 + $0xb0] sm:$0xf0]  ;;  %v10649_v36 = vld [vmem:[#allocation7 + $0xb00] sm:$0xf]  ;;  %v9514_v41 = vor.u32 %v13341_v27, %v9513_v45  ;;  %v13378_v27 = vld [vmem:[#allocation7 + $0x15c] sm:$0xf] }
 0x338   :  { %3745 = vmatpush.bf16.msra.mxu0 %v10746_v38  ;;  %v13691_v38 = vld [vmem:[#allocation7 + $0xb1c] sm:$0xf0]  ;;  %v9582_v46 = vor.u32 %v13353_v28, %v9579_v22 }
 0x339   :  { %3308 = vmatmul.bf16.vlgmr.msrb.gmra.mxu0 %v15226_v25  ;;  %v10650_v7 = vor.u32 %v13691_v38, %v10649_v36  ;;  %v9977_v28 = vld [vmem:[#allocation7 + $0x5c0] sm:$0xf]  ;;  %v13569_v36 = vld [vmem:[#allocation7 + $0x754] sm:$0xf] }
 0x33a   :  { %1820 = vmatpush.bf16.msra.mxu2 %v9642_v57  ;;  %v9547_v57 = vld [vmem:[#allocation7 + $0x70] sm:$0xf0]  ;;  %v13523_v22 = vld [vmem:[#allocation7 + $0x5dc] sm:$0xf0] }
 0x33b   :  { %1833 = vmatpush.bf16.msra.mxu3 %v9646_v14  ;;  %2769 = vmatpush.bf16.msrb.mxu1 %v10078_v15  ;;  %v10254_v14 = vor.u32 %v13585_v33, %v10251_v49  ;;  %v633_v15 = vadd.f32 %v15206_v62, %v15005_v21  ;;  %v9550_v11 = vor.u32 %v13345_v56, %v9547_v57  ;;  %v13675_v62 = vld [vmem:[#allocation7 + $0xa9c] sm:$0xf0]  ;;  %v10187_v38 = vld [vmem:[#allocation7 + $0x770] sm:$0xf0] }
 0x33c   :  { %3746 = vmatpush.bf16.msra.mxu0 %v10714_v63  ;;  %v9546_v63 = vor.u32 %v13349_v19, %v9545_v60  ;;  %v10222_v21 = vor.u32 %v13577_v48, %v10219_v1  ;;  %v9978_v60 = vor.u32 %v13523_v22, %v9977_v28  ;;  %v10553_v19 = vld [vmem:[#allocation7 + $0xa40] sm:$0xf]  ;;  %v10190_v56 = vor.u32 %v13569_v36, %v10187_v38  ;;  %v9651_v36 = vld [vmem:[#allocation7 + $0x138] sm:$0xf0]  ;;  %v15257_v38 = vpop.f32.mrf.mxu2 }
 0x33d   :  { %v698_v30 = vadd.f32 %v15042_v35, %v633_v15  ;;  %v13667_v35 = vld [vmem:[#allocation7 + $0xa5c] sm:$0xf0]  ;;  %15795 = vst [vmem:[#allocation25_spill] sm:$0xff] %v15257_v38 }
 0x33e   :  { %1821 = vmatpush.bf16.msra.mxu2 %v9610_v47  ;;  %v13337_v47 = vld [vmem:[#allocation7 + $0x14] sm:$0xf]  ;;  %v9945_v57 = vld [vmem:[#allocation7 + $0x580] sm:$0xf]  ;;  %v10554_v1 = vor.u32 %v13667_v35, %v10553_v19 }
 0x33f   :  { %1834 = vmatpush.bf16.msra.mxu3 %v9614_v18  ;;  %2770 = vmatpush.bf16.msrb.mxu1 %v10046_v17  ;;  %v9515_v18 = vld [vmem:[#allocation7 + $0x30] sm:$0xf0]  ;;  %v13394_v17 = vld [vmem:[#allocation7 + $0x1dc] sm:$0xf]  ;;  %v763_v49 = vadd.f32 %v15184_v26, %v698_v30  ;;  %v10521_v26 = vld [vmem:[#allocation7 + $0xa00] sm:$0xf] }
 0x340   :  { %3747 = vmatpush.bf16.msra.mxu0 %v10682_v51  ;;  %v9747_v51 = vld [vmem:[#allocation7 + $0x1f8] sm:$0xf0]  ;;  %v13545_v19 = vld [vmem:[#allocation7 + $0x694] sm:$0xf]  ;;  %v13731_v38 = vld [vmem:[#allocation7 + $0xc5c] sm:$0xf0] }
 0x341   :  { %v9750_v33 = vor.u32 %v13394_v17, %v9747_v51  ;;  %v828_v48 = vadd.f32 %v15168_v59, %v763_v49  ;;  %v13553_v17 = vld [vmem:[#allocation7 + $0x6d4] sm:$0xf] }
 0x342   :  { %1822 = vmatpush.bf16.msra.mxu2 %v9578_v3  ;;  %v9518_v3 = vor.u32 %v13337_v47, %v9515_v18  ;;  %v15252_v15 = vpop.f32.mrf.mxu1  ;;  %v9683_v47 = vld [vmem:[#allocation7 + $0x178] sm:$0xf0]  ;;  %v10158_v18 = vor.u32 %v13561_v61, %v10155_v8  ;;  %v10123_v51 = vld [vmem:[#allocation7 + $0x6f0] sm:$0xf0] }
 0x343   :  { %1835 = vmatpush.bf16.msra.mxu3 %v9582_v46  ;;  %2771 = vmatpush.bf16.msrb.mxu1 %v10014_v55  ;;  %v10586_v46 = vor.u32 %v13675_v62, %v10585_v23  ;;  %v13386_v55 = vld [vmem:[#allocation7 + $0x19c] sm:$0xf]  ;;  %v13507_v23 = vld [vmem:[#allocation7 + $0x55c] sm:$0xf0]  ;;  %v13717_v62 = vld [vmem:[#allocation7 + $0xbec] sm:$0xf0]  ;;  %v9686_v59 = vor.u32 %v13378_v27, %v9683_v47 }
 0x344   :  { %3748 = vmatpush.bf16.msra.mxu0 %v10650_v7  ;;  %v9715_v7 = vld [vmem:[#allocation7 + $0x1b8] sm:$0xf0]  ;;  %v865_v28 = vmax.f32 %v828_v48, 0.0  ;;  %v10059_v27 = vld [vmem:[#allocation7 + $0x670] sm:$0xf0] }
 0x345   :  { %v13362_v61 = vld [vmem:[#allocation7 + $0xdc] sm:$0xf]  ;;  %v10697_v47 = vld [vmem:[#allocation7 + $0xb50] sm:$0xf] }
 0x346   :  { %1823 = vmatpush.bf16.msra.mxu2 %v9546_v63  ;;  %2772 = vmatmul.bf16.vlgmr.msrb.gmra.mxu1 %v15182_v16  ;;  %v9718_v63 = vor.u32 %v13386_v55, %v9715_v7  ;;  %v10091_v55 = vld [vmem:[#allocation7 + $0x6b0] sm:$0xf0]  ;;  %v10729_v7 = vld [vmem:[#allocation7 + $0xb90] sm:$0xf]  ;;  %v9619_v8 = vld [vmem:[#allocation7 + $0xf8] sm:$0xf0] }
 0x347   :  { %2816 = vmatpush.bf16.msra.mxu1 %v10254_v14  ;;  %1836 = vmatpush.bf16.msra.mxu3 %v9550_v11  ;;  %v13515_v14 = vld [vmem:[#allocation7 + $0x59c] sm:$0xf0] }
 0x348   :  { %3749 = vmatpush.bf16.msra.mxu0 %v10618_v44  ;;  %v9946_v45 = vor.u32 %v13515_v14, %v9945_v57  ;;  %v13659_v11 = vld [vmem:[#allocation7 + $0xa1c] sm:$0xf0] }
 0x349   :  { %v9913_v44 = vld [vmem:[#allocation7 + $0x540] sm:$0xf]  ;;  %v10522_v22 = vor.u32 %v13659_v11, %v10521_v26  ;;  %v10094_v26 = vor.u32 %v13545_v19, %v10091_v55  ;;  %v13537_v11 = vld [vmem:[#allocation7 + $0x654] sm:$0xf] }
 0x34a   :  { %1824 = vmatpush.bf16.msra.mxu2 %v9514_v41  ;;  %v9914_v30 = vor.u32 %v13507_v23, %v9913_v44  ;;  %v13370_v41 = vld [vmem:[#allocation7 + $0x11c] sm:$0xf]  ;;  %v1776_v35 = vpop.f32.mrf.mxu1  ;;  %v9622_v44 = vor.u32 %v13362_v61, %v9619_v8  ;;  %v9785_v8 = vld [vmem:[#allocation7 + $0x440] sm:$0xf] }
 0x34b   :  { %2817 = vmatpush.bf16.msra.mxu1 %v10222_v21  ;;  %1837 = vmatpush.bf16.msra.mxu3 %v9518_v3  ;;  %v10761_v21 = vld [vmem:[#allocation7 + $0xbd0] sm:$0xf]  ;;  %v15259_v3 = vpop.f32.mrf.mxu3  ;;  %v9654_v57 = vor.u32 %v13370_v41, %v9651_v36  ;;  %v13529_v41 = vld [vmem:[#allocation7 + $0x614] sm:$0xf] }
 0x34c   :  { %3750 = vmatpush.bf16.msra.mxu0 %v10586_v46  ;;  %15796 = vst [vmem:[#allocation26_spill] sm:$0xff] %v15259_v3  ;;  %v10762_v49 = vor.u32 %v13717_v62, %v10761_v21  ;;  %v9881_v46 = vld [vmem:[#allocation7 + $0x500] sm:$0xf]  ;;  %v10443_v3 = vld [vmem:[#allocation7 + $0x970] sm:$0xf0] }
 0x34d   :  { %1825 = vmatmul.bf16.vlgmr.msra.gmra.mxu2 %v15154_v39 }
 0x34e   :  { %1856 = vmatpush.bf16.msrb.mxu2 %v9750_v33  ;;  %1838 = vmatmul.bf16.vlgmr.msra.gmra.mxu3 %v15154_v39  ;;  %v10126_v33 = vor.u32 %v13553_v17, %v10123_v51  ;;  %v13354_v17 = vld [vmem:[#allocation7 + $0x9c] sm:$0xf] }
 0x34f   :  { %2254 = vmatpush.bf16.msrb.mxu3 %v9978_v60  ;;  %2818 = vmatpush.bf16.msra.mxu1 %v10190_v56  ;;  %v13499_v60 = vld [vmem:[#allocation7 + $0x51c] sm:$0xf0]  ;;  %v13709_v56 = vld [vmem:[#allocation7 + $0xbac] sm:$0xf0]  ;;  %v9587_v51 = vld [vmem:[#allocation7 + $0xb8] sm:$0xf0] }
 0x350   :  { %3751 = vmatpush.bf16.msra.mxu0 %v10554_v1  ;;  %v9882_v14 = vor.u32 %v13499_v60, %v9881_v46  ;;  %v10730_v48 = vor.u32 %v13709_v56, %v10729_v7  ;;  %v9849_v1 = vld [vmem:[#allocation7 + $0x4c0] sm:$0xf]  ;;  %v1350_v21 = vpop.f32.mrf.mxu2  ;;  %v13693_v46 = vld [vmem:[#allocation7 + $0xb2c] sm:$0xf0]  ;;  %v9590_v55 = vor.u32 %v13354_v17, %v9587_v51  ;;  %v13647_v7 = vld [vmem:[#allocation7 + $0x9c4] sm:$0xf] }
 0x351   :  { %v15267_v36 = vadd.f32 %v15252_v15, %v1350_v21  ;;  %v10491_v56 = vld [vmem:[#allocation7 + $0x9e0] sm:$0xf0]  ;;  %v9753_v17 = vld [vmem:[#allocation7 + $0x400] sm:$0xf] }
 0x352   :  { %1857 = vmatpush.bf16.msrb.mxu2 %v9718_v63  ;;  %v15261_v63 = vpack.c.bf16 %v865_v28, %v865_v28  ;;  %v15269_v60 = vpop.f32.mrf.mxu1  ;;  %v15271_v19 = vpop.f32.mrf.mxu0  ;;  %v13467_v51 = vld [vmem:[#allocation7 + $0x41c] sm:$0xf0] }
 0x353   :  { %2255 = vmatpush.bf16.msrb.mxu3 %v9946_v45  ;;  %2819 = vmatpush.bf16.msra.mxu1 %v10158_v18  ;;  %v13491_v45 = vld [vmem:[#allocation7 + $0x4dc] sm:$0xf0]  ;;  %v13701_v18 = vld [vmem:[#allocation7 + $0xb6c] sm:$0xf0]  ;;  %v15264_v62 = vpop.f32.mrf.mxu3 }
 0x354   :  { %3752 = vmatpush.bf16.msra.mxu0 %v10522_v22  ;;  %v9850_v23 = vor.u32 %v13491_v45, %v9849_v1  ;;  %v10698_v28 = vor.u32 %v13701_v18, %v10697_v47  ;;  %v9817_v22 = vld [vmem:[#allocation7 + $0x480] sm:$0xf]  ;;  %v10633_v1 = vld [vmem:[#allocation7 + $0xad0] sm:$0xf]  ;;  %v10459_v47 = vld [vmem:[#allocation7 + $0x9a0] sm:$0xf0] }
 0x355   :  { %v13685_v45 = vld [vmem:[#allocation7 + $0xaec] sm:$0xf0]  ;;  %v13338_v18 = vld [vmem:[#allocation7 + $0x1c] sm:$0xf] }
 0x356   :  { %1858 = vmatpush.bf16.msrb.mxu2 %v9686_v59  ;;  %v10062_v59 = vor.u32 %v13537_v11, %v10059_v27  ;;  %v13639_v27 = vld [vmem:[#allocation7 + $0x984] sm:$0xf] }
 0x357   :  { %2256 = vmatpush.bf16.msrb.mxu3 %v9914_v30  ;;  %2820 = vmatpush.bf16.msra.mxu1 %v10126_v33  ;;  %v13483_v30 = vld [vmem:[#allocation7 + $0x49c] sm:$0xf0]  ;;  %v10027_v33 = vld [vmem:[#allocation7 + $0x630] sm:$0xf0] }
 0x358   :  { %3797 = vmatpush.bf16.msrb.mxu0 %v10762_v49  ;;  %v10665_v49 = vld [vmem:[#allocation7 + $0xb10] sm:$0xf]  ;;  %v9818_v35 = vor.u32 %v13483_v30, %v9817_v22  ;;  %v10030_v61 = vor.u32 %v13529_v41, %v10027_v33  ;;  %v1352_v21 = vpop.f32.mrf.mxu2  ;;  %v9985_v30 = vld [vmem:[#allocation7 + $0x5c8] sm:$0xf]  ;;  %v10462_v33 = vor.u32 %v13639_v27, %v10459_v47 }
 0x359   :  { %3753 = vmatmul.bf16.vlgmr.msra.gmra.mxu0 %v15261_v63  ;;  %v10666_v15 = vor.u32 %v13693_v46, %v10665_v49  ;;  %v10601_v22 = vld [vmem:[#allocation7 + $0xa90] sm:$0xf]  ;;  %v13524_v41 = vld [vmem:[#allocation7 + $0x5e4] sm:$0xf0]  ;;  %v13520_v46 = vld [vmem:[#allocation7 + $0x5cc] sm:$0xf] }
 0x35a   :  { %1859 = vmatpush.bf16.msrb.mxu2 %v9654_v57  ;;  %v13346_v57 = vld [vmem:[#allocation7 + $0x5c] sm:$0xf]  ;;  %v13677_v49 = vld [vmem:[#allocation7 + $0xaac] sm:$0xf0]  ;;  %v9955_v21 = vld [vmem:[#allocation7 + $0x5a8] sm:$0xf0] }
 0x35b   :  { %2257 = vmatpush.bf16.msrb.mxu3 %v9882_v14  ;;  %2821 = vmatpush.bf16.msra.mxu1 %v10094_v26  ;;  %v9555_v14 = vld [vmem:[#allocation7 + $0x78] sm:$0xf0]  ;;  %v13475_v26 = vld [vmem:[#allocation7 + $0x45c] sm:$0xf0]  ;;  %v13669_v47 = vld [vmem:[#allocation7 + $0xa6c] sm:$0xf0] }
 0x35c   :  { %3798 = vmatpush.bf16.msrb.mxu0 %v10730_v48  ;;  %v10494_v48 = vor.u32 %v13647_v7, %v10491_v56  ;;  %v9558_v11 = vor.u32 %v13346_v57, %v9555_v14  ;;  %v1815_v7 = vpop.f32.mrf.mxu1  ;;  %v2317_v56 = vpop.f32.mrf.mxu0  ;;  %v13631_v57 = vld [vmem:[#allocation7 + $0x944] sm:$0xf] }
 0x35d   :  { %v10427_v14 = vld [vmem:[#allocation7 + $0x960] sm:$0xf0]  ;;  %v9923_v7 = vld [vmem:[#allocation7 + $0x568] sm:$0xf0] }
 0x35e   :  { %1860 = vmatpush.bf16.msrb.mxu2 %v9622_v44  ;;  %v9786_v44 = vor.u32 %v13475_v26, %v9785_v8  ;;  %v10602_v8 = vor.u32 %v13677_v49, %v10601_v22  ;;  %v10430_v27 = vor.u32 %v13631_v57, %v10427_v14  ;;  %v13615_v56 = vld [vmem:[#allocation7 + $0x8c4] sm:$0xf]  ;;  %v11001_v14 = vld [vmem:[#allocation7 + $0xdc0] sm:$0xf] }
 0x35f   :  { %2258 = vmatpush.bf16.msrb.mxu3 %v9850_v23  ;;  %2822 = vmatpush.bf16.msra.mxu1 %v10062_v59  ;;  %v9523_v23 = vld [vmem:[#allocation7 + $0x38] sm:$0xf0]  ;;  %v1365_v59 = vpop.f32.mrf.mxu3  ;;  %v10363_v57 = vld [vmem:[#allocation7 + $0x8e0] sm:$0xf0] }
 0x360   :  { %3799 = vmatpush.bf16.msrb.mxu0 %v10698_v28  ;;  %v10634_v28 = vor.u32 %v13685_v45, %v10633_v1  ;;  %v10569_v1 = vld [vmem:[#allocation7 + $0xa50] sm:$0xf]  ;;  %v13516_v45 = vld [vmem:[#allocation7 + $0x5a4] sm:$0xf0] }
 0x362   :  { %1861 = vmatpush.bf16.msrb.mxu2 %v9590_v55  ;;  %v9987_v55 = vld [vmem:[#allocation7 + $0x5e8] sm:$0xf0] }
 0x363   :  { %2259 = vmatpush.bf16.msrb.mxu3 %v9818_v35  ;;  %2823 = vmatpush.bf16.msra.mxu1 %v10030_v61  ;;  %v9526_v35 = vor.u32 %v13338_v18, %v9523_v23  ;;  %v9754_v61 = vor.u32 %v13467_v51, %v9753_v17  ;;  %v9990_v26 = vor.u32 %v13520_v46, %v9987_v55  ;;  %v13623_v18 = vld [vmem:[#allocation7 + $0x904] sm:$0xf]  ;;  %v15274_v17 = vpop.f32.mrf.mxu2  ;;  %v13504_v55 = vld [vmem:[#allocation7 + $0x54c] sm:$0xf] }
 0x364   :  { %3800 = vmatpush.bf16.msrb.mxu0 %v10666_v15  ;;  %v9986_v15 = vor.u32 %v13524_v41, %v9985_v30  ;;  %v10395_v23 = vld [vmem:[#allocation7 + $0x920] sm:$0xf0]  ;;  %v13661_v30 = vld [vmem:[#allocation7 + $0xa2c] sm:$0xf0]  ;;  %v9921_v41 = vld [vmem:[#allocation7 + $0x548] sm:$0xf] }
 0x365   :  { %v10398_v46 = vor.u32 %v13623_v18, %v10395_v23  ;;  %v10969_v18 = vld [vmem:[#allocation7 + $0xd80] sm:$0xf] }
 0x366   :  { %1862 = vmatpush.bf16.msrb.mxu2 %v9558_v11  ;;  %2824 = vmatmul.bf16.vlgmr.msra.gmra.mxu1 %v15182_v16  ;;  %v13512_v11 = vld [vmem:[#allocation7 + $0x58c] sm:$0xf]  ;;  %v13771_v23 = vld [vmem:[#allocation7 + $0xd9c] sm:$0xf0] }
 0x367   :  { %3261 = vmatpush.bf16.msrb.mxu1 %v10494_v48  ;;  %2260 = vmatpush.bf16.msrb.mxu3 %v9786_v44  ;;  %v9953_v48 = vld [vmem:[#allocation7 + $0x588] sm:$0xf]  ;;  %v10537_v44 = vld [vmem:[#allocation7 + $0xa10] sm:$0xf]  ;;  %v1389_v51 = vpop.f32.mrf.mxu3  ;;  %v9958_v22 = vor.u32 %v13512_v11, %v9955_v21  ;;  %v13607_v11 = vld [vmem:[#allocation7 + $0x884] sm:$0xf] }
 0x368   :  { %3801 = vmatpush.bf16.msrb.mxu0 %v10634_v28  ;;  %v9954_v59 = vor.u32 %v13516_v45, %v9953_v48  ;;  %v10570_v28 = vor.u32 %v13669_v47, %v10569_v1  ;;  %v15277_v49 = vadd.f32 %v15269_v60, %v1389_v51  ;;  %v10538_v60 = vor.u32 %v13661_v30, %v10537_v44  ;;  %v13500_v1 = vld [vmem:[#allocation7 + $0x524] sm:$0xf0]  ;;  %v9891_v47 = vld [vmem:[#allocation7 + $0x528] sm:$0xf0]  ;;  %v10331_v21 = vld [vmem:[#allocation7 + $0x8a0] sm:$0xf0] }
 0x369   :  { %v10366_v48 = vor.u32 %v13615_v56, %v10363_v57  ;;  %v9857_v44 = vld [vmem:[#allocation7 + $0x4c8] sm:$0xf]  ;;  %v10299_v57 = vld [vmem:[#allocation7 + $0x860] sm:$0xf0] }
 0x36a   :  { %1863 = vmatpush.bf16.msrb.mxu2 %v9526_v35  ;;  %v15281_v35 = vpop.f32.mrf.mxu0  ;;  %v13492_v30 = vld [vmem:[#allocation7 + $0x4e4] sm:$0xf0] }
 0x36b   :  { %3262 = vmatpush.bf16.msrb.mxu1 %v10462_v33  ;;  %2261 = vmatpush.bf16.msrb.mxu3 %v9754_v61  ;;  %v13508_v33 = vld [vmem:[#allocation7 + $0x564] sm:$0xf0]  ;;  %v13779_v61 = vld [vmem:[#allocation7 + $0xddc] sm:$0xf0]  ;;  %v1378_v51 = vpop.f32.mrf.mxu2 }
 0x36c   :  { %3802 = vmatpush.bf16.msrb.mxu0 %v10602_v8  ;;  %v15283_v8 = vpop.f32.mrf.mxu1  ;;  %v11002_v45 = vor.u32 %v13779_v61, %v11001_v14  ;;  %v10937_v14 = vld [vmem:[#allocation7 + $0xd40] sm:$0xf] }
 0x36d   :  { %1864 = vmatmul.bf16.vlgmr.msrb.gmra.mxu2 %v15154_v39  ;;  %v9889_v39 = vld [vmem:[#allocation7 + $0x508] sm:$0xf]  ;;  %v13763_v61 = vld [vmem:[#allocation7 + $0xd5c] sm:$0xf0] }
 0x36e   :  { %2280 = vmatpush.bf16.msra.mxu2 %v9986_v15  ;;  %2262 = vmatmul.bf16.vlgmr.msrb.gmra.mxu3 %v15170_v4  ;;  %v9922_v15 = vor.u32 %v13508_v33, %v9921_v41  ;;  %v10334_v41 = vor.u32 %v13607_v11, %v10331_v21  ;;  %v10970_v33 = vor.u32 %v13771_v23, %v10969_v18  ;;  %v13591_v11 = vld [vmem:[#allocation7 + $0x804] sm:$0xf]  ;;  %v10905_v18 = vld [vmem:[#allocation7 + $0xd00] sm:$0xf] }
 0x36f   :  { %2293 = vmatpush.bf16.msra.mxu3 %v9990_v26  ;;  %3263 = vmatpush.bf16.msrb.mxu1 %v10430_v27  ;;  %v9926_v26 = vor.u32 %v13504_v55, %v9923_v7  ;;  %v13496_v27 = vld [vmem:[#allocation7 + $0x50c] sm:$0xf]  ;;  %v13599_v7 = vld [vmem:[#allocation7 + $0x844] sm:$0xf]  ;;  %v13755_v23 = vld [vmem:[#allocation7 + $0xd1c] sm:$0xf0] }
 0x370   :  { %3803 = vmatpush.bf16.msrb.mxu0 %v10570_v28  ;;  %v1391_v28 = vpop.f32.mrf.mxu3  ;;  %v9859_v55 = vld [vmem:[#allocation7 + $0x4e8] sm:$0xf0]  ;;  %v10267_v21 = vld [vmem:[#allocation7 + $0x820] sm:$0xf0] }
 0x371   :  { %v13649_v28 = vld [vmem:[#allocation7 + $0x9d4] sm:$0xf] }
 0x372   :  { %2281 = vmatpush.bf16.msra.mxu2 %v9954_v59  ;;  %v9890_v59 = vor.u32 %v13500_v1, %v9889_v39  ;;  %v2762_v56 = vpop.f32.mrf.mxu0  ;;  %v9825_v39 = vld [vmem:[#allocation7 + $0x488] sm:$0xf] }
 0x373   :  { %2294 = vmatpush.bf16.msra.mxu3 %v9958_v22  ;;  %3264 = vmatpush.bf16.msrb.mxu1 %v10398_v46  ;;  %v9894_v22 = vor.u32 %v13496_v27, %v9891_v47  ;;  %v13488_v46 = vld [vmem:[#allocation7 + $0x4cc] sm:$0xf]  ;;  %v13484_v1 = vld [vmem:[#allocation7 + $0x4a4] sm:$0xf0] }
 0x374   :  { %3804 = vmatpush.bf16.msrb.mxu0 %v10538_v60  ;;  %v1854_v60 = vpop.f32.mrf.mxu1  ;;  %v13480_v27 = vld [vmem:[#allocation7 + $0x48c] sm:$0xf]  ;;  %v9826_v51 = vor.u32 %v13484_v1, %v9825_v39  ;;  %v10475_v39 = vld [vmem:[#allocation7 + $0x9b0] sm:$0xf0]  ;;  %v9761_v1 = vld [vmem:[#allocation7 + $0x408] sm:$0xf] }
 0x375   :  { %v9827_v47 = vld [vmem:[#allocation7 + $0x4a8] sm:$0xf0] }
 0x376   :  { %2282 = vmatpush.bf16.msra.mxu2 %v9922_v15  ;;  %v9858_v15 = vor.u32 %v13492_v30, %v9857_v44  ;;  %v15286_v44 = vpop.f32.mrf.mxu2  ;;  %v9830_v30 = vor.u32 %v13480_v27, %v9827_v47  ;;  %v9795_v56 = vld [vmem:[#allocation7 + $0x468] sm:$0xf0]  ;;  %v13468_v47 = vld [vmem:[#allocation7 + $0x424] sm:$0xf0] }
 0x377   :  { %2295 = vmatpush.bf16.msra.mxu3 %v9926_v26  ;;  %3265 = vmatpush.bf16.msrb.mxu1 %v10366_v48  ;;  %v9862_v26 = vor.u32 %v13488_v46, %v9859_v55  ;;  %v10302_v48 = vor.u32 %v13599_v7, %v10299_v57  ;;  %v10270_v46 = vor.u32 %v13591_v11, %v10267_v21  ;;  %v13472_v7 = vld [vmem:[#allocation7 + $0x44c] sm:$0xf]  ;;  %v10841_v11 = vld [vmem:[#allocation7 + $0xc80] sm:$0xf]  ;;  %v10001_v21 = vld [vmem:[#allocation7 + $0x5d8] sm:$0xf] }
 0x378   :  { %4242 = vmatpush.bf16.msra.mxu0 %v11002_v45  ;;  %v10938_v45 = vor.u32 %v13763_v61, %v10937_v14  ;;  %v10906_v55 = vor.u32 %v13755_v23, %v10905_v18  ;;  %v10873_v14 = vld [vmem:[#allocation7 + $0xcc0] sm:$0xf]  ;;  %v9798_v27 = vor.u32 %v13472_v7, %v9795_v56  ;;  %v13526_v18 = vld [vmem:[#allocation7 + $0x5f4] sm:$0xf0] }
 0x379   :  { %3805 = vmatmul.bf16.vlgmr.msrb.gmra.mxu0 %v15261_v63  ;;  %v13747_v61 = vld [vmem:[#allocation7 + $0xcdc] sm:$0xf0] }
 0x37a   :  { %2283 = vmatpush.bf16.msra.mxu2 %v9890_v59  ;;  %v10507_v59 = vld [vmem:[#allocation7 + $0x9f0] sm:$0xf0] }
 0x37b   :  { %2296 = vmatpush.bf16.msra.mxu3 %v9894_v22  ;;  %3266 = vmatpush.bf16.msrb.mxu1 %v10334_v41  ;;  %v15288_v22 = vpop.f32.mrf.mxu3  ;;  %v9793_v41 = vld [vmem:[#allocation7 + $0x448] sm:$0xf]  ;;  %v10510_v57 = vor.u32 %v13649_v28, %v10507_v59  ;;  %v13522_v28 = vld [vmem:[#allocation7 + $0x5dc] sm:$0xf] }
 0x37c   :  { %4243 = vmatpush.bf16.msra.mxu0 %v10970_v33  ;;  %v13476_v33 = vld [vmem:[#allocation7 + $0x464] sm:$0xf0]  ;;  %v10003_v59 = vld [vmem:[#allocation7 + $0x5f8] sm:$0xf0] }
 0x37d   :  { %v9794_v60 = vor.u32 %v13476_v33, %v9793_v41  ;;  %v9762_v41 = vor.u32 %v13468_v47, %v9761_v1  ;;  %v13633_v33 = vld [vmem:[#allocation7 + $0x954] sm:$0xf]  ;;  %v9971_v1 = vld [vmem:[#allocation7 + $0x5b8] sm:$0xf0] }
 0x37e   :  { %2284 = vmatpush.bf16.msra.mxu2 %v9858_v15  ;;  %v15290_v15 = vpop.f32.mrf.mxu0 }
 0x37f   :  { %2297 = vmatpush.bf16.msra.mxu3 %v9862_v26  ;;  %3267 = vmatpush.bf16.msrb.mxu1 %v10302_v48  ;;  %v13641_v26 = vld [vmem:[#allocation7 + $0x994] sm:$0xf]  ;;  %v9763_v48 = vld [vmem:[#allocation7 + $0x428] sm:$0xf0] }
 0x380   :  { %4244 = vmatpush.bf16.msra.mxu0 %v10938_v45  ;;  %v10874_v45 = vor.u32 %v13747_v61, %v10873_v14  ;;  %v10478_v23 = vor.u32 %v13641_v26, %v10475_v39  ;;  %v10006_v14 = vor.u32 %v13522_v28, %v10003_v59  ;;  %v10809_v61 = vld [vmem:[#allocation7 + $0xc40] sm:$0xf]  ;;  %v13518_v26 = vld [vmem:[#allocation7 + $0x5b4] sm:$0xf0]  ;;  %v10446_v39 = vor.u32 %v13633_v33, %v10443_v3  ;;  %v13617_v28 = vld [vmem:[#allocation7 + $0x8d4] sm:$0xf] }
 0x381   :  { %v10414_v3 = vor.u32 %v13625_v58, %v10411_v10  ;;  %v10379_v59 = vld [vmem:[#allocation7 + $0x8f0] sm:$0xf0]  ;;  %v13781_v33 = vld [vmem:[#allocation7 + $0xdec] sm:$0xf0]  ;;  %v13502_v58 = vld [vmem:[#allocation7 + $0x534] sm:$0xf0] }
 0x382   :  { %2285 = vmatpush.bf16.msra.mxu2 %v9826_v51  ;;  %v13739_v51 = vld [vmem:[#allocation7 + $0xc9c] sm:$0xf0]  ;;  %v10382_v10 = vor.u32 %v13617_v28, %v10379_v59  ;;  %v13765_v28 = vld [vmem:[#allocation7 + $0xd6c] sm:$0xf0] }
 0x383   :  { %2298 = vmatpush.bf16.msra.mxu3 %v9830_v30  ;;  %3268 = vmatpush.bf16.msrb.mxu1 %v10270_v46  ;;  %v1404_v30 = vpop.f32.mrf.mxu2  ;;  %v1417_v7 = vpop.f32.mrf.mxu3  ;;  %v9766_v46 = vor.u32 %v13464_v5, %v9763_v48  ;;  %v10842_v56 = vor.u32 %v13739_v51, %v10841_v11  ;;  %v10777_v5 = vld [vmem:[#allocation7 + $0xc00] sm:$0xf]  ;;  %v10810_v48 = vor.u32 %v13731_v38, %v10809_v61  ;;  %v9939_v51 = vld [vmem:[#allocation7 + $0x578] sm:$0xf0] }
 0x384   :  { %4245 = vmatpush.bf16.msra.mxu0 %v10906_v55  ;;  %v10002_v55 = vor.u32 %v13526_v18, %v10001_v21  ;;  %v13723_v11 = vld [vmem:[#allocation7 + $0xc1c] sm:$0xf0]  ;;  %v9937_v21 = vld [vmem:[#allocation7 + $0x558] sm:$0xf]  ;;  %v15295_v30 = vpop.f32.mrf.mxu1  ;;  %v866_v7 = vmax.f32 %v15196_v32, 0.0 }
 0x385   :  { %v13510_v18 = vld [vmem:[#allocation7 + $0x574] sm:$0xf0]  ;;  %v13498_v61 = vld [vmem:[#allocation7 + $0x51c] sm:$0xf] }
 0x386   :  { %2286 = vmatpush.bf16.msra.mxu2 %v9794_v60  ;;  %3269 = vmatmul.bf16.vlgmr.msrb.gmra.mxu1 %v15226_v25  ;;  %v13514_v60 = vld [vmem:[#allocation7 + $0x59c] sm:$0xf]  ;;  %v2814_v47 = vpop.f32.mrf.mxu0  ;;  %v9938_v38 = vor.u32 %v13510_v18, %v9937_v21 }
 0x387   :  { %3313 = vmatpush.bf16.msra.mxu1 %v10510_v57  ;;  %2299 = vmatpush.bf16.msra.mxu3 %v9798_v27  ;;  %v9969_v57 = vld [vmem:[#allocation7 + $0x598] sm:$0xf]  ;;  %v13490_v21 = vld [vmem:[#allocation7 + $0x4dc] sm:$0xf] }
 0x388   :  { %4246 = vmatpush.bf16.msra.mxu0 %v10874_v45  ;;  %v9970_v27 = vor.u32 %v13518_v26, %v9969_v57  ;;  %v9974_v45 = vor.u32 %v13514_v60, %v9971_v1  ;;  %v9907_v57 = vld [vmem:[#allocation7 + $0x538] sm:$0xf0]  ;;  %v13609_v26 = vld [vmem:[#allocation7 + $0x894] sm:$0xf]  ;;  %v10985_v60 = vld [vmem:[#allocation7 + $0xd90] sm:$0xf] }
 0x389   :  { %v13773_v1 = vld [vmem:[#allocation7 + $0xdac] sm:$0xf0]  ;;  %v9910_v32 = vor.u32 %v13498_v61, %v9907_v57  ;;  %v9875_v18 = vld [vmem:[#allocation7 + $0x4f8] sm:$0xf0] }
 0x38a   :  { %2287 = vmatpush.bf16.msra.mxu2 %v9762_v41  ;;  %v11017_v41 = vld [vmem:[#allocation7 + $0xdd0] sm:$0xf] }
 0x38b   :  { %3314 = vmatpush.bf16.msra.mxu1 %v10478_v23  ;;  %2300 = vmatpush.bf16.msra.mxu3 %v9766_v46  ;;  %v13506_v23 = vld [vmem:[#allocation7 + $0x55c] sm:$0xf]  ;;  %v10778_v46 = vor.u32 %v13723_v11, %v10777_v5  ;;  %v15298_v5 = vpack.c.bf16 %v866_v7, %v866_v7  ;;  %v10986_v11 = vor.u32 %v13773_v1, %v10985_v60  ;;  %v13486_v7 = vld [vmem:[#allocation7 + $0x4b4] sm:$0xf0]  ;;  %v10921_v61 = vld [vmem:[#allocation7 + $0xd10] sm:$0xf] }
 0x38c   :  { %4247 = vmatpush.bf16.msra.mxu0 %v10842_v56  ;;  %v9905_v56 = vld [vmem:[#allocation7 + $0x518] sm:$0xf]  ;;  %v2278_v59 = vpop.f32.mrf.mxu1  ;;  %v13757_v57 = vld [vmem:[#allocation7 + $0xd2c] sm:$0xf0]  ;;  %v10747_v60 = vld [vmem:[#allocation7 + $0xbe0] sm:$0xf0] }
 0x38d   :  { %2288 = vmatmul.bf16.vlgmr.msra.gmra.mxu2 %v15170_v4  ;;  %v9906_v47 = vor.u32 %v13502_v58, %v9905_v56  ;;  %v13482_v56 = vld [vmem:[#allocation7 + $0x49c] sm:$0xf] }
 0x38e   :  { %2332 = vmatpush.bf16.msrb.mxu2 %v10002_v55  ;;  %2301 = vmatmul.bf16.vlgmr.msra.gmra.mxu3 %v15170_v4  ;;  %v9942_v55 = vor.u32 %v13506_v23, %v9939_v51  ;;  %v10315_v23 = vld [vmem:[#allocation7 + $0x870] sm:$0xf0]  ;;  %v10953_v51 = vld [vmem:[#allocation7 + $0xd50] sm:$0xf]  ;;  %v9843_v58 = vld [vmem:[#allocation7 + $0x4b8] sm:$0xf0] }
 0x38f   :  { %2345 = vmatpush.bf16.msrb.mxu3 %v10006_v14  ;;  %3315 = vmatpush.bf16.msra.mxu1 %v10446_v39  ;;  %v11018_v14 = vor.u32 %v13781_v33, %v11017_v41  ;;  %v10347_v39 = vld [vmem:[#allocation7 + $0x8b0] sm:$0xf0]  ;;  %v9878_v33 = vor.u32 %v13490_v21, %v9875_v18  ;;  %v10922_v21 = vor.u32 %v13757_v57, %v10921_v61  ;;  %v13474_v18 = vld [vmem:[#allocation7 + $0x45c] sm:$0xf]  ;;  %v13588_v61 = vld [vmem:[#allocation7 + $0x7e4] sm:$0xf0] }
 0x390   :  { %4248 = vmatpush.bf16.msra.mxu0 %v10810_v48  ;;  %v13494_v48 = vld [vmem:[#allocation7 + $0x4f4] sm:$0xf0]  ;;  %v1428_v1 = vpop.f32.mrf.mxu2 }
 0x392   :  { %2333 = vmatpush.bf16.msrb.mxu2 %v9970_v27  ;;  %v9873_v27 = vld [vmem:[#allocation7 + $0x4d8] sm:$0xf] }
 0x393   :  { %2346 = vmatpush.bf16.msrb.mxu3 %v9974_v45  ;;  %3316 = vmatpush.bf16.msra.mxu1 %v10414_v3  ;;  %v10350_v45 = vor.u32 %v13609_v26, %v10347_v39  ;;  %v13601_v3 = vld [vmem:[#allocation7 + $0x854] sm:$0xf]  ;;  %v9874_v41 = vor.u32 %v13494_v48, %v9873_v27  ;;  %v13711_v39 = vld [vmem:[#allocation7 + $0xbc4] sm:$0xf]  ;;  %v13478_v27 = vld [vmem:[#allocation7 + $0x474] sm:$0xf0]  ;;  %v15302_v48 = vadd.f32 %v15283_v8, %v1428_v1 }
 0x394   :  { %4249 = vmatpush.bf16.msra.mxu0 %v10778_v46  ;;  %v10318_v46 = vor.u32 %v13601_v3, %v10315_v23  ;;  %v9811_v3 = vld [vmem:[#allocation7 + $0x478] sm:$0xf0]  ;;  %v10750_v23 = vor.u32 %v13711_v39, %v10747_v60  ;;  %v13470_v8 = vld [vmem:[#allocation7 + $0x434] sm:$0xf0]  ;;  %v13584_v39 = vld [vmem:[#allocation7 + $0x7cc] sm:$0xf] }
 0x395   :  { %v10243_v60 = vld [vmem:[#allocation7 + $0x7e8] sm:$0xf0] }
 0x396   :  { %2334 = vmatpush.bf16.msrb.mxu2 %v9938_v38  ;;  %v9841_v38 = vld [vmem:[#allocation7 + $0x498] sm:$0xf] }
 0x397   :  { %2347 = vmatpush.bf16.msrb.mxu3 %v9942_v55  ;;  %3317 = vmatpush.bf16.msra.mxu1 %v10382_v10  ;;  %v10954_v55 = vor.u32 %v13765_v28, %v10953_v51  ;;  %v13593_v10 = vld [vmem:[#allocation7 + $0x814] sm:$0xf]  ;;  %v9842_v26 = vor.u32 %v13486_v7, %v9841_v38  ;;  %v10889_v51 = vld [vmem:[#allocation7 + $0xcd0] sm:$0xf]  ;;  %v9777_v38 = vld [vmem:[#allocation7 + $0x418] sm:$0xf]  ;;  %v15306_v7 = vpop.f32.mrf.mxu0 }
 0x398   :  { %4294 = vmatpush.bf16.msrb.mxu0 %v11018_v14  ;;  %v10283_v14 = vld [vmem:[#allocation7 + $0x830] sm:$0xf0]  ;;  %v13749_v28 = vld [vmem:[#allocation7 + $0xcec] sm:$0xf0]  ;;  %v9778_v1 = vor.u32 %v13470_v8, %v9777_v38  ;;  %v10211_v38 = vld [vmem:[#allocation7 + $0x7a8] sm:$0xf0] }
 0x399   :  { %4250 = vmatmul.bf16.vlgmr.msra.gmra.mxu0 %v15298_v5  ;;  %v13687_v8 = vld [vmem:[#allocation7 + $0xb04] sm:$0xf] }
 0x39a   :  { %2335 = vmatpush.bf16.msrb.mxu2 %v9906_v47  ;;  %v9846_v47 = vor.u32 %v13482_v56, %v9843_v58  ;;  %v9779_v56 = vld [vmem:[#allocation7 + $0x438] sm:$0xf0]  ;;  %v10890_v58 = vor.u32 %v13749_v28, %v10889_v51  ;;  %v10246_v51 = vor.u32 %v13584_v39, %v10243_v60  ;;  %v10825_v28 = vld [vmem:[#allocation7 + $0xc50] sm:$0xf]  ;;  %v10179_v39 = vld [vmem:[#allocation7 + $0x768] sm:$0xf0] }
 0x39b   :  { %2348 = vmatpush.bf16.msrb.mxu3 %v9910_v32  ;;  %3318 = vmatpush.bf16.msra.mxu1 %v10350_v45  ;;  %v9809_v32 = vld [vmem:[#allocation7 + $0x458] sm:$0xf]  ;;  %v15304_v45 = vpop.f32.mrf.mxu3  ;;  %v13679_v60 = vld [vmem:[#allocation7 + $0xac4] sm:$0xf] }
 0x39c   :  { %4295 = vmatpush.bf16.msrb.mxu0 %v10986_v11  ;;  %v10286_v11 = vor.u32 %v13593_v10, %v10283_v14  ;;  %v9810_v59 = vor.u32 %v13478_v27, %v9809_v32  ;;  %v10857_v10 = vld [vmem:[#allocation7 + $0xc90] sm:$0xf]  ;;  %v10241_v14 = vld [vmem:[#allocation7 + $0x7c8] sm:$0xf]  ;;  %v13695_v32 = vld [vmem:[#allocation7 + $0xb44] sm:$0xf] }
 0x39d   :  { %v10683_v27 = vld [vmem:[#allocation7 + $0xb60] sm:$0xf0] }
 0x39e   :  { %2336 = vmatpush.bf16.msrb.mxu2 %v9874_v41  ;;  %v13703_v41 = vld [vmem:[#allocation7 + $0xb84] sm:$0xf] }
 0x39f   :  { %2349 = vmatpush.bf16.msrb.mxu3 %v9878_v33  ;;  %3319 = vmatpush.bf16.msra.mxu1 %v10318_v46  ;;  %v10715_v33 = vld [vmem:[#allocation7 + $0xba0] sm:$0xf0]  ;;  %v9814_v46 = vor.u32 %v13474_v18, %v9811_v3  ;;  %v3259_v20 = vpop.f32.mrf.mxu0 }
 0x3a0   :  { %4296 = vmatpush.bf16.msrb.mxu0 %v10954_v55  ;;  %v13466_v55 = vld [vmem:[#allocation7 + $0x41c] sm:$0xf]  ;;  %v10718_v57 = vor.u32 %v13703_v41, %v10715_v33  ;;  %v13580_v41 = vld [vmem:[#allocation7 + $0x7a4] sm:$0xf0]  ;;  %v10686_v33 = vor.u32 %v13695_v32, %v10683_v27  ;;  %v10619_v20 = vld [vmem:[#allocation7 + $0xae0] sm:$0xf0] }
 0x3a1   :  { %v9782_v18 = vor.u32 %v13466_v55, %v9779_v56  ;;  %v10793_v55 = vld [vmem:[#allocation7 + $0xc10] sm:$0xf]  ;;  %v10826_v56 = vor.u32 %v13733_v50, %v10825_v28  ;;  %v13843_v32 = vld [vmem:[#allocation7 + $0xfdc] sm:$0xf0]  ;;  %v10147_v28 = vld [vmem:[#allocation7 + $0x728] sm:$0xf0] }
 0x3a2   :  { %2337 = vmatpush.bf16.msrb.mxu2 %v9842_v26  ;;  %v13741_v26 = vld [vmem:[#allocation7 + $0xcac] sm:$0xf0] }
 0x3a3   :  { %2350 = vmatpush.bf16.msrb.mxu3 %v9846_v47  ;;  %3320 = vmatpush.bf16.msra.mxu1 %v10286_v11  ;;  %v1430_v47 = vpop.f32.mrf.mxu2  ;;  %v10242_v11 = vor.u32 %v13588_v61, %v10241_v14  ;;  %v10858_v3 = vor.u32 %v13741_v26, %v10857_v10  ;;  %v13725_v10 = vld [vmem:[#allocation7 + $0xc2c] sm:$0xf0]  ;;  %v10177_v14 = vld [vmem:[#allocation7 + $0x748] sm:$0xf]  ;;  %v13568_v26 = vld [vmem:[#allocation7 + $0x74c] sm:$0xf] }
 0x3a4   :  { %4297 = vmatpush.bf16.msrb.mxu0 %v10922_v21  ;;  %v1443_v21 = vpop.f32.mrf.mxu3  ;;  %v13572_v61 = vld [vmem:[#allocation7 + $0x764] sm:$0xf0]  ;;  %v15311_v47 = vpop.f32.mrf.mxu1  ;;  %v10794_v50 = vor.u32 %v13725_v10, %v10793_v55  ;;  %v10115_v10 = vld [vmem:[#allocation7 + $0x6e8] sm:$0xf0] }
 0x3a5   :  { %v10178_v27 = vor.u32 %v13572_v61, %v10177_v14  ;;  %v13564_v21 = vld [vmem:[#allocation7 + $0x724] sm:$0xf0]  ;;  %v13663_v14 = vld [vmem:[#allocation7 + $0xa44] sm:$0xf] }
 0x3a6   :  { %2338 = vmatpush.bf16.msrb.mxu2 %v9810_v59  ;;  %3321 = vmatmul.bf16.vlgmr.msra.gmra.mxu1 %v15226_v25  ;;  %v13576_v59 = vld [vmem:[#allocation7 + $0x78c] sm:$0xf]  ;;  %v10555_v61 = vld [vmem:[#allocation7 + $0xa60] sm:$0xf0] }
 0x3a7   :  { %3758 = vmatpush.bf16.msrb.mxu1 %v10750_v23  ;;  %2351 = vmatpush.bf16.msrb.mxu3 %v9814_v46  ;;  %v10209_v23 = vld [vmem:[#allocation7 + $0x788] sm:$0xf] }
 0x3a8   :  { %4298 = vmatpush.bf16.msrb.mxu0 %v10890_v58  ;;  %v10210_v46 = vor.u32 %v13580_v41, %v10209_v23  ;;  %v10214_v58 = vor.u32 %v13576_v59, %v10211_v38  ;;  %v13671_v23 = vld [vmem:[#allocation7 + $0xa84] sm:$0xf]  ;;  %v11225_v41 = vld [vmem:[#allocation7 + $0xf80] sm:$0xf] }
 0x3aa   :  { %2339 = vmatpush.bf16.msrb.mxu2 %v9778_v1  ;;  %v11257_v1 = vld [vmem:[#allocation7 + $0xfc0] sm:$0xf] }
 0x3ab   :  { %3759 = vmatpush.bf16.msrb.mxu1 %v10718_v57  ;;  %2352 = vmatpush.bf16.msrb.mxu3 %v9782_v18  ;;  %v10654_v57 = vor.u32 %v13687_v8, %v10651_v2  ;;  %v10182_v18 = vor.u32 %v13568_v26, %v10179_v39  ;;  %v10622_v2 = vor.u32 %v13679_v60, %v10619_v20  ;;  %v10113_v8 = vld [vmem:[#allocation7 + $0x6c8] sm:$0xf]  ;;  %v13827_v26 = vld [vmem:[#allocation7 + $0xf5c] sm:$0xf0] }
 0x3ac   :  { %4299 = vmatpush.bf16.msrb.mxu0 %v10858_v3  ;;  %v11258_v3 = vor.u32 %v13843_v32, %v11257_v1  ;;  %v2330_v60 = vpop.f32.mrf.mxu1  ;;  %v10081_v1 = vld [vmem:[#allocation7 + $0x688] sm:$0xf] }
 0x3ad   :  { %2340 = vmatmul.bf16.vlgmr.msrb.gmra.mxu2 %v15170_v4  ;;  %v13548_v32 = vld [vmem:[#allocation7 + $0x6a4] sm:$0xf0] }
 0x3ae   :  { %2777 = vmatpush.bf16.msra.mxu2 %v10242_v11  ;;  %2353 = vmatmul.bf16.vlgmr.msrb.gmra.mxu3 %v15170_v4  ;;  %v10145_v11 = vld [vmem:[#allocation7 + $0x708] sm:$0xf]  ;;  %v10587_v4 = vld [vmem:[#allocation7 + $0xaa0] sm:$0xf0] }
 0x3af   :  { %2790 = vmatpush.bf16.msra.mxu3 %v10246_v51  ;;  %3760 = vmatpush.bf16.msrb.mxu1 %v10686_v33  ;;  %v13560_v51 = vld [vmem:[#allocation7 + $0x70c] sm:$0xf]  ;;  %v13835_v33 = vld [vmem:[#allocation7 + $0xf9c] sm:$0xf0]  ;;  %v10146_v59 = vor.u32 %v13564_v21, %v10145_v11  ;;  %v10590_v55 = vor.u32 %v13671_v23, %v10587_v4  ;;  %v13655_v21 = vld [vmem:[#allocation7 + $0xa04] sm:$0xf] }
 0x3b0   :  { %4300 = vmatpush.bf16.msrb.mxu0 %v10826_v56  ;;  %v10150_v38 = vor.u32 %v13560_v51, %v10147_v28  ;;  %v11226_v56 = vor.u32 %v13835_v33, %v11225_v41  ;;  %v10083_v11 = vld [vmem:[#allocation7 + $0x6a8] sm:$0xf0]  ;;  %v13819_v51 = vld [vmem:[#allocation7 + $0xf1c] sm:$0xf0]  ;;  %v10082_v28 = vor.u32 %v13548_v32, %v10081_v1  ;;  %v13713_v23 = vld [vmem:[#allocation7 + $0xbd4] sm:$0xf]  ;;  %v1787_v41 = vpop.f32.mrf.mxu2 }
 0x3b1   :  { %v10763_v4 = vld [vmem:[#allocation7 + $0xbf0] sm:$0xf0]  ;;  %v10017_v32 = vld [vmem:[#allocation7 + $0x608] sm:$0xf] }
 0x3b2   :  { %2778 = vmatpush.bf16.msra.mxu2 %v10210_v46  ;;  %v13556_v46 = vld [vmem:[#allocation7 + $0x6e4] sm:$0xf0]  ;;  %v10731_v1 = vld [vmem:[#allocation7 + $0xbb0] sm:$0xf0] }
 0x3b3   :  { %2791 = vmatpush.bf16.msra.mxu3 %v10214_v58  ;;  %3761 = vmatpush.bf16.msrb.mxu1 %v10654_v57  ;;  %v13552_v58 = vld [vmem:[#allocation7 + $0x6cc] sm:$0xf]  ;;  %v11193_v57 = vld [vmem:[#allocation7 + $0xf40] sm:$0xf]  ;;  %v10114_v39 = vor.u32 %v13556_v46, %v10113_v8  ;;  %v1788_v8 = vadd.f32 %v1787_v41, %v15264_v62  ;;  %v15315_v46 = vpop.f32.mrf.mxu3  ;;  %v10259_v41 = vld [vmem:[#allocation7 + $0x7f8] sm:$0xf0] }
 0x3b4   :  { %4301 = vmatpush.bf16.msrb.mxu0 %v10794_v50  ;;  %v10118_v20 = vor.u32 %v13552_v58, %v10115_v10  ;;  %v11194_v50 = vor.u32 %v13827_v26, %v11193_v57  ;;  %v13536_v58 = vld [vmem:[#allocation7 + $0x64c] sm:$0xf]  ;;  %v13811_v57 = vld [vmem:[#allocation7 + $0xedc] sm:$0xf0]  ;;  %v14373_v26 = vld [vmem:[#allocation5] ss:$0 sm:$0xff] }
 0x3b5   :  { %v10051_v10 = vld [vmem:[#allocation7 + $0x668] sm:$0xf0] }
 0x3b6   :  { %2779 = vmatpush.bf16.msra.mxu2 %v10178_v27  ;;  %v10558_v27 = vor.u32 %v13663_v14, %v10555_v61  ;;  %v10766_v14 = vor.u32 %v13713_v23, %v10763_v4  ;;  %v11129_v61 = vld [vmem:[#allocation7 + $0xec0] sm:$0xf]  ;;  %v15321_v62 = vpop.f32.mrf.mxu0  ;;  %v13586_v4 = vld [vmem:[#allocation7 + $0x7dc] sm:$0xf] }
 0x3b7   :  { %2792 = vmatpush.bf16.msra.mxu3 %v10182_v18  ;;  %3762 = vmatpush.bf16.msrb.mxu1 %v10622_v2  ;;  %v13544_v18 = vld [vmem:[#allocation7 + $0x68c] sm:$0xf]  ;;  %v10523_v2 = vld [vmem:[#allocation7 + $0xa20] sm:$0xf0]  ;;  %v13803_v23 = vld [vmem:[#allocation7 + $0xe9c] sm:$0xf0] }
 0x3b8   :  { %4739 = vmatpush.bf16.msra.mxu0 %v11258_v3  ;;  %v11161_v3 = vld [vmem:[#allocation7 + $0xf00] sm:$0xf]  ;;  %v10086_v33 = vor.u32 %v13544_v18, %v10083_v11  ;;  %v13532_v18 = vld [vmem:[#allocation7 + $0x624] sm:$0xf0]  ;;  %v13528_v11 = vld [vmem:[#allocation7 + $0x60c] sm:$0xf] }
 0x3b9   :  { %4302 = vmatmul.bf16.vlgmr.msrb.gmra.mxu0 %v15298_v5 }
 0x3ba   :  { %2780 = vmatpush.bf16.msra.mxu2 %v10146_v59  ;;  %v10049_v59 = vld [vmem:[#allocation7 + $0x648] sm:$0xf] }
 0x3bb   :  { %2793 = vmatpush.bf16.msra.mxu3 %v10150_v38  ;;  %3763 = vmatpush.bf16.msrb.mxu1 %v10590_v55  ;;  %v13540_v38 = vld [vmem:[#allocation7 + $0x664] sm:$0xf0]  ;;  %v10526_v55 = vor.u32 %v13655_v21, %v10523_v2  ;;  %v10019_v21 = vld [vmem:[#allocation7 + $0x628] sm:$0xf0]  ;;  %v11130_v2 = vor.u32 %v13811_v57, %v11129_v61  ;;  %v10262_v61 = vor.u32 %v13586_v4, %v10259_v41  ;;  %v11065_v57 = vld [vmem:[#allocation7 + $0xe40] sm:$0xf] }
 0x3bc   :  { %4740 = vmatpush.bf16.msra.mxu0 %v11226_v56  ;;  %v11162_v56 = vor.u32 %v13819_v51, %v11161_v3  ;;  %v10050_v60 = vor.u32 %v13540_v38, %v10049_v59  ;;  %v11097_v3 = vld [vmem:[#allocation7 + $0xe80] sm:$0xf]  ;;  %v13590_v51 = vld [vmem:[#allocation7 + $0x7f4] sm:$0xf0]  ;;  %v10018_v59 = vor.u32 %v13532_v18, %v10017_v32  ;;  %v10699_v38 = vld [vmem:[#allocation7 + $0xb70] sm:$0xf0] }
 0x3bd   :  { %v13689_v32 = vld [vmem:[#allocation7 + $0xb14] sm:$0xf]  ;;  %v13570_v4 = vld [vmem:[#allocation7 + $0x75c] sm:$0xf] }
 0x3be   :  { %2781 = vmatpush.bf16.msra.mxu2 %v10114_v39  ;;  %v639_v39 = vadd.f32 %v14373_v26, %v15027_v29  ;;  %v10257_v29 = vld [vmem:[#allocation7 + $0x7d8] sm:$0xf]  ;;  %v3311_v18 = vpop.f32.mrf.mxu0  ;;  %v10195_v41 = vld [vmem:[#allocation7 + $0x778] sm:$0xf0] }
 0x3bf   :  { %2794 = vmatpush.bf16.msra.mxu3 %v10118_v20  ;;  %3764 = vmatpush.bf16.msrb.mxu1 %v10558_v27  ;;  %v13705_v20 = vld [vmem:[#allocation7 + $0xb94] sm:$0xf]  ;;  %v15319_v27 = vadd.f32 %v15295_v30, %v1788_v8  ;;  %v1789_v8 = vpop.f32.mrf.mxu2  ;;  %v10225_v26 = vld [vmem:[#allocation7 + $0x798] sm:$0xf] }
 0x3c0   :  { %4741 = vmatpush.bf16.msra.mxu0 %v11194_v50  ;;  %v10054_v50 = vor.u32 %v13536_v58, %v10051_v10  ;;  %v704_v30 = vadd.f32 %v15064_v0, %v639_v39  ;;  %v1802_v10 = vpop.f32.mrf.mxu3  ;;  %v13795_v39 = vld [vmem:[#allocation7 + $0xe5c] sm:$0xf0] }
 0x3c1   :  { %v10161_v10 = vld [vmem:[#allocation7 + $0x718] sm:$0xf] }
 0x3c2   :  { %2782 = vmatpush.bf16.msra.mxu2 %v10082_v28  ;;  %v10734_v28 = vor.u32 %v13705_v20, %v10731_v1  ;;  %v769_v58 = vadd.f32 %v15200_v13, %v704_v30  ;;  %v13582_v20 = vld [vmem:[#allocation7 + $0x7b4] sm:$0xf0]  ;;  %v10227_v1 = vld [vmem:[#allocation7 + $0x7b8] sm:$0xf0]  ;;  %v11033_v13 = vld [vmem:[#allocation7 + $0xe00] sm:$0xf] }
 0x3c3   :  { %2795 = vmatpush.bf16.msra.mxu3 %v10086_v33  ;;  %3765 = vmatpush.bf16.msrb.mxu1 %v10526_v55  ;;  %v13697_v33 = vld [vmem:[#allocation7 + $0xb54] sm:$0xf]  ;;  %v10022_v55 = vor.u32 %v13528_v11, %v10019_v21  ;;  %v10226_v11 = vor.u32 %v13582_v20, %v10225_v26  ;;  %v13562_v20 = vld [vmem:[#allocation7 + $0x71c] sm:$0xf] }
 0x3c4   :  { %4742 = vmatpush.bf16.msra.mxu0 %v11162_v56  ;;  %v10258_v56 = vor.u32 %v13590_v51, %v10257_v29  ;;  %v10702_v0 = vor.u32 %v13697_v33, %v10699_v38  ;;  %v834_v21 = vadd.f32 %v15187_v43, %v769_v58  ;;  %v13787_v29 = vld [vmem:[#allocation7 + $0xe1c] sm:$0xf0]  ;;  %v10193_v51 = vld [vmem:[#allocation7 + $0x758] sm:$0xf]  ;;  %v13681_v30 = vld [vmem:[#allocation7 + $0xad4] sm:$0xf]  ;;  %v10198_v58 = vor.u32 %v13570_v4, %v10195_v41 }
 0x3c5   :  { %v11273_v33 = vld [vmem:[#allocation7 + $0xfd0] sm:$0xf] }
 0x3c6   :  { %2783 = vmatpush.bf16.msra.mxu2 %v10050_v60  ;;  %3766 = vmatmul.bf16.vlgmr.msrb.gmra.mxu1 %v15261_v63  ;;  %v13578_v60 = vld [vmem:[#allocation7 + $0x79c] sm:$0xf]  ;;  %v13845_v38 = vld [vmem:[#allocation7 + $0xfec] sm:$0xf0]  ;;  %v867_v8 = vmax.f32 %v834_v21, 0.0 }
 0x3c7   :  { %3810 = vmatpush.bf16.msra.mxu1 %v10766_v14  ;;  %2796 = vmatpush.bf16.msra.mxu3 %v10054_v50  ;;  %v11098_v14 = vor.u32 %v13803_v23, %v11097_v3  ;;  %v10667_v50 = vld [vmem:[#allocation7 + $0xb30] sm:$0xf0]  ;;  %v10230_v3 = vor.u32 %v13578_v60, %v10227_v1  ;;  %v11274_v26 = vor.u32 %v13845_v38, %v11273_v33  ;;  %v11241_v1 = vld [vmem:[#allocation7 + $0xf90] sm:$0xf]  ;;  %v10097_v33 = vld [vmem:[#allocation7 + $0x698] sm:$0xf] }
 0x3c8   :  { %4743 = vmatpush.bf16.msra.mxu0 %v11130_v2  ;;  %v11066_v2 = vor.u32 %v13795_v39, %v11065_v57  ;;  %v10670_v23 = vor.u32 %v13689_v32, %v10667_v50  ;;  %v13673_v39 = vld [vmem:[#allocation7 + $0xa94] sm:$0xf]  ;;  %v13837_v32 = vld [vmem:[#allocation7 + $0xfac] sm:$0xf0]  ;;  %v15332_v21 = vpack.c.bf16 %v867_v8, %v867_v8  ;;  %v13550_v38 = vld [vmem:[#allocation7 + $0x6b4] sm:$0xf0] }
 0x3c9   :  { %v10603_v60 = vld [vmem:[#allocation7 + $0xab0] sm:$0xf0]  ;;  %v13829_v4 = vld [vmem:[#allocation7 + $0xf6c] sm:$0xf0] }
 0x3ca   :  { %2784 = vmatpush.bf16.msra.mxu2 %v10018_v59  ;;  %v10635_v59 = vld [vmem:[#allocation7 + $0xaf0] sm:$0xf0] }
 0x3cb   :  { %3811 = vmatpush.bf16.msra.mxu1 %v10734_v28  ;;  %2797 = vmatpush.bf16.msra.mxu3 %v10022_v55  ;;  %v13574_v28 = vld [vmem:[#allocation7 + $0x774] sm:$0xf0]  ;;  %v2773_v55 = vpop.f32.mrf.mxu1  ;;  %v10638_v57 = vor.u32 %v13681_v30, %v10635_v59 }
 0x3cc   :  { %4744 = vmatpush.bf16.msra.mxu0 %v11098_v14  ;;  %v10194_v43 = vor.u32 %v13574_v28, %v10193_v51  ;;  %v13566_v14 = vld [vmem:[#allocation7 + $0x734] sm:$0xf0]  ;;  %v13665_v51 = vld [vmem:[#allocation7 + $0xa54] sm:$0xf] }
 0x3cd   :  { %2785 = vmatmul.bf16.vlgmr.msra.gmra.mxu2 %v15182_v16  ;;  %v10162_v50 = vor.u32 %v13566_v14, %v10161_v10  ;;  %v10571_v28 = vld [vmem:[#allocation7 + $0xa70] sm:$0xf0]  ;;  %v11177_v14 = vld [vmem:[#allocation7 + $0xf10] sm:$0xf] }
 0x3ce   :  { %2829 = vmatpush.bf16.msrb.mxu2 %v10258_v56  ;;  %2798 = vmatmul.bf16.vlgmr.msra.gmra.mxu3 %v15182_v16  ;;  %v11034_v56 = vor.u32 %v13787_v29, %v11033_v13  ;;  %v13558_v13 = vld [vmem:[#allocation7 + $0x6f4] sm:$0xf0]  ;;  %v10131_v29 = vld [vmem:[#allocation7 + $0x6f8] sm:$0xf0]  ;;  %v10539_v10 = vld [vmem:[#allocation7 + $0xa30] sm:$0xf0] }
 0x3cf   :  { %2842 = vmatpush.bf16.msrb.mxu3 %v10262_v61  ;;  %3812 = vmatpush.bf16.msra.mxu1 %v10702_v0  ;;  %v15330_v61 = vadd.f32 %v2773_v55, %v15319_v27  ;;  %v10163_v0 = vld [vmem:[#allocation7 + $0x738] sm:$0xf0]  ;;  %v10606_v27 = vor.u32 %v13673_v39, %v10603_v60 }
 0x3d0   :  { %4745 = vmatpush.bf16.msra.mxu0 %v11066_v2  ;;  %v10166_v18 = vor.u32 %v13562_v20, %v10163_v0  ;;  %v11242_v2 = vor.u32 %v13837_v32, %v11241_v1  ;;  %v13546_v55 = vld [vmem:[#allocation7 + $0x69c] sm:$0xf]  ;;  %v13775_v20 = vld [vmem:[#allocation7 + $0xdc4] sm:$0xf]  ;;  %v1826_v39 = vpop.f32.mrf.mxu2  ;;  %v10065_v1 = vld [vmem:[#allocation7 + $0x658] sm:$0xf] }
 0x3d1   :  { %v11003_v0 = vld [vmem:[#allocation7 + $0xde0] sm:$0xf0]  ;;  %v13542_v32 = vld [vmem:[#allocation7 + $0x674] sm:$0xf0] }
 0x3d2   :  { %2830 = vmatpush.bf16.msrb.mxu2 %v10226_v11  ;;  %v10129_v11 = vld [vmem:[#allocation7 + $0x6d8] sm:$0xf] }
 0x3d3   :  { %2843 = vmatpush.bf16.msrb.mxu3 %v10230_v3  ;;  %3813 = vmatpush.bf16.msra.mxu1 %v10670_v23  ;;  %v13554_v3 = vld [vmem:[#allocation7 + $0x6dc] sm:$0xf]  ;;  %v11209_v23 = vld [vmem:[#allocation7 + $0xf50] sm:$0xf]  ;;  %v10130_v41 = vor.u32 %v13558_v13, %v10129_v11  ;;  %v2775_v30 = vpop.f32.mrf.mxu1 }
 0x3d4   :  { %4746 = vmatpush.bf16.msra.mxu0 %v11034_v56  ;;  %v10134_v59 = vor.u32 %v13554_v3, %v10131_v29  ;;  %v11210_v8 = vor.u32 %v13829_v4, %v11209_v23  ;;  %v10099_v56 = vld [vmem:[#allocation7 + $0x6b8] sm:$0xf0]  ;;  %v11006_v29 = vor.u32 %v13775_v20, %v11003_v0  ;;  %v10066_v4 = vor.u32 %v13542_v32, %v10065_v1  ;;  %v10971_v30 = vld [vmem:[#allocation7 + $0xda0] sm:$0xf0]  ;;  %v10499_v20 = vld [vmem:[#allocation7 + $0x9e8] sm:$0xf0] }
 0x3d5   :  { %v10102_v60 = vor.u32 %v13546_v55, %v10099_v56  ;;  %v11113_v56 = vld [vmem:[#allocation7 + $0xe90] sm:$0xf] }
 0x3d6   :  { %2831 = vmatpush.bf16.msrb.mxu2 %v10194_v43  ;;  %v10574_v43 = vor.u32 %v13665_v51, %v10571_v28  ;;  %v11145_v51 = vld [vmem:[#allocation7 + $0xed0] sm:$0xf] }
 0x3d7   :  { %2844 = vmatpush.bf16.msrb.mxu3 %v10198_v58  ;;  %3814 = vmatpush.bf16.msra.mxu1 %v10638_v57  ;;  %v13657_v58 = vld [vmem:[#allocation7 + $0xa14] sm:$0xf]  ;;  %v13821_v57 = vld [vmem:[#allocation7 + $0xf2c] sm:$0xf0] }
 0x3d8   :  { %4791 = vmatpush.bf16.msrb.mxu0 %v11274_v26  ;;  %v10098_v26 = vor.u32 %v13550_v38, %v10097_v33  ;;  %v10542_v11 = vor.u32 %v13657_v58, %v10539_v10  ;;  %v11178_v13 = vor.u32 %v13821_v57, %v11177_v14  ;;  %v13813_v28 = vld [vmem:[#allocation7 + $0xeec] sm:$0xf0]  ;;  %v15338_v33 = vpop.f32.mrf.mxu0  ;;  %v13534_v38 = vld [vmem:[#allocation7 + $0x634] sm:$0xf0]  ;;  %v13652_v58 = vld [vmem:[#allocation7 + $0x9e4] sm:$0xf0]  ;;  %v1828_v1 = vpop.f32.mrf.mxu2 }
 0x3d9   :  { %4747 = vmatmul.bf16.vlgmr.msra.gmra.mxu0 %v15332_v21  ;;  %v13805_v57 = vld [vmem:[#allocation7 + $0xeac] sm:$0xf0]  ;;  %v13628_v1 = vld [vmem:[#allocation7 + $0x924] sm:$0xf0] }
 0x3da   :  { %2832 = vmatpush.bf16.msrb.mxu2 %v10162_v50  ;;  %v1827_v50 = vadd.f32 %v1826_v39, %v15286_v44  ;;  %v13759_v39 = vld [vmem:[#allocation7 + $0xd44] sm:$0xf] }
 0x3db   :  { %2845 = vmatpush.bf16.msrb.mxu3 %v10166_v18  ;;  %3815 = vmatpush.bf16.msra.mxu1 %v10606_v27  ;;  %v1839_v18 = vpop.f32.mrf.mxu3  ;;  %v13538_v27 = vld [vmem:[#allocation7 + $0x65c] sm:$0xf] }
 0x3dc   :  { %4792 = vmatpush.bf16.msrb.mxu0 %v11242_v2  ;;  %v10067_v2 = vld [vmem:[#allocation7 + $0x678] sm:$0xf0]  ;;  %v1840_v3 = vadd.f32 %v1839_v18, %v15288_v22  ;;  %v2362_v23 = vadd.f32 %v15271_v19, %v1827_v50  ;;  %v11146_v22 = vor.u32 %v13813_v28, %v11145_v51  ;;  %v10497_v19 = vld [vmem:[#allocation7 + $0x9c8] sm:$0xf]  ;;  %v11114_v18 = vor.u32 %v13805_v57, %v11113_v56  ;;  %v13640_v51 = vld [vmem:[#allocation7 + $0x98c] sm:$0xf] }
 0x3dd   :  { %v10070_v44 = vor.u32 %v13538_v27, %v10067_v2  ;;  %v10498_v50 = vor.u32 %v13652_v58, %v10497_v19  ;;  %v10465_v27 = vld [vmem:[#allocation7 + $0x988] sm:$0xf]  ;;  %v10467_v28 = vld [vmem:[#allocation7 + $0x9a8] sm:$0xf0]  ;;  %v13743_v58 = vld [vmem:[#allocation7 + $0xcc4] sm:$0xf] }
 0x3de   :  { %2833 = vmatpush.bf16.msrb.mxu2 %v10130_v41  ;;  %v13767_v41 = vld [vmem:[#allocation7 + $0xd84] sm:$0xf]  ;;  %v15341_v55 = vadd.f32 %v15311_v47, %v1840_v3  ;;  %v2859_v10 = vadd.f32 %v15290_v15, %v2362_v23  ;;  %v13644_v2 = vld [vmem:[#allocation7 + $0x9a4] sm:$0xf0]  ;;  %v13632_v56 = vld [vmem:[#allocation7 + $0x94c] sm:$0xf] }
 0x3df   :  { %2846 = vmatpush.bf16.msrb.mxu3 %v10134_v59  ;;  %3816 = vmatpush.bf16.msra.mxu1 %v10574_v43  ;;  %v10033_v59 = vld [vmem:[#allocation7 + $0x618] sm:$0xf]  ;;  %v13530_v43 = vld [vmem:[#allocation7 + $0x61c] sm:$0xf]  ;;  %v10974_v14 = vor.u32 %v13767_v41, %v10971_v30  ;;  %v10907_v23 = vld [vmem:[#allocation7 + $0xd20] sm:$0xf0]  ;;  %v10466_v41 = vor.u32 %v13644_v2, %v10465_v27 }
 0x3e0   :  { %4793 = vmatpush.bf16.msrb.mxu0 %v11210_v8  ;;  %v10035_v8 = vld [vmem:[#allocation7 + $0x638] sm:$0xf0]  ;;  %v10034_v0 = vor.u32 %v13534_v38, %v10033_v59  ;;  %v15345_v47 = vadd.f32 %v15321_v62, %v2859_v10  ;;  %v13751_v62 = vld [vmem:[#allocation7 + $0xd04] sm:$0xf]  ;;  %v11049_v30 = vld [vmem:[#allocation7 + $0xe10] sm:$0xf] }
 0x3e1   :  { %v10038_v32 = vor.u32 %v13530_v43, %v10035_v8  ;;  %v13789_v38 = vld [vmem:[#allocation7 + $0xe2c] sm:$0xf0]  ;;  %v10433_v43 = vld [vmem:[#allocation7 + $0x948] sm:$0xf]  ;;  %v10435_v19 = vld [vmem:[#allocation7 + $0x968] sm:$0xf0] }
 0x3e2   :  { %2834 = vmatpush.bf16.msrb.mxu2 %v10098_v26  ;;  %v13648_v26 = vld [vmem:[#allocation7 + $0x9cc] sm:$0xf]  ;;  %v13636_v8 = vld [vmem:[#allocation7 + $0x964] sm:$0xf0]  ;;  %v10875_v10 = vld [vmem:[#allocation7 + $0xce0] sm:$0xf0] }
 0x3e3   :  { %2847 = vmatpush.bf16.msrb.mxu3 %v10102_v60  ;;  %3817 = vmatpush.bf16.msra.mxu1 %v10542_v11  ;;  %v10939_v60 = vld [vmem:[#allocation7 + $0xd60] sm:$0xf0]  ;;  %v1841_v15 = vpop.f32.mrf.mxu3  ;;  %v10502_v11 = vor.u32 %v13648_v26, %v10499_v20  ;;  %v13907_v57 = vld [vmem:[#allocation7 + $0x11dc] sm:$0xf0]  ;;  %v10434_v26 = vor.u32 %v13636_v8, %v10433_v43  ;;  %v2825_v20 = vpop.f32.mrf.mxu1 }
 0x3e4   :  { %4794 = vmatpush.bf16.msrb.mxu0 %v11178_v13  ;;  %v11081_v13 = vld [vmem:[#allocation7 + $0xe50] sm:$0xf]  ;;  %v10942_v3 = vor.u32 %v13759_v39, %v10939_v60  ;;  %v10438_v39 = vor.u32 %v13632_v56, %v10435_v19  ;;  %v10401_v60 = vld [vmem:[#allocation7 + $0x908] sm:$0xf]  ;;  %v11481_v27 = vld [vmem:[#allocation7 + $0x1180] sm:$0xf] }
 0x3e5   :  { %v13899_v2 = vld [vmem:[#allocation7 + $0x119c] sm:$0xf0]  ;;  %v13612_v56 = vld [vmem:[#allocation7 + $0x8a4] sm:$0xf0] }
 0x3e6   :  { %2835 = vmatpush.bf16.msrb.mxu2 %v10066_v4  ;;  %3818 = vmatmul.bf16.vlgmr.msra.gmra.mxu1 %v15261_v63  ;;  %v3756_v4 = vpop.f32.mrf.mxu0 }
 0x3e7   :  { %4255 = vmatpush.bf16.msrb.mxu1 %v11006_v29  ;;  %2848 = vmatpush.bf16.msrb.mxu3 %v10070_v44  ;;  %v13797_v29 = vld [vmem:[#allocation7 + $0xe6c] sm:$0xf0]  ;;  %v10470_v44 = vor.u32 %v13640_v51, %v10467_v28  ;;  %v10369_v51 = vld [vmem:[#allocation7 + $0x8c8] sm:$0xf]  ;;  %v10371_v4 = vld [vmem:[#allocation7 + $0x8e8] sm:$0xf0] }
 0x3e8   :  { %4795 = vmatpush.bf16.msrb.mxu0 %v11146_v22  ;;  %v11082_v59 = vor.u32 %v13797_v29, %v11081_v13  ;;  %v10910_v22 = vor.u32 %v13751_v62, %v10907_v23  ;;  %v10843_v13 = vld [vmem:[#allocation7 + $0xca0] sm:$0xf0]  ;;  %v13620_v28 = vld [vmem:[#allocation7 + $0x8e4] sm:$0xf0]  ;;  %v11482_v62 = vor.u32 %v13899_v2, %v11481_v27  ;;  %v13616_v23 = vld [vmem:[#allocation7 + $0x8cc] sm:$0xf] }
 0x3e9   :  { %v10374_v8 = vor.u32 %v13616_v23, %v10371_v4  ;;  %v13600_v2 = vld [vmem:[#allocation7 + $0x84c] sm:$0xf]  ;;  %v13769_v23 = vld [vmem:[#allocation7 + $0xd94] sm:$0xf] }
 0x3ea   :  { %2836 = vmatpush.bf16.msrb.mxu2 %v10034_v0  ;;  %v11050_v0 = vor.u32 %v13789_v38, %v11049_v30  ;;  %v10811_v30 = vld [vmem:[#allocation7 + $0xc60] sm:$0xf0]  ;;  %v10370_v38 = vor.u32 %v13620_v28, %v10369_v51  ;;  %v11385_v28 = vld [vmem:[#allocation7 + $0x10c0] sm:$0xf]  ;;  %v10987_v4 = vld [vmem:[#allocation7 + $0xdb0] sm:$0xf0] }
 0x3eb   :  { %4256 = vmatpush.bf16.msrb.mxu1 %v10974_v14  ;;  %2849 = vmatpush.bf16.msrb.mxu3 %v10038_v32  ;;  %v11513_v14 = vld [vmem:[#allocation7 + $0x11c0] sm:$0xf]  ;;  %v15351_v32 = vadd.f32 %v2825_v20, %v15341_v55  ;;  %v2827_v43 = vpop.f32.mrf.mxu1 }
 0x3ec   :  { %4796 = vmatpush.bf16.msrb.mxu0 %v11114_v18  ;;  %v11514_v15 = vor.u32 %v13907_v57, %v11513_v14  ;;  %v13624_v18 = vld [vmem:[#allocation7 + $0x90c] sm:$0xf]  ;;  %v13719_v57 = vld [vmem:[#allocation7 + $0xc04] sm:$0xf]  ;;  %v11417_v20 = vld [vmem:[#allocation7 + $0x1100] sm:$0xf] }
 0x3ed   :  { %2837 = vmatmul.bf16.vlgmr.msrb.gmra.mxu2 %v15182_v16  ;;  %v10339_v14 = vld [vmem:[#allocation7 + $0x8a8] sm:$0xf0] }
 0x3ee   :  { %3274 = vmatpush.bf16.msra.mxu2 %v10498_v50  ;;  %2850 = vmatmul.bf16.vlgmr.msrb.gmra.mxu3 %v15182_v16  ;;  %v10878_v50 = vor.u32 %v13743_v58, %v10875_v10  ;;  %v10403_v16 = vld [vmem:[#allocation7 + $0x928] sm:$0xf0] }
 0x3ef   :  { %3287 = vmatpush.bf16.msra.mxu3 %v10502_v11  ;;  %4257 = vmatpush.bf16.msrb.mxu1 %v10942_v3  ;;  %v13735_v11 = vld [vmem:[#allocation7 + $0xc84] sm:$0xf]  ;;  %v10402_v3 = vor.u32 %v13628_v1, %v10401_v60  ;;  %v10406_v29 = vor.u32 %v13624_v18, %v10403_v16  ;;  %v13608_v10 = vld [vmem:[#allocation7 + $0x88c] sm:$0xf]  ;;  %v13777_v60 = vld [vmem:[#allocation7 + $0xdd4] sm:$0xf] }
 0x3f0   :  { %4797 = vmatpush.bf16.msrb.mxu0 %v11082_v59  ;;  %v10846_v55 = vor.u32 %v13735_v11, %v10843_v13  ;;  %v11449_v59 = vld [vmem:[#allocation7 + $0x1140] sm:$0xf]  ;;  %v11019_v1 = vld [vmem:[#allocation7 + $0xdf0] sm:$0xf0]  ;;  %v10305_v18 = vld [vmem:[#allocation7 + $0x848] sm:$0xf] }
 0x3f1   :  { %v13604_v16 = vld [vmem:[#allocation7 + $0x864] sm:$0xf0]  ;;  %v2263_v11 = vpop.f32.mrf.mxu3  ;;  %v11022_v51 = vor.u32 %v13777_v60, %v11019_v1  ;;  %v13592_v43 = vld [vmem:[#allocation7 + $0x80c] sm:$0xf] }
 0x3f2   :  { %3275 = vmatpush.bf16.msra.mxu2 %v10466_v41  ;;  %v13727_v41 = vld [vmem:[#allocation7 + $0xc44] sm:$0xf] }
 0x3f3   :  { %3288 = vmatpush.bf16.msra.mxu3 %v10470_v44  ;;  %4258 = vmatpush.bf16.msrb.mxu1 %v10910_v22  ;;  %v13891_v44 = vld [vmem:[#allocation7 + $0x115c] sm:$0xf0]  ;;  %v10337_v22 = vld [vmem:[#allocation7 + $0x888] sm:$0xf]  ;;  %v10814_v19 = vor.u32 %v13727_v41, %v10811_v30 }
 0x3f4   :  { %4798 = vmatpush.bf16.msrb.mxu0 %v11050_v0  ;;  %v11450_v58 = vor.u32 %v13891_v44, %v11449_v59  ;;  %v13883_v0 = vld [vmem:[#allocation7 + $0x111c] sm:$0xf0]  ;;  %v10273_v41 = vld [vmem:[#allocation7 + $0x808] sm:$0xf] }
 0x3f5   :  { %v11418_v27 = vor.u32 %v13883_v0, %v11417_v20  ;;  %v13761_v0 = vld [vmem:[#allocation7 + $0xd54] sm:$0xf] }
 0x3f6   :  { %3276 = vmatpush.bf16.msra.mxu2 %v10434_v26  ;;  %v10779_v26 = vld [vmem:[#allocation7 + $0xc20] sm:$0xf0]  ;;  %v3806_v59 = vpop.f32.mrf.mxu0 }
 0x3f7   :  { %3289 = vmatpush.bf16.msra.mxu3 %v10438_v39  ;;  %4259 = vmatpush.bf16.msrb.mxu1 %v10878_v50  ;;  %v10338_v39 = vor.u32 %v13612_v56, %v10337_v22  ;;  %v15354_v50 = vpop.f32.mrf.mxu2  ;;  %v10782_v13 = vor.u32 %v13719_v57, %v10779_v26  ;;  %v15359_v22 = vadd.f32 %v3806_v59, %v15345_v47  ;;  %v11353_v56 = vld [vmem:[#allocation7 + $0x1080] sm:$0xf]  ;;  %v13650_v57 = vld [vmem:[#allocation7 + $0x9dc] sm:$0xf]  ;;  %v10449_v59 = vld [vmem:[#allocation7 + $0x958] sm:$0xf] }
 0x3f8   :  { %5236 = vmatpush.bf16.msra.mxu0 %v11514_v15  ;;  %v10342_v15 = vor.u32 %v13608_v10, %v10339_v14  ;;  %v10990_v10 = vor.u32 %v13769_v23, %v10987_v4  ;;  %v13867_v14 = vld [vmem:[#allocation7 + $0x109c] sm:$0xf0] }
 0x3f9   :  { %4799 = vmatmul.bf16.vlgmr.msrb.gmra.mxu0 %v15332_v21  ;;  %v11289_v23 = vld [vmem:[#allocation7 + $0x1000] sm:$0xf] }
 0x3fa   :  { %3277 = vmatpush.bf16.msra.mxu2 %v10402_v3  ;;  %v10307_v3 = vld [vmem:[#allocation7 + $0x868] sm:$0xf0] }
 0x3fb   :  { %3290 = vmatpush.bf16.msra.mxu3 %v10406_v29  ;;  %4260 = vmatpush.bf16.msrb.mxu1 %v10846_v55  ;;  %v2358_v29 = vadd.f32 %v2263_v11, %v15267_v36  ;;  %v13875_v55 = vld [vmem:[#allocation7 + $0x10dc] sm:$0xf0]  ;;  %v10310_v44 = vor.u32 %v13600_v2, %v10307_v3 }
 0x3fc   :  { %5237 = vmatpush.bf16.msra.mxu0 %v11482_v62  ;;  %v10306_v62 = vor.u32 %v13604_v16, %v10305_v18  ;;  %v11386_v36 = vor.u32 %v13875_v55, %v11385_v28  ;;  %v2265_v18 = vpop.f32.mrf.mxu3  ;;  %v11354_v16 = vor.u32 %v13867_v14, %v11353_v56  ;;  %v13859_v3 = vld [vmem:[#allocation7 + $0x105c] sm:$0xf0]  ;;  %v13753_v28 = vld [vmem:[#allocation7 + $0xd14] sm:$0xf]  ;;  %v868_v14 = vmax.f32 %v15211_v42, 0.0 }
 0x3fd   :  { %v2855_v30 = vadd.f32 %v15281_v35, %v2358_v29  ;;  %v10515_v35 = vld [vmem:[#allocation7 + $0x9f8] sm:$0xf0]  ;;  %v10923_v55 = vld [vmem:[#allocation7 + $0xd30] sm:$0xf0] }
 0x3fe   :  { %3278 = vmatpush.bf16.msra.mxu2 %v10370_v38  ;;  %v13596_v38 = vld [vmem:[#allocation7 + $0x824] sm:$0xf0]  ;;  %v10518_v11 = vor.u32 %v13650_v57, %v10515_v35  ;;  %v13642_v29 = vld [vmem:[#allocation7 + $0x99c] sm:$0xf]  ;;  %v10891_v56 = vld [vmem:[#allocation7 + $0xcf0] sm:$0xf0] }
 0x3ff   :  { %3291 = vmatpush.bf16.msra.mxu3 %v10374_v8  ;;  %4261 = vmatpush.bf16.msrb.mxu1 %v10814_v19  ;;  %v10275_v8 = vld [vmem:[#allocation7 + $0x828] sm:$0xf0]  ;;  %v10513_v19 = vld [vmem:[#allocation7 + $0x9d8] sm:$0xf]  ;;  %v3352_v26 = vadd.f32 %v15306_v7, %v2855_v30  ;;  %v10274_v20 = vor.u32 %v13596_v38, %v10273_v41  ;;  %v1867_v47 = vpop.f32.mrf.mxu2  ;;  %v13851_v30 = vld [vmem:[#allocation7 + $0x101c] sm:$0xf0]  ;;  %v10926_v38 = vor.u32 %v13753_v28, %v10923_v55 }
 0x400   :  { %5238 = vmatpush.bf16.msra.mxu0 %v11450_v58  ;;  %v13654_v58 = vld [vmem:[#allocation7 + $0x9f4] sm:$0xf0]  ;;  %v10278_v60 = vor.u32 %v13592_v43, %v10275_v8  ;;  %v13634_v43 = vld [vmem:[#allocation7 + $0x95c] sm:$0xf]  ;;  %v11290_v35 = vor.u32 %v13851_v30, %v11289_v23  ;;  %v11465_v23 = vld [vmem:[#allocation7 + $0x1150] sm:$0xf] }
 0x401   :  { %v10514_v1 = vor.u32 %v13654_v58, %v10513_v19  ;;  %v13646_v7 = vld [vmem:[#allocation7 + $0x9b4] sm:$0xf0]  ;;  %v10451_v8 = vld [vmem:[#allocation7 + $0x978] sm:$0xf0]  ;;  %v11529_v19 = vld [vmem:[#allocation7 + $0x11d0] sm:$0xf] }
 0x402   :  { %3279 = vmatpush.bf16.msra.mxu2 %v10338_v39  ;;  %v10955_v39 = vld [vmem:[#allocation7 + $0xd70] sm:$0xf0]  ;;  %v13909_v58 = vld [vmem:[#allocation7 + $0x11ec] sm:$0xf0]  ;;  %v10419_v18 = vld [vmem:[#allocation7 + $0x938] sm:$0xf0] }
 0x403   :  { %3292 = vmatpush.bf16.msra.mxu3 %v10342_v15  ;;  %4262 = vmatpush.bf16.msrb.mxu1 %v10782_v13  ;;  %v15364_v15 = vadd.f32 %v15338_v33, %v3352_v26  ;;  %v11321_v13 = vld [vmem:[#allocation7 + $0x1040] sm:$0xf]  ;;  %v10958_v2 = vor.u32 %v13761_v0, %v10955_v39  ;;  %v3270_v57 = vpop.f32.mrf.mxu1  ;;  %v10454_v26 = vor.u32 %v13634_v43, %v10451_v8  ;;  %v13630_v0 = vld [vmem:[#allocation7 + $0x934] sm:$0xf0]  ;;  %v13618_v28 = vld [vmem:[#allocation7 + $0x8dc] sm:$0xf] }
 0x404   :  { %5239 = vmatpush.bf16.msra.mxu0 %v11418_v27  ;;  %v10481_v27 = vld [vmem:[#allocation7 + $0x998] sm:$0xf]  ;;  %v11322_v4 = vor.u32 %v13859_v3, %v11321_v13  ;;  %v15370_v39 = vadd.f32 %v3270_v57, %v15330_v61  ;;  %v11497_v13 = vld [vmem:[#allocation7 + $0x1190] sm:$0xf]  ;;  %v10387_v55 = vld [vmem:[#allocation7 + $0x8f8] sm:$0xf0]  ;;  %v1801_v57 = vadd.f32 %v15315_v46, %v15274_v17 }
 0x405   :  { %v10482_v33 = vor.u32 %v13646_v7, %v10481_v27  ;;  %v13901_v27 = vld [vmem:[#allocation7 + $0x11ac] sm:$0xf0]  ;;  %v13622_v3 = vld [vmem:[#allocation7 + $0x8f4] sm:$0xf0] }
 0x406   :  { %3280 = vmatpush.bf16.msra.mxu2 %v10306_v62  ;;  %4263 = vmatmul.bf16.vlgmr.msrb.gmra.mxu1 %v15298_v5  ;;  %v3808_v62 = vpop.f32.mrf.mxu0 }
 0x407   :  { %4307 = vmatpush.bf16.msra.mxu1 %v11022_v51  ;;  %3293 = vmatpush.bf16.msra.mxu3 %v10310_v44  ;;  %v10483_v51 = vld [vmem:[#allocation7 + $0x9b8] sm:$0xf0]  ;;  %v13638_v44 = vld [vmem:[#allocation7 + $0x974] sm:$0xf0]  ;;  %v13729_v62 = vld [vmem:[#allocation7 + $0xc54] sm:$0xf] }
 0x408   :  { %5240 = vmatpush.bf16.msra.mxu0 %v11386_v36  ;;  %v10486_v41 = vor.u32 %v13642_v29, %v10483_v51  ;;  %v13745_v36 = vld [vmem:[#allocation7 + $0xcd4] sm:$0xf]  ;;  %v15372_v29 = vpack.c.bf16 %v868_v14, %v868_v14  ;;  %v11498_v51 = vor.u32 %v13901_v27, %v11497_v13  ;;  %v13885_v14 = vld [vmem:[#allocation7 + $0x112c] sm:$0xf0]  ;;  %v13602_v27 = vld [vmem:[#allocation7 + $0x85c] sm:$0xf] }
 0x409   :  { %v10894_v47 = vor.u32 %v13745_v36, %v10891_v56  ;;  %v13610_v36 = vld [vmem:[#allocation7 + $0x89c] sm:$0xf] }
 0x40a   :  { %3281 = vmatpush.bf16.msra.mxu2 %v10274_v20  ;;  %v10417_v20 = vld [vmem:[#allocation7 + $0x918] sm:$0xf]  ;;  %v10355_v56 = vld [vmem:[#allocation7 + $0x8b8] sm:$0xf0] }
 0x40b   :  { %4308 = vmatpush.bf16.msra.mxu1 %v10990_v10  ;;  %3294 = vmatpush.bf16.msra.mxu3 %v10278_v60  ;;  %v10450_v10 = vor.u32 %v13638_v44, %v10449_v59  ;;  %v11530_v60 = vor.u32 %v13909_v58, %v11529_v19  ;;  %v10418_v42 = vor.u32 %v13630_v0, %v10417_v20  ;;  %v3272_v30 = vpop.f32.mrf.mxu1  ;;  %v10353_v44 = vld [vmem:[#allocation7 + $0x898] sm:$0xf]  ;;  %v13721_v19 = vld [vmem:[#allocation7 + $0xc14] sm:$0xf]  ;;  %v11259_v20 = vld [vmem:[#allocation7 + $0xfe0] sm:$0xf0] }
 0x40c   :  { %5241 = vmatpush.bf16.msra.mxu0 %v11354_v16  ;;  %v13737_v16 = vld [vmem:[#allocation7 + $0xc94] sm:$0xf]  ;;  %v10390_v59 = vor.u32 %v13618_v28, %v10387_v55  ;;  %v10289_v28 = vld [vmem:[#allocation7 + $0x818] sm:$0xf]  ;;  %v11369_v30 = vld [vmem:[#allocation7 + $0x1090] sm:$0xf] }
 0x40d   :  { %3282 = vmatmul.bf16.vlgmr.msra.gmra.mxu2 %v15226_v25  ;;  %v10795_v58 = vld [vmem:[#allocation7 + $0xc30] sm:$0xf0] }
 0x40e   :  { %3326 = vmatpush.bf16.msrb.mxu2 %v10514_v1  ;;  %3295 = vmatmul.bf16.vlgmr.msra.gmra.mxu3 %v15226_v25  ;;  %v13626_v1 = vld [vmem:[#allocation7 + $0x91c] sm:$0xf] }
 0x40f   :  { %3339 = vmatpush.bf16.msrb.mxu3 %v10518_v11  ;;  %4309 = vmatpush.bf16.msra.mxu1 %v10958_v2  ;;  %v10859_v11 = vld [vmem:[#allocation7 + $0xcb0] sm:$0xf0]  ;;  %v10422_v7 = vor.u32 %v13626_v1, %v10419_v18  ;;  %v10385_v2 = vld [vmem:[#allocation7 + $0x8d8] sm:$0xf] }
 0x410   :  { %5242 = vmatpush.bf16.msra.mxu0 %v11322_v4  ;;  %v10862_v61 = vor.u32 %v13737_v16, %v10859_v11  ;;  %v13893_v4 = vld [vmem:[#allocation7 + $0x116c] sm:$0xf0]  ;;  %v2289_v0 = vpop.f32.mrf.mxu2  ;;  %v13606_v1 = vld [vmem:[#allocation7 + $0x874] sm:$0xf0]  ;;  %v10798_v11 = vor.u32 %v13721_v19, %v10795_v58  ;;  %v13823_v19 = vld [vmem:[#allocation7 + $0xf44] sm:$0xf] }
 0x411   :  { %v11466_v8 = vor.u32 %v13893_v4, %v11465_v23  ;;  %v15377_v18 = vadd.f32 %v2289_v0, %v1801_v57  ;;  %v2302_v16 = vpop.f32.mrf.mxu3  ;;  %v13594_v23 = vld [vmem:[#allocation7 + $0x81c] sm:$0xf]  ;;  %v11195_v58 = vld [vmem:[#allocation7 + $0xf60] sm:$0xf0]  ;;  %v10721_v0 = vld [vmem:[#allocation7 + $0xb88] sm:$0xf] }
 0x412   :  { %3327 = vmatpush.bf16.msrb.mxu2 %v10482_v33  ;;  %v10827_v33 = vld [vmem:[#allocation7 + $0xc70] sm:$0xf0]  ;;  %v15380_v17 = vadd.f32 %v2302_v16, %v15277_v49  ;;  %v10291_v4 = vld [vmem:[#allocation7 + $0x838] sm:$0xf0]  ;;  %v13704_v16 = vld [vmem:[#allocation7 + $0xb8c] sm:$0xf] }
 0x413   :  { %3340 = vmatpush.bf16.msrb.mxu3 %v10486_v41  ;;  %4310 = vmatpush.bf16.msra.mxu1 %v10926_v38  ;;  %v10386_v41 = vor.u32 %v13622_v3, %v10385_v2  ;;  %v13614_v38 = vld [vmem:[#allocation7 + $0x8b4] sm:$0xf0]  ;;  %v10830_v43 = vor.u32 %v13729_v62, %v10827_v33  ;;  %v13877_v2 = vld [vmem:[#allocation7 + $0x10ec] sm:$0xf0] }
 0x414   :  { %5243 = vmatpush.bf16.msra.mxu0 %v11290_v35  ;;  %v10354_v35 = vor.u32 %v13614_v38, %v10353_v44  ;;  %v13598_v33 = vld [vmem:[#allocation7 + $0x834] sm:$0xf0]  ;;  %v13716_v44 = vld [vmem:[#allocation7 + $0xbe4] sm:$0xf0] }
 0x416   :  { %3328 = vmatpush.bf16.msrb.mxu2 %v10450_v10  ;;  %v11433_v10 = vld [vmem:[#allocation7 + $0x1110] sm:$0xf]  ;;  %v4251_v55 = vpop.f32.mrf.mxu0 }
 0x417   :  { %3341 = vmatpush.bf16.msrb.mxu3 %v10454_v26  ;;  %4311 = vmatpush.bf16.msra.mxu1 %v10894_v47  ;;  %v13839_v26 = vld [vmem:[#allocation7 + $0xfc4] sm:$0xf]  ;;  %v10358_v47 = vor.u32 %v13610_v36, %v10355_v56  ;;  %v11434_v13 = vor.u32 %v13885_v14, %v11433_v10  ;;  %v10755_v36 = vld [vmem:[#allocation7 + $0xbe8] sm:$0xf0]  ;;  %v10290_v56 = vor.u32 %v13598_v33, %v10289_v28  ;;  %v13700_v28 = vld [vmem:[#allocation7 + $0xb64] sm:$0xf0] }
 0x418   :  { %5288 = vmatpush.bf16.msrb.mxu0 %v11530_v60  ;;  %v10321_v60 = vld [vmem:[#allocation7 + $0x858] sm:$0xf]  ;;  %v11262_v46 = vor.u32 %v13839_v26, %v11259_v20  ;;  %v10294_v10 = vor.u32 %v13594_v23, %v10291_v4  ;;  %v11337_v20 = vld [vmem:[#allocation7 + $0x1050] sm:$0xf]  ;;  %v10691_v33 = vld [vmem:[#allocation7 + $0xb68] sm:$0xf0] }
 0x419   :  { %5244 = vmatmul.bf16.vlgmr.msra.gmra.mxu0 %v15372_v29  ;;  %v10322_v3 = vor.u32 %v13606_v1, %v10321_v60  ;;  %v2304_v57 = vpop.f32.mrf.mxu3  ;;  %v11198_v60 = vor.u32 %v13823_v19, %v11195_v58  ;;  %v13861_v1 = vld [vmem:[#allocation7 + $0x106c] sm:$0xf0]  ;;  %v13807_v23 = vld [vmem:[#allocation7 + $0xec4] sm:$0xf] }
 0x41a   :  { %3329 = vmatpush.bf16.msrb.mxu2 %v10418_v42  ;;  %v10323_v42 = vld [vmem:[#allocation7 + $0x878] sm:$0xf0]  ;;  %v11131_v4 = vld [vmem:[#allocation7 + $0xee0] sm:$0xf0]  ;;  %v11737_v57 = vld [vmem:[#allocation7 + $0x1380] sm:$0xf] }
 0x41b   :  { %3342 = vmatpush.bf16.msrb.mxu3 %v10422_v7  ;;  %4312 = vmatpush.bf16.msra.mxu1 %v10862_v61  ;;  %v11401_v7 = vld [vmem:[#allocation7 + $0x10d0] sm:$0xf]  ;;  %v13831_v61 = vld [vmem:[#allocation7 + $0xf84] sm:$0xf]  ;;  %v10326_v62 = vor.u32 %v13602_v27, %v10323_v42  ;;  %v11134_v19 = vor.u32 %v13807_v23, %v11131_v4  ;;  %v11673_v4 = vld [vmem:[#allocation7 + $0x1300] sm:$0xf] }
 0x41c   :  { %5289 = vmatpush.bf16.msrb.mxu0 %v11498_v51  ;;  %v11227_v51 = vld [vmem:[#allocation7 + $0xfa0] sm:$0xf0]  ;;  %v11402_v49 = vor.u32 %v13877_v2, %v11401_v7  ;;  %v11305_v7 = vld [vmem:[#allocation7 + $0x1010] sm:$0xf]  ;;  %v11338_v2 = vor.u32 %v13861_v1, %v11337_v20  ;;  %v13680_v1 = vld [vmem:[#allocation7 + $0xacc] sm:$0xf] }
 0x41d   :  { %v11230_v38 = vor.u32 %v13831_v61, %v11227_v51  ;;  %v11163_v27 = vld [vmem:[#allocation7 + $0xf20] sm:$0xf0]  ;;  %v13853_v61 = vld [vmem:[#allocation7 + $0x102c] sm:$0xf0]  ;;  %v10689_v51 = vld [vmem:[#allocation7 + $0xb48] sm:$0xf] }
 0x41e   :  { %3330 = vmatpush.bf16.msrb.mxu2 %v10386_v41  ;;  %v15383_v41 = vadd.f32 %v4251_v55, %v15364_v15  ;;  %v2291_v15 = vpop.f32.mrf.mxu2  ;;  %v4253_v42 = vpop.f32.mrf.mxu0  ;;  %v11035_v23 = vld [vmem:[#allocation7 + $0xe20] sm:$0xf0] }
 0x41f   :  { %3343 = vmatpush.bf16.msrb.mxu3 %v10390_v59  ;;  %4313 = vmatpush.bf16.msra.mxu1 %v10830_v43  ;;  %v10753_v59 = vld [vmem:[#allocation7 + $0xbc8] sm:$0xf]  ;;  %v13869_v43 = vld [vmem:[#allocation7 + $0x10ac] sm:$0xf0]  ;;  %v13688_v15 = vld [vmem:[#allocation7 + $0xb0c] sm:$0xf] }
 0x420   :  { %5290 = vmatpush.bf16.msrb.mxu0 %v11466_v8  ;;  %v13712_v8 = vld [vmem:[#allocation7 + $0xbcc] sm:$0xf]  ;;  %v10754_v14 = vor.u32 %v13716_v44, %v10753_v59  ;;  %v10690_v59 = vor.u32 %v13700_v28, %v10689_v51  ;;  %v13955_v42 = vld [vmem:[#allocation7 + $0x135c] sm:$0xf0] }
 0x421   :  { %v10758_v26 = vor.u32 %v13712_v8, %v10755_v36  ;;  %v10657_v8 = vld [vmem:[#allocation7 + $0xb08] sm:$0xf] }
 0x422   :  { %3331 = vmatpush.bf16.msrb.mxu2 %v10354_v35  ;;  %v11370_v35 = vor.u32 %v13869_v43, %v11369_v30  ;;  %v13971_v30 = vld [vmem:[#allocation7 + $0x13dc] sm:$0xf0]  ;;  %v13692_v36 = vld [vmem:[#allocation7 + $0xb24] sm:$0xf0] }
 0x423   :  { %3344 = vmatpush.bf16.msrb.mxu3 %v10358_v47  ;;  %4314 = vmatpush.bf16.msra.mxu1 %v10798_v11  ;;  %v13708_v47 = vld [vmem:[#allocation7 + $0xba4] sm:$0xf0]  ;;  %v10723_v11 = vld [vmem:[#allocation7 + $0xba8] sm:$0xf0]  ;;  %v3322_v44 = vpop.f32.mrf.mxu1 }
 0x424   :  { %5291 = vmatpush.bf16.msrb.mxu0 %v11434_v13  ;;  %v13815_v13 = vld [vmem:[#allocation7 + $0xf04] sm:$0xf] }
 0x425   :  { %v11166_v55 = vor.u32 %v13815_v13, %v11163_v27  ;;  %v11067_v13 = vld [vmem:[#allocation7 + $0xe60] sm:$0xf0]  ;;  %v11705_v27 = vld [vmem:[#allocation7 + $0x1340] sm:$0xf] }
 0x426   :  { %3332 = vmatpush.bf16.msrb.mxu2 %v10322_v3  ;;  %4315 = vmatmul.bf16.vlgmr.msra.gmra.mxu1 %v15298_v5  ;;  %v10726_v3 = vor.u32 %v13704_v16, %v10723_v11  ;;  %v10627_v16 = vld [vmem:[#allocation7 + $0xae8] sm:$0xf0]  ;;  %v13791_v11 = vld [vmem:[#allocation7 + $0xe44] sm:$0xf]  ;;  %v11706_v28 = vor.u32 %v13955_v42, %v11705_v27 }
 0x427   :  { %4752 = vmatpush.bf16.msrb.mxu1 %v11262_v46  ;;  %3345 = vmatpush.bf16.msrb.mxu3 %v10326_v62  ;;  %v10722_v46 = vor.u32 %v13708_v47, %v10721_v0  ;;  %v13696_v62 = vld [vmem:[#allocation7 + $0xb4c] sm:$0xf]  ;;  %v10625_v0 = vld [vmem:[#allocation7 + $0xac8] sm:$0xf]  ;;  %v11070_v51 = vor.u32 %v13791_v11, %v11067_v13 }
 0x428   :  { %5292 = vmatpush.bf16.msrb.mxu0 %v11402_v49  ;;  %v11769_v49 = vld [vmem:[#allocation7 + $0x13c0] sm:$0xf]  ;;  %v10694_v43 = vor.u32 %v13696_v62, %v10691_v33  ;;  %v13684_v47 = vld [vmem:[#allocation7 + $0xae4] sm:$0xf0]  ;;  %v10595_v62 = vld [vmem:[#allocation7 + $0xaa8] sm:$0xf0] }
 0x429   :  { %v11770_v58 = vor.u32 %v13971_v30, %v11769_v49  ;;  %v13783_v33 = vld [vmem:[#allocation7 + $0xe04] sm:$0xf]  ;;  %v13947_v49 = vld [vmem:[#allocation7 + $0x131c] sm:$0xf0]  ;;  %v13660_v11 = vld [vmem:[#allocation7 + $0xa24] sm:$0xf0] }
 0x42a   :  { %3333 = vmatpush.bf16.msrb.mxu2 %v10290_v56  ;;  %v15389_v56 = vadd.f32 %v3322_v44, %v15351_v32  ;;  %v11275_v44 = vld [vmem:[#allocation7 + $0xff0] sm:$0xf0]  ;;  %v13656_v13 = vld [vmem:[#allocation7 + $0xa0c] sm:$0xf] }
 0x42b   :  { %4753 = vmatpush.bf16.msrb.mxu1 %v11230_v38  ;;  %3346 = vmatpush.bf16.msrb.mxu3 %v10294_v10  ;;  %v11306_v38 = vor.u32 %v13853_v61, %v11305_v7  ;;  %v13799_v10 = vld [vmem:[#allocation7 + $0xe84] sm:$0xf]  ;;  %v3324_v7 = vpop.f32.mrf.mxu1  ;;  %v13676_v61 = vld [vmem:[#allocation7 + $0xaa4] sm:$0xf0]  ;;  %v10531_v27 = vld [vmem:[#allocation7 + $0xa28] sm:$0xf0] }
 0x42c   :  { %5293 = vmatpush.bf16.msrb.mxu0 %v11370_v35  ;;  %v13963_v35 = vld [vmem:[#allocation7 + $0x139c] sm:$0xf0] }
 0x42d   :  { %3334 = vmatmul.bf16.vlgmr.msrb.gmra.mxu2 %v15226_v25  ;;  %v11609_v7 = vld [vmem:[#allocation7 + $0x1280] sm:$0xf] }
 0x42e   :  { %3771 = vmatpush.bf16.msra.mxu2 %v10754_v14  ;;  %3347 = vmatmul.bf16.vlgmr.msrb.gmra.mxu3 %v15226_v25  ;;  %v10659_v25 = vld [vmem:[#allocation7 + $0xb28] sm:$0xf0]  ;;  %v11099_v14 = vld [vmem:[#allocation7 + $0xea0] sm:$0xf0] }
 0x42f   :  { %3784 = vmatpush.bf16.msra.mxu3 %v10758_v26  ;;  %4754 = vmatpush.bf16.msrb.mxu1 %v11198_v60  ;;  %v10658_v26 = vor.u32 %v13692_v36, %v10657_v8  ;;  %v10662_v20 = vor.u32 %v13688_v15, %v10659_v25  ;;  %v11102_v32 = vor.u32 %v13799_v10, %v11099_v14  ;;  %v10561_v36 = vld [vmem:[#allocation7 + $0xa48] sm:$0xf]  ;;  %v13664_v14 = vld [vmem:[#allocation7 + $0xa4c] sm:$0xf] }
 0x430   :  { %5294 = vmatpush.bf16.msrb.mxu0 %v11338_v2  ;;  %v11738_v60 = vor.u32 %v13963_v35, %v11737_v57  ;;  %v10630_v2 = vor.u32 %v13680_v1, %v10627_v16  ;;  %v11038_v25 = vor.u32 %v13783_v33, %v11035_v23  ;;  %v11674_v10 = vor.u32 %v13947_v49, %v11673_v4  ;;  %v10563_v57 = vld [vmem:[#allocation7 + $0xa68] sm:$0xf0]  ;;  %v10529_v1 = vld [vmem:[#allocation7 + $0xa08] sm:$0xf]  ;;  %v13825_v33 = vld [vmem:[#allocation7 + $0xf54] sm:$0xf] }
 0x431   :  { %v2354_v15 = vpop.f32.mrf.mxu3  ;;  %v10566_v16 = vor.u32 %v13664_v14, %v10563_v57  ;;  %v11211_v23 = vld [vmem:[#allocation7 + $0xf70] sm:$0xf0]  ;;  %v10534_v4 = vor.u32 %v13656_v13, %v10531_v27  ;;  %v11785_v13 = vld [vmem:[#allocation7 + $0x13d0] sm:$0xf] }
 0x432   :  { %3772 = vmatpush.bf16.msra.mxu2 %v10722_v46  ;;  %v10626_v46 = vor.u32 %v13684_v47, %v10625_v0  ;;  %v11179_v14 = vld [vmem:[#allocation7 + $0xf30] sm:$0xf0]  ;;  %v13973_v27 = vld [vmem:[#allocation7 + $0x13ec] sm:$0xf0] }
 0x433   :  { %3785 = vmatpush.bf16.msra.mxu3 %v10726_v3  ;;  %4755 = vmatpush.bf16.msrb.mxu1 %v11166_v55  ;;  %v10593_v3 = vld [vmem:[#allocation7 + $0xa88] sm:$0xf]  ;;  %v13672_v55 = vld [vmem:[#allocation7 + $0xa8c] sm:$0xf] }
 0x434   :  { %5295 = vmatpush.bf16.msrb.mxu0 %v11306_v38  ;;  %v10594_v30 = vor.u32 %v13676_v61, %v10593_v3  ;;  %v1866_v38 = vadd.f32 %v15354_v50, %v15304_v45  ;;  %v10598_v8 = vor.u32 %v13672_v55, %v10595_v62  ;;  %v13939_v45 = vld [vmem:[#allocation7 + $0x12dc] sm:$0xf0]  ;;  %v14374_v50 = vld [vmem:[#allocation5] ss:$0 sm:$0xff]  ;;  %v10530_v62 = vor.u32 %v13660_v11, %v10529_v1  ;;  %v11147_v11 = vld [vmem:[#allocation7 + $0xef0] sm:$0xf0] }
 0x435   :  { %v645_v0 = vadd.f32 %v14374_v50, %v15047_v37  ;;  %v13718_v37 = vld [vmem:[#allocation7 + $0xbf4] sm:$0xf0]  ;;  %v13931_v61 = vld [vmem:[#allocation7 + $0x129c] sm:$0xf0]  ;;  %v13698_v1 = vld [vmem:[#allocation7 + $0xb5c] sm:$0xf] }
 0x436   :  { %3773 = vmatpush.bf16.msra.mxu2 %v10690_v59  ;;  %v13841_v59 = vld [vmem:[#allocation7 + $0xfd4] sm:$0xf]  ;;  %v15397_v35 = vadd.f32 %v2354_v15, %v1866_v38  ;;  %v13706_v15 = vld [vmem:[#allocation7 + $0xb9c] sm:$0xf] }
 0x437   :  { %3786 = vmatpush.bf16.msra.mxu3 %v10694_v43  ;;  %4756 = vmatpush.bf16.msrb.mxu1 %v11134_v19  ;;  %v2341_v43 = vpop.f32.mrf.mxu2  ;;  %v13668_v19 = vld [vmem:[#allocation7 + $0xa64] sm:$0xf0]  ;;  %v710_v55 = vadd.f32 %v15089_v12, %v645_v0  ;;  %v11214_v12 = vor.u32 %v13825_v33, %v11211_v23  ;;  %v13915_v0 = vld [vmem:[#allocation7 + $0x121c] sm:$0xf0]  ;;  %v10675_v33 = vld [vmem:[#allocation7 + $0xb38] sm:$0xf0] }
 0x438   :  { %5733 = vmatpush.bf16.msra.mxu0 %v11770_v58  ;;  %v15395_v58 = vadd.f32 %v2341_v43, %v15302_v48  ;;  %v10562_v47 = vor.u32 %v13668_v19, %v10561_v36  ;;  %v4303_v48 = vpop.f32.mrf.mxu0  ;;  %v11577_v43 = vld [vmem:[#allocation7 + $0x1240] sm:$0xf]  ;;  %v13710_v36 = vld [vmem:[#allocation7 + $0xbb4] sm:$0xf0]  ;;  %v13801_v23 = vld [vmem:[#allocation7 + $0xe94] sm:$0xf] }
 0x439   :  { %5296 = vmatmul.bf16.vlgmr.msrb.gmra.mxu0 %v15372_v29  ;;  %v15401_v42 = vadd.f32 %v4303_v48, %v15359_v22  ;;  %v13923_v19 = vld [vmem:[#allocation7 + $0x125c] sm:$0xf0]  ;;  %v10707_v48 = vld [vmem:[#allocation7 + $0xb78] sm:$0xf0] }
 0x43a   :  { %3774 = vmatpush.bf16.msra.mxu2 %v10658_v26  ;;  %v11278_v26 = vor.u32 %v13841_v59, %v11275_v44  ;;  %v2356_v59 = vpop.f32.mrf.mxu3  ;;  %v11610_v44 = vor.u32 %v13931_v61, %v11609_v7  ;;  %v13694_v61 = vld [vmem:[#allocation7 + $0xb34] sm:$0xf0] }
 0x43b   :  { %3787 = vmatpush.bf16.msra.mxu3 %v10662_v20  ;;  %4757 = vmatpush.bf16.msrb.mxu1 %v11102_v32  ;;  %v11641_v20 = vld [vmem:[#allocation7 + $0x12c0] sm:$0xf]  ;;  %v13833_v32 = vld [vmem:[#allocation7 + $0xf94] sm:$0xf] }
 0x43c   :  { %5734 = vmatpush.bf16.msra.mxu0 %v11738_v60  ;;  %v11243_v60 = vld [vmem:[#allocation7 + $0xfb0] sm:$0xf0] }
 0x43d   :  { %v11246_v3 = vor.u32 %v13833_v32, %v11243_v60  ;;  %v13702_v32 = vld [vmem:[#allocation7 + $0xb74] sm:$0xf0] }
 0x43e   :  { %3775 = vmatpush.bf16.msra.mxu2 %v10626_v46  ;;  %v11642_v46 = vor.u32 %v13939_v45, %v11641_v20  ;;  %v11578_v45 = vor.u32 %v13923_v19, %v11577_v43  ;;  %v13793_v19 = vld [vmem:[#allocation7 + $0xe54] sm:$0xf] }
 0x43f   :  { %3788 = vmatpush.bf16.msra.mxu3 %v10630_v2  ;;  %4758 = vmatpush.bf16.msrb.mxu1 %v11070_v51  ;;  %v10769_v2 = vld [vmem:[#allocation7 + $0xbd8] sm:$0xf]  ;;  %v13714_v51 = vld [vmem:[#allocation7 + $0xbdc] sm:$0xf]  ;;  %v2343_v22 = vpop.f32.mrf.mxu2 }
 0x440   :  { %5735 = vmatpush.bf16.msra.mxu0 %v11706_v28  ;;  %v10771_v28 = vld [vmem:[#allocation7 + $0xbf8] sm:$0xf0]  ;;  %v10770_v49 = vor.u32 %v13718_v37, %v10769_v2  ;;  %v4305_v57 = vpop.f32.mrf.mxu0  ;;  %v10710_v37 = vor.u32 %v13698_v1, %v10707_v48  ;;  %v11115_v22 = vld [vmem:[#allocation7 + $0xeb0] sm:$0xf0]  ;;  %v11689_v1 = vld [vmem:[#allocation7 + $0x1310] sm:$0xf] }
 0x441   :  { %v10774_v38 = vor.u32 %v13714_v51, %v10771_v28  ;;  %v13949_v48 = vld [vmem:[#allocation7 + $0x132c] sm:$0xf0] }
 0x442   :  { %3776 = vmatpush.bf16.msra.mxu2 %v10594_v30  ;;  %v775_v30 = vadd.f32 %v15215_v40, %v710_v55  ;;  %v11545_v40 = vld [vmem:[#allocation7 + $0x1200] sm:$0xf]  ;;  %v11786_v55 = vor.u32 %v13973_v27, %v11785_v13  ;;  %v11515_v13 = vld [vmem:[#allocation7 + $0x11e0] sm:$0xf0] }
 0x443   :  { %3789 = vmatpush.bf16.msra.mxu3 %v10598_v8  ;;  %4759 = vmatpush.bf16.msrb.mxu1 %v11038_v25  ;;  %v10737_v8 = vld [vmem:[#allocation7 + $0xb98] sm:$0xf]  ;;  %v10739_v25 = vld [vmem:[#allocation7 + $0xbb8] sm:$0xf0]  ;;  %v3767_v7 = vpop.f32.mrf.mxu1  ;;  %v11546_v2 = vor.u32 %v13915_v0, %v11545_v40 }
 0x444   :  { %5736 = vmatpush.bf16.msra.mxu0 %v11674_v10  ;;  %v13817_v10 = vld [vmem:[#allocation7 + $0xf14] sm:$0xf]  ;;  %v840_v20 = vadd.f32 %v15203_v52, %v775_v30  ;;  %v10742_v50 = vor.u32 %v13706_v15, %v10739_v25  ;;  %v15410_v51 = vadd.f32 %v3767_v7, %v15370_v39  ;;  %v11118_v39 = vor.u32 %v13801_v23, %v11115_v22  ;;  %v11721_v25 = vld [vmem:[#allocation7 + $0x1350] sm:$0xf]  ;;  %v10609_v40 = vld [vmem:[#allocation7 + $0xa98] sm:$0xf] }
 0x445   :  { %v11182_v60 = vor.u32 %v13817_v10, %v11179_v14  ;;  %v11083_v15 = vld [vmem:[#allocation7 + $0xe70] sm:$0xf0]  ;;  %v13957_v10 = vld [vmem:[#allocation7 + $0x136c] sm:$0xf0]  ;;  %v13674_v0 = vld [vmem:[#allocation7 + $0xa9c] sm:$0xf] }
 0x446   :  { %3777 = vmatpush.bf16.msra.mxu2 %v10562_v47  ;;  %4760 = vmatmul.bf16.vlgmr.msrb.gmra.mxu1 %v15332_v21  ;;  %v10705_v47 = vld [vmem:[#allocation7 + $0xb58] sm:$0xf]  ;;  %v11657_v23 = vld [vmem:[#allocation7 + $0x12d0] sm:$0xf] }
 0x447   :  { %4804 = vmatpush.bf16.msra.mxu1 %v11278_v26  ;;  %3790 = vmatpush.bf16.msra.mxu3 %v10566_v16  ;;  %v10738_v26 = vor.u32 %v13710_v36, %v10737_v8  ;;  %v13809_v16 = vld [vmem:[#allocation7 + $0xed4] sm:$0xf]  ;;  %v10706_v52 = vor.u32 %v13702_v32, %v10705_v47  ;;  %v13682_v36 = vld [vmem:[#allocation7 + $0xadc] sm:$0xf]  ;;  %v13670_v7 = vld [vmem:[#allocation7 + $0xa74] sm:$0xf0] }
 0x448   :  { %5737 = vmatpush.bf16.msra.mxu0 %v11642_v46  ;;  %v869_v46 = vmax.f32 %v840_v20, 0.0  ;;  %v11150_v28 = vor.u32 %v13809_v16, %v11147_v11  ;;  %v13678_v20 = vld [vmem:[#allocation7 + $0xab4] sm:$0xf0]  ;;  %v10611_v47 = vld [vmem:[#allocation7 + $0xab8] sm:$0xf0] }
 0x449   :  { %v13785_v32 = vld [vmem:[#allocation7 + $0xe14] sm:$0xf]  ;;  %v10610_v16 = vor.u32 %v13678_v20, %v10609_v40  ;;  %v13903_v11 = vld [vmem:[#allocation7 + $0x11c4] sm:$0xf]  ;;  %v13941_v22 = vld [vmem:[#allocation7 + $0x12ec] sm:$0xf0] }
 0x44a   :  { %3778 = vmatpush.bf16.msra.mxu2 %v10530_v62  ;;  %v13690_v62 = vld [vmem:[#allocation7 + $0xb1c] sm:$0xf]  ;;  %v15412_v43 = vpack.c.bf16 %v869_v46, %v869_v46  ;;  %v10577_v46 = vld [vmem:[#allocation7 + $0xa58] sm:$0xf]  ;;  %v13887_v40 = vld [vmem:[#allocation7 + $0x1144] sm:$0xf] }
 0x44b   :  { %4805 = vmatpush.bf16.msra.mxu1 %v11246_v3  ;;  %3791 = vmatpush.bf16.msra.mxu3 %v10534_v4  ;;  %v10673_v3 = vld [vmem:[#allocation7 + $0xb18] sm:$0xf]  ;;  %v11753_v4 = vld [vmem:[#allocation7 + $0x1390] sm:$0xf]  ;;  %v10678_v59 = vor.u32 %v13690_v62, %v10675_v33  ;;  %v3769_v57 = vpop.f32.mrf.mxu1  ;;  %v11518_v33 = vor.u32 %v13903_v11, %v11515_v13  ;;  %v11451_v20 = vld [vmem:[#allocation7 + $0x1160] sm:$0xf0] }
 0x44c   :  { %5738 = vmatpush.bf16.msra.mxu0 %v11610_v44  ;;  %v10674_v30 = vor.u32 %v13694_v61, %v10673_v3  ;;  %v10641_v44 = vld [vmem:[#allocation7 + $0xad8] sm:$0xf]  ;;  %v11690_v61 = vor.u32 %v13949_v48, %v11689_v1  ;;  %v11011_v57 = vld [vmem:[#allocation7 + $0xde8] sm:$0xf0]  ;;  %v10977_v1 = vld [vmem:[#allocation7 + $0xd88] sm:$0xf] }
 0x44d   :  { %3779 = vmatmul.bf16.vlgmr.msra.gmra.mxu2 %v15261_v63  ;;  %v13772_v48 = vld [vmem:[#allocation7 + $0xda4] sm:$0xf0]  ;;  %v13925_v11 = vld [vmem:[#allocation7 + $0x126c] sm:$0xf0]  ;;  %v13768_v13 = vld [vmem:[#allocation7 + $0xd8c] sm:$0xf] }
 0x44e   :  { %3823 = vmatpush.bf16.msrb.mxu2 %v10770_v49  ;;  %3792 = vmatmul.bf16.vlgmr.msra.gmra.mxu3 %v15261_v63  ;;  %v13965_v49 = vld [vmem:[#allocation7 + $0x13ac] sm:$0xf0] }
 0x44f   :  { %3836 = vmatpush.bf16.msrb.mxu3 %v10774_v38  ;;  %4806 = vmatpush.bf16.msra.mxu1 %v11214_v12  ;;  %v13686_v38 = vld [vmem:[#allocation7 + $0xaf4] sm:$0xf0]  ;;  %v11754_v8 = vor.u32 %v13965_v49, %v11753_v4  ;;  %v10643_v12 = vld [vmem:[#allocation7 + $0xaf8] sm:$0xf0]  ;;  %v10578_v4 = vor.u32 %v13670_v7, %v10577_v46  ;;  %v13895_v49 = vld [vmem:[#allocation7 + $0x1184] sm:$0xf] }
 0x450   :  { %5739 = vmatpush.bf16.msra.mxu0 %v11578_v45  ;;  %v10642_v14 = vor.u32 %v13686_v38, %v10641_v44  ;;  %v11086_v45 = vor.u32 %v13793_v19, %v11083_v15  ;;  %v2786_v27 = vpop.f32.mrf.mxu2  ;;  %v13662_v38 = vld [vmem:[#allocation7 + $0xa34] sm:$0xf0]  ;;  %v11009_v19 = vld [vmem:[#allocation7 + $0xdc8] sm:$0xf]  ;;  %v11419_v46 = vld [vmem:[#allocation7 + $0x1120] sm:$0xf0] }
 0x451   :  { %v13780_v15 = vld [vmem:[#allocation7 + $0xde4] sm:$0xf0] }
 0x452   :  { %3824 = vmatpush.bf16.msrb.mxu2 %v10738_v26  ;;  %v10646_v26 = vor.u32 %v13682_v36, %v10643_v12  ;;  %v11625_v12 = vld [vmem:[#allocation7 + $0x1290] sm:$0xf] }
 0x453   :  { %3837 = vmatpush.bf16.msrb.mxu3 %v10742_v50  ;;  %4807 = vmatpush.bf16.msra.mxu1 %v11182_v60  ;;  %v11722_v50 = vor.u32 %v13957_v10, %v11721_v25  ;;  %v11051_v60 = vld [vmem:[#allocation7 + $0xe30] sm:$0xf0]  ;;  %v13933_v10 = vld [vmem:[#allocation7 + $0x12ac] sm:$0xf0] }
 0x454   :  { %5740 = vmatpush.bf16.msra.mxu0 %v11546_v2  ;;  %v15416_v2 = vadd.f32 %v2786_v27, %v15377_v18  ;;  %v11054_v3 = vor.u32 %v13785_v32, %v11051_v60  ;;  %v11593_v60 = vld [vmem:[#allocation7 + $0x1250] sm:$0xf]  ;;  %v10979_v27 = vld [vmem:[#allocation7 + $0xda8] sm:$0xf0] }
 0x456   :  { %3825 = vmatpush.bf16.msrb.mxu2 %v10706_v52  ;;  %v10614_v52 = vor.u32 %v13674_v0, %v10611_v47  ;;  %v4748_v44 = vpop.f32.mrf.mxu0  ;;  %v11626_v47 = vor.u32 %v13933_v10, %v11625_v12  ;;  %v10913_v12 = vld [vmem:[#allocation7 + $0xd08] sm:$0xf] }
 0x457   :  { %3838 = vmatpush.bf16.msrb.mxu3 %v10710_v37  ;;  %4808 = vmatpush.bf16.msra.mxu1 %v11150_v28  ;;  %v2799_v37 = vpop.f32.mrf.mxu3  ;;  %v13666_v28 = vld [vmem:[#allocation7 + $0xa5c] sm:$0xf]  ;;  %v15422_v36 = vadd.f32 %v4748_v44, %v15383_v41  ;;  %v12025_v44 = vld [vmem:[#allocation7 + $0x15c0] sm:$0xf] }
 0x458   :  { %5785 = vmatpush.bf16.msrb.mxu0 %v11786_v55  ;;  %v10579_v55 = vld [vmem:[#allocation7 + $0xa78] sm:$0xf0]  ;;  %v15419_v62 = vadd.f32 %v2799_v37, %v15380_v17  ;;  %v11658_v17 = vor.u32 %v13941_v22, %v11657_v23  ;;  %v2788_v41 = vpop.f32.mrf.mxu2  ;;  %v10978_v37 = vor.u32 %v13772_v48, %v10977_v1  ;;  %v13764_v23 = vld [vmem:[#allocation7 + $0xd64] sm:$0xf0]  ;;  %v13855_v1 = vld [vmem:[#allocation7 + $0x1044] sm:$0xf] }
 0x459   :  { %5741 = vmatmul.bf16.vlgmr.msra.gmra.mxu0 %v15412_v43  ;;  %v10582_v18 = vor.u32 %v13666_v28, %v10579_v55  ;;  %v10982_v28 = vor.u32 %v13768_v13, %v10979_v27  ;;  %v13917_v55 = vld [vmem:[#allocation7 + $0x122c] sm:$0xf0]  ;;  %v11323_v48 = vld [vmem:[#allocation7 + $0x1060] sm:$0xf0] }
 0x45a   :  { %3826 = vmatpush.bf16.msrb.mxu2 %v10674_v30  ;;  %v11483_v30 = vld [vmem:[#allocation7 + $0x11a0] sm:$0xf0] }
 0x45b   :  { %3839 = vmatpush.bf16.msrb.mxu3 %v10678_v59  ;;  %4809 = vmatpush.bf16.msra.mxu1 %v11118_v39  ;;  %v10545_v59 = vld [vmem:[#allocation7 + $0xa18] sm:$0xf]  ;;  %v13658_v39 = vld [vmem:[#allocation7 + $0xa1c] sm:$0xf]  ;;  %v11486_v25 = vor.u32 %v13895_v49, %v11483_v30  ;;  %v10947_v49 = vld [vmem:[#allocation7 + $0xd68] sm:$0xf0] }
 0x45c   :  { %5786 = vmatpush.bf16.msrb.mxu0 %v11754_v8  ;;  %v10547_v8 = vld [vmem:[#allocation7 + $0xa38] sm:$0xf0]  ;;  %v13871_v30 = vld [vmem:[#allocation7 + $0x10c4] sm:$0xf] }
 0x45e   :  { %3827 = vmatpush.bf16.msrb.mxu2 %v10642_v14  ;;  %v13776_v14 = vld [vmem:[#allocation7 + $0xdcc] sm:$0xf]  ;;  %v4750_v7 = vpop.f32.mrf.mxu0 }
 0x45f   :  { %3840 = vmatpush.bf16.msrb.mxu3 %v10646_v26  ;;  %4810 = vmatpush.bf16.msra.mxu1 %v11086_v45  ;;  %v10546_v26 = vor.u32 %v13662_v38, %v10545_v59  ;;  %v10550_v45 = vor.u32 %v13658_v39, %v10547_v8  ;;  %v2801_v0 = vpop.f32.mrf.mxu3  ;;  %v11014_v32 = vor.u32 %v13776_v14, %v11011_v57  ;;  %v11387_v59 = vld [vmem:[#allocation7 + $0x10e0] sm:$0xf0]  ;;  %v13752_v14 = vld [vmem:[#allocation7 + $0xd0c] sm:$0xf]  ;;  %v13740_v7 = vld [vmem:[#allocation7 + $0xca4] sm:$0xf0] }
 0x460   :  { %5787 = vmatpush.bf16.msrb.mxu0 %v11722_v50  ;;  %v11010_v50 = vor.u32 %v13780_v15, %v11009_v19  ;;  %v13756_v19 = vld [vmem:[#allocation7 + $0xd24] sm:$0xf0]  ;;  %v13863_v57 = vld [vmem:[#allocation7 + $0x1084] sm:$0xf] }
 0x461   :  { %v10914_v41 = vor.u32 %v13756_v19, %v10913_v12  ;;  %v13748_v0 = vld [vmem:[#allocation7 + $0xce4] sm:$0xf0]  ;;  %v13728_v19 = vld [vmem:[#allocation7 + $0xc4c] sm:$0xf] }
 0x462   :  { %3828 = vmatpush.bf16.msrb.mxu2 %v10610_v16  ;;  %v11454_v16 = vor.u32 %v13887_v40, %v11451_v20  ;;  %v11993_v40 = vld [vmem:[#allocation7 + $0x1580] sm:$0xf] }
 0x463   :  { %3841 = vmatpush.bf16.msrb.mxu3 %v10614_v52  ;;  %4811 = vmatpush.bf16.msra.mxu1 %v11054_v3  ;;  %v13879_v52 = vld [vmem:[#allocation7 + $0x1104] sm:$0xf]  ;;  %v11561_v3 = vld [vmem:[#allocation7 + $0x1210] sm:$0xf]  ;;  %v3819_v39 = vpop.f32.mrf.mxu1  ;;  %v14027_v20 = vld [vmem:[#allocation7 + $0x159c] sm:$0xf0] }
 0x464   :  { %5788 = vmatpush.bf16.msrb.mxu0 %v11690_v61  ;;  %v11594_v61 = vor.u32 %v13925_v11, %v11593_v60  ;;  %v11422_v22 = vor.u32 %v13879_v52, %v11419_v46  ;;  %v11562_v8 = vor.u32 %v13917_v55, %v11561_v3  ;;  %v15428_v15 = vadd.f32 %v3819_v39, %v15389_v56  ;;  %v10883_v60 = vld [vmem:[#allocation7 + $0xce8] sm:$0xf0]  ;;  %v14019_v11 = vld [vmem:[#allocation7 + $0x155c] sm:$0xf0]  ;;  %v10849_v46 = vld [vmem:[#allocation7 + $0xc88] sm:$0xf] }
 0x465   :  { %v13847_v55 = vld [vmem:[#allocation7 + $0x1004] sm:$0xf] }
 0x466   :  { %3829 = vmatpush.bf16.msrb.mxu2 %v10578_v4  ;;  %4812 = vmatmul.bf16.vlgmr.msra.gmra.mxu1 %v15332_v21  ;;  %v13760_v4 = vld [vmem:[#allocation7 + $0xd4c] sm:$0xf] }
 0x467   :  { %5249 = vmatpush.bf16.msrb.mxu1 %v11518_v33  ;;  %3842 = vmatpush.bf16.msrb.mxu3 %v10582_v18  ;;  %v10945_v33 = vld [vmem:[#allocation7 + $0xd48] sm:$0xf]  ;;  %v14035_v18 = vld [vmem:[#allocation7 + $0x15dc] sm:$0xf0] }
 0x468   :  { %5789 = vmatpush.bf16.msrb.mxu0 %v11658_v17  ;;  %v10946_v38 = vor.u32 %v13764_v23, %v10945_v33  ;;  %v10950_v17 = vor.u32 %v13760_v4, %v10947_v49  ;;  %v12026_v10 = vor.u32 %v14035_v18, %v12025_v44  ;;  %v11291_v33 = vld [vmem:[#allocation7 + $0x1020] sm:$0xf0]  ;;  %v11929_v23 = vld [vmem:[#allocation7 + $0x1500] sm:$0xf]  ;;  %v10850_v4 = vor.u32 %v13740_v7, %v10849_v46  ;;  %v13905_v49 = vld [vmem:[#allocation7 + $0x11d4] sm:$0xf] }
 0x469   :  { %v10817_v18 = vld [vmem:[#allocation7 + $0xc48] sm:$0xf]  ;;  %v11467_v46 = vld [vmem:[#allocation7 + $0x1170] sm:$0xf0] }
 0x46a   :  { %3830 = vmatpush.bf16.msrb.mxu2 %v10546_v26  ;;  %v11355_v26 = vld [vmem:[#allocation7 + $0x10a0] sm:$0xf0] }
 0x46b   :  { %5250 = vmatpush.bf16.msrb.mxu1 %v11486_v25  ;;  %3843 = vmatpush.bf16.msrb.mxu3 %v10550_v45  ;;  %v11390_v25 = vor.u32 %v13871_v30, %v11387_v59  ;;  %v11358_v56 = vor.u32 %v13863_v57, %v11355_v26  ;;  %v3821_v27 = vpop.f32.mrf.mxu1  ;;  %v11531_v30 = vld [vmem:[#allocation7 + $0x11f0] sm:$0xf0]  ;;  %v14003_v57 = vld [vmem:[#allocation7 + $0x14dc] sm:$0xf0] }
 0x46c   :  { %5790 = vmatpush.bf16.msrb.mxu0 %v11626_v47  ;;  %v11994_v47 = vor.u32 %v14027_v20, %v11993_v40  ;;  %v13897_v40 = vld [vmem:[#allocation7 + $0x1194] sm:$0xf] }
 0x46d   :  { %3831 = vmatmul.bf16.vlgmr.msrb.gmra.mxu2 %v15261_v63  ;;  %v11499_v20 = vld [vmem:[#allocation7 + $0x11b0] sm:$0xf0] }
 0x46e   :  { %4268 = vmatpush.bf16.msra.mxu2 %v11010_v50  ;;  %3844 = vmatmul.bf16.vlgmr.msrb.gmra.mxu3 %v15261_v63  ;;  %v10915_v63 = vld [vmem:[#allocation7 + $0xd28] sm:$0xf0]  ;;  %v10881_v50 = vld [vmem:[#allocation7 + $0xcc8] sm:$0xf] }
 0x46f   :  { %4281 = vmatpush.bf16.msra.mxu3 %v11014_v32  ;;  %5251 = vmatpush.bf16.msrb.mxu1 %v11454_v16  ;;  %v10918_v45 = vor.u32 %v13752_v14, %v10915_v63  ;;  %v13744_v32 = vld [vmem:[#allocation7 + $0xccc] sm:$0xf]  ;;  %v11961_v16 = vld [vmem:[#allocation7 + $0x1540] sm:$0xf]  ;;  %v10882_v13 = vor.u32 %v13748_v0, %v10881_v50  ;;  %v11534_v14 = vor.u32 %v13905_v49, %v11531_v30  ;;  %v13724_v50 = vld [vmem:[#allocation7 + $0xc24] sm:$0xf0] }
 0x470   :  { %5791 = vmatpush.bf16.msrb.mxu0 %v11594_v61  ;;  %v10886_v52 = vor.u32 %v13744_v32, %v10883_v60  ;;  %v11962_v3 = vor.u32 %v14019_v11, %v11961_v16  ;;  %v13736_v61 = vld [vmem:[#allocation7 + $0xc8c] sm:$0xf]  ;;  %v2838_v59 = vpop.f32.mrf.mxu2  ;;  %v11897_v63 = vld [vmem:[#allocation7 + $0x14c0] sm:$0xf]  ;;  %v11025_v60 = vld [vmem:[#allocation7 + $0xdd8] sm:$0xf] }
 0x471   :  { %v15432_v39 = vadd.f32 %v2838_v59, %v15395_v58  ;;  %v13720_v0 = vld [vmem:[#allocation7 + $0xc0c] sm:$0xf]  ;;  %v11865_v32 = vld [vmem:[#allocation7 + $0x1480] sm:$0xf]  ;;  %v13778_v11 = vld [vmem:[#allocation7 + $0xddc] sm:$0xf] }
 0x472   :  { %4269 = vmatpush.bf16.msra.mxu2 %v10978_v37  ;;  %v11326_v37 = vor.u32 %v13855_v1, %v11323_v48  ;;  %v13782_v1 = vld [vmem:[#allocation7 + $0xdf4] sm:$0xf0]  ;;  %v11502_v48 = vor.u32 %v13897_v40, %v11499_v20  ;;  %v13995_v16 = vld [vmem:[#allocation7 + $0x149c] sm:$0xf0]  ;;  %v13770_v49 = vld [vmem:[#allocation7 + $0xd9c] sm:$0xf] }
 0x473   :  { %4282 = vmatpush.bf16.msra.mxu3 %v10982_v28  ;;  %5252 = vmatpush.bf16.msrb.mxu1 %v11422_v22  ;;  %v10851_v28 = vld [vmem:[#allocation7 + $0xca8] sm:$0xf0]  ;;  %v14011_v22 = vld [vmem:[#allocation7 + $0x151c] sm:$0xf0]  ;;  %v10995_v30 = vld [vmem:[#allocation7 + $0xdb8] sm:$0xf0] }
 0x474   :  { %5792 = vmatpush.bf16.msrb.mxu0 %v11562_v8  ;;  %v10854_v44 = vor.u32 %v13736_v61, %v10851_v28  ;;  %v2851_v8 = vpop.f32.mrf.mxu3  ;;  %v11930_v12 = vor.u32 %v14011_v22, %v11929_v23  ;;  %v11866_v61 = vor.u32 %v13995_v16, %v11865_v32  ;;  %v13774_v23 = vld [vmem:[#allocation7 + $0xdb4] sm:$0xf0]  ;;  %v13881_v59 = vld [vmem:[#allocation7 + $0x1114] sm:$0xf] }
 0x475   :  { %v13873_v40 = vld [vmem:[#allocation7 + $0x10d4] sm:$0xf]  ;;  %v10929_v32 = vld [vmem:[#allocation7 + $0xd18] sm:$0xf] }
 0x476   :  { %4270 = vmatpush.bf16.msra.mxu2 %v10946_v38  ;;  %v13732_v38 = vld [vmem:[#allocation7 + $0xc64] sm:$0xf0]  ;;  %v11403_v20 = vld [vmem:[#allocation7 + $0x10f0] sm:$0xf0] }
 0x477   :  { %4283 = vmatpush.bf16.msra.mxu3 %v10950_v17  ;;  %5253 = vmatpush.bf16.msrb.mxu1 %v11390_v25  ;;  %v11294_v17 = vor.u32 %v13847_v55, %v11291_v33  ;;  %v10819_v25 = vld [vmem:[#allocation7 + $0xc68] sm:$0xf0]  ;;  %v10818_v26 = vor.u32 %v13732_v38, %v10817_v18  ;;  %v11833_v55 = vld [vmem:[#allocation7 + $0x1440] sm:$0xf]  ;;  %v10993_v33 = vld [vmem:[#allocation7 + $0xd98] sm:$0xf] }
 0x478   :  { %6230 = vmatpush.bf16.msra.mxu0 %v12026_v10  ;;  %v15435_v10 = vadd.f32 %v2851_v8, %v15397_v35  ;;  %v10822_v58 = vor.u32 %v13728_v19, %v10819_v25  ;;  %v11898_v35 = vor.u32 %v14003_v57, %v11897_v63  ;;  %v10994_v38 = vor.u32 %v13774_v23, %v10993_v33  ;;  %v11801_v8 = vld [vmem:[#allocation7 + $0x1400] sm:$0xf]  ;;  %v10961_v25 = vld [vmem:[#allocation7 + $0xd58] sm:$0xf]  ;;  %v13762_v57 = vld [vmem:[#allocation7 + $0xd5c] sm:$0xf] }
 0x479   :  { %5793 = vmatmul.bf16.vlgmr.msrb.gmra.mxu0 %v15412_v43  ;;  %v13979_v19 = vld [vmem:[#allocation7 + $0x141c] sm:$0xf0]  ;;  %v10899_v33 = vld [vmem:[#allocation7 + $0xcf8] sm:$0xf0]  ;;  %v13857_v23 = vld [vmem:[#allocation7 + $0x1054] sm:$0xf] }
 0x47a   :  { %4271 = vmatpush.bf16.msra.mxu2 %v10914_v41  ;;  %v10785_v41 = vld [vmem:[#allocation7 + $0xc08] sm:$0xf] }
 0x47b   :  { %4284 = vmatpush.bf16.msra.mxu3 %v10918_v45  ;;  %5254 = vmatpush.bf16.msrb.mxu1 %v11358_v56  ;;  %v4800_v45 = vpop.f32.mrf.mxu0  ;;  %v10787_v56 = vld [vmem:[#allocation7 + $0xc28] sm:$0xf0]  ;;  %v10786_v27 = vor.u32 %v13724_v50, %v10785_v41  ;;  %v12041_v41 = vld [vmem:[#allocation7 + $0x15d0] sm:$0xf]  ;;  %v870_v50 = vmax.f32 %v15224_v31, 0.0 }
 0x47c   :  { %6231 = vmatpush.bf16.msra.mxu0 %v11994_v47  ;;  %v15438_v47 = vadd.f32 %v4800_v45, %v15401_v42  ;;  %v2840_v42 = vpop.f32.mrf.mxu2  ;;  %v10790_v7 = vor.u32 %v13720_v0, %v10787_v56  ;;  %v14037_v45 = vld [vmem:[#allocation7 + $0x15ec] sm:$0xf0]  ;;  %v11802_v56 = vor.u32 %v13979_v19, %v11801_v8  ;;  %v10867_v19 = vld [vmem:[#allocation7 + $0xcb8] sm:$0xf0] }
 0x47d   :  { %v12042_v16 = vor.u32 %v14037_v45, %v12041_v41  ;;  %v14029_v42 = vld [vmem:[#allocation7 + $0x15ac] sm:$0xf0] }
 0x47e   :  { %4272 = vmatpush.bf16.msra.mxu2 %v10882_v13  ;;  %v11027_v13 = vld [vmem:[#allocation7 + $0xdf8] sm:$0xf0] }
 0x47f   :  { %4285 = vmatpush.bf16.msra.mxu3 %v10886_v52  ;;  %5255 = vmatpush.bf16.msrb.mxu1 %v11326_v37  ;;  %v13889_v52 = vld [vmem:[#allocation7 + $0x1154] sm:$0xf]  ;;  %v11026_v37 = vor.u32 %v13782_v1, %v11025_v60  ;;  %v11030_v28 = vor.u32 %v13778_v11, %v11027_v13  ;;  %v13758_v60 = vld [vmem:[#allocation7 + $0xd34] sm:$0xf0]  ;;  %v13754_v11 = vld [vmem:[#allocation7 + $0xd1c] sm:$0xf] }
 0x480   :  { %6232 = vmatpush.bf16.msra.mxu0 %v11962_v3  ;;  %v2853_v3 = vpop.f32.mrf.mxu3  ;;  %v11470_v22 = vor.u32 %v13889_v52, %v11467_v46  ;;  %v10931_v13 = vld [vmem:[#allocation7 + $0xd38] sm:$0xf0]  ;;  %v11371_v52 = vld [vmem:[#allocation7 + $0x10b0] sm:$0xf0]  ;;  %v12009_v46 = vld [vmem:[#allocation7 + $0x1590] sm:$0xf]  ;;  %v10930_v31 = vor.u32 %v13758_v60, %v10929_v32 }
 0x481   :  { %v13750_v3 = vld [vmem:[#allocation7 + $0xcf4] sm:$0xf0]  ;;  %v13730_v60 = vld [vmem:[#allocation7 + $0xc5c] sm:$0xf] }
 0x482   :  { %4273 = vmatpush.bf16.msra.mxu2 %v10850_v4  ;;  %v13987_v4 = vld [vmem:[#allocation7 + $0x145c] sm:$0xf0] }
 0x483   :  { %4286 = vmatpush.bf16.msra.mxu3 %v10854_v44  ;;  %5256 = vmatpush.bf16.msrb.mxu1 %v11294_v17  ;;  %v11435_v44 = vld [vmem:[#allocation7 + $0x1130] sm:$0xf0]  ;;  %v4802_v18 = vpop.f32.mrf.mxu0  ;;  %v11834_v17 = vor.u32 %v13987_v4, %v11833_v55  ;;  %v4264_v0 = vpop.f32.mrf.mxu1  ;;  %v13746_v55 = vld [vmem:[#allocation7 + $0xcdc] sm:$0xf]  ;;  %v11977_v4 = vld [vmem:[#allocation7 + $0x1550] sm:$0xf] }
 0x484   :  { %6233 = vmatpush.bf16.msra.mxu0 %v11930_v12  ;;  %v10998_v12 = vor.u32 %v13770_v49, %v10995_v30  ;;  %v11438_v63 = vor.u32 %v13881_v59, %v11435_v44  ;;  %v15445_v1 = vadd.f32 %v4264_v0, %v15410_v51  ;;  %v14021_v49 = vld [vmem:[#allocation7 + $0x156c] sm:$0xf0]  ;;  %v10902_v44 = vor.u32 %v13746_v55, %v10899_v33  ;;  %v10865_v18 = vld [vmem:[#allocation7 + $0xc98] sm:$0xf]  ;;  %v11265_v33 = vld [vmem:[#allocation7 + $0xfc8] sm:$0xf] }
 0x485   :  { %v11881_v55 = vld [vmem:[#allocation7 + $0x1490] sm:$0xf] }
 0x486   :  { %4274 = vmatpush.bf16.msra.mxu2 %v10818_v26  ;;  %5257 = vmatmul.bf16.vlgmr.msrb.gmra.mxu1 %v15372_v29  ;;  %v10963_v26 = vld [vmem:[#allocation7 + $0xd78] sm:$0xf0] }
 0x487   :  { %5301 = vmatpush.bf16.msra.mxu1 %v11534_v14  ;;  %4287 = vmatpush.bf16.msra.mxu3 %v10822_v58  ;;  %v13766_v14 = vld [vmem:[#allocation7 + $0xd74] sm:$0xf0] }
 0x488   :  { %6234 = vmatpush.bf16.msra.mxu0 %v11898_v35  ;;  %v10962_v58 = vor.u32 %v13766_v14, %v10961_v25  ;;  %v10966_v35 = vor.u32 %v13762_v57, %v10963_v26  ;;  %v13849_v25 = vld [vmem:[#allocation7 + $0x1014] sm:$0xf]  ;;  %v14013_v57 = vld [vmem:[#allocation7 + $0x152c] sm:$0xf0] }
 0x489   :  { %v11307_v14 = vld [vmem:[#allocation7 + $0x1030] sm:$0xf0] }
 0x48a   :  { %4275 = vmatpush.bf16.msra.mxu2 %v10786_v27  ;;  %v13865_v27 = vld [vmem:[#allocation7 + $0x1094] sm:$0xf] }
 0x48b   :  { %5302 = vmatpush.bf16.msra.mxu1 %v11502_v48  ;;  %4288 = vmatpush.bf16.msra.mxu3 %v10790_v7  ;;  %v11406_v48 = vor.u32 %v13873_v40, %v11403_v20  ;;  %v10934_v7 = vor.u32 %v13754_v11, %v10931_v13  ;;  %v11374_v51 = vor.u32 %v13865_v27, %v11371_v52  ;;  %v4266_v59 = vpop.f32.mrf.mxu1  ;;  %v13967_v40 = vld [vmem:[#allocation7 + $0x13c4] sm:$0xf]  ;;  %v11913_v13 = vld [vmem:[#allocation7 + $0x14d0] sm:$0xf] }
 0x48c   :  { %6235 = vmatpush.bf16.msra.mxu0 %v11866_v61  ;;  %v15447_v61 = vpack.c.bf16 %v870_v50, %v870_v50  ;;  %v11771_v20 = vld [vmem:[#allocation7 + $0x13e0] sm:$0xf0]  ;;  %v13734_v50 = vld [vmem:[#allocation7 + $0xc74] sm:$0xf0]  ;;  %v14005_v27 = vld [vmem:[#allocation7 + $0x14ec] sm:$0xf0] }
 0x48d   :  { %4276 = vmatmul.bf16.vlgmr.msra.gmra.mxu2 %v15298_v5  ;;  %v11774_v11 = vor.u32 %v13967_v40, %v11771_v20  ;;  %v13832_v40 = vld [vmem:[#allocation7 + $0xf8c] sm:$0xf] }
 0x48e   :  { %4320 = vmatpush.bf16.msrb.mxu2 %v11026_v37  ;;  %4289 = vmatmul.bf16.vlgmr.msra.gmra.mxu3 %v15298_v5  ;;  %v10897_v37 = vld [vmem:[#allocation7 + $0xcd8] sm:$0xf]  ;;  %v11235_v20 = vld [vmem:[#allocation7 + $0xfa8] sm:$0xf0] }
 0x48f   :  { %4333 = vmatpush.bf16.msrb.mxu3 %v11030_v28  ;;  %5303 = vmatpush.bf16.msra.mxu1 %v11470_v22  ;;  %v12010_v28 = vor.u32 %v14029_v42, %v12009_v46  ;;  %v11339_v22 = vld [vmem:[#allocation7 + $0x1070] sm:$0xf0]  ;;  %v10898_v30 = vor.u32 %v13750_v3, %v10897_v37  ;;  %v13959_v46 = vld [vmem:[#allocation7 + $0x1384] sm:$0xf]  ;;  %v13726_v37 = vld [vmem:[#allocation7 + $0xc34] sm:$0xf0] }
 0x490   :  { %6236 = vmatpush.bf16.msra.mxu0 %v11834_v17  ;;  %v11342_v8 = vor.u32 %v13857_v23, %v11339_v22  ;;  %v11978_v17 = vor.u32 %v14021_v49, %v11977_v4  ;;  %v3283_v41 = vpop.f32.mrf.mxu2  ;;  %v11739_v42 = vld [vmem:[#allocation7 + $0x13a0] sm:$0xf0]  ;;  %v13722_v3 = vld [vmem:[#allocation7 + $0xc1c] sm:$0xf]  ;;  %v13844_v23 = vld [vmem:[#allocation7 + $0xfe4] sm:$0xf0] }
 0x491   :  { %v15451_v0 = vadd.f32 %v3283_v41, %v15416_v2  ;;  %v11742_v22 = vor.u32 %v13959_v46, %v11739_v42  ;;  %v13997_v4 = vld [vmem:[#allocation7 + $0x14ac] sm:$0xf0]  ;;  %v13840_v49 = vld [vmem:[#allocation7 + $0xfcc] sm:$0xf]  ;;  %v13943_v41 = vld [vmem:[#allocation7 + $0x1304] sm:$0xf] }
 0x492   :  { %4321 = vmatpush.bf16.msrb.mxu2 %v10994_v38  ;;  %v13742_v38 = vld [vmem:[#allocation7 + $0xcb4] sm:$0xf0]  ;;  %v13935_v46 = vld [vmem:[#allocation7 + $0x12c4] sm:$0xf] }
 0x493   :  { %4334 = vmatpush.bf16.msrb.mxu3 %v10998_v12  ;;  %5304 = vmatpush.bf16.msra.mxu1 %v11438_v63  ;;  %v13738_v12 = vld [vmem:[#allocation7 + $0xc9c] sm:$0xf]  ;;  %v11945_v63 = vld [vmem:[#allocation7 + $0x1510] sm:$0xf]  ;;  %v10866_v26 = vor.u32 %v13742_v38, %v10865_v18  ;;  %v11707_v18 = vld [vmem:[#allocation7 + $0x1360] sm:$0xf0] }
 0x494   :  { %6237 = vmatpush.bf16.msra.mxu0 %v11802_v56  ;;  %v10870_v45 = vor.u32 %v13738_v12, %v10867_v19  ;;  %v3296_v56 = vpop.f32.mrf.mxu3  ;;  %v11946_v32 = vor.u32 %v14013_v57, %v11945_v63  ;;  %v11882_v12 = vor.u32 %v13997_v4, %v11881_v55  ;;  %v13836_v63 = vld [vmem:[#allocation7 + $0xfa4] sm:$0xf0]  ;;  %v11643_v42 = vld [vmem:[#allocation7 + $0x12e0] sm:$0xf0]  ;;  %v13816_v4 = vld [vmem:[#allocation7 + $0xf0c] sm:$0xf] }
 0x495   :  { %v13820_v55 = vld [vmem:[#allocation7 + $0xf24] sm:$0xf0] }
 0x496   :  { %4322 = vmatpush.bf16.msrb.mxu2 %v10962_v58  ;;  %v10833_v58 = vld [vmem:[#allocation7 + $0xc58] sm:$0xf] }
 0x497   :  { %4335 = vmatpush.bf16.msrb.mxu3 %v10966_v35  ;;  %5305 = vmatpush.bf16.msra.mxu1 %v11406_v48  ;;  %v11310_v35 = vor.u32 %v13849_v25, %v11307_v14  ;;  %v10835_v48 = vld [vmem:[#allocation7 + $0xc78] sm:$0xf0]  ;;  %v10834_v52 = vor.u32 %v13734_v50, %v10833_v58  ;;  %v11849_v25 = vld [vmem:[#allocation7 + $0x1450] sm:$0xf]  ;;  %v11233_v14 = vld [vmem:[#allocation7 + $0xf88] sm:$0xf] }
 0x498   :  { %6282 = vmatpush.bf16.msrb.mxu0 %v12042_v16  ;;  %v15454_v16 = vadd.f32 %v3296_v56, %v15419_v62  ;;  %v10838_v2 = vor.u32 %v13730_v60, %v10835_v48  ;;  %v11914_v62 = vor.u32 %v14005_v27, %v11913_v13  ;;  %v11234_v50 = vor.u32 %v13836_v63, %v11233_v14  ;;  %v11817_v56 = vld [vmem:[#allocation7 + $0x1410] sm:$0xf]  ;;  %v11201_v48 = vld [vmem:[#allocation7 + $0xf48] sm:$0xf]  ;;  %v13824_v27 = vld [vmem:[#allocation7 + $0xf4c] sm:$0xf] }
 0x499   :  { %6238 = vmatmul.bf16.vlgmr.msra.gmra.mxu0 %v15447_v61  ;;  %v13981_v60 = vld [vmem:[#allocation7 + $0x142c] sm:$0xf0]  ;;  %v11579_v14 = vld [vmem:[#allocation7 + $0x1260] sm:$0xf0]  ;;  %v12217_v63 = vld [vmem:[#allocation7 + $0x1740] sm:$0xf] }
 0x49a   :  { %4323 = vmatpush.bf16.msrb.mxu2 %v10930_v31  ;;  %v10801_v31 = vld [vmem:[#allocation7 + $0xc18] sm:$0xf] }
 0x49b   :  { %4336 = vmatpush.bf16.msrb.mxu3 %v10934_v7  ;;  %5306 = vmatpush.bf16.msra.mxu1 %v11374_v51  ;;  %v5245_v7 = vpop.f32.mrf.mxu0  ;;  %v10803_v51 = vld [vmem:[#allocation7 + $0xc38] sm:$0xf0]  ;;  %v10802_v59 = vor.u32 %v13726_v37, %v10801_v31  ;;  %v12281_v31 = vld [vmem:[#allocation7 + $0x17c0] sm:$0xf] }
 0x49c   :  { %6283 = vmatpush.bf16.msrb.mxu0 %v12010_v28  ;;  %v15457_v28 = vadd.f32 %v5245_v7, %v15422_v36  ;;  %v3285_v36 = vpop.f32.mrf.mxu2  ;;  %v10806_v38 = vor.u32 %v13722_v3, %v10803_v51  ;;  %v14099_v7 = vld [vmem:[#allocation7 + $0x17dc] sm:$0xf0]  ;;  %v11818_v3 = vor.u32 %v13981_v60, %v11817_v56  ;;  %v13800_v56 = vld [vmem:[#allocation7 + $0xe8c] sm:$0xf]  ;;  %v11547_v60 = vld [vmem:[#allocation7 + $0x1220] sm:$0xf0] }
 0x49e   :  { %4324 = vmatpush.bf16.msrb.mxu2 %v10898_v30  ;;  %v11267_v30 = vld [vmem:[#allocation7 + $0xfe8] sm:$0xf0] }
 0x49f   :  { %4337 = vmatpush.bf16.msrb.mxu3 %v10902_v44  ;;  %5307 = vmatpush.bf16.msra.mxu1 %v11342_v8  ;;  %v13951_v44 = vld [vmem:[#allocation7 + $0x1344] sm:$0xf]  ;;  %v11266_v8 = vor.u32 %v13844_v23, %v11265_v33  ;;  %v11270_v19 = vor.u32 %v13840_v49, %v11267_v30  ;;  %v11646_v23 = vor.u32 %v13935_v46, %v11643_v42 }
 0x4a0   :  { %6284 = vmatpush.bf16.msrb.mxu0 %v11978_v17  ;;  %v3298_v17 = vpop.f32.mrf.mxu3  ;;  %v11710_v57 = vor.u32 %v13951_v44, %v11707_v18  ;;  %v13927_v49 = vld [vmem:[#allocation7 + $0x1284] sm:$0xf]  ;;  %v14091_v44 = vld [vmem:[#allocation7 + $0x179c] sm:$0xf0] }
 0x4a1   :  { %v11611_v30 = vld [vmem:[#allocation7 + $0x12a0] sm:$0xf0] }
 0x4a2   :  { %4325 = vmatpush.bf16.msrb.mxu2 %v10866_v26  ;;  %v13989_v26 = vld [vmem:[#allocation7 + $0x146c] sm:$0xf0] }
 0x4a3   :  { %4338 = vmatpush.bf16.msrb.mxu3 %v10870_v45  ;;  %5308 = vmatpush.bf16.msra.mxu1 %v11310_v35  ;;  %v11675_v45 = vld [vmem:[#allocation7 + $0x1320] sm:$0xf0]  ;;  %v5247_v58 = vpop.f32.mrf.mxu0  ;;  %v11850_v35 = vor.u32 %v13989_v26, %v11849_v25  ;;  %v4316_v37 = vpop.f32.mrf.mxu1 }
 0x4a4   :  { %6285 = vmatpush.bf16.msrb.mxu0 %v11946_v32  ;;  %v11238_v32 = vor.u32 %v13832_v40, %v11235_v20  ;;  %v11678_v13 = vor.u32 %v13943_v41, %v11675_v45  ;;  %v15463_v33 = vadd.f32 %v4316_v37, %v15428_v15  ;;  %v11614_v15 = vor.u32 %v13927_v49, %v11611_v30  ;;  %v13919_v25 = vld [vmem:[#allocation7 + $0x1244] sm:$0xf]  ;;  %v11105_v41 = vld [vmem:[#allocation7 + $0xe88] sm:$0xf]  ;;  %v14375_v49 = vld [vmem:[#allocation5] ss:$0 sm:$0xff] }
 0x4a5   :  { %v13804_v45 = vld [vmem:[#allocation7 + $0xea4] sm:$0xf0]  ;;  %v11582_v58 = vor.u32 %v13919_v25, %v11579_v14  ;;  %v651_v30 = vadd.f32 %v14375_v49, %v15069_v6  ;;  %v11281_v25 = vld [vmem:[#allocation7 + $0xfd8] sm:$0xf]  ;;  %v13826_v49 = vld [vmem:[#allocation7 + $0xf5c] sm:$0xf] }
 0x4a6   :  { %4326 = vmatpush.bf16.msrb.mxu2 %v10834_v52  ;;  %5309 = vmatmul.bf16.vlgmr.msra.gmra.mxu1 %v15372_v29  ;;  %v11203_v52 = vld [vmem:[#allocation7 + $0xf68] sm:$0xf0]  ;;  %v13846_v6 = vld [vmem:[#allocation7 + $0xff4] sm:$0xf0] }
 0x4a7   :  { %5746 = vmatpush.bf16.msrb.mxu1 %v11774_v11  ;;  %4339 = vmatpush.bf16.msrb.mxu3 %v10838_v2  ;;  %v13828_v11 = vld [vmem:[#allocation7 + $0xf64] sm:$0xf0]  ;;  %v11206_v51 = vor.u32 %v13824_v27, %v11203_v52  ;;  %v13969_v27 = vld [vmem:[#allocation7 + $0x13d4] sm:$0xf] }
 0x4a8   :  { %6286 = vmatpush.bf16.msrb.mxu0 %v11914_v62  ;;  %v11202_v2 = vor.u32 %v13828_v11, %v11201_v48  ;;  %v11169_v62 = vld [vmem:[#allocation7 + $0xf08] sm:$0xf]  ;;  %v12185_v48 = vld [vmem:[#allocation7 + $0x1700] sm:$0xf]  ;;  %v11787_v52 = vld [vmem:[#allocation7 + $0x13f0] sm:$0xf0] }
 0x4a9   :  { %v11170_v18 = vor.u32 %v13820_v55, %v11169_v62  ;;  %v14075_v11 = vld [vmem:[#allocation7 + $0x171c] sm:$0xf0]  ;;  %v13792_v62 = vld [vmem:[#allocation7 + $0xe4c] sm:$0xf] }
 0x4aa   :  { %4327 = vmatpush.bf16.msrb.mxu2 %v10802_v59  ;;  %v12249_v59 = vld [vmem:[#allocation7 + $0x1780] sm:$0xf]  ;;  %v11075_v55 = vld [vmem:[#allocation7 + $0xe68] sm:$0xf0] }
 0x4ab   :  { %5747 = vmatpush.bf16.msrb.mxu1 %v11742_v22  ;;  %4340 = vmatpush.bf16.msrb.mxu3 %v10806_v38  ;;  %v12282_v22 = vor.u32 %v14099_v7, %v12281_v31  ;;  %v11137_v38 = vld [vmem:[#allocation7 + $0xec8] sm:$0xf]  ;;  %v12250_v17 = vor.u32 %v14091_v44, %v12249_v59  ;;  %v4318_v40 = vpop.f32.mrf.mxu1  ;;  %v13961_v44 = vld [vmem:[#allocation7 + $0x1394] sm:$0xf] }
 0x4ac   :  { %6287 = vmatpush.bf16.msrb.mxu0 %v11882_v12  ;;  %v13808_v12 = vld [vmem:[#allocation7 + $0xecc] sm:$0xf]  ;;  %v11073_v31 = vld [vmem:[#allocation7 + $0xe48] sm:$0xf]  ;;  %v716_v40 = vadd.f32 %v15112_v53, %v651_v30  ;;  %v11219_v30 = vld [vmem:[#allocation7 + $0xf78] sm:$0xf0] }
 0x4ad   :  { %4328 = vmatmul.bf16.vlgmr.msrb.gmra.mxu2 %v15298_v5  ;;  %v13796_v7 = vld [vmem:[#allocation7 + $0xe64] sm:$0xf0] }
 0x4ae   :  { %4765 = vmatpush.bf16.msra.mxu2 %v11266_v8  ;;  %4341 = vmatmul.bf16.vlgmr.msrb.gmra.mxu3 %v15298_v5  ;;  %v11171_v5 = vld [vmem:[#allocation7 + $0xf28] sm:$0xf0]  ;;  %v13812_v8 = vld [vmem:[#allocation7 + $0xee4] sm:$0xf0]  ;;  %v11074_v59 = vor.u32 %v13796_v7, %v11073_v31  ;;  %v11691_v31 = vld [vmem:[#allocation7 + $0x1330] sm:$0xf0] }
 0x4af   :  { %4778 = vmatpush.bf16.msra.mxu3 %v11270_v19  ;;  %5748 = vmatpush.bf16.msrb.mxu1 %v11710_v57  ;;  %v11174_v36 = vor.u32 %v13816_v4, %v11171_v5  ;;  %v11139_v19 = vld [vmem:[#allocation7 + $0xee8] sm:$0xf0]  ;;  %v14083_v57 = vld [vmem:[#allocation7 + $0x175c] sm:$0xf0]  ;;  %v11138_v26 = vor.u32 %v13812_v8, %v11137_v38  ;;  %v11078_v38 = vor.u32 %v13792_v62, %v11075_v55  ;;  %v13788_v8 = vld [vmem:[#allocation7 + $0xe24] sm:$0xf0] }
 0x4b0   :  { %6288 = vmatpush.bf16.msrb.mxu0 %v11850_v35  ;;  %v11142_v20 = vor.u32 %v13808_v12, %v11139_v19  ;;  %v11107_v35 = vld [vmem:[#allocation7 + $0xea8] sm:$0xf0]  ;;  %v3335_v46 = vpop.f32.mrf.mxu2  ;;  %v12153_v4 = vld [vmem:[#allocation7 + $0x16c0] sm:$0xf] }
 0x4b1   :  { %v11110_v42 = vor.u32 %v13800_v56, %v11107_v35  ;;  %v3348_v37 = vpop.f32.mrf.mxu3  ;;  %v14067_v5 = vld [vmem:[#allocation7 + $0x16dc] sm:$0xf0]  ;;  %v781_v56 = vadd.f32 %v15229_v9, %v716_v40  ;;  %v12265_v40 = vld [vmem:[#allocation7 + $0x1790] sm:$0xf] }
 0x4b2   :  { %4766 = vmatpush.bf16.msra.mxu2 %v11234_v50  ;;  %v12218_v50 = vor.u32 %v14083_v57, %v12217_v63  ;;  %v12154_v12 = vor.u32 %v14067_v5, %v12153_v4  ;;  %v12121_v19 = vld [vmem:[#allocation7 + $0x1680] sm:$0xf]  ;;  %v13842_v57 = vld [vmem:[#allocation7 + $0xfdc] sm:$0xf]  ;;  %v13830_v4 = vld [vmem:[#allocation7 + $0xf74] sm:$0xf0] }
 0x4b3   :  { %4779 = vmatpush.bf16.msra.mxu3 %v11238_v32  ;;  %5749 = vmatpush.bf16.msrb.mxu1 %v11678_v13  ;;  %v13911_v32 = vld [vmem:[#allocation7 + $0x1204] sm:$0xf]  ;;  %v11106_v13 = vor.u32 %v13804_v45, %v11105_v41  ;;  %v14059_v63 = vld [vmem:[#allocation7 + $0x169c] sm:$0xf0]  ;;  %v13953_v41 = vld [vmem:[#allocation7 + $0x1354] sm:$0xf] }
 0x4b4   :  { %6289 = vmatpush.bf16.msrb.mxu0 %v11818_v3  ;;  %v11550_v3 = vor.u32 %v13911_v32, %v11547_v60  ;;  %v11723_v45 = vld [vmem:[#allocation7 + $0x1370] sm:$0xf0]  ;;  %v12122_v32 = vor.u32 %v14059_v63, %v12121_v19  ;;  %v12057_v9 = vld [vmem:[#allocation7 + $0x1600] sm:$0xf]  ;;  %v11187_v63 = vld [vmem:[#allocation7 + $0xf38] sm:$0xf0] }
 0x4b5   :  { %v11726_v53 = vor.u32 %v13953_v41, %v11723_v45  ;;  %v14043_v55 = vld [vmem:[#allocation7 + $0x161c] sm:$0xf0] }
 0x4b6   :  { %4767 = vmatpush.bf16.msra.mxu2 %v11202_v2  ;;  %v15467_v2 = vadd.f32 %v3335_v46, %v15432_v39  ;;  %v11041_v39 = vld [vmem:[#allocation7 + $0xe08] sm:$0xf]  ;;  %v11251_v46 = vld [vmem:[#allocation7 + $0xfb8] sm:$0xf0] }
 0x4b7   :  { %4780 = vmatpush.bf16.msra.mxu3 %v11206_v51  ;;  %5750 = vmatpush.bf16.msrb.mxu1 %v11646_v23  ;;  %v12186_v51 = vor.u32 %v14075_v11, %v12185_v48  ;;  %v15470_v23 = vadd.f32 %v3348_v37, %v15435_v10  ;;  %v12089_v48 = vld [vmem:[#allocation7 + $0x1640] sm:$0xf]  ;;  %v11249_v11 = vld [vmem:[#allocation7 + $0xf98] sm:$0xf] }
 0x4b8   :  { %6727 = vmatpush.bf16.msra.mxu0 %v12282_v22  ;;  %v11790_v22 = vor.u32 %v13969_v27, %v11787_v52  ;;  %v14051_v27 = vld [vmem:[#allocation7 + $0x165c] sm:$0xf0]  ;;  %v13834_v52 = vld [vmem:[#allocation7 + $0xf9c] sm:$0xf] }
 0x4b9   :  { %6290 = vmatmul.bf16.vlgmr.msrb.gmra.mxu0 %v15447_v61  ;;  %v3350_v35 = vpop.f32.mrf.mxu3  ;;  %v11254_v62 = vor.u32 %v13834_v52, %v11251_v46  ;;  %v11121_v46 = vld [vmem:[#allocation7 + $0xe98] sm:$0xf] }
 0x4ba   :  { %4768 = vmatpush.bf16.msra.mxu2 %v11170_v18  ;;  %v11755_v18 = vld [vmem:[#allocation7 + $0x13b0] sm:$0xf0]  ;;  %v13810_v35 = vld [vmem:[#allocation7 + $0xedc] sm:$0xf] }
 0x4bb   :  { %4781 = vmatpush.bf16.msra.mxu3 %v11174_v36  ;;  %5751 = vmatpush.bf16.msrb.mxu1 %v11614_v15  ;;  %v5297_v36 = vpop.f32.mrf.mxu0  ;;  %v13784_v15 = vld [vmem:[#allocation7 + $0xe0c] sm:$0xf]  ;;  %v11758_v14 = vor.u32 %v13961_v44, %v11755_v18  ;;  %v11659_v44 = vld [vmem:[#allocation7 + $0x12f0] sm:$0xf0]  ;;  %v12297_v18 = vld [vmem:[#allocation7 + $0x17d0] sm:$0xf] }
 0x4bc   :  { %6728 = vmatpush.bf16.msra.mxu0 %v12250_v17  ;;  %v11043_v17 = vld [vmem:[#allocation7 + $0xe28] sm:$0xf0]  ;;  %v15474_v10 = vadd.f32 %v5297_v36, %v15438_v47  ;;  %v3337_v47 = vpop.f32.mrf.mxu2 }
 0x4bd   :  { %v11153_v47 = vld [vmem:[#allocation7 + $0xed8] sm:$0xf] }
 0x4be   :  { %4769 = vmatpush.bf16.msra.mxu2 %v11138_v26  ;;  %v11283_v26 = vld [vmem:[#allocation7 + $0xff8] sm:$0xf0] }
 0x4bf   :  { %4782 = vmatpush.bf16.msra.mxu3 %v11142_v20  ;;  %5752 = vmatpush.bf16.msrb.mxu1 %v11582_v58  ;;  %v11042_v20 = vor.u32 %v13788_v8, %v11041_v39  ;;  %v11046_v58 = vor.u32 %v13784_v15, %v11043_v17  ;;  %v11286_v60 = vor.u32 %v13842_v57, %v11283_v26  ;;  %v14101_v39 = vld [vmem:[#allocation7 + $0x17ec] sm:$0xf0]  ;;  %v11185_v17 = vld [vmem:[#allocation7 + $0xf18] sm:$0xf]  ;;  %v13929_v57 = vld [vmem:[#allocation7 + $0x1294] sm:$0xf] }
 0x4c0   :  { %6729 = vmatpush.bf16.msra.mxu0 %v12218_v50  ;;  %v11282_v50 = vor.u32 %v13846_v6, %v11281_v25  ;;  %v12058_v8 = vor.u32 %v14043_v55, %v12057_v9  ;;  %v11222_v15 = vor.u32 %v13826_v49, %v11219_v30  ;;  %v12298_v6 = vor.u32 %v14101_v39, %v12297_v18  ;;  %v11627_v26 = vld [vmem:[#allocation7 + $0x12b0] sm:$0xf0]  ;;  %v11123_v9 = vld [vmem:[#allocation7 + $0xeb8] sm:$0xf0]  ;;  %v14077_v55 = vld [vmem:[#allocation7 + $0x172c] sm:$0xf0] }
 0x4c2   :  { %4770 = vmatpush.bf16.msra.mxu2 %v11106_v13  ;;  %v13838_v13 = vld [vmem:[#allocation7 + $0xfb4] sm:$0xf0] }
 0x4c3   :  { %4783 = vmatpush.bf16.msra.mxu3 %v11110_v42  ;;  %5753 = vmatpush.bf16.msrb.mxu1 %v11550_v3  ;;  %v13945_v42 = vld [vmem:[#allocation7 + $0x1314] sm:$0xf]  ;;  %v5299_v7 = vpop.f32.mrf.mxu0  ;;  %v11250_v37 = vor.u32 %v13838_v13, %v11249_v11  ;;  %v846_v3 = vadd.f32 %v15222_v54, %v781_v56  ;;  %v12233_v11 = vld [vmem:[#allocation7 + $0x1750] sm:$0xf] }
 0x4c4   :  { %6730 = vmatpush.bf16.msra.mxu0 %v12186_v51  ;;  %v12090_v51 = vor.u32 %v14051_v27, %v12089_v48  ;;  %v11694_v5 = vor.u32 %v13945_v42, %v11691_v31  ;;  %v11595_v48 = vld [vmem:[#allocation7 + $0x1270] sm:$0xf0]  ;;  %v14085_v13 = vld [vmem:[#allocation7 + $0x176c] sm:$0xf0]  ;;  %v13806_v42 = vld [vmem:[#allocation7 + $0xeb4] sm:$0xf0] }
 0x4c5   :  { %v871_v36 = vmax.f32 %v846_v3, 0.0  ;;  %v12234_v7 = vor.u32 %v14085_v13, %v12233_v11  ;;  %v13913_v3 = vld [vmem:[#allocation7 + $0x1214] sm:$0xf]  ;;  %v14015_v11 = vld [vmem:[#allocation7 + $0x1544] sm:$0xf] }
 0x4c6   :  { %4771 = vmatpush.bf16.msra.mxu2 %v11074_v59  ;;  %5754 = vmatmul.bf16.vlgmr.msrb.gmra.mxu1 %v15412_v43  ;;  %v13937_v59 = vld [vmem:[#allocation7 + $0x12d4] sm:$0xf]  ;;  %v11963_v13 = vld [vmem:[#allocation7 + $0x1560] sm:$0xf0] }
 0x4c7   :  { %5798 = vmatpush.bf16.msra.mxu1 %v11790_v22  ;;  %4784 = vmatpush.bf16.msra.mxu3 %v11078_v38  ;;  %v11217_v22 = vld [vmem:[#allocation7 + $0xf58] sm:$0xf]  ;;  %v4761_v38 = vpop.f32.mrf.mxu1  ;;  %v11662_v25 = vor.u32 %v13937_v59, %v11659_v44 }
 0x4c8   :  { %6731 = vmatpush.bf16.msra.mxu0 %v12154_v12  ;;  %v11218_v54 = vor.u32 %v13830_v4, %v11217_v22  ;;  %v13822_v12 = vld [vmem:[#allocation7 + $0xf34] sm:$0xf0]  ;;  %v15483_v19 = vadd.f32 %v4761_v38, %v15445_v1  ;;  %v11630_v1 = vor.u32 %v13929_v57, %v11627_v26  ;;  %v11122_v22 = vor.u32 %v13806_v42, %v11121_v46  ;;  %v14031_v4 = vld [vmem:[#allocation7 + $0x15c4] sm:$0xf]  ;;  %v13794_v38 = vld [vmem:[#allocation7 + $0xe5c] sm:$0xf] }
 0x4c9   :  { %v11186_v41 = vor.u32 %v13822_v12, %v11185_v17  ;;  %v11089_v59 = vld [vmem:[#allocation7 + $0xe58] sm:$0xf]  ;;  %v12169_v12 = vld [vmem:[#allocation7 + $0x16d0] sm:$0xf] }
 0x4ca   :  { %4772 = vmatpush.bf16.msra.mxu2 %v11042_v20  ;;  %v14093_v20 = vld [vmem:[#allocation7 + $0x17ac] sm:$0xf0]  ;;  %v13798_v44 = vld [vmem:[#allocation7 + $0xe74] sm:$0xf0] }
 0x4cb   :  { %5799 = vmatpush.bf16.msra.mxu1 %v11758_v14  ;;  %4785 = vmatpush.bf16.msra.mxu3 %v11046_v58  ;;  %v13818_v14 = vld [vmem:[#allocation7 + $0xf1c] sm:$0xf]  ;;  %v13814_v58 = vld [vmem:[#allocation7 + $0xef4] sm:$0xf0]  ;;  %v12266_v56 = vor.u32 %v14093_v20, %v12265_v40 }
 0x4cc   :  { %6732 = vmatpush.bf16.msra.mxu0 %v12122_v32  ;;  %v11190_v45 = vor.u32 %v13818_v14, %v11187_v63  ;;  %v11155_v32 = vld [vmem:[#allocation7 + $0xef8] sm:$0xf0]  ;;  %v14023_v14 = vld [vmem:[#allocation7 + $0x1584] sm:$0xf]  ;;  %v11057_v57 = vld [vmem:[#allocation7 + $0xe18] sm:$0xf] }
 0x4cd   :  { %4773 = vmatmul.bf16.vlgmr.msra.gmra.mxu2 %v15332_v21  ;;  %v11158_v52 = vor.u32 %v13810_v35, %v11155_v32  ;;  %v11995_v63 = vld [vmem:[#allocation7 + $0x15a0] sm:$0xf0]  ;;  %v13790_v40 = vld [vmem:[#allocation7 + $0xe34] sm:$0xf0]  ;;  %v13786_v20 = vld [vmem:[#allocation7 + $0xe1c] sm:$0xf] }
 0x4ce   :  { %4817 = vmatpush.bf16.msrb.mxu2 %v11282_v50  ;;  %4786 = vmatmul.bf16.vlgmr.msra.gmra.mxu3 %v15332_v21  ;;  %v15485_v50 = vpack.c.bf16 %v871_v36, %v871_v36  ;;  %v14061_v35 = vld [vmem:[#allocation7 + $0x16ac] sm:$0xf0]  ;;  %v13904_v32 = vld [vmem:[#allocation7 + $0x11cc] sm:$0xf] }
 0x4cf   :  { %4830 = vmatpush.bf16.msrb.mxu3 %v11286_v60  ;;  %5800 = vmatpush.bf16.msra.mxu1 %v11726_v53  ;;  %v13921_v60 = vld [vmem:[#allocation7 + $0x1254] sm:$0xf]  ;;  %v11154_v53 = vor.u32 %v13814_v58, %v11153_v47  ;;  %v4763_v27 = vpop.f32.mrf.mxu1  ;;  %v12137_v47 = vld [vmem:[#allocation7 + $0x1690] sm:$0xf]  ;;  %v11521_v58 = vld [vmem:[#allocation7 + $0x11c8] sm:$0xf] }
 0x4d0   :  { %6733 = vmatpush.bf16.msra.mxu0 %v12090_v51  ;;  %v11598_v31 = vor.u32 %v13921_v60, %v11595_v48  ;;  %v11563_v51 = vld [vmem:[#allocation7 + $0x1230] sm:$0xf0]  ;;  %v3780_v49 = vpop.f32.mrf.mxu2  ;;  %v11523_v60 = vld [vmem:[#allocation7 + $0x11e8] sm:$0xf0]  ;;  %v11058_v48 = vor.u32 %v13790_v40, %v11057_v57  ;;  %v12138_v46 = vor.u32 %v14061_v35, %v12137_v47  ;;  %v13884_v40 = vld [vmem:[#allocation7 + $0x1124] sm:$0xf0] }
 0x4d1   :  { %v15489_v18 = vadd.f32 %v3780_v49, %v15451_v0  ;;  %v3793_v39 = vpop.f32.mrf.mxu3  ;;  %v11526_v42 = vor.u32 %v13904_v32, %v11523_v60  ;;  %v12073_v49 = vld [vmem:[#allocation7 + $0x1610] sm:$0xf]  ;;  %v13880_v47 = vld [vmem:[#allocation7 + $0x110c] sm:$0xf]  ;;  %v14155_v35 = vld [vmem:[#allocation7 + $0x199c] sm:$0xf0] }
 0x4d2   :  { %4818 = vmatpush.bf16.msrb.mxu2 %v11250_v37  ;;  %v13802_v37 = vld [vmem:[#allocation7 + $0xe9c] sm:$0xf] }
 0x4d3   :  { %4831 = vmatpush.bf16.msrb.mxu3 %v11254_v62  ;;  %5801 = vmatpush.bf16.msra.mxu1 %v11694_v5  ;;  %v12201_v62 = vld [vmem:[#allocation7 + $0x1710] sm:$0xf]  ;;  %v12027_v5 = vld [vmem:[#allocation7 + $0x15e0] sm:$0xf0]  ;;  %v11126_v30 = vor.u32 %v13802_v37, %v11123_v9  ;;  %v13900_v37 = vld [vmem:[#allocation7 + $0x11a4] sm:$0xf0]  ;;  %v11966_v9 = vor.u32 %v14015_v11, %v11963_v13 }
 0x4d4   :  { %6734 = vmatpush.bf16.msra.mxu0 %v12058_v8  ;;  %v12202_v36 = vor.u32 %v14077_v55, %v12201_v62  ;;  %v11091_v8 = vld [vmem:[#allocation7 + $0xe78] sm:$0xf0]  ;;  %v12030_v17 = vor.u32 %v14031_v4, %v12027_v5  ;;  %v11491_v62 = vld [vmem:[#allocation7 + $0x11a8] sm:$0xf0]  ;;  %v14007_v55 = vld [vmem:[#allocation7 + $0x1504] sm:$0xf] }
 0x4d5   :  { %v11094_v0 = vor.u32 %v13794_v38, %v11091_v8  ;;  %v13888_v38 = vld [vmem:[#allocation7 + $0x114c] sm:$0xf]  ;;  %v13876_v11 = vld [vmem:[#allocation7 + $0x10e4] sm:$0xf0] }
 0x4d6   :  { %4819 = vmatpush.bf16.msrb.mxu2 %v11218_v54  ;;  %v11566_v54 = vor.u32 %v13913_v3, %v11563_v51  ;;  %v5742_v26 = vpop.f32.mrf.mxu0  ;;  %v14053_v3 = vld [vmem:[#allocation7 + $0x166c] sm:$0xf0]  ;;  %v13896_v51 = vld [vmem:[#allocation7 + $0x118c] sm:$0xf] }
 0x4d7   :  { %4832 = vmatpush.bf16.msrb.mxu3 %v11222_v15  ;;  %5802 = vmatpush.bf16.msra.mxu1 %v11662_v25  ;;  %v15492_v15 = vadd.f32 %v3793_v39, %v15454_v16  ;;  %v14069_v25 = vld [vmem:[#allocation7 + $0x16ec] sm:$0xf0]  ;;  %v11457_v39 = vld [vmem:[#allocation7 + $0x1148] sm:$0xf]  ;;  %v11459_v8 = vld [vmem:[#allocation7 + $0x1168] sm:$0xf0] }
 0x4d8   :  { %6779 = vmatpush.bf16.msrb.mxu0 %v12298_v6  ;;  %v11090_v6 = vor.u32 %v13798_v44, %v11089_v59  ;;  %v12170_v16 = vor.u32 %v14069_v25, %v12169_v12  ;;  %v11494_v59 = vor.u32 %v13896_v51, %v11491_v62  ;;  %v14045_v44 = vld [vmem:[#allocation7 + $0x162c] sm:$0xf0]  ;;  %v11899_v12 = vld [vmem:[#allocation7 + $0x14e0] sm:$0xf0]  ;;  %v12537_v25 = vld [vmem:[#allocation7 + $0x19c0] sm:$0xf] }
 0x4d9   :  { %6735 = vmatmul.bf16.vlgmr.msra.gmra.mxu0 %v15485_v50  ;;  %v12074_v57 = vor.u32 %v14045_v44, %v12073_v49  ;;  %v12441_v49 = vld [vmem:[#allocation7 + $0x1900] sm:$0xf]  ;;  %v14033_v44 = vld [vmem:[#allocation7 + $0x15d4] sm:$0xf] }
 0x4da   :  { %4820 = vmatpush.bf16.msrb.mxu2 %v11186_v41  ;;  %v11059_v41 = vld [vmem:[#allocation7 + $0xe38] sm:$0xf0] }
 0x4db   :  { %4833 = vmatpush.bf16.msrb.mxu3 %v11190_v45  ;;  %5803 = vmatpush.bf16.msra.mxu1 %v11630_v1  ;;  %v15495_v45 = vadd.f32 %v5742_v26, %v15457_v28  ;;  %v13908_v1 = vld [vmem:[#allocation7 + $0x11e4] sm:$0xf0]  ;;  %v3782_v28 = vpop.f32.mrf.mxu2  ;;  %v11462_v26 = vor.u32 %v13888_v38, %v11459_v8 }
 0x4dc   :  { %6780 = vmatpush.bf16.msrb.mxu0 %v12266_v56  ;;  %v11998_v56 = vor.u32 %v14023_v14, %v11995_v63  ;;  %v11522_v27 = vor.u32 %v13908_v1, %v11521_v58  ;;  %v13991_v58 = vld [vmem:[#allocation7 + $0x1484] sm:$0xf]  ;;  %v13872_v28 = vld [vmem:[#allocation7 + $0x10cc] sm:$0xf]  ;;  %v11329_v38 = vld [vmem:[#allocation7 + $0x1048] sm:$0xf] }
 0x4dd   :  { %v11867_v1 = vld [vmem:[#allocation7 + $0x14a0] sm:$0xf0]  ;;  %v13860_v8 = vld [vmem:[#allocation7 + $0x1064] sm:$0xf0] }
 0x4de   :  { %4821 = vmatpush.bf16.msrb.mxu2 %v11154_v53  ;;  %v11062_v53 = vor.u32 %v13786_v20, %v11059_v41  ;;  %v5744_v4 = vpop.f32.mrf.mxu0 }
 0x4df   :  { %4834 = vmatpush.bf16.msrb.mxu3 %v11158_v52  ;;  %5804 = vmatpush.bf16.msra.mxu1 %v11598_v31  ;;  %v3795_v52 = vpop.f32.mrf.mxu3  ;;  %v12105_v31 = vld [vmem:[#allocation7 + $0x1650] sm:$0xf]  ;;  %v13975_v4 = vld [vmem:[#allocation7 + $0x1404] sm:$0xf] }
 0x4e0   :  { %6781 = vmatpush.bf16.msrb.mxu0 %v12234_v7  ;;  %v11489_v7 = vld [vmem:[#allocation7 + $0x1188] sm:$0xf]  ;;  %v11835_v52 = vld [vmem:[#allocation7 + $0x1460] sm:$0xf0] }
 0x4e1   :  { %v11490_v5 = vor.u32 %v13900_v37, %v11489_v7 }
 0x4e2   :  { %4822 = vmatpush.bf16.msrb.mxu2 %v11122_v22  ;;  %v11931_v22 = vld [vmem:[#allocation7 + $0x1520] sm:$0xf0] }
 0x4e3   :  { %4835 = vmatpush.bf16.msrb.mxu3 %v11126_v30  ;;  %5805 = vmatpush.bf16.msra.mxu1 %v11566_v54  ;;  %v12106_v30 = vor.u32 %v14053_v3, %v12105_v31  ;;  %v13892_v54 = vld [vmem:[#allocation7 + $0x1164] sm:$0xf0]  ;;  %v4813_v63 = vpop.f32.mrf.mxu1 }
 0x4e4   :  { %6782 = vmatpush.bf16.msrb.mxu0 %v12202_v36  ;;  %v11934_v36 = vor.u32 %v14007_v55, %v11931_v22  ;;  %v11458_v14 = vor.u32 %v13892_v54, %v11457_v39  ;;  %v15501_v20 = vadd.f32 %v4813_v63, %v15463_v33  ;;  %v11870_v33 = vor.u32 %v13991_v58, %v11867_v1  ;;  %v13868_v3 = vld [vmem:[#allocation7 + $0x10a4] sm:$0xf0]  ;;  %v13864_v55 = vld [vmem:[#allocation7 + $0x108c] sm:$0xf]  ;;  %v12043_v39 = vld [vmem:[#allocation7 + $0x15f0] sm:$0xf0] }
 0x4e5   :  { %v11363_v22 = vld [vmem:[#allocation7 + $0x10a8] sm:$0xf0]  ;;  %v13852_v1 = vld [vmem:[#allocation7 + $0x1024] sm:$0xf0] }
 0x4e6   :  { %4823 = vmatpush.bf16.msrb.mxu2 %v11090_v6  ;;  %5806 = vmatmul.bf16.vlgmr.msra.gmra.mxu1 %v15412_v43  ;;  %v14163_v6 = vld [vmem:[#allocation7 + $0x19dc] sm:$0xf0]  ;;  %v11331_v63 = vld [vmem:[#allocation7 + $0x1068] sm:$0xf0] }
 0x4e7   :  { %6243 = vmatpush.bf16.msrb.mxu1 %v12030_v17  ;;  %4836 = vmatpush.bf16.msrb.mxu3 %v11094_v0  ;;  %v13999_v17 = vld [vmem:[#allocation7 + $0x14c4] sm:$0xf]  ;;  %v11425_v0 = vld [vmem:[#allocation7 + $0x1108] sm:$0xf] }
 0x4e8   :  { %6783 = vmatpush.bf16.msrb.mxu0 %v12170_v16  ;;  %v11902_v41 = vor.u32 %v13999_v17, %v11899_v12  ;;  %v12538_v16 = vor.u32 %v14163_v6, %v12537_v25  ;;  %v11426_v32 = vor.u32 %v13884_v40, %v11425_v0  ;;  %v12409_v0 = vld [vmem:[#allocation7 + $0x18c0] sm:$0xf] }
 0x4e9   :  { %v14131_v40 = vld [vmem:[#allocation7 + $0x18dc] sm:$0xf0] }
 0x4ea   :  { %4824 = vmatpush.bf16.msrb.mxu2 %v11058_v48  ;;  %v11393_v48 = vld [vmem:[#allocation7 + $0x10c8] sm:$0xf] }
 0x4eb   :  { %6244 = vmatpush.bf16.msrb.mxu1 %v11998_v56  ;;  %4837 = vmatpush.bf16.msrb.mxu3 %v11062_v53  ;;  %v12505_v56 = vld [vmem:[#allocation7 + $0x1980] sm:$0xf]  ;;  %v11395_v53 = vld [vmem:[#allocation7 + $0x10e8] sm:$0xf0]  ;;  %v11394_v31 = vor.u32 %v13876_v11, %v11393_v48  ;;  %v4815_v7 = vpop.f32.mrf.mxu1  ;;  %v11537_v48 = vld [vmem:[#allocation7 + $0x11d8] sm:$0xf] }
 0x4ec   :  { %6784 = vmatpush.bf16.msrb.mxu0 %v12138_v46  ;;  %v12506_v13 = vor.u32 %v14155_v35, %v12505_v56  ;;  %v12473_v46 = vld [vmem:[#allocation7 + $0x1940] sm:$0xf]  ;;  %v11398_v37 = vor.u32 %v13872_v28, %v11395_v53  ;;  %v13848_v56 = vld [vmem:[#allocation7 + $0x100c] sm:$0xf]  ;;  %v13910_v11 = vld [vmem:[#allocation7 + $0x11f4] sm:$0xf0] }
 0x4ed   :  { %4825 = vmatmul.bf16.vlgmr.msrb.gmra.mxu2 %v15332_v21  ;;  %v11299_v35 = vld [vmem:[#allocation7 + $0x1028] sm:$0xf0]  ;;  %v13906_v28 = vld [vmem:[#allocation7 + $0x11dc] sm:$0xf] }
 0x4ee   :  { %5262 = vmatpush.bf16.msra.mxu2 %v11522_v27  ;;  %4838 = vmatmul.bf16.vlgmr.msrb.gmra.mxu3 %v15332_v21  ;;  %v11427_v21 = vld [vmem:[#allocation7 + $0x1128] sm:$0xf0]  ;;  %v13983_v27 = vld [vmem:[#allocation7 + $0x1444] sm:$0xf]  ;;  %v11539_v53 = vld [vmem:[#allocation7 + $0x11f8] sm:$0xf0] }
 0x4ef   :  { %5275 = vmatpush.bf16.msra.mxu3 %v11526_v42  ;;  %6245 = vmatpush.bf16.msrb.mxu1 %v11966_v9  ;;  %v11430_v60 = vor.u32 %v13880_v47, %v11427_v21  ;;  %v14147_v42 = vld [vmem:[#allocation7 + $0x195c] sm:$0xf0]  ;;  %v11361_v9 = vld [vmem:[#allocation7 + $0x1088] sm:$0xf]  ;;  %v11838_v51 = vor.u32 %v13983_v27, %v11835_v52  ;;  %v12011_v47 = vld [vmem:[#allocation7 + $0x15b0] sm:$0xf0] }
 0x4f0   :  { %6785 = vmatpush.bf16.msrb.mxu0 %v12106_v30  ;;  %v12474_v62 = vor.u32 %v14147_v42, %v12473_v46  ;;  %v14139_v30 = vld [vmem:[#allocation7 + $0x191c] sm:$0xf0]  ;;  %v3832_v54 = vpop.f32.mrf.mxu2  ;;  %v11297_v21 = vld [vmem:[#allocation7 + $0x1008] sm:$0xf]  ;;  %v14017_v52 = vld [vmem:[#allocation7 + $0x1554] sm:$0xf]  ;;  %v11302_v42 = vor.u32 %v13848_v56, %v11299_v35 }
 0x4f1   :  { %v15505_v17 = vadd.f32 %v3832_v54, %v15467_v2  ;;  %v3845_v12 = vpop.f32.mrf.mxu3  ;;  %v12442_v6 = vor.u32 %v14139_v30, %v12441_v49  ;;  %v11298_v27 = vor.u32 %v13852_v1, %v11297_v21  ;;  %v11979_v46 = vld [vmem:[#allocation7 + $0x1570] sm:$0xf0]  ;;  %v13886_v1 = vld [vmem:[#allocation7 + $0x1134] sm:$0xf0] }
 0x4f2   :  { %5263 = vmatpush.bf16.msra.mxu2 %v11490_v5  ;;  %v11803_v5 = vld [vmem:[#allocation7 + $0x1420] sm:$0xf0]  ;;  %v14009_v49 = vld [vmem:[#allocation7 + $0x1514] sm:$0xf] }
 0x4f3   :  { %5276 = vmatpush.bf16.msra.mxu3 %v11494_v59  ;;  %6246 = vmatpush.bf16.msrb.mxu1 %v11934_v36  ;;  %v11362_v59 = vor.u32 %v13868_v3, %v11361_v9  ;;  %v11366_v36 = vor.u32 %v13864_v55, %v11363_v22  ;;  %v11806_v25 = vor.u32 %v13975_v4, %v11803_v5  ;;  %v12345_v3 = vld [vmem:[#allocation7 + $0x1840] sm:$0xf]  ;;  %v13898_v4 = vld [vmem:[#allocation7 + $0x119c] sm:$0xf]  ;;  %v11947_v30 = vld [vmem:[#allocation7 + $0x1530] sm:$0xf0] }
 0x4f4   :  { %6786 = vmatpush.bf16.msrb.mxu0 %v12074_v57  ;;  %v15508_v57 = vadd.f32 %v3845_v12, %v15470_v23  ;;  %v12410_v23 = vor.u32 %v14131_v40, %v12409_v0  ;;  %v11542_v9 = vor.u32 %v13906_v28, %v11539_v53  ;;  %v11982_v55 = vor.u32 %v14017_v52, %v11979_v46  ;;  %v14115_v22 = vld [vmem:[#allocation7 + $0x185c] sm:$0xf0]  ;;  %v11507_v5 = vld [vmem:[#allocation7 + $0x11b8] sm:$0xf0]  ;;  %v13894_v12 = vld [vmem:[#allocation7 + $0x1174] sm:$0xf0] }
 0x4f5   :  { %v12346_v54 = vor.u32 %v14115_v22, %v12345_v3  ;;  %v12553_v0 = vld [vmem:[#allocation7 + $0x19d0] sm:$0xf]  ;;  %v13878_v52 = vld [vmem:[#allocation7 + $0x10f4] sm:$0xf0] }
 0x4f6   :  { %5264 = vmatpush.bf16.msra.mxu2 %v11458_v14  ;;  %v13856_v14 = vld [vmem:[#allocation7 + $0x104c] sm:$0xf]  ;;  %v5794_v58 = vpop.f32.mrf.mxu0  ;;  %v14165_v40 = vld [vmem:[#allocation7 + $0x19ec] sm:$0xf0]  ;;  %v11377_v22 = vld [vmem:[#allocation7 + $0x1098] sm:$0xf] }
 0x4f7   :  { %5277 = vmatpush.bf16.msra.mxu3 %v11462_v26  ;;  %6247 = vmatpush.bf16.msrb.mxu1 %v11902_v41  ;;  %v12046_v26 = vor.u32 %v14033_v44, %v12043_v39  ;;  %v11330_v41 = vor.u32 %v13860_v8, %v11329_v38  ;;  %v11334_v2 = vor.u32 %v13856_v14, %v11331_v63  ;;  %v12313_v39 = vld [vmem:[#allocation7 + $0x1800] sm:$0xf]  ;;  %v11473_v8 = vld [vmem:[#allocation7 + $0x1158] sm:$0xf]  ;;  %v11475_v14 = vld [vmem:[#allocation7 + $0x1178] sm:$0xf0] }
 0x4f8   :  { %7224 = vmatpush.bf16.msra.mxu0 %v12538_v16  ;;  %v14025_v16 = vld [vmem:[#allocation7 + $0x1594] sm:$0xf]  ;;  %v14107_v38 = vld [vmem:[#allocation7 + $0x181c] sm:$0xf0]  ;;  %v14157_v28 = vld [vmem:[#allocation7 + $0x19ac] sm:$0xf0] }
 0x4f9   :  { %6787 = vmatmul.bf16.vlgmr.msrb.gmra.mxu0 %v15485_v50  ;;  %v3847_v7 = vpop.f32.mrf.mxu3  ;;  %v14001_v63 = vld [vmem:[#allocation7 + $0x14d4] sm:$0xf]  ;;  %v12314_v21 = vor.u32 %v14107_v38, %v12313_v39  ;;  %v14149_v3 = vld [vmem:[#allocation7 + $0x196c] sm:$0xf0] }
 0x4fa   :  { %5265 = vmatpush.bf16.msra.mxu2 %v11426_v32  ;;  %v15511_v32 = vadd.f32 %v5794_v58, %v15474_v10  ;;  %v3834_v10 = vpop.f32.mrf.mxu2  ;;  %v13985_v7 = vld [vmem:[#allocation7 + $0x1454] sm:$0xf] }
 0x4fb   :  { %5278 = vmatpush.bf16.msra.mxu3 %v11430_v60  ;;  %6248 = vmatpush.bf16.msrb.mxu1 %v11870_v33  ;;  %v12377_v60 = vld [vmem:[#allocation7 + $0x1880] sm:$0xf]  ;;  %v12014_v33 = vor.u32 %v14025_v16, %v12011_v47  ;;  %v872_v16 = vmax.f32 %v15232_v24, 0.0  ;;  %v11819_v39 = vld [vmem:[#allocation7 + $0x1430] sm:$0xf0] }
 0x4fc   :  { %7225 = vmatpush.bf16.msra.mxu0 %v12506_v13  ;;  %v14123_v13 = vld [vmem:[#allocation7 + $0x189c] sm:$0xf0] }
 0x4fd   :  { %v15520_v46 = vpack.c.bf16 %v872_v16, %v872_v16  ;;  %v13858_v16 = vld [vmem:[#allocation7 + $0x105c] sm:$0xf] }
 0x4fe   :  { %5266 = vmatpush.bf16.msra.mxu2 %v11394_v31  ;;  %v11538_v31 = vor.u32 %v13910_v11, %v11537_v48  ;;  %v11443_v48 = vld [vmem:[#allocation7 + $0x1138] sm:$0xf0]  ;;  %v13993_v11 = vld [vmem:[#allocation7 + $0x1494] sm:$0xf] }
 0x4ff   :  { %5279 = vmatpush.bf16.msra.mxu3 %v11398_v37  ;;  %6249 = vmatpush.bf16.msrb.mxu1 %v11838_v51  ;;  %v12378_v37 = vor.u32 %v14123_v13, %v12377_v60  ;;  %v11505_v51 = vld [vmem:[#allocation7 + $0x1198] sm:$0xf]  ;;  %v13882_v60 = vld [vmem:[#allocation7 + $0x111c] sm:$0xf]  ;;  %v12521_v13 = vld [vmem:[#allocation7 + $0x1990] sm:$0xf] }
 0x500   :  { %7226 = vmatpush.bf16.msra.mxu0 %v12474_v62  ;;  %v13902_v62 = vld [vmem:[#allocation7 + $0x11b4] sm:$0xf0]  ;;  %v11446_v53 = vor.u32 %v13882_v60, %v11443_v48  ;;  %v12522_v10 = vor.u32 %v14157_v28, %v12521_v13  ;;  %v12251_v60 = vld [vmem:[#allocation7 + $0x17a0] sm:$0xf0]  ;;  %v13850_v13 = vld [vmem:[#allocation7 + $0x101c] sm:$0xf] }
 0x501   :  { %v11506_v44 = vor.u32 %v13902_v62, %v11505_v51  ;;  %v11313_v48 = vld [vmem:[#allocation7 + $0x1018] sm:$0xf]  ;;  %v11315_v28 = vld [vmem:[#allocation7 + $0x1038] sm:$0xf0] }
 0x502   :  { %5267 = vmatpush.bf16.msra.mxu2 %v11362_v59  ;;  %v5796_v59 = vpop.f32.mrf.mxu0 }
 0x503   :  { %5280 = vmatpush.bf16.msra.mxu3 %v11366_v36  ;;  %6250 = vmatpush.bf16.msrb.mxu1 %v11806_v25  ;;  %v11510_v36 = vor.u32 %v13898_v4, %v11507_v5  ;;  %v11950_v25 = vor.u32 %v14009_v49, %v11947_v30  ;;  %v5258_v47 = vpop.f32.mrf.mxu1  ;;  %v13870_v4 = vld [vmem:[#allocation7 + $0x10b4] sm:$0xf0]  ;;  %v13866_v30 = vld [vmem:[#allocation7 + $0x109c] sm:$0xf] }
 0x504   :  { %7227 = vmatpush.bf16.msra.mxu0 %v12442_v6  ;;  %v13890_v6 = vld [vmem:[#allocation7 + $0x115c] sm:$0xf]  ;;  %v15518_v56 = vadd.f32 %v5258_v47, %v15483_v19  ;;  %v11378_v38 = vor.u32 %v13870_v4, %v11377_v22  ;;  %v12361_v4 = vld [vmem:[#allocation7 + $0x1850] sm:$0xf] }
 0x505   :  { %v11478_v58 = vor.u32 %v13890_v6, %v11475_v14  ;;  %v11379_v59 = vld [vmem:[#allocation7 + $0x10b8] sm:$0xf0]  ;;  %v11345_v14 = vld [vmem:[#allocation7 + $0x1058] sm:$0xf] }
 0x506   :  { %5268 = vmatpush.bf16.msra.mxu2 %v11330_v41  ;;  %6251 = vmatmul.bf16.vlgmr.msrb.gmra.mxu1 %v15447_v61  ;;  %v11474_v41 = vor.u32 %v13894_v12, %v11473_v8  ;;  %v14095_v8 = vld [vmem:[#allocation7 + $0x17c4] sm:$0xf]  ;;  %v11382_v6 = vor.u32 %v13866_v30, %v11379_v59  ;;  %v11347_v47 = vld [vmem:[#allocation7 + $0x1078] sm:$0xf0]  ;;  %v14117_v59 = vld [vmem:[#allocation7 + $0x186c] sm:$0xf0] }
 0x507   :  { %6295 = vmatpush.bf16.msra.mxu1 %v12046_v26  ;;  %5281 = vmatpush.bf16.msra.mxu3 %v11334_v2  ;;  %v11915_v26 = vld [vmem:[#allocation7 + $0x14f0] sm:$0xf0]  ;;  %v11441_v2 = vld [vmem:[#allocation7 + $0x1118] sm:$0xf]  ;;  %v12283_v12 = vld [vmem:[#allocation7 + $0x17e0] sm:$0xf0] }
 0x508   :  { %7228 = vmatpush.bf16.msra.mxu0 %v12410_v23  ;;  %v11918_v35 = vor.u32 %v14001_v63, %v11915_v26  ;;  %v12554_v23 = vor.u32 %v14165_v40, %v12553_v0  ;;  %v11442_v24 = vor.u32 %v13886_v1, %v11441_v2  ;;  %v13862_v63 = vld [vmem:[#allocation7 + $0x1074] sm:$0xf0]  ;;  %v12425_v2 = vld [vmem:[#allocation7 + $0x18d0] sm:$0xf] }
 0x509   :  { %v14133_v1 = vld [vmem:[#allocation7 + $0x18ec] sm:$0xf0] }
 0x50a   :  { %5269 = vmatpush.bf16.msra.mxu2 %v11298_v27  ;;  %v11409_v27 = vld [vmem:[#allocation7 + $0x10d8] sm:$0xf] }
 0x50b   :  { %6296 = vmatpush.bf16.msra.mxu1 %v12014_v33  ;;  %5282 = vmatpush.bf16.msra.mxu3 %v11302_v42  ;;  %v11883_v33 = vld [vmem:[#allocation7 + $0x14b0] sm:$0xf0]  ;;  %v13874_v42 = vld [vmem:[#allocation7 + $0x10dc] sm:$0xf]  ;;  %v11410_v51 = vor.u32 %v13878_v52, %v11409_v27  ;;  %v5260_v62 = vpop.f32.mrf.mxu1  ;;  %v13972_v27 = vld [vmem:[#allocation7 + $0x13e4] sm:$0xf0] }
 0x50c   :  { %7229 = vmatpush.bf16.msra.mxu0 %v12378_v37  ;;  %v11886_v19 = vor.u32 %v13993_v11, %v11883_v33  ;;  %v11851_v37 = vld [vmem:[#allocation7 + $0x1470] sm:$0xf0]  ;;  %v13854_v33 = vld [vmem:[#allocation7 + $0x1034] sm:$0xf0] }
 0x50d   :  { %5270 = vmatmul.bf16.vlgmr.msra.gmra.mxu2 %v15372_v29  ;;  %v11854_v5 = vor.u32 %v13985_v7, %v11851_v37  ;;  %v14079_v7 = vld [vmem:[#allocation7 + $0x1744] sm:$0xf] }
 0x50e   :  { %5314 = vmatpush.bf16.msrb.mxu2 %v11538_v31  ;;  %5283 = vmatmul.bf16.vlgmr.msra.gmra.mxu3 %v15372_v29  ;;  %v11411_v31 = vld [vmem:[#allocation7 + $0x10f8] sm:$0xf0]  ;;  %v12219_v37 = vld [vmem:[#allocation7 + $0x1760] sm:$0xf0] }
 0x50f   :  { %5327 = vmatpush.bf16.msrb.mxu3 %v11542_v9  ;;  %6297 = vmatpush.bf16.msra.mxu1 %v11982_v55  ;;  %v12489_v9 = vld [vmem:[#allocation7 + $0x1950] sm:$0xf]  ;;  %v11414_v55 = vor.u32 %v13874_v42, %v11411_v31  ;;  %v11779_v42 = vld [vmem:[#allocation7 + $0x13e8] sm:$0xf0]  ;;  %v11314_v31 = vor.u32 %v13854_v33, %v11313_v48  ;;  %v12222_v30 = vor.u32 %v14079_v7, %v12219_v37  ;;  %v13948_v33 = vld [vmem:[#allocation7 + $0x1324] sm:$0xf0] }
 0x510   :  { %7230 = vmatpush.bf16.msra.mxu0 %v12346_v54  ;;  %v12490_v49 = vor.u32 %v14149_v3, %v12489_v9  ;;  %v12457_v54 = vld [vmem:[#allocation7 + $0x1910] sm:$0xf]  ;;  %v11318_v3 = vor.u32 %v13850_v13, %v11315_v28  ;;  %v13940_v7 = vld [vmem:[#allocation7 + $0x12e4] sm:$0xf0] }
 0x511   :  { %v4290_v0 = vpop.f32.mrf.mxu3 }
 0x512   :  { %5315 = vmatpush.bf16.msrb.mxu2 %v11506_v44  ;;  %v13977_v44 = vld [vmem:[#allocation7 + $0x1414] sm:$0xf] }
 0x513   :  { %5328 = vmatpush.bf16.msrb.mxu3 %v11510_v36  ;;  %6298 = vmatpush.bf16.msra.mxu1 %v11950_v25  ;;  %v14141_v36 = vld [vmem:[#allocation7 + $0x192c] sm:$0xf0]  ;;  %v4277_v25 = vpop.f32.mrf.mxu2  ;;  %v11822_v40 = vor.u32 %v13977_v44, %v11819_v39  ;;  %v13960_v44 = vld [vmem:[#allocation7 + $0x138c] sm:$0xf] }
 0x514   :  { %7231 = vmatpush.bf16.msra.mxu0 %v12314_v21  ;;  %v15524_v26 = vadd.f32 %v4277_v25, %v15489_v18  ;;  %v15527_v21 = vadd.f32 %v4290_v0, %v15492_v15  ;;  %v11350_v18 = vor.u32 %v13858_v16, %v11347_v47  ;;  %v12393_v15 = vld [vmem:[#allocation7 + $0x1890] sm:$0xf]  ;;  %v11747_v39 = vld [vmem:[#allocation7 + $0x13a8] sm:$0xf0]  ;;  %v12362_v25 = vor.u32 %v14117_v59, %v12361_v4  ;;  %v13956_v0 = vld [vmem:[#allocation7 + $0x1364] sm:$0xf0] }
 0x515   :  { %v11715_v16 = vld [vmem:[#allocation7 + $0x1368] sm:$0xf0]  ;;  %v14063_v47 = vld [vmem:[#allocation7 + $0x16c4] sm:$0xf]  ;;  %v13932_v59 = vld [vmem:[#allocation7 + $0x12a4] sm:$0xf0] }
 0x516   :  { %5316 = vmatpush.bf16.msrb.mxu2 %v11474_v41  ;;  %v12458_v41 = vor.u32 %v14141_v36, %v12457_v54  ;;  %v15529_v11 = vpop.f32.mrf.mxu0  ;;  %v14071_v54 = vld [vmem:[#allocation7 + $0x1704] sm:$0xf] }
 0x517   :  { %5329 = vmatpush.bf16.msrb.mxu3 %v11478_v58  ;;  %6299 = vmatpush.bf16.msra.mxu1 %v11918_v35  ;;  %v12286_v58 = vor.u32 %v14095_v8, %v12283_v12  ;;  %v11346_v35 = vor.u32 %v13862_v63, %v11345_v14  ;;  %v12187_v36 = vld [vmem:[#allocation7 + $0x1720] sm:$0xf0]  ;;  %v12329_v12 = vld [vmem:[#allocation7 + $0x1810] sm:$0xf]  ;;  %v11713_v63 = vld [vmem:[#allocation7 + $0x1348] sm:$0xf] }
 0x518   :  { %7276 = vmatpush.bf16.msrb.mxu0 %v12554_v23  ;;  %v14087_v23 = vld [vmem:[#allocation7 + $0x1784] sm:$0xf]  ;;  %v14109_v14 = vld [vmem:[#allocation7 + $0x182c] sm:$0xf0] }
 0x519   :  { %7232 = vmatmul.bf16.vlgmr.msra.gmra.mxu0 %v15520_v46  ;;  %v12254_v52 = vor.u32 %v14087_v23, %v12251_v60  ;;  %v4292_v62 = vpop.f32.mrf.mxu3  ;;  %v12330_v60 = vor.u32 %v14109_v14, %v12329_v12  ;;  %v12697_v12 = vld [vmem:[#allocation7 + $0x1b00] sm:$0xf]  ;;  %v14097_v14 = vld [vmem:[#allocation7 + $0x17d4] sm:$0xf] }
 0x51a   :  { %5317 = vmatpush.bf16.msrb.mxu2 %v11442_v24  ;;  %v12426_v24 = vor.u32 %v14133_v1, %v12425_v2  ;;  %v12793_v2 = vld [vmem:[#allocation7 + $0x1bc0] sm:$0xf]  ;;  %v12091_v62 = vld [vmem:[#allocation7 + $0x1660] sm:$0xf0] }
 0x51b   :  { %5330 = vmatpush.bf16.msrb.mxu3 %v11446_v53  ;;  %6300 = vmatpush.bf16.msra.mxu1 %v11886_v19  ;;  %v11777_v53 = vld [vmem:[#allocation7 + $0x13c8] sm:$0xf]  ;;  %v14125_v19 = vld [vmem:[#allocation7 + $0x18ac] sm:$0xf0]  ;;  %v4279_v9 = vpop.f32.mrf.mxu2  ;;  %v14227_v1 = vld [vmem:[#allocation7 + $0x1bdc] sm:$0xf0] }
 0x51c   :  { %7277 = vmatpush.bf16.msrb.mxu0 %v12522_v10  ;;  %v13968_v10 = vld [vmem:[#allocation7 + $0x13cc] sm:$0xf] }
 0x51d   :  { %v11782_v22 = vor.u32 %v13968_v10, %v11779_v42  ;;  %v13936_v9 = vld [vmem:[#allocation7 + $0x12cc] sm:$0xf] }
 0x51e   :  { %5318 = vmatpush.bf16.msrb.mxu2 %v11410_v51  ;;  %v11778_v51 = vor.u32 %v13972_v27, %v11777_v53  ;;  %v14055_v53 = vld [vmem:[#allocation7 + $0x1684] sm:$0xf] }
 0x51f   :  { %5331 = vmatpush.bf16.msrb.mxu3 %v11414_v55  ;;  %6301 = vmatpush.bf16.msra.mxu1 %v11854_v5  ;;  %v12394_v55 = vor.u32 %v14125_v19, %v12393_v15  ;;  %v11745_v5 = vld [vmem:[#allocation7 + $0x1388] sm:$0xf]  ;;  %v13944_v15 = vld [vmem:[#allocation7 + $0x130c] sm:$0xf]  ;;  %v12123_v27 = vld [vmem:[#allocation7 + $0x16a0] sm:$0xf0] }
 0x520   :  { %7278 = vmatpush.bf16.msrb.mxu0 %v12490_v49  ;;  %v13964_v49 = vld [vmem:[#allocation7 + $0x13a4] sm:$0xf0]  ;;  %v14219_v19 = vld [vmem:[#allocation7 + $0x1b9c] sm:$0xf0] }
 0x521   :  { %v11746_v8 = vor.u32 %v13964_v49, %v11745_v5 }
 0x522   :  { %5319 = vmatpush.bf16.msrb.mxu2 %v11378_v38  ;;  %v6241_v38 = vpop.f32.mrf.mxu0 }
 0x523   :  { %5332 = vmatpush.bf16.msrb.mxu3 %v11382_v6  ;;  %6302 = vmatpush.bf16.msra.mxu1 %v11822_v40  ;;  %v11750_v6 = vor.u32 %v13960_v44, %v11747_v39  ;;  %v12190_v40 = vor.u32 %v14071_v54, %v12187_v36  ;;  %v5310_v23 = vpop.f32.mrf.mxu1  ;;  %v13928_v54 = vld [vmem:[#allocation7 + $0x128c] sm:$0xf]  ;;  %v14039_v38 = vld [vmem:[#allocation7 + $0x1604] sm:$0xf] }
 0x524   :  { %7279 = vmatpush.bf16.msrb.mxu0 %v12458_v41  ;;  %v13952_v41 = vld [vmem:[#allocation7 + $0x134c] sm:$0xf]  ;;  %v15535_v13 = vadd.f32 %v5310_v23, %v15501_v20  ;;  %v12126_v20 = vor.u32 %v14055_v53, %v12123_v27  ;;  %v12267_v53 = vld [vmem:[#allocation7 + $0x17b0] sm:$0xf0] }
 0x525   :  { %v11718_v48 = vor.u32 %v13952_v41, %v11715_v16  ;;  %v11619_v36 = vld [vmem:[#allocation7 + $0x12a8] sm:$0xf0]  ;;  %v11585_v41 = vld [vmem:[#allocation7 + $0x1248] sm:$0xf] }
 0x526   :  { %5320 = vmatpush.bf16.msrb.mxu2 %v11346_v35  ;;  %6303 = vmatmul.bf16.vlgmr.msra.gmra.mxu1 %v15447_v61  ;;  %v11714_v35 = vor.u32 %v13956_v0, %v11713_v63  ;;  %v12299_v63 = vld [vmem:[#allocation7 + $0x17f0] sm:$0xf0]  ;;  %v13924_v16 = vld [vmem:[#allocation7 + $0x1264] sm:$0xf0]  ;;  %v11587_v23 = vld [vmem:[#allocation7 + $0x1268] sm:$0xf0] }
 0x527   :  { %6740 = vmatpush.bf16.msrb.mxu1 %v12286_v58  ;;  %5333 = vmatpush.bf16.msrb.mxu3 %v11350_v18  ;;  %v12155_v58 = vld [vmem:[#allocation7 + $0x16e0] sm:$0xf0]  ;;  %v11681_v18 = vld [vmem:[#allocation7 + $0x1308] sm:$0xf] }
 0x528   :  { %7280 = vmatpush.bf16.msrb.mxu0 %v12426_v24  ;;  %v12158_v28 = vor.u32 %v14063_v47, %v12155_v58  ;;  %v12794_v24 = vor.u32 %v14227_v1, %v12793_v2  ;;  %v11682_v10 = vor.u32 %v13948_v33, %v11681_v18  ;;  %v12665_v18 = vld [vmem:[#allocation7 + $0x1ac0] sm:$0xf] }
 0x529   :  { %v14195_v33 = vld [vmem:[#allocation7 + $0x1adc] sm:$0xf0] }
 0x52a   :  { %5321 = vmatpush.bf16.msrb.mxu2 %v11314_v31  ;;  %v11649_v31 = vld [vmem:[#allocation7 + $0x12c8] sm:$0xf] }
 0x52b   :  { %6741 = vmatpush.bf16.msrb.mxu1 %v12254_v52  ;;  %5334 = vmatpush.bf16.msrb.mxu3 %v11318_v3  ;;  %v12761_v52 = vld [vmem:[#allocation7 + $0x1b80] sm:$0xf]  ;;  %v11651_v3 = vld [vmem:[#allocation7 + $0x12e8] sm:$0xf0]  ;;  %v11650_v4 = vor.u32 %v13940_v7, %v11649_v31  ;;  %v5312_v5 = vpop.f32.mrf.mxu1  ;;  %v12666_v31 = vor.u32 %v14195_v33, %v12665_v18  ;;  %v11729_v18 = vld [vmem:[#allocation7 + $0x1358] sm:$0xf] }
 0x52c   :  { %7281 = vmatpush.bf16.msrb.mxu0 %v12394_v55  ;;  %v12762_v37 = vor.u32 %v14219_v19, %v12761_v52  ;;  %v12729_v55 = vld [vmem:[#allocation7 + $0x1b40] sm:$0xf]  ;;  %v11654_v49 = vor.u32 %v13936_v9, %v11651_v3  ;;  %v13916_v19 = vld [vmem:[#allocation7 + $0x1224] sm:$0xf0]  ;;  %v13970_v3 = vld [vmem:[#allocation7 + $0x13dc] sm:$0xf] }
 0x52d   :  { %5322 = vmatmul.bf16.vlgmr.msrb.gmra.mxu2 %v15372_v29  ;;  %v12633_v7 = vld [vmem:[#allocation7 + $0x1a80] sm:$0xf]  ;;  %v12235_v5 = vld [vmem:[#allocation7 + $0x1770] sm:$0xf0]  ;;  %v13958_v33 = vld [vmem:[#allocation7 + $0x1374] sm:$0xf0] }
 0x52e   :  { %5759 = vmatpush.bf16.msra.mxu2 %v11778_v51  ;;  %5335 = vmatmul.bf16.vlgmr.msrb.gmra.mxu3 %v15372_v29  ;;  %v11683_v29 = vld [vmem:[#allocation7 + $0x1328] sm:$0xf0]  ;;  %v14047_v51 = vld [vmem:[#allocation7 + $0x1644] sm:$0xf]  ;;  %v14187_v9 = vld [vmem:[#allocation7 + $0x1a9c] sm:$0xf0] }
 0x52f   :  { %5772 = vmatpush.bf16.msra.mxu3 %v11782_v22  ;;  %6742 = vmatpush.bf16.msrb.mxu1 %v12222_v30  ;;  %v11686_v42 = vor.u32 %v13944_v15, %v11683_v29  ;;  %v14211_v22 = vld [vmem:[#allocation7 + $0x1b5c] sm:$0xf0]  ;;  %v11617_v30 = vld [vmem:[#allocation7 + $0x1288] sm:$0xf]  ;;  %v12094_v44 = vor.u32 %v14047_v51, %v12091_v62  ;;  %v11586_v15 = vor.u32 %v13924_v16, %v11585_v41  ;;  %v14089_v29 = vld [vmem:[#allocation7 + $0x1794] sm:$0xf] }
 0x530   :  { %7282 = vmatpush.bf16.msrb.mxu0 %v12362_v25  ;;  %v12730_v39 = vor.u32 %v14211_v22, %v12729_v55  ;;  %v14203_v25 = vld [vmem:[#allocation7 + $0x1b1c] sm:$0xf0]  ;;  %v4329_v0 = vpop.f32.mrf.mxu2  ;;  %v11795_v51 = vld [vmem:[#allocation7 + $0x13f8] sm:$0xf0] }
 0x531   :  { %v15539_v47 = vadd.f32 %v4329_v0, %v15505_v17  ;;  %v4342_v58 = vpop.f32.mrf.mxu3  ;;  %v12698_v1 = vor.u32 %v14203_v25, %v12697_v12  ;;  %v11553_v17 = vld [vmem:[#allocation7 + $0x1208] sm:$0xf]  ;;  %v15797_v62 = vld [vmem:[#allocation20_spill] sm:$0xff]  ;;  %v14073_v0 = vld [vmem:[#allocation7 + $0x1714] sm:$0xf] }
 0x532   :  { %5760 = vmatpush.bf16.msra.mxu2 %v11746_v8  ;;  %v12059_v8 = vld [vmem:[#allocation7 + $0x1620] sm:$0xf0]  ;;  %v11554_v22 = vor.u32 %v13916_v19, %v11553_v17  ;;  %v13966_v12 = vld [vmem:[#allocation7 + $0x13b4] sm:$0xf0]  ;;  %v12809_v17 = vld [vmem:[#allocation7 + $0x1bd0] sm:$0xf] }
 0x533   :  { %5773 = vmatpush.bf16.msra.mxu3 %v11750_v6  ;;  %6743 = vmatpush.bf16.msrb.mxu1 %v12190_v40  ;;  %v11618_v6 = vor.u32 %v13932_v59, %v11617_v30  ;;  %v11622_v40 = vor.u32 %v13928_v54, %v11619_v36  ;;  %v12062_v2 = vor.u32 %v14039_v38, %v12059_v8  ;;  %v15798_v59 = vld [vmem:[#allocation22_spill] sm:$0xff]  ;;  %v12601_v38 = vld [vmem:[#allocation7 + $0x1a40] sm:$0xf]  ;;  %v11761_v8 = vld [vmem:[#allocation7 + $0x1398] sm:$0xf] }
 0x534   :  { %7283 = vmatpush.bf16.msrb.mxu0 %v12330_v60  ;;  %v15542_v60 = vadd.f32 %v4342_v58, %v15508_v57  ;;  %v12634_v54 = vor.u32 %v14187_v9, %v12633_v7  ;;  %v11798_v36 = vor.u32 %v13970_v3, %v11795_v51  ;;  %v11762_v16 = vor.u32 %v13966_v12, %v11761_v8  ;;  %v12569_v58 = vld [vmem:[#allocation7 + $0x1a00] sm:$0xf]  ;;  %v11697_v7 = vld [vmem:[#allocation7 + $0x1318] sm:$0xf]  ;;  %v13946_v3 = vld [vmem:[#allocation7 + $0x131c] sm:$0xf] }
 0x535   :  { %v11699_v51 = vld [vmem:[#allocation7 + $0x1338] sm:$0xf0]  ;;  %v12745_v8 = vld [vmem:[#allocation7 + $0x1b50] sm:$0xf] }
 0x536   :  { %5761 = vmatpush.bf16.msra.mxu2 %v11714_v35  ;;  %v13920_v35 = vld [vmem:[#allocation7 + $0x124c] sm:$0xf]  ;;  %v6291_v27 = vpop.f32.mrf.mxu0  ;;  %v14213_v12 = vld [vmem:[#allocation7 + $0x1b6c] sm:$0xf0] }
 0x537   :  { %5774 = vmatpush.bf16.msra.mxu3 %v11718_v48  ;;  %6744 = vmatpush.bf16.msrb.mxu1 %v12158_v28  ;;  %v12302_v48 = vor.u32 %v14097_v14, %v12299_v63  ;;  %v14376_v28 = vld [vmem:[#allocation5] ss:$0 sm:$0xff]  ;;  %v11590_v52 = vor.u32 %v13920_v35, %v11587_v23  ;;  %v15546_v57 = vadd.f32 %v6291_v27, %v15511_v32  ;;  %v14229_v27 = vld [vmem:[#allocation7 + $0x1bec] sm:$0xf0] }
 0x538   :  { %7721 = vmatpush.bf16.msra.mxu0 %v12794_v24  ;;  %v657_v24 = vadd.f32 %v14376_v28, %v15094_v34  ;;  %v13974_v34 = vld [vmem:[#allocation7 + $0x13f4] sm:$0xf0]  ;;  %v4331_v32 = vpop.f32.mrf.mxu2  ;;  %v13962_v14 = vld [vmem:[#allocation7 + $0x139c] sm:$0xf]  ;;  %v12810_v9 = vor.u32 %v14229_v27, %v12809_v17 }
 0x539   :  { %7284 = vmatmul.bf16.vlgmr.msrb.gmra.mxu0 %v15520_v46  ;;  %v11763_v63 = vld [vmem:[#allocation7 + $0x13b8] sm:$0xf0]  ;;  %v11702_v32 = vor.u32 %v13946_v3, %v11699_v51  ;;  %v14151_v3 = vld [vmem:[#allocation7 + $0x1984] sm:$0xf] }
 0x53a   :  { %5762 = vmatpush.bf16.msra.mxu2 %v11682_v10  ;;  %v13912_v10 = vld [vmem:[#allocation7 + $0x120c] sm:$0xf]  ;;  %v722_v55 = vadd.f32 %v15797_v62, %v657_v24  ;;  %v11766_v23 = vor.u32 %v13962_v14, %v11763_v63  ;;  %v13954_v24 = vld [vmem:[#allocation7 + $0x135c] sm:$0xf]  ;;  %v14057_v62 = vld [vmem:[#allocation7 + $0x1694] sm:$0xf] }
 0x53b   :  { %5775 = vmatpush.bf16.msra.mxu3 %v11686_v42  ;;  %6745 = vmatpush.bf16.msrb.mxu1 %v12126_v20  ;;  %v11555_v42 = vld [vmem:[#allocation7 + $0x1228] sm:$0xf0]  ;;  %v11793_v20 = vld [vmem:[#allocation7 + $0x13d8] sm:$0xf]  ;;  %v12507_v51 = vld [vmem:[#allocation7 + $0x19a0] sm:$0xf0] }
 0x53c   :  { %7722 = vmatpush.bf16.msra.mxu0 %v12762_v37  ;;  %v12270_v37 = vor.u32 %v14089_v29, %v12267_v53  ;;  %v11794_v30 = vor.u32 %v13974_v34, %v11793_v20  ;;  %v14065_v29 = vld [vmem:[#allocation7 + $0x16d4] sm:$0xf]  ;;  %v13950_v20 = vld [vmem:[#allocation7 + $0x1334] sm:$0xf0] }
 0x53d   :  { %v12171_v53 = vld [vmem:[#allocation7 + $0x16f0] sm:$0xf0]  ;;  %v11633_v63 = vld [vmem:[#allocation7 + $0x1298] sm:$0xf] }
 0x53e   :  { %5763 = vmatpush.bf16.msra.mxu2 %v11650_v4  ;;  %v14081_v4 = vld [vmem:[#allocation7 + $0x1754] sm:$0xf]  ;;  %v6293_v41 = vpop.f32.mrf.mxu0 }
 0x53f   :  { %5776 = vmatpush.bf16.msra.mxu3 %v11654_v49  ;;  %6746 = vmatpush.bf16.msrb.mxu1 %v12094_v44  ;;  %v11558_v49 = vor.u32 %v13912_v10, %v11555_v42  ;;  %v787_v44 = vadd.f32 %v15798_v59, %v722_v55  ;;  %v12238_v25 = vor.u32 %v14081_v4, %v12235_v5  ;;  %v12139_v55 = vld [vmem:[#allocation7 + $0x16b0] sm:$0xf0]  ;;  %v14221_v4 = vld [vmem:[#allocation7 + $0x1bac] sm:$0xf0] }
 0x540   :  { %7723 = vmatpush.bf16.msra.mxu0 %v12730_v39  ;;  %v4344_v39 = vpop.f32.mrf.mxu3  ;;  %v11698_v5 = vor.u32 %v13950_v20, %v11697_v7  ;;  %v12746_v41 = vor.u32 %v14213_v12, %v12745_v8  ;;  %v12681_v7 = vld [vmem:[#allocation7 + $0x1ad0] sm:$0xf] }
 0x541   :  { %v13938_v39 = vld [vmem:[#allocation7 + $0x12dc] sm:$0xf]  ;;  %v14197_v20 = vld [vmem:[#allocation7 + $0x1aec] sm:$0xf0] }
 0x542   :  { %5764 = vmatpush.bf16.msra.mxu2 %v11618_v6  ;;  %v14179_v6 = vld [vmem:[#allocation7 + $0x1a5c] sm:$0xf0] }
 0x543   :  { %5777 = vmatpush.bf16.msra.mxu3 %v11622_v40  ;;  %6747 = vmatpush.bf16.msrb.mxu1 %v12062_v2  ;;  %v12203_v40 = vld [vmem:[#allocation7 + $0x1730] sm:$0xf0]  ;;  %v15799_v2 = vld [vmem:[#allocation21_spill] sm:$0xff]  ;;  %v12602_v35 = vor.u32 %v14179_v6, %v12601_v38  ;;  %v5755_v10 = vpop.f32.mrf.mxu1 }
 0x544   :  { %7724 = vmatpush.bf16.msra.mxu0 %v12698_v1  ;;  %v852_v1 = vadd.f32 %v15799_v2, %v787_v44  ;;  %v12206_v28 = vor.u32 %v14073_v0, %v12203_v40  ;;  %v15555_v34 = vadd.f32 %v5755_v10, %v15518_v56  ;;  %v12142_v56 = vor.u32 %v14057_v62, %v12139_v55  ;;  %v12107_v38 = vld [vmem:[#allocation7 + $0x1670] sm:$0xf0]  ;;  %v13934_v0 = vld [vmem:[#allocation7 + $0x12b4] sm:$0xf0]  ;;  %v11603_v10 = vld [vmem:[#allocation7 + $0x1278] sm:$0xf0] }
 0x545   :  { %v14041_v2 = vld [vmem:[#allocation7 + $0x1614] sm:$0xf] }
 0x546   :  { %5765 = vmatpush.bf16.msra.mxu2 %v11586_v15  ;;  %6748 = vmatmul.bf16.vlgmr.msrb.gmra.mxu1 %v15485_v50  ;;  %v11731_v15 = vld [vmem:[#allocation7 + $0x1378] sm:$0xf0]  ;;  %v873_v19 = vmax.f32 %v852_v1, 0.0  ;;  %v12075_v1 = vld [vmem:[#allocation7 + $0x1630] sm:$0xf0] }
 0x547   :  { %6792 = vmatpush.bf16.msra.mxu1 %v12302_v48  ;;  %5778 = vmatpush.bf16.msra.mxu3 %v11590_v52  ;;  %v14171_v48 = vld [vmem:[#allocation7 + $0x1a1c] sm:$0xf0]  ;;  %v11730_v52 = vor.u32 %v13958_v33, %v11729_v18  ;;  %v14159_v18 = vld [vmem:[#allocation7 + $0x19c4] sm:$0xf]  ;;  %v12078_v27 = vor.u32 %v14041_v2, %v12075_v1  ;;  %v14024_v2 = vld [vmem:[#allocation7 + $0x158c] sm:$0xf] }
 0x548   :  { %7725 = vmatpush.bf16.msra.mxu0 %v12666_v31  ;;  %v12570_v42 = vor.u32 %v14171_v48, %v12569_v58  ;;  %v11734_v31 = vor.u32 %v13954_v24, %v11731_v15  ;;  %v15557_v59 = vpack.c.bf16 %v873_v19, %v873_v19  ;;  %v11635_v58 = vld [vmem:[#allocation7 + $0x12b8] sm:$0xf0]  ;;  %v11634_v48 = vor.u32 %v13934_v0, %v11633_v63  ;;  %v12539_v33 = vld [vmem:[#allocation7 + $0x19e0] sm:$0xf0]  ;;  %v11601_v15 = vld [vmem:[#allocation7 + $0x1258] sm:$0xf] }
 0x549   :  { %v13922_v19 = vld [vmem:[#allocation7 + $0x125c] sm:$0xf]  ;;  %v12617_v0 = vld [vmem:[#allocation7 + $0x1a50] sm:$0xf]  ;;  %v12003_v1 = vld [vmem:[#allocation7 + $0x15a8] sm:$0xf0] }
 0x54a   :  { %5766 = vmatpush.bf16.msra.mxu2 %v11554_v22  ;;  %v12777_v22 = vld [vmem:[#allocation7 + $0x1b90] sm:$0xf]  ;;  %v11606_v55 = vor.u32 %v13922_v19, %v11603_v10  ;;  %v11971_v19 = vld [vmem:[#allocation7 + $0x1568] sm:$0xf0]  ;;  %v14127_v10 = vld [vmem:[#allocation7 + $0x18c4] sm:$0xf] }
 0x54b   :  { %6793 = vmatpush.bf16.msra.mxu1 %v12270_v37  ;;  %5779 = vmatpush.bf16.msra.mxu3 %v11558_v49  ;;  %v12174_v37 = vor.u32 %v14065_v29, %v12171_v53  ;;  %v11665_v49 = vld [vmem:[#allocation7 + $0x12d8] sm:$0xf]  ;;  %v12778_v44 = vor.u32 %v14221_v4, %v12777_v22  ;;  %v5757_v6 = vpop.f32.mrf.mxu1  ;;  %v13914_v4 = vld [vmem:[#allocation7 + $0x121c] sm:$0xf] }
 0x54c   :  { %7726 = vmatpush.bf16.msra.mxu0 %v12634_v54  ;;  %v11667_v54 = vld [vmem:[#allocation7 + $0x12f8] sm:$0xf0]  ;;  %v13926_v29 = vld [vmem:[#allocation7 + $0x1274] sm:$0xf0] }
 0x54d   :  { %5767 = vmatmul.bf16.vlgmr.msra.gmra.mxu2 %v15412_v43  ;;  %v11670_v14 = vor.u32 %v13938_v39, %v11667_v54  ;;  %v13918_v22 = vld [vmem:[#allocation7 + $0x1234] sm:$0xf0]  ;;  %v12035_v39 = vld [vmem:[#allocation7 + $0x15e8] sm:$0xf0] }
 0x54e   :  { %5811 = vmatpush.bf16.msrb.mxu2 %v11794_v30  ;;  %5780 = vmatmul.bf16.vlgmr.msra.gmra.mxu3 %v15412_v43  ;;  %v13942_v30 = vld [vmem:[#allocation7 + $0x12f4] sm:$0xf0] }
 0x54f   :  { %5824 = vmatpush.bf16.msrb.mxu3 %v11798_v36  ;;  %6794 = vmatpush.bf16.msra.mxu1 %v12238_v25  ;;  %v14049_v36 = vld [vmem:[#allocation7 + $0x1654] sm:$0xf]  ;;  %v11666_v25 = vor.u32 %v13942_v30, %v11665_v49  ;;  %v12649_v49 = vld [vmem:[#allocation7 + $0x1a90] sm:$0xf]  ;;  %v12033_v30 = vld [vmem:[#allocation7 + $0x15c8] sm:$0xf] }
 0x550   :  { %7727 = vmatpush.bf16.msra.mxu0 %v12602_v35  ;;  %v12110_v40 = vor.u32 %v14049_v36, %v12107_v38  ;;  %v12713_v35 = vld [vmem:[#allocation7 + $0x1b10] sm:$0xf]  ;;  %v14143_v36 = vld [vmem:[#allocation7 + $0x1944] sm:$0xf] }
 0x551   :  { %v4787_v17 = vpop.f32.mrf.mxu3  ;;  %v12475_v38 = vld [vmem:[#allocation7 + $0x1960] sm:$0xf0] }
 0x552   :  { %5812 = vmatpush.bf16.msrb.mxu2 %v11762_v16  ;;  %v13930_v16 = vld [vmem:[#allocation7 + $0x129c] sm:$0xf] }
 0x553   :  { %5825 = vmatpush.bf16.msrb.mxu3 %v11766_v23  ;;  %6795 = vmatpush.bf16.msra.mxu1 %v12206_v28  ;;  %v14205_v23 = vld [vmem:[#allocation7 + $0x1b2c] sm:$0xf0]  ;;  %v4774_v28 = vpop.f32.mrf.mxu2  ;;  %v11638_v24 = vor.u32 %v13930_v16, %v11635_v58  ;;  %v12478_v16 = vor.u32 %v14143_v36, %v12475_v38  ;;  %v14000_v36 = vld [vmem:[#allocation7 + $0x14cc] sm:$0xf] }
 0x554   :  { %7728 = vmatpush.bf16.msra.mxu0 %v12570_v42  ;;  %v15561_v53 = vadd.f32 %v4774_v28, %v15524_v26  ;;  %v15564_v42 = vadd.f32 %v4787_v17, %v15527_v21  ;;  %v11569_v26 = vld [vmem:[#allocation7 + $0x1218] sm:$0xf]  ;;  %v12682_v21 = vor.u32 %v14197_v20, %v12681_v7  ;;  %v14181_v58 = vld [vmem:[#allocation7 + $0x1a6c] sm:$0xf0]  ;;  %v14020_v17 = vld [vmem:[#allocation7 + $0x1564] sm:$0xf0] }
 0x555   :  { %v11570_v54 = vor.u32 %v13918_v22, %v11569_v26  ;;  %v12618_v28 = vor.u32 %v14181_v58, %v12617_v0  ;;  %v13049_v7 = vld [vmem:[#allocation7 + $0x1dc0] sm:$0xf]  ;;  %v11937_v26 = vld [vmem:[#allocation7 + $0x1508] sm:$0xf]  ;;  %v11907_v38 = vld [vmem:[#allocation7 + $0x14e8] sm:$0xf0] }
 0x556   :  { %5813 = vmatpush.bf16.msrb.mxu2 %v11730_v52  ;;  %v12714_v52 = vor.u32 %v14205_v23, %v12713_v35  ;;  %v6736_v62 = vpop.f32.mrf.mxu0  ;;  %v14135_v35 = vld [vmem:[#allocation7 + $0x1904] sm:$0xf]  ;;  %v14291_v20 = vld [vmem:[#allocation7 + $0x1ddc] sm:$0xf0]  ;;  %v11910_v0 = vor.u32 %v14000_v36, %v11907_v38  ;;  %v14145_v38 = vld [vmem:[#allocation7 + $0x1954] sm:$0xf] }
 0x557   :  { %5826 = vmatpush.bf16.msrb.mxu3 %v11734_v31  ;;  %6796 = vmatpush.bf16.msra.mxu1 %v12174_v37  ;;  %v12542_v31 = vor.u32 %v14159_v18, %v12539_v33  ;;  %v6334_v37 = vadd.f32 %v15529_v11, %v15495_v45  ;;  %v12510_v45 = vor.u32 %v14151_v3, %v12507_v51  ;;  %v14189_v11 = vld [vmem:[#allocation7 + $0x1aac] sm:$0xf0]  ;;  %v12443_v23 = vld [vmem:[#allocation7 + $0x1920] sm:$0xf0] }
 0x558   :  { %7773 = vmatpush.bf16.msrb.mxu0 %v12810_v9  ;;  %v11602_v9 = vor.u32 %v13926_v29, %v11601_v15  ;;  %v12585_v33 = vld [vmem:[#allocation7 + $0x1a10] sm:$0xf]  ;;  %v11969_v29 = vld [vmem:[#allocation7 + $0x1548] sm:$0xf] }
 0x559   :  { %7729 = vmatmul.bf16.vlgmr.msra.gmra.mxu0 %v15557_v59  ;;  %v4789_v6 = vpop.f32.mrf.mxu3  ;;  %v14173_v15 = vld [vmem:[#allocation7 + $0x1a2c] sm:$0xf0] }
 0x55a   :  { %5814 = vmatpush.bf16.msrb.mxu2 %v11698_v5  ;;  %v11571_v5 = vld [vmem:[#allocation7 + $0x1238] sm:$0xf0]  ;;  %v12586_v3 = vor.u32 %v14173_v15, %v12585_v33  ;;  %v14275_v6 = vld [vmem:[#allocation7 + $0x1d5c] sm:$0xf0] }
 0x55b   :  { %5827 = vmatpush.bf16.msrb.mxu3 %v11702_v32  ;;  %6797 = vmatpush.bf16.msra.mxu1 %v12142_v56  ;;  %v15568_v32 = vadd.f32 %v6736_v62, %v6334_v37  ;;  %v14036_v56 = vld [vmem:[#allocation7 + $0x15e4] sm:$0xf0]  ;;  %v4776_v8 = vpop.f32.mrf.mxu2  ;;  %v11574_v12 = vor.u32 %v13914_v4, %v11571_v5  ;;  %v11970_v37 = vor.u32 %v14020_v17, %v11969_v29  ;;  %v14008_v5 = vld [vmem:[#allocation7 + $0x150c] sm:$0xf] }
 0x55c   :  { %7774 = vmatpush.bf16.msrb.mxu0 %v12778_v44  ;;  %v14032_v44 = vld [vmem:[#allocation7 + $0x15cc] sm:$0xf]  ;;  %v14012_v62 = vld [vmem:[#allocation7 + $0x1524] sm:$0xf0]  ;;  %v13050_v4 = vor.u32 %v14291_v20, %v13049_v7  ;;  %v14111_v8 = vld [vmem:[#allocation7 + $0x1844] sm:$0xf] }
 0x55d   :  { %v12038_v63 = vor.u32 %v14032_v44, %v12035_v39  ;;  %v11905_v44 = vld [vmem:[#allocation7 + $0x14c8] sm:$0xf]  ;;  %v13984_v7 = vld [vmem:[#allocation7 + $0x144c] sm:$0xf] }
 0x55e   :  { %5815 = vmatpush.bf16.msrb.mxu2 %v11666_v25  ;;  %v12034_v25 = vor.u32 %v14036_v56, %v12033_v30  ;;  %v13017_v30 = vld [vmem:[#allocation7 + $0x1d80] sm:$0xf]  ;;  %v14004_v39 = vld [vmem:[#allocation7 + $0x14e4] sm:$0xf0]  ;;  %v11843_v20 = vld [vmem:[#allocation7 + $0x1468] sm:$0xf0] }
 0x55f   :  { %5828 = vmatpush.bf16.msrb.mxu3 %v11670_v14  ;;  %6798 = vmatpush.bf16.msra.mxu1 %v12110_v40  ;;  %v12650_v14 = vor.u32 %v14189_v11, %v12649_v49  ;;  %v12001_v40 = vld [vmem:[#allocation7 + $0x1588] sm:$0xf]  ;;  %v12379_v49 = vld [vmem:[#allocation7 + $0x18a0] sm:$0xf0]  ;;  %v14283_v56 = vld [vmem:[#allocation7 + $0x1d9c] sm:$0xf0] }
 0x560   :  { %7775 = vmatpush.bf16.msrb.mxu0 %v12746_v41  ;;  %v14028_v41 = vld [vmem:[#allocation7 + $0x15a4] sm:$0xf0] }
 0x561   :  { %v12002_v18 = vor.u32 %v14028_v41, %v12001_v40  ;;  %v11873_v40 = vld [vmem:[#allocation7 + $0x1488] sm:$0xf] }
 0x562   :  { %5816 = vmatpush.bf16.msrb.mxu2 %v11634_v48  ;;  %v6738_v48 = vpop.f32.mrf.mxu0  ;;  %v13996_v41 = vld [vmem:[#allocation7 + $0x14a4] sm:$0xf0] }
 0x563   :  { %5829 = vmatpush.bf16.msrb.mxu3 %v11638_v24  ;;  %6799 = vmatpush.bf16.msra.mxu1 %v12078_v27  ;;  %v12006_v24 = vor.u32 %v14024_v2, %v12003_v1  ;;  %v12446_v27 = vor.u32 %v14135_v35, %v12443_v23  ;;  %v13992_v2 = vld [vmem:[#allocation7 + $0x148c] sm:$0xf]  ;;  %v14103_v35 = vld [vmem:[#allocation7 + $0x1804] sm:$0xf]  ;;  %v12953_v48 = vld [vmem:[#allocation7 + $0x1d00] sm:$0xf]  ;;  %v11874_v33 = vor.u32 %v13996_v41, %v11873_v40 }
 0x564   :  { %7776 = vmatpush.bf16.msrb.mxu0 %v12714_v52  ;;  %v14016_v52 = vld [vmem:[#allocation7 + $0x154c] sm:$0xf]  ;;  %v12315_v23 = vld [vmem:[#allocation7 + $0x1820] sm:$0xf0]  ;;  %v11841_v17 = vld [vmem:[#allocation7 + $0x1448] sm:$0xf] }
 0x565   :  { %v11974_v51 = vor.u32 %v14016_v52, %v11971_v19  ;;  %v11875_v1 = vld [vmem:[#allocation7 + $0x14a8] sm:$0xf0]  ;;  %v12017_v40 = vld [vmem:[#allocation7 + $0x1598] sm:$0xf] }
 0x566   :  { %5817 = vmatpush.bf16.msrb.mxu2 %v11602_v9  ;;  %6800 = vmatmul.bf16.vlgmr.msra.gmra.mxu1 %v15485_v50  ;;  %v5807_v9 = vpop.f32.mrf.mxu1  ;;  %v11878_v29 = vor.u32 %v13992_v2, %v11875_v1  ;;  %v14030_v41 = vld [vmem:[#allocation7 + $0x15b4] sm:$0xf0]  ;;  %v14026_v2 = vld [vmem:[#allocation7 + $0x159c] sm:$0xf] }
 0x567   :  { %7237 = vmatpush.bf16.msrb.mxu1 %v12542_v31  ;;  %5830 = vmatpush.bf16.msrb.mxu3 %v11606_v55  ;;  %v12411_v31 = vld [vmem:[#allocation7 + $0x18e0] sm:$0xf0]  ;;  %v15574_v55 = vadd.f32 %v5807_v9, %v15535_v13  ;;  %v12019_v1 = vld [vmem:[#allocation7 + $0x15b8] sm:$0xf0] }
 0x568   :  { %7777 = vmatpush.bf16.msrb.mxu0 %v12682_v21  ;;  %v12414_v22 = vor.u32 %v14127_v10, %v12411_v31  ;;  %v14119_v21 = vld [vmem:[#allocation7 + $0x1884] sm:$0xf]  ;;  %v12318_v10 = vor.u32 %v14103_v35, %v12315_v23  ;;  %v14137_v35 = vld [vmem:[#allocation7 + $0x1914] sm:$0xf] }
 0x569   :  { %v12382_v13 = vor.u32 %v14119_v21, %v12379_v49  ;;  %v13976_v21 = vld [vmem:[#allocation7 + $0x140c] sm:$0xf]  ;;  %v12459_v23 = vld [vmem:[#allocation7 + $0x1930] sm:$0xf0] }
 0x56a   :  { %5818 = vmatpush.bf16.msrb.mxu2 %v11570_v54  ;;  %v13018_v54 = vor.u32 %v14283_v56, %v13017_v30  ;;  %v11811_v49 = vld [vmem:[#allocation7 + $0x1428] sm:$0xf0]  ;;  %v12889_v56 = vld [vmem:[#allocation7 + $0x1c80] sm:$0xf] }
 0x56b   :  { %7238 = vmatpush.bf16.msrb.mxu1 %v12510_v45  ;;  %5831 = vmatpush.bf16.msrb.mxu3 %v11574_v12  ;;  %v11938_v45 = vor.u32 %v14012_v62, %v11937_v26  ;;  %v12347_v12 = vld [vmem:[#allocation7 + $0x1860] sm:$0xf0]  ;;  %v14153_v62 = vld [vmem:[#allocation7 + $0x1994] sm:$0xf] }
 0x56c   :  { %7778 = vmatpush.bf16.msrb.mxu0 %v12650_v14  ;;  %v11906_v14 = vor.u32 %v14004_v39, %v11905_v44  ;;  %v14251_v39 = vld [vmem:[#allocation7 + $0x1c9c] sm:$0xf0] }
 0x56d   :  { %5819 = vmatmul.bf16.vlgmr.msrb.gmra.mxu2 %v15412_v43 }
 0x56e   :  { %6256 = vmatpush.bf16.msra.mxu2 %v12034_v25  ;;  %5832 = vmatmul.bf16.vlgmr.msrb.gmra.mxu3 %v15412_v43  ;;  %v11939_v43 = vld [vmem:[#allocation7 + $0x1528] sm:$0xf0]  ;;  %v12985_v25 = vld [vmem:[#allocation7 + $0x1d40] sm:$0xf] }
 0x56f   :  { %6269 = vmatpush.bf16.msra.mxu3 %v12038_v63  ;;  %7239 = vmatpush.bf16.msrb.mxu1 %v12478_v16  ;;  %v11942_v11 = vor.u32 %v14008_v5, %v11939_v43  ;;  %v5809_v63 = vpop.f32.mrf.mxu1  ;;  %v12350_v16 = vor.u32 %v14111_v8, %v12347_v12  ;;  %v12986_v58 = vor.u32 %v14275_v6, %v12985_v25  ;;  %v13980_v43 = vld [vmem:[#allocation7 + $0x1424] sm:$0xf0]  ;;  %v12491_v8 = vld [vmem:[#allocation7 + $0x1970] sm:$0xf0] }
 0x570   :  { %7779 = vmatpush.bf16.msrb.mxu0 %v12618_v28  ;;  %v14161_v28 = vld [vmem:[#allocation7 + $0x19d4] sm:$0xf]  ;;  %v4826_v15 = vpop.f32.mrf.mxu2  ;;  %v11814_v12 = vor.u32 %v13976_v21, %v11811_v49  ;;  %v14010_v49 = vld [vmem:[#allocation7 + $0x151c] sm:$0xf] }
 0x571   :  { %v15578_v52 = vadd.f32 %v4826_v15, %v15539_v47  ;;  %v4839_v19 = vpop.f32.mrf.mxu3  ;;  %v11846_v47 = vor.u32 %v13984_v7, %v11843_v20  ;;  %v14235_v15 = vld [vmem:[#allocation7 + $0x1c1c] sm:$0xf0]  ;;  %v12427_v7 = vld [vmem:[#allocation7 + $0x18f0] sm:$0xf0]  ;;  %v13065_v20 = vld [vmem:[#allocation7 + $0x1dd0] sm:$0xf] }
 0x572   :  { %6257 = vmatpush.bf16.msra.mxu2 %v12002_v18  ;;  %v14267_v18 = vld [vmem:[#allocation7 + $0x1d1c] sm:$0xf0] }
 0x573   :  { %6270 = vmatpush.bf16.msra.mxu3 %v12006_v24  ;;  %7240 = vmatpush.bf16.msrb.mxu1 %v12446_v27  ;;  %v12555_v24 = vld [vmem:[#allocation7 + $0x19f0] sm:$0xf0]  ;;  %v13988_v27 = vld [vmem:[#allocation7 + $0x1464] sm:$0xf0]  ;;  %v12954_v31 = vor.u32 %v14267_v18, %v12953_v48  ;;  %v12018_v18 = vor.u32 %v14030_v41, %v12017_v40 }
 0x574   :  { %7780 = vmatpush.bf16.msrb.mxu0 %v12586_v3  ;;  %v12558_v9 = vor.u32 %v14161_v28, %v12555_v24  ;;  %v12921_v3 = vld [vmem:[#allocation7 + $0x1cc0] sm:$0xf]  ;;  %v11842_v26 = vor.u32 %v13988_v27, %v11841_v17  ;;  %v12022_v24 = vor.u32 %v14026_v2, %v12019_v1  ;;  %v14022_v17 = vld [vmem:[#allocation7 + $0x1574] sm:$0xf0]  ;;  %v12462_v27 = vor.u32 %v14137_v35, %v12459_v23  ;;  %v13994_v23 = vld [vmem:[#allocation7 + $0x149c] sm:$0xf] }
 0x575   :  { %v13998_v2 = vld [vmem:[#allocation7 + $0x14b4] sm:$0xf0] }
 0x576   :  { %6258 = vmatpush.bf16.msra.mxu2 %v11970_v37  ;;  %v15581_v37 = vadd.f32 %v4839_v19, %v15542_v60  ;;  %v6788_v5 = vpop.f32.mrf.mxu0  ;;  %v14018_v19 = vld [vmem:[#allocation7 + $0x155c] sm:$0xf] }
 0x577   :  { %6271 = vmatpush.bf16.msra.mxu3 %v11974_v51  ;;  %7241 = vmatpush.bf16.msrb.mxu1 %v12414_v22  ;;  %v14259_v51 = vld [vmem:[#allocation7 + $0x1cdc] sm:$0xf0]  ;;  %v12523_v22 = vld [vmem:[#allocation7 + $0x19b0] sm:$0xf0]  ;;  %v15584_v30 = vadd.f32 %v6788_v5, %v15546_v57  ;;  %v11953_v5 = vld [vmem:[#allocation7 + $0x1518] sm:$0xf] }
 0x578   :  { %8218 = vmatpush.bf16.msra.mxu0 %v13050_v4  ;;  %v11809_v4 = vld [vmem:[#allocation7 + $0x1408] sm:$0xf]  ;;  %v12922_v60 = vor.u32 %v14259_v51, %v12921_v3  ;;  %v12526_v44 = vor.u32 %v14153_v62, %v12523_v22  ;;  %v4828_v57 = vpop.f32.mrf.mxu2  ;;  %v15800_v51 = vld [vmem:[#allocation23_spill] sm:$0xff] }
 0x579   :  { %7781 = vmatmul.bf16.vlgmr.msrb.gmra.mxu0 %v15557_v59  ;;  %v11810_v36 = vor.u32 %v13980_v43, %v11809_v4  ;;  %v4841_v6 = vpop.f32.mrf.mxu3 }
 0x57a   :  { %6259 = vmatpush.bf16.msra.mxu2 %v11938_v45  ;;  %v12049_v45 = vld [vmem:[#allocation7 + $0x15d8] sm:$0xf]  ;;  %v14113_v6 = vld [vmem:[#allocation7 + $0x1854] sm:$0xf] }
 0x57b   :  { %6272 = vmatpush.bf16.msra.mxu3 %v11942_v11  ;;  %7242 = vmatpush.bf16.msrb.mxu1 %v12382_v13  ;;  %v14038_v11 = vld [vmem:[#allocation7 + $0x15f4] sm:$0xf0]  ;;  %v14034_v13 = vld [vmem:[#allocation7 + $0x15dc] sm:$0xf] }
 0x57c   :  { %8219 = vmatpush.bf16.msra.mxu0 %v13018_v54  ;;  %v12051_v54 = vld [vmem:[#allocation7 + $0x15f8] sm:$0xf0]  ;;  %v12050_v25 = vor.u32 %v14038_v11, %v12049_v45  ;;  %v12395_v45 = vld [vmem:[#allocation7 + $0x18b0] sm:$0xf0]  ;;  %v13033_v11 = vld [vmem:[#allocation7 + $0x1d90] sm:$0xf] }
 0x57d   :  { %v12054_v63 = vor.u32 %v14034_v13, %v12051_v54  ;;  %v11921_v54 = vld [vmem:[#allocation7 + $0x14d8] sm:$0xf] }
 0x57e   :  { %6260 = vmatpush.bf16.msra.mxu2 %v11906_v14  ;;  %v12890_v14 = vor.u32 %v14251_v39, %v12889_v56  ;;  %v6790_v48 = vpop.f32.mrf.mxu0  ;;  %v14121_v56 = vld [vmem:[#allocation7 + $0x1894] sm:$0xf] }
 0x57f   :  { %6273 = vmatpush.bf16.msra.mxu3 %v11910_v0  ;;  %7243 = vmatpush.bf16.msrb.mxu1 %v12350_v16  ;;  %v12857_v0 = vld [vmem:[#allocation7 + $0x1c40] sm:$0xf]  ;;  %v12494_v16 = vor.u32 %v14145_v38, %v12491_v8  ;;  %v12398_v8 = vor.u32 %v14121_v56, %v12395_v45  ;;  %v11891_v48 = vld [vmem:[#allocation7 + $0x14b8] sm:$0xf0]  ;;  %v13982_v45 = vld [vmem:[#allocation7 + $0x1434] sm:$0xf0] }
 0x580   :  { %8220 = vmatpush.bf16.msra.mxu0 %v12986_v58  ;;  %v14243_v58 = vld [vmem:[#allocation7 + $0x1c5c] sm:$0xf0] }
 0x581   :  { %v12858_v28 = vor.u32 %v14243_v58, %v12857_v0  ;;  %v14277_v0 = vld [vmem:[#allocation7 + $0x1d6c] sm:$0xf0]  ;;  %v11889_v58 = vld [vmem:[#allocation7 + $0x1498] sm:$0xf] }
 0x582   :  { %6261 = vmatpush.bf16.msra.mxu2 %v11874_v33  ;;  %v12825_v33 = vld [vmem:[#allocation7 + $0x1c00] sm:$0xf] }
 0x583   :  { %6274 = vmatpush.bf16.msra.mxu3 %v11878_v29  ;;  %7244 = vmatpush.bf16.msrb.mxu1 %v12318_v10  ;;  %v11985_v29 = vld [vmem:[#allocation7 + $0x1558] sm:$0xf]  ;;  %v11987_v10 = vld [vmem:[#allocation7 + $0x1578] sm:$0xf0]  ;;  %v15590_v62 = vpop.f32.mrf.mxu1  ;;  %v12826_v22 = vor.u32 %v14235_v15, %v12825_v33  ;;  %v12331_v33 = vld [vmem:[#allocation7 + $0x1830] sm:$0xf0]  ;;  %v11890_v15 = vor.u32 %v13998_v2, %v11889_v58 }
 0x584   :  { %8221 = vmatpush.bf16.msra.mxu0 %v12954_v31  ;;  %v14129_v31 = vld [vmem:[#allocation7 + $0x18d4] sm:$0xf]  ;;  %v11986_v3 = vor.u32 %v14022_v17, %v11985_v29  ;;  %v11990_v4 = vor.u32 %v14018_v19, %v11987_v10  ;;  %v14223_v29 = vld [vmem:[#allocation7 + $0x1bc4] sm:$0xf]  ;;  %v11894_v19 = vor.u32 %v13994_v23, %v11891_v48  ;;  %v11857_v10 = vld [vmem:[#allocation7 + $0x1458] sm:$0xf] }
 0x585   :  { %v12430_v43 = vor.u32 %v14129_v31, %v12427_v7  ;;  %v12795_v17 = vld [vmem:[#allocation7 + $0x1be0] sm:$0xf0]  ;;  %v13990_v31 = vld [vmem:[#allocation7 + $0x1474] sm:$0xf0]  ;;  %v12873_v2 = vld [vmem:[#allocation7 + $0x1c50] sm:$0xf] }
 0x586   :  { %6262 = vmatpush.bf16.msra.mxu2 %v11842_v26  ;;  %7245 = vmatmul.bf16.vlgmr.msrb.gmra.mxu1 %v15520_v46  ;;  %v874_v26 = vmax.f32 %v15800_v51, 0.0  ;;  %v13986_v51 = vld [vmem:[#allocation7 + $0x145c] sm:$0xf]  ;;  %v14245_v48 = vld [vmem:[#allocation7 + $0x1c6c] sm:$0xf0] }
 0x587   :  { %7289 = vmatpush.bf16.msra.mxu1 %v12558_v9  ;;  %6275 = vmatpush.bf16.msra.mxu3 %v11846_v47  ;;  %v14293_v9 = vld [vmem:[#allocation7 + $0x1dec] sm:$0xf0]  ;;  %v14014_v47 = vld [vmem:[#allocation7 + $0x1534] sm:$0xf0] }
 0x588   :  { %8222 = vmatpush.bf16.msra.mxu0 %v12922_v60  ;;  %v13066_v21 = vor.u32 %v14293_v9, %v13065_v20  ;;  %v11955_v60 = vld [vmem:[#allocation7 + $0x1538] sm:$0xf0]  ;;  %v11954_v39 = vor.u32 %v14014_v47, %v11953_v5  ;;  %v15592_v38 = vpack.c.bf16 %v874_v26, %v874_v26  ;;  %v12937_v5 = vld [vmem:[#allocation7 + $0x1cd0] sm:$0xf] }
 0x589   :  { %v11958_v13 = vor.u32 %v14010_v49, %v11955_v60  ;;  %v11859_v26 = vld [vmem:[#allocation7 + $0x1478] sm:$0xf0]  ;;  %v14261_v47 = vld [vmem:[#allocation7 + $0x1cec] sm:$0xf0]  ;;  %v12763_v49 = vld [vmem:[#allocation7 + $0x1ba0] sm:$0xf0] }
 0x58a   :  { %6263 = vmatpush.bf16.msra.mxu2 %v11810_v36  ;;  %v14006_v36 = vld [vmem:[#allocation7 + $0x14f4] sm:$0xf0] }
 0x58b   :  { %7290 = vmatpush.bf16.msra.mxu1 %v12526_v44  ;;  %6276 = vmatpush.bf16.msra.mxu3 %v11814_v12  ;;  %v14285_v44 = vld [vmem:[#allocation7 + $0x1dac] sm:$0xf0]  ;;  %v14002_v12 = vld [vmem:[#allocation7 + $0x14dc] sm:$0xf]  ;;  %v11922_v40 = vor.u32 %v14006_v36, %v11921_v54  ;;  %v6254_v41 = vpop.f32.mrf.mxu1  ;;  %v11825_v60 = vld [vmem:[#allocation7 + $0x1418] sm:$0xf] }
 0x58c   :  { %8223 = vmatpush.bf16.msra.mxu0 %v12890_v14  ;;  %v13034_v57 = vor.u32 %v14285_v44, %v13033_v11  ;;  %v12363_v14 = vld [vmem:[#allocation7 + $0x1870] sm:$0xf0]  ;;  %v13978_v11 = vld [vmem:[#allocation7 + $0x141c] sm:$0xf]  ;;  %v12289_v54 = vld [vmem:[#allocation7 + $0x17c8] sm:$0xf] }
 0x58d   :  { %6264 = vmatmul.bf16.vlgmr.msra.gmra.mxu2 %v15447_v61  ;;  %v12366_v1 = vor.u32 %v14113_v6, %v12363_v14  ;;  %v11827_v44 = vld [vmem:[#allocation7 + $0x1438] sm:$0xf0]  ;;  %v14100_v36 = vld [vmem:[#allocation7 + $0x17e4] sm:$0xf0]  ;;  %v11826_v6 = vor.u32 %v13982_v45, %v11825_v60  ;;  %v14207_v14 = vld [vmem:[#allocation7 + $0x1b44] sm:$0xf] }
 0x58e   :  { %6308 = vmatpush.bf16.msrb.mxu2 %v12050_v25  ;;  %6277 = vmatmul.bf16.vlgmr.msra.gmra.mxu3 %v15447_v61  ;;  %v11923_v25 = vld [vmem:[#allocation7 + $0x14f8] sm:$0xf0] }
 0x58f   :  { %6321 = vmatpush.bf16.msrb.mxu3 %v12054_v63  ;;  %7291 = vmatpush.bf16.msra.mxu1 %v12494_v16  ;;  %v13001_v63 = vld [vmem:[#allocation7 + $0x1d50] sm:$0xf]  ;;  %v11926_v16 = vor.u32 %v14002_v12, %v11923_v25  ;;  %v14096_v12 = vld [vmem:[#allocation7 + $0x17cc] sm:$0xf] }
 0x590   :  { %8224 = vmatpush.bf16.msra.mxu0 %v12858_v28  ;;  %v13002_v35 = vor.u32 %v14277_v0, %v13001_v63  ;;  %v12969_v28 = vld [vmem:[#allocation7 + $0x1d10] sm:$0xf]  ;;  %v12291_v25 = vld [vmem:[#allocation7 + $0x17e8] sm:$0xf0]  ;;  %v12731_v63 = vld [vmem:[#allocation7 + $0x1b60] sm:$0xf0]  ;;  %v11830_v0 = vor.u32 %v13978_v11, %v11827_v44 }
 0x591   :  { %v5284_v20 = vpop.f32.mrf.mxu3  ;;  %v12294_v58 = vor.u32 %v14096_v12, %v12291_v25  ;;  %v12734_v23 = vor.u32 %v14207_v14, %v12731_v63  ;;  %v12161_v25 = vld [vmem:[#allocation7 + $0x16c8] sm:$0xf]  ;;  %v14064_v63 = vld [vmem:[#allocation7 + $0x16cc] sm:$0xf] }
 0x592   :  { %6309 = vmatpush.bf16.msrb.mxu2 %v12018_v18  ;;  %v14105_v18 = vld [vmem:[#allocation7 + $0x1814] sm:$0xf] }
 0x593   :  { %6322 = vmatpush.bf16.msrb.mxu3 %v12022_v24  ;;  %7292 = vmatpush.bf16.msra.mxu1 %v12462_v27  ;;  %v14269_v24 = vld [vmem:[#allocation7 + $0x1d2c] sm:$0xf0]  ;;  %v5271_v27 = vpop.f32.mrf.mxu2  ;;  %v12334_v9 = vor.u32 %v14105_v18, %v12331_v33  ;;  %v14088_v18 = vld [vmem:[#allocation7 + $0x178c] sm:$0xf] }
 0x594   :  { %8225 = vmatpush.bf16.msra.mxu0 %v12826_v22  ;;  %v15596_v7 = vadd.f32 %v5271_v27, %v15561_v53  ;;  %v15599_v22 = vadd.f32 %v5284_v20, %v15564_v42  ;;  %v11862_v53 = vor.u32 %v13986_v51, %v11859_v26  ;;  %v12938_v42 = vor.u32 %v14261_v47, %v12937_v5  ;;  %v12259_v33 = vld [vmem:[#allocation7 + $0x17a8] sm:$0xf0]  ;;  %v14084_v20 = vld [vmem:[#allocation7 + $0x1764] sm:$0xf0]  ;;  %v14191_v26 = vld [vmem:[#allocation7 + $0x1ac4] sm:$0xf] }
 0x595   :  { %v12874_v27 = vor.u32 %v14245_v48, %v12873_v2  ;;  %v12227_v51 = vld [vmem:[#allocation7 + $0x1768] sm:$0xf0]  ;;  %v13305_v5 = vld [vmem:[#allocation7 + $0x1fc0] sm:$0xf] }
 0x596   :  { %6310 = vmatpush.bf16.msrb.mxu2 %v11986_v3  ;;  %v12970_v3 = vor.u32 %v14269_v24, %v12969_v28  ;;  %v7233_v56 = vpop.f32.mrf.mxu0  ;;  %v14199_v28 = vld [vmem:[#allocation7 + $0x1b04] sm:$0xf]  ;;  %v14355_v47 = vld [vmem:[#allocation7 + $0x1fdc] sm:$0xf0] }
 0x597   :  { %6323 = vmatpush.bf16.msrb.mxu3 %v11990_v4  ;;  %7293 = vmatpush.bf16.msra.mxu1 %v12430_v43  ;;  %v12798_v4 = vor.u32 %v14223_v29, %v12795_v17  ;;  %v11858_v43 = vor.u32 %v13990_v31, %v11857_v10  ;;  %v12699_v24 = vld [vmem:[#allocation7 + $0x1b20] sm:$0xf0]  ;;  %v12841_v17 = vld [vmem:[#allocation7 + $0x1c10] sm:$0xf]  ;;  %v12225_v31 = vld [vmem:[#allocation7 + $0x1748] sm:$0xf]  ;;  %v13306_v44 = vor.u32 %v14355_v47, %v13305_v5 }
 0x598   :  { %8270 = vmatpush.bf16.msrb.mxu0 %v13066_v21  ;;  %v14215_v21 = vld [vmem:[#allocation7 + $0x1b84] sm:$0xf]  ;;  %v14237_v10 = vld [vmem:[#allocation7 + $0x1c2c] sm:$0xf0]  ;;  %v14048_v47 = vld [vmem:[#allocation7 + $0x164c] sm:$0xf] }
 0x599   :  { %8226 = vmatmul.bf16.vlgmr.msra.gmra.mxu0 %v15592_v38  ;;  %v5286_v41 = vpop.f32.mrf.mxu3 }
 0x59a   :  { %6311 = vmatpush.bf16.msrb.mxu2 %v11954_v39  ;;  %v15602_v39 = vadd.f32 %v7233_v56, %v15568_v32  ;;  %v12193_v56 = vld [vmem:[#allocation7 + $0x1708] sm:$0xf]  ;;  %v13241_v41 = vld [vmem:[#allocation7 + $0x1f40] sm:$0xf] }
 0x59b   :  { %6324 = vmatpush.bf16.msrb.mxu3 %v11958_v13  ;;  %7294 = vmatpush.bf16.msra.mxu1 %v12398_v8  ;;  %v12905_v13 = vld [vmem:[#allocation7 + $0x1c90] sm:$0xf]  ;;  %v12766_v8 = vor.u32 %v14215_v21, %v12763_v49  ;;  %v5273_v32 = vpop.f32.mrf.mxu2  ;;  %v12842_v49 = vor.u32 %v14237_v10, %v12841_v17  ;;  %v14331_v17 = vld [vmem:[#allocation7 + $0x1f1c] sm:$0xf0]  ;;  %v12811_v10 = vld [vmem:[#allocation7 + $0x1bf0] sm:$0xf0] }
 0x59c   :  { %8271 = vmatpush.bf16.msrb.mxu0 %v13034_v57  ;;  %v14253_v57 = vld [vmem:[#allocation7 + $0x1cac] sm:$0xf0]  ;;  %v12163_v32 = vld [vmem:[#allocation7 + $0x16e8] sm:$0xf0] }
 0x59e   :  { %6312 = vmatpush.bf16.msrb.mxu2 %v11922_v40  ;;  %v12290_v40 = vor.u32 %v14100_v36, %v12289_v54  ;;  %v12635_v54 = vld [vmem:[#allocation7 + $0x1aa0] sm:$0xf0]  ;;  %v13273_v36 = vld [vmem:[#allocation7 + $0x1f80] sm:$0xf] }
 0x59f   :  { %6325 = vmatpush.bf16.msrb.mxu3 %v11926_v16  ;;  %7295 = vmatpush.bf16.msra.mxu1 %v12366_v1  ;;  %v12906_v16 = vor.u32 %v14253_v57, %v12905_v13  ;;  %v12257_v1 = vld [vmem:[#allocation7 + $0x1788] sm:$0xf]  ;;  %v14183_v13 = vld [vmem:[#allocation7 + $0x1a84] sm:$0xf] }
 0x5a0   :  { %8272 = vmatpush.bf16.msrb.mxu0 %v13002_v35  ;;  %v14092_v35 = vld [vmem:[#allocation7 + $0x17a4] sm:$0xf0] }
 0x5a1   :  { %v12258_v29 = vor.u32 %v14092_v35, %v12257_v1  ;;  %v12166_v1 = vor.u32 %v14064_v63, %v12163_v32  ;;  %v12129_v35 = vld [vmem:[#allocation7 + $0x1688] sm:$0xf]  ;;  %v14315_v32 = vld [vmem:[#allocation7 + $0x1e9c] sm:$0xf0] }
 0x5a2   :  { %6313 = vmatpush.bf16.msrb.mxu2 %v11890_v15  ;;  %v7235_v15 = vpop.f32.mrf.mxu0 }
 0x5a3   :  { %6326 = vmatpush.bf16.msrb.mxu3 %v11894_v19  ;;  %7296 = vmatpush.bf16.msra.mxu1 %v12334_v9  ;;  %v12262_v19 = vor.u32 %v14088_v18, %v12259_v33  ;;  %v12702_v9 = vor.u32 %v14199_v28, %v12699_v24  ;;  %v6304_v21 = vpop.f32.mrf.mxu1  ;;  %v14056_v33 = vld [vmem:[#allocation7 + $0x168c] sm:$0xf]  ;;  %v14167_v24 = vld [vmem:[#allocation7 + $0x1a04] sm:$0xf] }
 0x5a4   :  { %8273 = vmatpush.bf16.msrb.mxu0 %v12970_v3  ;;  %v14080_v3 = vld [vmem:[#allocation7 + $0x174c] sm:$0xf]  ;;  %v15608_v45 = vadd.f32 %v6304_v21, %v15574_v55  ;;  %v12638_v55 = vor.u32 %v14183_v13, %v12635_v54  ;;  %v12571_v15 = vld [vmem:[#allocation7 + $0x1a20] sm:$0xf0]  ;;  %v12779_v13 = vld [vmem:[#allocation7 + $0x1bb0] sm:$0xf0] }
 0x5a5   :  { %v12230_v60 = vor.u32 %v14080_v3, %v12227_v51  ;;  %v12131_v28 = vld [vmem:[#allocation7 + $0x16a8] sm:$0xf0]  ;;  %v14052_v3 = vld [vmem:[#allocation7 + $0x1664] sm:$0xf0] }
 0x5a6   :  { %6314 = vmatpush.bf16.msrb.mxu2 %v11858_v43  ;;  %7297 = vmatmul.bf16.vlgmr.msra.gmra.mxu1 %v15520_v46  ;;  %v12226_v43 = vor.u32 %v14084_v20, %v12225_v31  ;;  %v12134_v20 = vor.u32 %v14056_v33, %v12131_v28 }
 0x5a7   :  { %7734 = vmatpush.bf16.msrb.mxu1 %v12798_v4  ;;  %6327 = vmatpush.bf16.msrb.mxu3 %v11862_v53  ;;  %v12667_v4 = vld [vmem:[#allocation7 + $0x1ae0] sm:$0xf0]  ;;  %v14076_v53 = vld [vmem:[#allocation7 + $0x1724] sm:$0xf0] }
 0x5a8   :  { %8274 = vmatpush.bf16.msrb.mxu0 %v12938_v42  ;;  %v12670_v11 = vor.u32 %v14191_v26, %v12667_v4  ;;  %v14072_v42 = vld [vmem:[#allocation7 + $0x170c] sm:$0xf]  ;;  %v12194_v57 = vor.u32 %v14076_v53, %v12193_v56  ;;  %v12574_v4 = vor.u32 %v14167_v24, %v12571_v15  ;;  %v14323_v56 = vld [vmem:[#allocation7 + $0x1edc] sm:$0xf0]  ;;  %v14377_v53 = vld [vmem:[#allocation5] ss:$0 sm:$0xff] }
 0x5a9   :  { %v13113_v15 = vld [vmem:[#allocation7 + $0x1e40] sm:$0xf] }
 0x5aa   :  { %6315 = vmatpush.bf16.msrb.mxu2 %v11826_v6  ;;  %v14068_v6 = vld [vmem:[#allocation7 + $0x16e4] sm:$0xf0] }
 0x5ab   :  { %7735 = vmatpush.bf16.msrb.mxu1 %v12766_v8  ;;  %6328 = vmatpush.bf16.msrb.mxu3 %v11830_v0  ;;  %v14347_v8 = vld [vmem:[#allocation7 + $0x1f9c] sm:$0xf0]  ;;  %v14175_v0 = vld [vmem:[#allocation7 + $0x1a44] sm:$0xf]  ;;  %v6306_v2 = vpop.f32.mrf.mxu1 }
 0x5ac   :  { %8275 = vmatpush.bf16.msrb.mxu0 %v12906_v16  ;;  %v13274_v14 = vor.u32 %v14347_v8, %v13273_v36  ;;  %v14339_v16 = vld [vmem:[#allocation7 + $0x1f5c] sm:$0xf0]  ;;  %v14044_v8 = vld [vmem:[#allocation7 + $0x1624] sm:$0xf0]  ;;  %v14209_v2 = vld [vmem:[#allocation7 + $0x1b54] sm:$0xf] }
 0x5ad   :  { %6316 = vmatmul.bf16.vlgmr.msrb.gmra.mxu2 %v15447_v61  ;;  %v13242_v18 = vor.u32 %v14339_v16, %v13241_v41  ;;  %v15802_v41 = vld [vmem:[#allocation25_spill] sm:$0xff] }
 0x5ae   :  { %6753 = vmatpush.bf16.msra.mxu2 %v12290_v40  ;;  %6329 = vmatmul.bf16.vlgmr.msrb.gmra.mxu3 %v15447_v61  ;;  %v12195_v61 = vld [vmem:[#allocation7 + $0x1728] sm:$0xf0]  ;;  %v12603_v40 = vld [vmem:[#allocation7 + $0x1a60] sm:$0xf0] }
 0x5af   :  { %6766 = vmatpush.bf16.msra.mxu3 %v12294_v58  ;;  %7736 = vmatpush.bf16.msrb.mxu1 %v12734_v23  ;;  %v12198_v12 = vor.u32 %v14072_v42, %v12195_v61  ;;  %v12162_v58 = vor.u32 %v14068_v6, %v12161_v25  ;;  %v14060_v23 = vld [vmem:[#allocation7 + $0x16a4] sm:$0xf0]  ;;  %v12606_v48 = vor.u32 %v14175_v0, %v12603_v40  ;;  %v14217_v61 = vld [vmem:[#allocation7 + $0x1b94] sm:$0xf]  ;;  %v13145_v6 = vld [vmem:[#allocation7 + $0x1e80] sm:$0xf] }
 0x5b0   :  { %8276 = vmatpush.bf16.msrb.mxu0 %v12874_v27  ;;  %v12130_v27 = vor.u32 %v14060_v23, %v12129_v35  ;;  %v5323_v31 = vpop.f32.mrf.mxu2  ;;  %v12782_v63 = vor.u32 %v14217_v61, %v12779_v13  ;;  %v14098_v0 = vld [vmem:[#allocation7 + $0x17dc] sm:$0xf]  ;;  %v13146_v28 = vor.u32 %v14315_v32, %v13145_v6  ;;  %v14193_v61 = vld [vmem:[#allocation7 + $0x1ad4] sm:$0xf] }
 0x5b1   :  { %v15612_v51 = vadd.f32 %v5323_v31, %v15578_v52  ;;  %v5336_v26 = vpop.f32.mrf.mxu3  ;;  %v12065_v52 = vld [vmem:[#allocation7 + $0x1608] sm:$0xf]  ;;  %v12307_v40 = vld [vmem:[#allocation7 + $0x17f8] sm:$0xf0]  ;;  %v12683_v13 = vld [vmem:[#allocation7 + $0x1af0] sm:$0xf0] }
 0x5b2   :  { %6754 = vmatpush.bf16.msra.mxu2 %v12258_v29  ;;  %v13209_v29 = vld [vmem:[#allocation7 + $0x1f00] sm:$0xf]  ;;  %v15615_v21 = vadd.f32 %v5336_v26, %v15581_v37  ;;  %v12310_v24 = vor.u32 %v14098_v0, %v12307_v40  ;;  %v12275_v31 = vld [vmem:[#allocation7 + $0x17b8] sm:$0xf0]  ;;  %v12686_v32 = vor.u32 %v14193_v61, %v12683_v13  ;;  %v14054_v61 = vld [vmem:[#allocation7 + $0x1674] sm:$0xf0] }
 0x5b3   :  { %6767 = vmatpush.bf16.msra.mxu3 %v12262_v19  ;;  %7737 = vmatpush.bf16.msrb.mxu1 %v12702_v9  ;;  %v14225_v19 = vld [vmem:[#allocation7 + $0x1bd4] sm:$0xf]  ;;  %v12097_v9 = vld [vmem:[#allocation7 + $0x1648] sm:$0xf]  ;;  %v13210_v5 = vor.u32 %v14331_v17, %v13209_v29  ;;  %v12273_v29 = vld [vmem:[#allocation7 + $0x1798] sm:$0xf] }
 0x5b4   :  { %8277 = vmatpush.bf16.msrb.mxu0 %v12842_v49  ;;  %v12814_v49 = vor.u32 %v14225_v19, %v12811_v10  ;;  %v12098_v42 = vor.u32 %v14052_v3, %v12097_v9  ;;  %v14094_v17 = vld [vmem:[#allocation7 + $0x17b4] sm:$0xf0]  ;;  %v14307_v19 = vld [vmem:[#allocation7 + $0x1e5c] sm:$0xf0]  ;;  %v14090_v10 = vld [vmem:[#allocation7 + $0x179c] sm:$0xf] }
 0x5b5   :  { %v12715_v9 = vld [vmem:[#allocation7 + $0x1b30] sm:$0xf0]  ;;  %v12274_v26 = vor.u32 %v14094_v17, %v12273_v29  ;;  %v14074_v40 = vld [vmem:[#allocation7 + $0x171c] sm:$0xf]  ;;  %v13257_v29 = vld [vmem:[#allocation7 + $0x1f50] sm:$0xf] }
 0x5b6   :  { %6755 = vmatpush.bf16.msra.mxu2 %v12226_v43  ;;  %v12099_v43 = vld [vmem:[#allocation7 + $0x1668] sm:$0xf0]  ;;  %v7285_v54 = vpop.f32.mrf.mxu0  ;;  %v14341_v17 = vld [vmem:[#allocation7 + $0x1f6c] sm:$0xf0] }
 0x5b7   :  { %6768 = vmatpush.bf16.msra.mxu3 %v12230_v60  ;;  %7738 = vmatpush.bf16.msrb.mxu1 %v12670_v11  ;;  %v13177_v60 = vld [vmem:[#allocation7 + $0x1ec0] sm:$0xf]  ;;  %v15801_v11 = vld [vmem:[#allocation19_spill] sm:$0xff]  ;;  %v12102_v36 = vor.u32 %v14048_v47, %v12099_v43  ;;  %v15619_v37 = vadd.f32 %v7285_v54, %v15584_v30  ;;  %v13114_v43 = vor.u32 %v14307_v19, %v13113_v15 }
 0x5b8   :  { %8715 = vmatpush.bf16.msra.mxu0 %v13306_v44  ;;  %v663_v44 = vadd.f32 %v14377_v53, %v15801_v11  ;;  %v13178_v25 = vor.u32 %v14323_v56, %v13177_v60  ;;  %v5325_v30 = vpop.f32.mrf.mxu2  ;;  %v14299_v60 = vld [vmem:[#allocation7 + $0x1e1c] sm:$0xf0]  ;;  %v12241_v56 = vld [vmem:[#allocation7 + $0x1758] sm:$0xf]  ;;  %v14357_v54 = vld [vmem:[#allocation7 + $0x1fec] sm:$0xf0] }
 0x5b9   :  { %8278 = vmatmul.bf16.vlgmr.msrb.gmra.mxu0 %v15592_v38  ;;  %v5338_v33 = vpop.f32.mrf.mxu3  ;;  %v14086_v53 = vld [vmem:[#allocation7 + $0x1774] sm:$0xf0]  ;;  %v12619_v15 = vld [vmem:[#allocation7 + $0x1a70] sm:$0xf0] }
 0x5ba   :  { %6756 = vmatpush.bf16.msra.mxu2 %v12194_v57  ;;  %v14040_v57 = vld [vmem:[#allocation7 + $0x160c] sm:$0xf]  ;;  %v728_v16 = vadd.f32 %v15802_v41, %v663_v44  ;;  %v14082_v44 = vld [vmem:[#allocation7 + $0x175c] sm:$0xf]  ;;  %v12177_v30 = vld [vmem:[#allocation7 + $0x16d8] sm:$0xf] }
 0x5bb   :  { %6769 = vmatpush.bf16.msra.mxu3 %v12198_v12  ;;  %7739 = vmatpush.bf16.msrb.mxu1 %v12638_v55  ;;  %v12067_v12 = vld [vmem:[#allocation7 + $0x1628] sm:$0xf0]  ;;  %v12305_v55 = vld [vmem:[#allocation7 + $0x17d8] sm:$0xf]  ;;  %v12211_v41 = vld [vmem:[#allocation7 + $0x1738] sm:$0xf0] }
 0x5bc   :  { %8716 = vmatpush.bf16.msra.mxu0 %v13274_v14  ;;  %v14102_v14 = vld [vmem:[#allocation7 + $0x17f4] sm:$0xf0]  ;;  %v12070_v35 = vor.u32 %v14040_v57, %v12067_v12  ;;  %v14066_v33 = vld [vmem:[#allocation7 + $0x16dc] sm:$0xf] }
 0x5bd   :  { %v12306_v23 = vor.u32 %v14102_v14, %v12305_v55  ;;  %v12209_v55 = vld [vmem:[#allocation7 + $0x1718] sm:$0xf] }
 0x5be   :  { %6757 = vmatpush.bf16.msra.mxu2 %v12162_v58  ;;  %v12066_v58 = vor.u32 %v14044_v8, %v12065_v52  ;;  %v7287_v3 = vpop.f32.mrf.mxu0  ;;  %v13321_v52 = vld [vmem:[#allocation7 + $0x1fd0] sm:$0xf]  ;;  %v12242_v8 = vor.u32 %v14086_v53, %v12241_v56  ;;  %v14078_v14 = vld [vmem:[#allocation7 + $0x1734] sm:$0xf0]  ;;  %v14287_v56 = vld [vmem:[#allocation7 + $0x1dc4] sm:$0xf] }
 0x5bf   :  { %6770 = vmatpush.bf16.msra.mxu3 %v12166_v1  ;;  %7740 = vmatpush.bf16.msrb.mxu1 %v12606_v48  ;;  %v12747_v1 = vld [vmem:[#allocation7 + $0x1b70] sm:$0xf0]  ;;  %v15803_v48 = vld [vmem:[#allocation26_spill] sm:$0xff]  ;;  %v13322_v0 = vor.u32 %v14357_v54, %v13321_v52  ;;  %v13258_v3 = vor.u32 %v14341_v17, %v13257_v29  ;;  %v13051_v53 = vld [vmem:[#allocation7 + $0x1de0] sm:$0xf0] }
 0x5c0   :  { %8717 = vmatpush.bf16.msra.mxu0 %v13242_v18  ;;  %v793_v18 = vadd.f32 %v15803_v48, %v728_v16  ;;  %v14185_v16 = vld [vmem:[#allocation7 + $0x1a94] sm:$0xf] }
 0x5c2   :  { %6758 = vmatpush.bf16.msra.mxu2 %v12130_v27  ;;  %v12750_v27 = vor.u32 %v14209_v2, %v12747_v1  ;;  %v12210_v2 = vor.u32 %v14078_v14, %v12209_v55  ;;  %v12214_v1 = vor.u32 %v14074_v40, %v12211_v41  ;;  %v14325_v55 = vld [vmem:[#allocation7 + $0x1eec] sm:$0xf0]  ;;  %v12081_v40 = vld [vmem:[#allocation7 + $0x1618] sm:$0xf] }
 0x5c3   :  { %6771 = vmatpush.bf16.msra.mxu3 %v12134_v20  ;;  %7741 = vmatpush.bf16.msrb.mxu1 %v12574_v4  ;;  %v14201_v20 = vld [vmem:[#allocation7 + $0x1b14] sm:$0xf]  ;;  %v13081_v4 = vld [vmem:[#allocation7 + $0x1e00] sm:$0xf]  ;;  %v6749_v12 = vpop.f32.mrf.mxu1 }
 0x5c4   :  { %8718 = vmatpush.bf16.msra.mxu0 %v13210_v5  ;;  %v15804_v5 = vld [vmem:[#allocation24_spill] sm:$0xff]  ;;  %v12718_v11 = vor.u32 %v14201_v20, %v12715_v9 }
 0x5c5   :  { %v858_v47 = vadd.f32 %v15804_v5, %v793_v18  ;;  %v14062_v20 = vld [vmem:[#allocation7 + $0x16b4] sm:$0xf0]  ;;  %v14169_v5 = vld [vmem:[#allocation7 + $0x1a14] sm:$0xf] }
 0x5c6   :  { %6759 = vmatpush.bf16.msra.mxu2 %v12098_v42  ;;  %7742 = vmatmul.bf16.vlgmr.msrb.gmra.mxu1 %v15557_v59  ;;  %v12243_v42 = vld [vmem:[#allocation7 + $0x1778] sm:$0xf0] }
 0x5c7   :  { %7786 = vmatpush.bf16.msra.mxu1 %v12814_v49  ;;  %6772 = vmatpush.bf16.msra.mxu3 %v12102_v36  ;;  %v12278_v49 = vor.u32 %v14090_v10, %v12275_v31  ;;  %v6335_v36 = vadd.f32 %v15590_v62, %v15555_v34  ;;  %v875_v57 = vmax.f32 %v858_v47, 0.0  ;;  %v12246_v6 = vor.u32 %v14082_v44, %v12243_v42  ;;  %v13289_v34 = vld [vmem:[#allocation7 + $0x1f90] sm:$0xf]  ;;  %v12145_v31 = vld [vmem:[#allocation7 + $0x1698] sm:$0xf] }
 0x5c8   :  { %8719 = vmatpush.bf16.msra.mxu0 %v13178_v25  ;;  %v13082_v25 = vor.u32 %v14299_v60, %v13081_v4  ;;  %v14349_v62 = vld [vmem:[#allocation7 + $0x1fac] sm:$0xf0]  ;;  %v12147_v4 = vld [vmem:[#allocation7 + $0x16b8] sm:$0xf0]  ;;  %v12587_v47 = vld [vmem:[#allocation7 + $0x1a30] sm:$0xf0]  ;;  %v12146_v60 = vor.u32 %v14062_v20, %v12145_v31 }
 0x5c9   :  { %v13290_v18 = vor.u32 %v14349_v62, %v13289_v34  ;;  %v12113_v42 = vld [vmem:[#allocation7 + $0x1658] sm:$0xf]  ;;  %v12590_v54 = vor.u32 %v14169_v5, %v12587_v47  ;;  %v12083_v34 = vld [vmem:[#allocation7 + $0x1638] sm:$0xf0]  ;;  %v13129_v31 = vld [vmem:[#allocation7 + $0x1e50] sm:$0xf] }
 0x5ca   :  { %6760 = vmatpush.bf16.msra.mxu2 %v12066_v58  ;;  %v12651_v58 = vld [vmem:[#allocation7 + $0x1ab0] sm:$0xf0]  ;;  %v12114_v14 = vor.u32 %v14054_v61, %v12113_v42  ;;  %v12513_v20 = vld [vmem:[#allocation7 + $0x1988] sm:$0xf]  ;;  %v12515_v5 = vld [vmem:[#allocation7 + $0x19a8] sm:$0xf0] }
 0x5cb   :  { %7787 = vmatpush.bf16.msra.mxu1 %v12782_v63  ;;  %6773 = vmatpush.bf16.msra.mxu3 %v12070_v35  ;;  %v15629_v63 = vadd.f32 %v6749_v12, %v6335_v36  ;;  %v14070_v35 = vld [vmem:[#allocation7 + $0x16f4] sm:$0xf0]  ;;  %v12654_v48 = vor.u32 %v14185_v16, %v12651_v58  ;;  %v6751_v19 = vpop.f32.mrf.mxu1  ;;  %v14042_v58 = vld [vmem:[#allocation7 + $0x161c] sm:$0xf]  ;;  %v14263_v47 = vld [vmem:[#allocation7 + $0x1d04] sm:$0xf] }
 0x5cc   :  { %8720 = vmatpush.bf16.msra.mxu0 %v13146_v28  ;;  %v12179_v28 = vld [vmem:[#allocation7 + $0x16f8] sm:$0xf0]  ;;  %v14046_v16 = vld [vmem:[#allocation7 + $0x1634] sm:$0xf0]  ;;  %v12086_v29 = vor.u32 %v14042_v58, %v12083_v34  ;;  %v14148_v42 = vld [vmem:[#allocation7 + $0x1964] sm:$0xf0] }
 0x5cd   :  { %6761 = vmatmul.bf16.vlgmr.msra.gmra.mxu2 %v15485_v50  ;;  %v12182_v10 = vor.u32 %v14066_v33, %v12179_v28  ;;  %v12547_v33 = vld [vmem:[#allocation7 + $0x19e8] sm:$0xf0]  ;;  %v12082_v28 = vor.u32 %v14046_v16, %v12081_v40  ;;  %v14247_v58 = vld [vmem:[#allocation7 + $0x1c84] sm:$0xf] }
 0x5ce   :  { %6805 = vmatpush.bf16.msrb.mxu2 %v12306_v23  ;;  %6774 = vmatmul.bf16.vlgmr.msra.gmra.mxu3 %v15485_v50  ;;  %v15631_v23 = vpack.c.bf16 %v875_v57, %v875_v57  ;;  %v12115_v57 = vld [vmem:[#allocation7 + $0x1678] sm:$0xf0]  ;;  %v12451_v16 = vld [vmem:[#allocation7 + $0x1928] sm:$0xf0] }
 0x5cf   :  { %6818 = vmatpush.bf16.msrb.mxu3 %v12310_v24  ;;  %7788 = vmatpush.bf16.msra.mxu1 %v12750_v27  ;;  %v14177_v24 = vld [vmem:[#allocation7 + $0x1a54] sm:$0xf]  ;;  %v12178_v27 = vor.u32 %v14070_v35, %v12177_v30  ;;  %v14164_v30 = vld [vmem:[#allocation7 + $0x19e4] sm:$0xf0] }
 0x5d0   :  { %8721 = vmatpush.bf16.msra.mxu0 %v13114_v43  ;;  %v12622_v9 = vor.u32 %v14177_v24, %v12619_v15  ;;  %v13225_v43 = vld [vmem:[#allocation7 + $0x1f10] sm:$0xf]  ;;  %v14271_v24 = vld [vmem:[#allocation7 + $0x1d44] sm:$0xf] }
 0x5d1   :  { %v5781_v52 = vpop.f32.mrf.mxu3  ;;  %v12987_v15 = vld [vmem:[#allocation7 + $0x1d60] sm:$0xf0] }
 0x5d2   :  { %6806 = vmatpush.bf16.msrb.mxu2 %v12274_v26  ;;  %v14058_v26 = vld [vmem:[#allocation7 + $0x169c] sm:$0xf]  ;;  %v15638_v12 = vadd.f32 %v5781_v52, %v15599_v22  ;;  %v14301_v52 = vld [vmem:[#allocation7 + $0x1e2c] sm:$0xf0] }
 0x5d3   :  { %6819 = vmatpush.bf16.msrb.mxu3 %v12278_v49  ;;  %7789 = vmatpush.bf16.msra.mxu1 %v12718_v11  ;;  %v14333_v49 = vld [vmem:[#allocation7 + $0x1f2c] sm:$0xf0]  ;;  %v5768_v11 = vpop.f32.mrf.mxu2  ;;  %v12150_v44 = vor.u32 %v14058_v26, %v12147_v4  ;;  %v14152_v4 = vld [vmem:[#allocation7 + $0x198c] sm:$0xf] }
 0x5d4   :  { %8722 = vmatpush.bf16.msra.mxu0 %v13082_v25  ;;  %v15635_v13 = vadd.f32 %v5768_v11, %v15596_v7  ;;  %v13226_v36 = vor.u32 %v14333_v49, %v13225_v43  ;;  %v13054_v25 = vor.u32 %v14287_v56, %v13051_v53  ;;  %v14309_v26 = vld [vmem:[#allocation7 + $0x1e6c] sm:$0xf0]  ;;  %v12955_v43 = vld [vmem:[#allocation7 + $0x1d20] sm:$0xf0]  ;;  %v12518_v53 = vor.u32 %v14152_v4, %v12515_v5  ;;  %v12353_v4 = vld [vmem:[#allocation7 + $0x1848] sm:$0xf] }
 0x5d5   :  { %v13130_v56 = vor.u32 %v14309_v26, %v13129_v31  ;;  %v13097_v11 = vld [vmem:[#allocation7 + $0x1e10] sm:$0xf]  ;;  %v12958_v61 = vor.u32 %v14263_v47, %v12955_v43  ;;  %v14116_v5 = vld [vmem:[#allocation7 + $0x1864] sm:$0xf0] }
 0x5d6   :  { %6807 = vmatpush.bf16.msrb.mxu2 %v12242_v8  ;;  %v14050_v8 = vld [vmem:[#allocation7 + $0x165c] sm:$0xf]  ;;  %v7730_v41 = vpop.f32.mrf.mxu0 }
 0x5d7   :  { %6820 = vmatpush.bf16.msrb.mxu3 %v12246_v6  ;;  %7790 = vmatpush.bf16.msra.mxu1 %v12686_v32  ;;  %v13193_v6 = vld [vmem:[#allocation7 + $0x1ed0] sm:$0xf]  ;;  %v14279_v32 = vld [vmem:[#allocation7 + $0x1d84] sm:$0xf]  ;;  %v12118_v7 = vor.u32 %v14050_v8, %v12115_v57  ;;  %v15641_v62 = vadd.f32 %v7730_v41, %v15602_v39 }
 0x5d8   :  { %8767 = vmatpush.bf16.msrb.mxu0 %v13322_v0  ;;  %v13019_v0 = vld [vmem:[#allocation7 + $0x1da0] sm:$0xf0]  ;;  %v13194_v22 = vor.u32 %v14325_v55, %v13193_v6  ;;  %v13098_v55 = vor.u32 %v14301_v52, %v13097_v11 }
 0x5d9   :  { %8723 = vmatmul.bf16.vlgmr.msra.gmra.mxu0 %v15631_v23  ;;  %v13022_v35 = vor.u32 %v14279_v32, %v13019_v0  ;;  %v14255_v8 = vld [vmem:[#allocation7 + $0x1cc4] sm:$0xf]  ;;  %v12449_v32 = vld [vmem:[#allocation7 + $0x1908] sm:$0xf] }
 0x5da   :  { %6808 = vmatpush.bf16.msrb.mxu2 %v12210_v2  ;;  %v13161_v2 = vld [vmem:[#allocation7 + $0x1e90] sm:$0xf]  ;;  %v12923_v57 = vld [vmem:[#allocation7 + $0x1ce0] sm:$0xf0]  ;;  %v14140_v0 = vld [vmem:[#allocation7 + $0x1924] sm:$0xf0] }
 0x5db   :  { %6821 = vmatpush.bf16.msrb.mxu3 %v12214_v1  ;;  %7791 = vmatpush.bf16.msra.mxu1 %v12654_v48  ;;  %v12545_v1 = vld [vmem:[#allocation7 + $0x19c8] sm:$0xf]  ;;  %v14317_v48 = vld [vmem:[#allocation7 + $0x1eac] sm:$0xf0]  ;;  %v5770_v39 = vpop.f32.mrf.mxu2  ;;  %v12926_v41 = vor.u32 %v14255_v8, %v12923_v57  ;;  %v12450_v34 = vor.u32 %v14140_v0, %v12449_v32  ;;  %v14104_v57 = vld [vmem:[#allocation7 + $0x180c] sm:$0xf] }
 0x5dc   :  { %8768 = vmatpush.bf16.msrb.mxu0 %v13290_v18  ;;  %v14160_v18 = vld [vmem:[#allocation7 + $0x19cc] sm:$0xf]  ;;  %v12546_v17 = vor.u32 %v14164_v30, %v12545_v1  ;;  %v13162_v19 = vor.u32 %v14317_v48, %v13161_v2  ;;  %v12417_v2 = vld [vmem:[#allocation7 + $0x18c8] sm:$0xf]  ;;  %v12563_v32 = vld [vmem:[#allocation7 + $0x19f8] sm:$0xf0] }
 0x5dd   :  { %v14132_v1 = vld [vmem:[#allocation7 + $0x18e4] sm:$0xf0]  ;;  %v12419_v48 = vld [vmem:[#allocation7 + $0x18e8] sm:$0xf0] }
 0x5de   :  { %6809 = vmatpush.bf16.msrb.mxu2 %v12178_v27  ;;  %v5783_v27 = vpop.f32.mrf.mxu3  ;;  %v7732_v49 = vpop.f32.mrf.mxu0  ;;  %v14124_v39 = vld [vmem:[#allocation7 + $0x18a4] sm:$0xf0] }
 0x5df   :  { %6822 = vmatpush.bf16.msrb.mxu3 %v12182_v10  ;;  %7792 = vmatpush.bf16.msra.mxu1 %v12622_v9  ;;  %v12550_v10 = vor.u32 %v14160_v18, %v12547_v33  ;;  %v14156_v9 = vld [vmem:[#allocation7 + $0x19a4] sm:$0xf0]  ;;  %v14239_v18 = vld [vmem:[#allocation7 + $0x1c44] sm:$0xf]  ;;  %v12418_v33 = vor.u32 %v14132_v1, %v12417_v2  ;;  %v12387_v27 = vld [vmem:[#allocation7 + $0x18a8] sm:$0xf0] }
 0x5e0   :  { %8769 = vmatpush.bf16.msrb.mxu0 %v13258_v3  ;;  %v12990_v3 = vor.u32 %v14271_v24, %v12987_v15  ;;  %v12385_v15 = vld [vmem:[#allocation7 + $0x1888] sm:$0xf]  ;;  %v14158_v2 = vld [vmem:[#allocation7 + $0x19b4] sm:$0xf0] }
 0x5e1   :  { %v12386_v31 = vor.u32 %v14124_v39, %v12385_v15  ;;  %v14108_v8 = vld [vmem:[#allocation7 + $0x1824] sm:$0xf0]  ;;  %v14150_v15 = vld [vmem:[#allocation7 + $0x1974] sm:$0xf0] }
 0x5e2   :  { %6810 = vmatpush.bf16.msrb.mxu2 %v12146_v60  ;;  %v12514_v60 = vor.u32 %v14156_v9, %v12513_v20  ;;  %v14289_v20 = vld [vmem:[#allocation7 + $0x1dd4] sm:$0xf] }
 0x5e3   :  { %6823 = vmatpush.bf16.msrb.mxu3 %v12150_v44  ;;  %7793 = vmatpush.bf16.msra.mxu1 %v12590_v54  ;;  %v12481_v44 = vld [vmem:[#allocation7 + $0x1948] sm:$0xf]  ;;  %v14144_v54 = vld [vmem:[#allocation7 + $0x194c] sm:$0xf]  ;;  %v6801_v6 = vpop.f32.mrf.mxu1  ;;  %v13067_v9 = vld [vmem:[#allocation7 + $0x1df0] sm:$0xf0] }
 0x5e4   :  { %8770 = vmatpush.bf16.msrb.mxu0 %v13226_v36  ;;  %v12483_v36 = vld [vmem:[#allocation7 + $0x1968] sm:$0xf0]  ;;  %v15647_v40 = vadd.f32 %v6801_v6, %v15608_v45  ;;  %v12859_v45 = vld [vmem:[#allocation7 + $0x1c60] sm:$0xf0]  ;;  %v13070_v11 = vor.u32 %v14289_v20, %v13067_v9  ;;  %v12561_v6 = vld [vmem:[#allocation7 + $0x19d8] sm:$0xf] }
 0x5e5   :  { %v12465_v9 = vld [vmem:[#allocation7 + $0x1918] sm:$0xf] }
 0x5e6   :  { %6811 = vmatpush.bf16.msrb.mxu2 %v12114_v14  ;;  %7794 = vmatmul.bf16.vlgmr.msra.gmra.mxu1 %v15557_v59  ;;  %v12486_v14 = vor.u32 %v14144_v54, %v12483_v36  ;;  %v12321_v36 = vld [vmem:[#allocation7 + $0x1808] sm:$0xf] }
 0x5e7   :  { %8231 = vmatpush.bf16.msrb.mxu1 %v13054_v25  ;;  %6824 = vmatpush.bf16.msrb.mxu3 %v12118_v7  ;;  %v12482_v25 = vor.u32 %v14148_v42, %v12481_v44  ;;  %v14136_v7 = vld [vmem:[#allocation7 + $0x190c] sm:$0xf]  ;;  %v12354_v44 = vor.u32 %v14116_v5, %v12353_v4  ;;  %v14281_v42 = vld [vmem:[#allocation7 + $0x1d94] sm:$0xf]  ;;  %v12322_v0 = vor.u32 %v14108_v8, %v12321_v36  ;;  %v14138_v5 = vld [vmem:[#allocation7 + $0x191c] sm:$0xf] }
 0x5e8   :  { %8771 = vmatpush.bf16.msrb.mxu0 %v13194_v22  ;;  %v12454_v22 = vor.u32 %v14136_v7, %v12451_v16  ;;  %v13003_v7 = vld [vmem:[#allocation7 + $0x1d70] sm:$0xf0] }
 0x5e9   :  { %v14241_v36 = vld [vmem:[#allocation7 + $0x1c54] sm:$0xf] }
 0x5ea   :  { %6812 = vmatpush.bf16.msrb.mxu2 %v12082_v28  ;;  %v12875_v8 = vld [vmem:[#allocation7 + $0x1c70] sm:$0xf0] }
 0x5eb   :  { %8232 = vmatpush.bf16.msrb.mxu1 %v13022_v35  ;;  %6825 = vmatpush.bf16.msrb.mxu3 %v12086_v29  ;;  %v14128_v35 = vld [vmem:[#allocation7 + $0x18cc] sm:$0xf]  ;;  %v6803_v28 = vpop.f32.mrf.mxu1  ;;  %v12862_v29 = vor.u32 %v14239_v18, %v12859_v45  ;;  %v12971_v18 = vld [vmem:[#allocation7 + $0x1d30] sm:$0xf0] }
 0x5ec   :  { %8772 = vmatpush.bf16.msrb.mxu0 %v13162_v19  ;;  %v12422_v24 = vor.u32 %v14128_v35, %v12419_v48  ;;  %v14231_v19 = vld [vmem:[#allocation7 + $0x1c04] sm:$0xf]  ;;  %v12531_v35 = vld [vmem:[#allocation7 + $0x19b8] sm:$0xf0]  ;;  %v14265_v48 = vld [vmem:[#allocation7 + $0x1d14] sm:$0xf] }
 0x5ed   :  { %6813 = vmatmul.bf16.vlgmr.msrb.gmra.mxu2 %v15485_v50  ;;  %v12974_v39 = vor.u32 %v14265_v48, %v12971_v18  ;;  %v14343_v18 = vld [vmem:[#allocation7 + $0x1f84] sm:$0xf] }
 0x5ee   :  { %7250 = vmatpush.bf16.msra.mxu2 %v12546_v17  ;;  %6826 = vmatmul.bf16.vlgmr.msrb.gmra.mxu3 %v15485_v50  ;;  %v12891_v50 = vld [vmem:[#allocation7 + $0x1ca0] sm:$0xf0]  ;;  %v14120_v17 = vld [vmem:[#allocation7 + $0x188c] sm:$0xf] }
 0x5ef   :  { %7263 = vmatpush.bf16.msra.mxu3 %v12550_v10  ;;  %8233 = vmatpush.bf16.msrb.mxu1 %v12990_v3  ;;  %v12894_v30 = vor.u32 %v14247_v58, %v12891_v50  ;;  %v12827_v10 = vld [vmem:[#allocation7 + $0x1c20] sm:$0xf0]  ;;  %v12390_v26 = vor.u32 %v14120_v17, %v12387_v27  ;;  %v12499_v17 = vld [vmem:[#allocation7 + $0x1978] sm:$0xf0]  ;;  %v14257_v27 = vld [vmem:[#allocation7 + $0x1cd4] sm:$0xf] }
 0x5f0   :  { %8773 = vmatpush.bf16.msrb.mxu0 %v13130_v56  ;;  %v5820_v3 = vpop.f32.mrf.mxu2  ;;  %v12830_v49 = vor.u32 %v14231_v19, %v12827_v10  ;;  %v12355_v56 = vld [vmem:[#allocation7 + $0x1868] sm:$0xf0]  ;;  %v12939_v19 = vld [vmem:[#allocation7 + $0x1cf0] sm:$0xf0] }
 0x5f1   :  { %v15651_v47 = vadd.f32 %v5820_v3, %v15612_v51  ;;  %v5833_v43 = vpop.f32.mrf.mxu3  ;;  %v14142_v3 = vld [vmem:[#allocation7 + $0x1934] sm:$0xf0]  ;;  %v12942_v4 = vor.u32 %v14257_v27, %v12939_v19  ;;  %v12339_v27 = vld [vmem:[#allocation7 + $0x1838] sm:$0xf0]  ;;  %v12801_v19 = vld [vmem:[#allocation7 + $0x1bc8] sm:$0xf] }
 0x5f2   :  { %7251 = vmatpush.bf16.msra.mxu2 %v12514_v60  ;;  %v14112_v60 = vld [vmem:[#allocation7 + $0x184c] sm:$0xf] }
 0x5f3   :  { %7264 = vmatpush.bf16.msra.mxu3 %v12518_v53  ;;  %8234 = vmatpush.bf16.msrb.mxu1 %v12958_v61  ;;  %v15654_v53 = vadd.f32 %v5833_v43, %v15615_v21  ;;  %v13035_v61 = vld [vmem:[#allocation7 + $0x1db0] sm:$0xf0]  ;;  %v12358_v54 = vor.u32 %v14112_v60, %v12355_v56  ;;  %v12467_v43 = vld [vmem:[#allocation7 + $0x1938] sm:$0xf0]  ;;  %v12466_v56 = vor.u32 %v14142_v3, %v12465_v9  ;;  %v14224_v9 = vld [vmem:[#allocation7 + $0x1bcc] sm:$0xf] }
 0x5f4   :  { %8774 = vmatpush.bf16.msrb.mxu0 %v13098_v55  ;;  %v14166_v55 = vld [vmem:[#allocation7 + $0x19f4] sm:$0xf0]  ;;  %v13038_v21 = vor.u32 %v14281_v42, %v13035_v61  ;;  %v12907_v60 = vld [vmem:[#allocation7 + $0x1cb0] sm:$0xf0]  ;;  %v12803_v3 = vld [vmem:[#allocation7 + $0x1be8] sm:$0xf0] }
 0x5f5   :  { %v12562_v50 = vor.u32 %v14166_v55, %v12561_v6  ;;  %v14134_v42 = vld [vmem:[#allocation7 + $0x18f4] sm:$0xf0] }
 0x5f6   :  { %7252 = vmatpush.bf16.msra.mxu2 %v12482_v25  ;;  %v7782_v52 = vpop.f32.mrf.mxu0  ;;  %v12323_v25 = vld [vmem:[#allocation7 + $0x1828] sm:$0xf0]  ;;  %v12401_v6 = vld [vmem:[#allocation7 + $0x1898] sm:$0xf] }
 0x5f7   :  { %7265 = vmatpush.bf16.msra.mxu3 %v12486_v14  ;;  %8235 = vmatpush.bf16.msrb.mxu1 %v12926_v41  ;;  %v15657_v51 = vadd.f32 %v7782_v52, %v15619_v37  ;;  %v14162_v14 = vld [vmem:[#allocation7 + $0x19dc] sm:$0xf]  ;;  %v14273_v41 = vld [vmem:[#allocation7 + $0x1d54] sm:$0xf]  ;;  %v12326_v58 = vor.u32 %v14104_v57, %v12323_v25  ;;  %v14126_v55 = vld [vmem:[#allocation7 + $0x18b4] sm:$0xf0] }
 0x5f8   :  { %8775 = vmatmul.bf16.vlgmr.msrb.gmra.mxu0 %v15631_v23  ;;  %v5822_v16 = vpop.f32.mrf.mxu2  ;;  %v13006_v1 = vor.u32 %v14273_v41, %v13003_v7  ;;  %v14130_v52 = vld [vmem:[#allocation7 + $0x18dc] sm:$0xf]  ;;  %v12843_v41 = vld [vmem:[#allocation7 + $0x1c30] sm:$0xf0]  ;;  %v12402_v7 = vor.u32 %v14126_v55, %v12401_v6  ;;  %v8872_v6 = vld [vmem:[#allocation10 + $0x58] sm:$0xff] }
 0x5f9   :  { %v5835_v37 = vpop.f32.mrf.mxu3  ;;  %v14351_v16 = vld [vmem:[#allocation7 + $0x1fc4] sm:$0xf] }
 0x5fa   :  { %7253 = vmatpush.bf16.msra.mxu2 %v12450_v34  ;;  %v12566_v34 = vor.u32 %v14162_v14, %v12563_v32  ;;  %v14122_v14 = vld [vmem:[#allocation7 + $0x189c] sm:$0xf] }
 0x5fb   :  { %7266 = vmatpush.bf16.msra.mxu3 %v12454_v22  ;;  %8236 = vmatpush.bf16.msrb.mxu1 %v12894_v30  ;;  %v12529_v22 = vld [vmem:[#allocation7 + $0x1998] sm:$0xf]  ;;  %v14154_v30 = vld [vmem:[#allocation7 + $0x199c] sm:$0xf] }
 0x5fc   :  { %v12534_v28 = vor.u32 %v14154_v30, %v12531_v35  ;;  %v12403_v32 = vld [vmem:[#allocation7 + $0x18b8] sm:$0xf0] }
 0x5fd   :  { %v12406_v37 = vor.u32 %v14122_v14, %v12403_v32  ;;  %v14114_v30 = vld [vmem:[#allocation7 + $0x185c] sm:$0xf]  ;;  %v12737_v32 = vld [vmem:[#allocation7 + $0x1b48] sm:$0xf] }
 0x5fe   :  { %7254 = vmatpush.bf16.msra.mxu2 %v12418_v33  ;;  %v7784_v45 = vpop.f32.mrf.mxu0  ;;  %v12530_v33 = vor.u32 %v14158_v2, %v12529_v22  ;;  %v14118_v22 = vld [vmem:[#allocation7 + $0x1874] sm:$0xf0]  ;;  %v12371_v35 = vld [vmem:[#allocation7 + $0x1878] sm:$0xf0] }
 0x5ff   :  { %7267 = vmatpush.bf16.msra.mxu3 %v12422_v24  ;;  %8237 = vmatpush.bf16.msrb.mxu1 %v12862_v29  ;;  %v12497_v24 = vld [vmem:[#allocation7 + $0x1958] sm:$0xf]  ;;  %v14146_v29 = vld [vmem:[#allocation7 + $0x195c] sm:$0xf] }
 0x600   :  { %v12498_v10 = vor.u32 %v14150_v15, %v12497_v24  ;;  %v12502_v20 = vor.u32 %v14146_v29, %v12499_v17  ;;  %v8876_v24 = vld [vmem:[#allocation10 + $0x78] sm:$0xff]  ;;  %v14110_v29 = vld [vmem:[#allocation7 + $0x1834] sm:$0xf0]  ;;  %v14106_v17 = vld [vmem:[#allocation7 + $0x181c] sm:$0xf] }
 0x601   :  { %8993 = vmatpush.msra.mxu0 %v8876_v24  ;;  %v14200_v24 = vld [vmem:[#allocation7 + $0x1b0c] sm:$0xf] }
 0x602   :  { %7255 = vmatpush.bf16.msra.mxu2 %v12386_v31 }
 0x603   :  { %7268 = vmatpush.bf16.msra.mxu3 %v12390_v26  ;;  %8238 = vmatpush.bf16.msrb.mxu1 %v12830_v49  ;;  %v7246_v31 = vpop.f32.mrf.mxu1  ;;  %v14249_v49 = vld [vmem:[#allocation7 + $0x1c94] sm:$0xf] }
 0x604   :  { %v15663_v26 = vadd.f32 %v7246_v31, %v15629_v63  ;;  %v12910_v61 = vor.u32 %v14249_v49, %v12907_v60  ;;  %v8875_v31 = vld [vmem:[#allocation10 + $0x70] sm:$0xff]  ;;  %v8874_v49 = vld [vmem:[#allocation10 + $0x68] sm:$0xff] }
 0x605   :  { %8994 = vmatpush.msra.mxu0 %v8875_v31  ;;  %v14196_v31 = vld [vmem:[#allocation7 + $0x1ae4] sm:$0xf0] }
 0x606   :  { %7256 = vmatpush.bf16.msra.mxu2 %v12354_v44  ;;  %8239 = vmatmul.bf16.vlgmr.msrb.gmra.mxu1 %v15592_v38  ;;  %v12433_v44 = vld [vmem:[#allocation7 + $0x18d8] sm:$0xf] }
 0x607   :  { %8283 = vmatpush.bf16.msra.mxu1 %v13070_v11  ;;  %7269 = vmatpush.bf16.msra.mxu3 %v12358_v54  ;;  %v12470_v11 = vor.u32 %v14138_v5, %v12467_v43  ;;  %v12435_v54 = vld [vmem:[#allocation7 + $0x18f8] sm:$0xf0]  ;;  %v12434_v63 = vor.u32 %v14134_v42, %v12433_v44  ;;  %v14335_v5 = vld [vmem:[#allocation7 + $0x1f44] sm:$0xf]  ;;  %v12806_v42 = vor.u32 %v14224_v9, %v12803_v3  ;;  %v12675_v3 = vld [vmem:[#allocation7 + $0x1ae8] sm:$0xf0] }
 0x608   :  { %v12438_v25 = vor.u32 %v14130_v52, %v12435_v54  ;;  %v13243_v43 = vld [vmem:[#allocation7 + $0x1f60] sm:$0xf0]  ;;  %v14220_v52 = vld [vmem:[#allocation7 + $0x1ba4] sm:$0xf0]  ;;  %8995 = vmatpush.msra.mxu0 %v8874_v49 }
 0x609   :  { %v8873_v54 = vld [vmem:[#allocation10 + $0x60] sm:$0xff] }
 0x60a   :  { %7257 = vmatpush.bf16.msra.mxu2 %v12322_v0  ;;  %v14233_v0 = vld [vmem:[#allocation7 + $0x1c14] sm:$0xf]  ;;  %8996 = vmatpush.msra.mxu0 %v8873_v54  ;;  %v12643_v54 = vld [vmem:[#allocation7 + $0x1aa8] sm:$0xf0] }
 0x60b   :  { %8284 = vmatpush.bf16.msra.mxu1 %v13038_v21  ;;  %7270 = vmatpush.bf16.msra.mxu3 %v12326_v58  ;;  %v7248_v57 = vpop.f32.mrf.mxu1  ;;  %v12878_v21 = vor.u32 %v14241_v36, %v12875_v8  ;;  %v13307_v58 = vld [vmem:[#allocation7 + $0x1fe0] sm:$0xf0]  ;;  %v13246_v36 = vor.u32 %v14335_v5, %v13243_v43  ;;  %v14216_v8 = vld [vmem:[#allocation7 + $0x1b8c] sm:$0xf]  ;;  %v8866_v43 = vld [vmem:[#allocation10 + $0x28] sm:$0xff] }
 0x60c   :  { %v13310_v48 = vor.u32 %v14351_v16, %v13307_v58  ;;  %v14327_v57 = vld [vmem:[#allocation7 + $0x1f04] sm:$0xf]  ;;  %8997 = vmatpush.msra.mxu0 %v8872_v6  ;;  %v14208_v16 = vld [vmem:[#allocation7 + $0x1b4c] sm:$0xf]  ;;  %v13323_v6 = vld [vmem:[#allocation7 + $0x1ff0] sm:$0xf0] }
 0x60d   :  { %7258 = vmatmul.bf16.vlgmr.msra.gmra.mxu2 %v15520_v46  ;;  %v12739_v58 = vld [vmem:[#allocation7 + $0x1b68] sm:$0xf0]  ;;  %v13115_v5 = vld [vmem:[#allocation7 + $0x1e60] sm:$0xf0] }
 0x60e   :  { %7302 = vmatpush.bf16.msrb.mxu2 %v12562_v50  ;;  %7271 = vmatmul.bf16.vlgmr.msra.gmra.mxu3 %v15520_v46 }
 0x60f   :  { %7315 = vmatpush.bf16.msrb.mxu3 %v12566_v34  ;;  %8285 = vmatpush.bf16.msra.mxu1 %v13006_v1  ;;  %v12369_v34 = vld [vmem:[#allocation7 + $0x1858] sm:$0xf]  ;;  %v12846_v1 = vor.u32 %v14233_v0, %v12843_v41  ;;  %v14212_v0 = vld [vmem:[#allocation7 + $0x1b64] sm:$0xf0] }
 0x610   :  { %v15665_v50 = vpop.f32.mrf.mxu2  ;;  %v12370_v45 = vor.u32 %v14118_v22, %v12369_v34  ;;  %v8871_v41 = vld [vmem:[#allocation10 + $0x50] sm:$0xff]  ;;  %v13179_v34 = vld [vmem:[#allocation7 + $0x1ee0] sm:$0xf0]  ;;  %v8870_v22 = vld [vmem:[#allocation10 + $0x48] sm:$0xff] }
 0x611   :  { %v15667_v2 = vpop.f32.mrf.mxu3  ;;  %8998 = vmatpush.msra.mxu0 %v8871_v41 }
 0x612   :  { %7303 = vmatpush.bf16.msrb.mxu2 %v12530_v33  ;;  %v13275_v33 = vld [vmem:[#allocation7 + $0x1fa0] sm:$0xf0] }
 0x613   :  { %7316 = vmatpush.bf16.msrb.mxu3 %v12534_v28  ;;  %8286 = vmatpush.bf16.msra.mxu1 %v12974_v39  ;;  %v12337_v28 = vld [vmem:[#allocation7 + $0x1818] sm:$0xf]  ;;  %v12374_v39 = vor.u32 %v14114_v30, %v12371_v35  ;;  %v8869_v30 = vld [vmem:[#allocation10 + $0x40] sm:$0xff] }
 0x614   :  { %8999 = vmatpush.msra.mxu0 %v8870_v22 }
 0x616   :  { %7304 = vmatpush.bf16.msrb.mxu2 %v12498_v10  ;;  %v15669_v15 = vpop.f32.mrf.mxu0  ;;  %v14228_v10 = vld [vmem:[#allocation7 + $0x1be4] sm:$0xf0]  ;;  %9000 = vmatpush.msra.mxu0 %v8869_v30  ;;  %v8862_v30 = vld [vmem:[#allocation10 + $0x8] sm:$0xff] }
 0x617   :  { %7317 = vmatpush.bf16.msrb.mxu3 %v12502_v20  ;;  %8287 = vmatpush.bf16.msra.mxu1 %v12942_v4  ;;  %v13278_v20 = vor.u32 %v14343_v18, %v13275_v33  ;;  %v12338_v4 = vor.u32 %v14110_v29, %v12337_v28  ;;  %v12705_v18 = vld [vmem:[#allocation7 + $0x1b08] sm:$0xf]  ;;  %v13147_v29 = vld [vmem:[#allocation7 + $0x1ea0] sm:$0xf0] }
 0x618   :  { %v6267_v60 = vpop.f32.mrf.mxu2 }
 0x619   :  { %v6280_v44 = vpop.f32.mrf.mxu3  ;;  %v8865_v60 = vld [vmem:[#allocation10 + $0x20] sm:$0xff] }
 0x61a   :  { %7305 = vmatpush.bf16.msrb.mxu2 %v12466_v56  ;;  %v12342_v56 = vor.u32 %v14106_v17, %v12339_v27  ;;  %v8868_v17 = vld [vmem:[#allocation10 + $0x38] sm:$0xff]  ;;  %v12641_v44 = vld [vmem:[#allocation7 + $0x1a88] sm:$0xf] }
 0x61b   :  { %7318 = vmatpush.bf16.msrb.mxu3 %v12470_v11  ;;  %8288 = vmatpush.bf16.msra.mxu1 %v12910_v61  ;;  %v12802_v11 = vor.u32 %v14228_v10, %v12801_v19  ;;  %v12769_v61 = vld [vmem:[#allocation7 + $0x1b88] sm:$0xf] }
 0x61c   :  { %v12673_v10 = vld [vmem:[#allocation7 + $0x1ac8] sm:$0xf]  ;;  %9001 = vmatpush.msra.mxu0 %v8868_v17  ;;  %v8940_v17 = vld [vmem:[#allocation10 + $0x278] sm:$0xff] }
 0x61d   :  { %v12674_v49 = vor.u32 %v14196_v31, %v12673_v10  ;;  %v12819_v10 = vld [vmem:[#allocation7 + $0x1bf8] sm:$0xf0] }
 0x61e   :  { %7306 = vmatpush.bf16.msrb.mxu2 %v12434_v63  ;;  %v12771_v63 = vld [vmem:[#allocation7 + $0x1ba8] sm:$0xf0]  ;;  %v8229_v55 = vpop.f32.mrf.mxu0 }
 0x61f   :  { %7319 = vmatpush.bf16.msrb.mxu3 %v12438_v25  ;;  %8289 = vmatpush.bf16.msra.mxu1 %v12878_v21  ;;  %v13211_v25 = vld [vmem:[#allocation7 + $0x1f20] sm:$0xf0]  ;;  %v12770_v21 = vor.u32 %v14220_v52, %v12769_v61  ;;  %v12774_v14 = vor.u32 %v14216_v8, %v12771_v63  ;;  %v14184_v52 = vld [vmem:[#allocation7 + $0x1a8c] sm:$0xf] }
 0x620   :  { %v13083_v8 = vld [vmem:[#allocation7 + $0x1e20] sm:$0xf0] }
 0x621   :  { %v8864_v63 = vld [vmem:[#allocation10 + $0x18] sm:$0xff] }
 0x622   :  { %7307 = vmatpush.bf16.msrb.mxu2 %v12402_v7  ;;  %v13214_v7 = vor.u32 %v14327_v57, %v13211_v25  ;;  %v14353_v25 = vld [vmem:[#allocation7 + $0x1fd4] sm:$0xf] }
 0x623   :  { %7320 = vmatpush.bf16.msrb.mxu3 %v12406_v37  ;;  %8290 = vmatpush.bf16.msra.mxu1 %v12846_v1  ;;  %v14319_v37 = vld [vmem:[#allocation7 + $0x1ec4] sm:$0xf]  ;;  %v12738_v1 = vor.u32 %v14212_v0, %v12737_v32  ;;  %v7298_v35 = vpop.f32.mrf.mxu1  ;;  %v14180_v32 = vld [vmem:[#allocation7 + $0x1a64] sm:$0xf0]  ;;  %v8863_v0 = vld [vmem:[#allocation10 + $0x10] sm:$0xff]  ;;  %v13326_v22 = vor.u32 %v14353_v25, %v13323_v6 }
 0x624   :  { %v15675_v33 = vadd.f32 %v7298_v35, %v15647_v40  ;;  %v13182_v28 = vor.u32 %v14319_v37, %v13179_v34  ;;  %v14192_v40 = vld [vmem:[#allocation7 + $0x1acc] sm:$0xf]  ;;  %v12753_v25 = vld [vmem:[#allocation7 + $0x1b58] sm:$0xf] }
 0x625   :  { %v12611_v37 = vld [vmem:[#allocation7 + $0x1a68] sm:$0xf0]  ;;  %v14214_v6 = vld [vmem:[#allocation7 + $0x1b74] sm:$0xf0] }
 0x626   :  { %7308 = vmatpush.bf16.msrb.mxu2 %v12370_v45  ;;  %8291 = vmatmul.bf16.vlgmr.msra.gmra.mxu1 %v15592_v38  ;;  %v14204_v45 = vld [vmem:[#allocation7 + $0x1b24] sm:$0xf0] }
 0x627   :  { %8728 = vmatpush.bf16.msrb.mxu1 %v13310_v48  ;;  %7321 = vmatpush.bf16.msrb.mxu3 %v12374_v39  ;;  %v12742_v48 = vor.u32 %v14208_v16, %v12739_v58  ;;  %v14311_v39 = vld [vmem:[#allocation7 + $0x1e84] sm:$0xf]  ;;  %v12706_v27 = vor.u32 %v14204_v45, %v12705_v18  ;;  %v14176_v58 = vld [vmem:[#allocation7 + $0x1a4c] sm:$0xf]  ;;  %v12577_v18 = vld [vmem:[#allocation7 + $0x1a08] sm:$0xf] }
 0x628   :  { %v13150_v9 = vor.u32 %v14311_v39, %v13147_v29  ;;  %v14172_v45 = vld [vmem:[#allocation7 + $0x1a24] sm:$0xf0]  ;;  %v14230_v29 = vld [vmem:[#allocation7 + $0x1bf4] sm:$0xf0] }
 0x629   :  { %v8861_v39 = vld [vmem:[#allocation10] sm:$0xff]  ;;  %v12578_v31 = vor.u32 %v14172_v45, %v12577_v18  ;;  %v14202_v45 = vld [vmem:[#allocation7 + $0x1b1c] sm:$0xf] }
 0x62a   :  { %7309 = vmatpush.bf16.msrb.mxu2 %v12338_v4  ;;  %v14303_v4 = vld [vmem:[#allocation7 + $0x1e44] sm:$0xf] }
 0x62b   :  { %8729 = vmatpush.bf16.msrb.mxu1 %v13278_v20  ;;  %7322 = vmatpush.bf16.msrb.mxu3 %v12342_v56  ;;  %v8867_v20 = vld [vmem:[#allocation10 + $0x30] sm:$0xff]  ;;  %v7300_v56 = vpop.f32.mrf.mxu1  ;;  %v13118_v61 = vor.u32 %v14303_v4, %v13115_v5 }
 0x62c   :  { %9002 = vmatpush.msra.mxu0 %v8867_v20  ;;  %v14337_v20 = vld [vmem:[#allocation7 + $0x1f54] sm:$0xf]  ;;  %v14222_v56 = vld [vmem:[#allocation7 + $0x1bb4] sm:$0xf0] }
 0x62d   :  { %7310 = vmatmul.bf16.vlgmr.msrb.gmra.mxu2 %v15520_v46 }
 0x62e   :  { %7747 = vmatpush.bf16.msra.mxu2 %v12802_v11  ;;  %7323 = vmatmul.bf16.vlgmr.msrb.gmra.mxu3 %v15520_v46  ;;  %v12707_v46 = vld [vmem:[#allocation7 + $0x1b28] sm:$0xf0]  ;;  %v12678_v11 = vor.u32 %v14192_v40, %v12675_v3  ;;  %v8939_v40 = vld [vmem:[#allocation10 + $0x270] sm:$0xff] }
 0x62f   :  { %7760 = vmatpush.bf16.msra.mxu3 %v12806_v42  ;;  %8730 = vmatpush.bf16.msrb.mxu1 %v13246_v36  ;;  %v12710_v19 = vor.u32 %v14200_v24, %v12707_v46  ;;  %v14188_v42 = vld [vmem:[#allocation7 + $0x1aa4] sm:$0xf0]  ;;  %v14295_v36 = vld [vmem:[#allocation7 + $0x1e04] sm:$0xf]  ;;  %v14168_v24 = vld [vmem:[#allocation7 + $0x1a0c] sm:$0xf] }
 0x630   :  { %9003 = vmatpush.msra.mxu0 %v8866_v43  ;;  %v12642_v57 = vor.u32 %v14188_v42, %v12641_v44  ;;  %v6317_v55 = vpop.f32.mrf.mxu2  ;;  %v13086_v16 = vor.u32 %v14295_v36, %v13083_v8  ;;  %v12579_v46 = vld [vmem:[#allocation7 + $0x1a28] sm:$0xf0]  ;;  %v14218_v42 = vld [vmem:[#allocation7 + $0x1b9c] sm:$0xf]  ;;  %v13227_v36 = vld [vmem:[#allocation7 + $0x1f30] sm:$0xf0] }
 0x631   :  { %v15678_v41 = vadd.f32 %v6317_v55, %v15651_v47  ;;  %v12614_v47 = vor.u32 %v14176_v58, %v12611_v37  ;;  %v12582_v4 = vor.u32 %v14168_v24, %v12579_v46  ;;  %v8936_v55 = vld [vmem:[#allocation10 + $0x258] sm:$0xff]  ;;  %v12754_v58 = vor.u32 %v14214_v6, %v12753_v25  ;;  %v8934_v37 = vld [vmem:[#allocation10 + $0x248] sm:$0xff]  ;;  %v8933_v24 = vld [vmem:[#allocation10 + $0x240] sm:$0xff] }
 0x632   :  { %7748 = vmatpush.bf16.msra.mxu2 %v12770_v21  ;;  %9004 = vmatpush.msra.mxu0 %v8865_v60  ;;  %v12646_v21 = vor.u32 %v14184_v52, %v12643_v54  ;;  %v12785_v60 = vld [vmem:[#allocation7 + $0x1b98] sm:$0xf]  ;;  %v8937_v52 = vld [vmem:[#allocation10 + $0x260] sm:$0xff]  ;;  %v14329_v54 = vld [vmem:[#allocation7 + $0x1f14] sm:$0xf] }
 0x633   :  { %7761 = vmatpush.bf16.msra.mxu3 %v12774_v14  ;;  %8731 = vmatpush.bf16.msrb.mxu1 %v13214_v7  ;;  %v12609_v14 = vld [vmem:[#allocation7 + $0x1a48] sm:$0xf]  ;;  %v6330_v7 = vpop.f32.mrf.mxu3  ;;  %v14313_v46 = vld [vmem:[#allocation7 + $0x1e94] sm:$0xf]  ;;  %v12625_v6 = vld [vmem:[#allocation7 + $0x1a58] sm:$0xf] }
 0x634   :  { %9005 = vmatpush.msra.mxu0 %v8864_v63  ;;  %v15681_v34 = vadd.f32 %v6330_v7, %v15654_v53  ;;  %v12610_v35 = vor.u32 %v14180_v32, %v12609_v14  ;;  %v12817_v53 = vld [vmem:[#allocation7 + $0x1bd8] sm:$0xf]  ;;  %v12786_v63 = vor.u32 %v14222_v56, %v12785_v60  ;;  %v14210_v14 = vld [vmem:[#allocation7 + $0x1b5c] sm:$0xf]  ;;  %v13195_v7 = vld [vmem:[#allocation7 + $0x1ef0] sm:$0xf0] }
 0x635   :  { %v12818_v5 = vor.u32 %v14230_v29, %v12817_v53  ;;  %v12755_v32 = vld [vmem:[#allocation7 + $0x1b78] sm:$0xf0]  ;;  %v14190_v60 = vld [vmem:[#allocation7 + $0x1ab4] sm:$0xf0] }
 0x636   :  { %7749 = vmatpush.bf16.msra.mxu2 %v12738_v1  ;;  %v14345_v1 = vld [vmem:[#allocation7 + $0x1f94] sm:$0xf]  ;;  %9006 = vmatpush.msra.mxu0 %v8863_v0 }
 0x637   :  { %7762 = vmatpush.bf16.msra.mxu3 %v12742_v48  ;;  %8732 = vmatpush.bf16.msrb.mxu1 %v13182_v28  ;;  %v13291_v48 = vld [vmem:[#allocation7 + $0x1fb0] sm:$0xf0]  ;;  %v15683_v28 = vpop.f32.mrf.mxu0 }
 0x638   :  { %9007 = vmatpush.msra.mxu0 %v8862_v30  ;;  %v6319_v3 = vpop.f32.mrf.mxu2  ;;  %v14321_v0 = vld [vmem:[#allocation7 + $0x1ed4] sm:$0xf]  ;;  %v12721_v30 = vld [vmem:[#allocation7 + $0x1b18] sm:$0xf] }
 0x639   :  { %v13198_v18 = vor.u32 %v14321_v0, %v13195_v7 }
 0x63a   :  { %7750 = vmatpush.bf16.msra.mxu2 %v12706_v27  ;;  %v13294_v27 = vor.u32 %v14345_v1, %v13291_v48  ;;  %9008 = vmatpush.msra.mxu0 %v8861_v39  ;;  %v12758_v1 = vor.u32 %v14210_v14, %v12755_v32  ;;  %v13163_v39 = vld [vmem:[#allocation7 + $0x1eb0] sm:$0xf0] }
 0x63b   :  { %7763 = vmatpush.bf16.msra.mxu3 %v12710_v19  ;;  %8733 = vmatpush.bf16.msrb.mxu1 %v13150_v9  ;;  %v14226_v19 = vld [vmem:[#allocation7 + $0x1bdc] sm:$0xf]  ;;  %v13259_v9 = vld [vmem:[#allocation7 + $0x1f70] sm:$0xf0]  ;;  %v6332_v43 = vpop.f32.mrf.mxu3 }
 0x63c   :  { %9073 = vmatpush.msrb.mxu0 %v8940_v17  ;;  %v13262_v44 = vor.u32 %v14337_v20, %v13259_v9  ;;  %v12689_v17 = vld [vmem:[#allocation7 + $0x1ad8] sm:$0xf]  ;;  %v14305_v9 = vld [vmem:[#allocation7 + $0x1e54] sm:$0xf] }
 0x63d   :  { %v8931_v20 = vld [vmem:[#allocation10 + $0x230] sm:$0xff] }
 0x63e   :  { %7751 = vmatpush.bf16.msra.mxu2 %v12674_v49  ;;  %v12822_v49 = vor.u32 %v14226_v19, %v12819_v10  ;;  %9074 = vmatpush.msrb.mxu0 %v8939_v40  ;;  %v8932_v19 = vld [vmem:[#allocation10 + $0x238] sm:$0xff]  ;;  %v13166_v10 = vor.u32 %v14313_v46, %v13163_v39  ;;  %v13131_v40 = vld [vmem:[#allocation7 + $0x1e70] sm:$0xf0]  ;;  %v14292_v46 = vld [vmem:[#allocation7 + $0x1de4] sm:$0xf0] }
 0x63f   :  { %7764 = vmatpush.bf16.msra.mxu3 %v12678_v11  ;;  %8734 = vmatpush.bf16.msrb.mxu1 %v13118_v61  ;;  %v8938_v11 = vld [vmem:[#allocation10 + $0x268] sm:$0xff]  ;;  %v12787_v61 = vld [vmem:[#allocation7 + $0x1bb8] sm:$0xf0]  ;;  %v8281_v8 = vpop.f32.mrf.mxu0  ;;  %v13134_v56 = vor.u32 %v14305_v9, %v13131_v40  ;;  %v14288_v39 = vld [vmem:[#allocation7 + $0x1dcc] sm:$0xf] }
 0x640   :  { %9075 = vmatpush.msrb.mxu0 %v8938_v11  ;;  %v14186_v11 = vld [vmem:[#allocation7 + $0x1a9c] sm:$0xf]  ;;  %v14284_v9 = vld [vmem:[#allocation7 + $0x1da4] sm:$0xf0]  ;;  %v14280_v40 = vld [vmem:[#allocation7 + $0x1d8c] sm:$0xf] }
 0x642   :  { %7752 = vmatpush.bf16.msra.mxu2 %v12642_v57  ;;  %v12790_v57 = vor.u32 %v14218_v42, %v12787_v61  ;;  %9076 = vmatpush.msrb.mxu0 %v8937_v52  ;;  %v14297_v42 = vld [vmem:[#allocation7 + $0x1e14] sm:$0xf]  ;;  %v8929_v52 = vld [vmem:[#allocation10 + $0x220] sm:$0xff] }
 0x643   :  { %7765 = vmatpush.bf16.msra.mxu3 %v12646_v21  ;;  %8735 = vmatpush.bf16.msrb.mxu1 %v13086_v16  ;;  %v13230_v21 = vor.u32 %v14329_v54, %v13227_v36  ;;  %v8935_v16 = vld [vmem:[#allocation10 + $0x250] sm:$0xff]  ;;  %v13099_v61 = vld [vmem:[#allocation7 + $0x1e30] sm:$0xf0]  ;;  %v6336_v54 = vadd.f32 %v15665_v50, %v15635_v13  ;;  %v15693_v36 = vld [vmem:[#allocation8] sm:$0xff] }
 0x644   :  { %9077 = vmatpush.msrb.mxu0 %v8936_v55  ;;  %v14182_v55 = vld [vmem:[#allocation7 + $0x1a74] sm:$0xf0]  ;;  %v13102_v0 = vor.u32 %v14297_v42, %v13099_v61  ;;  %v14178_v13 = vld [vmem:[#allocation7 + $0x1a5c] sm:$0xf] }
 0x645   :  { %v12627_v50 = vld [vmem:[#allocation7 + $0x1a78] sm:$0xf0] }
 0x646   :  { %7753 = vmatpush.bf16.msra.mxu2 %v12610_v35  ;;  %8736 = vmatmul.bf16.vlgmr.msrb.gmra.mxu1 %v15631_v23  ;;  %v14206_v35 = vld [vmem:[#allocation7 + $0x1b34] sm:$0xf0] }
 0x647   :  { %8780 = vmatpush.bf16.msra.mxu1 %v13326_v22  ;;  %7766 = vmatpush.bf16.msra.mxu3 %v12614_v47  ;;  %v7743_v22 = vpop.f32.mrf.mxu1  ;;  %v12723_v47 = vld [vmem:[#allocation7 + $0x1b38] sm:$0xf0]  ;;  %v12722_v53 = vor.u32 %v14206_v35, %v12721_v30  ;;  %v14174_v30 = vld [vmem:[#allocation7 + $0x1a34] sm:$0xf0] }
 0x648   :  { %9078 = vmatpush.msrb.mxu0 %v8935_v16  ;;  %v15689_v48 = vadd.f32 %v7743_v22, %v15663_v26  ;;  %v12726_v29 = vor.u32 %v14202_v45, %v12723_v47  ;;  %v14194_v26 = vld [vmem:[#allocation7 + $0x1adc] sm:$0xf] }
 0x649   :  { %v8927_v16 = vld [vmem:[#allocation10 + $0x210] sm:$0xff] }
 0x64a   :  { %7754 = vmatpush.bf16.msra.mxu2 %v12578_v31  ;;  %9079 = vmatpush.msrb.mxu0 %v8934_v37  ;;  %v12691_v31 = vld [vmem:[#allocation7 + $0x1af8] sm:$0xf0]  ;;  %v12593_v37 = vld [vmem:[#allocation7 + $0x1a18] sm:$0xf] }
 0x64b   :  { %8781 = vmatpush.bf16.msra.mxu1 %v13294_v27  ;;  %7767 = vmatpush.bf16.msra.mxu3 %v12582_v4  ;;  %v14198_v27 = vld [vmem:[#allocation7 + $0x1af4] sm:$0xf0]  ;;  %v8930_v4 = vld [vmem:[#allocation10 + $0x228] sm:$0xff]  ;;  %v12694_v43 = vor.u32 %v14194_v26, %v12691_v31  ;;  %v14170_v35 = vld [vmem:[#allocation7 + $0x1a1c] sm:$0xf] }
 0x64c   :  { %9080 = vmatpush.msrb.mxu0 %v8933_v24  ;;  %v12690_v3 = vor.u32 %v14198_v27, %v12689_v17  ;;  %v12595_v47 = vld [vmem:[#allocation7 + $0x1a38] sm:$0xf0]  ;;  %v13057_v24 = vld [vmem:[#allocation7 + $0x1dc8] sm:$0xf] }
 0x64d   :  { %7755 = vmatmul.bf16.vlgmr.msra.gmra.mxu2 %v15557_v59  ;;  %v12598_v27 = vor.u32 %v14170_v35, %v12595_v47  ;;  %v12867_v47 = vld [vmem:[#allocation7 + $0x1c68] sm:$0xf0] }
 0x64e   :  { %7799 = vmatpush.bf16.msrb.mxu2 %v12818_v5  ;;  %7768 = vmatmul.bf16.vlgmr.msra.gmra.mxu3 %v15557_v59 }
 0x64f   :  { %7812 = vmatpush.bf16.msrb.mxu3 %v12822_v49  ;;  %8782 = vmatpush.bf16.msra.mxu1 %v13262_v44  ;;  %v7745_v5 = vpop.f32.mrf.mxu1  ;;  %v12657_v49 = vld [vmem:[#allocation7 + $0x1a98] sm:$0xf]  ;;  %v12659_v44 = vld [vmem:[#allocation7 + $0x1ab8] sm:$0xf0] }
 0x650   :  { %9081 = vmatpush.msrb.mxu0 %v8932_v19  ;;  %v12658_v8 = vor.u32 %v14190_v60, %v12657_v49  ;;  %v12662_v25 = vor.u32 %v14186_v11, %v12659_v44  ;;  %v13058_v19 = vor.u32 %v14292_v46, %v13057_v24  ;;  %v12993_v49 = vld [vmem:[#allocation7 + $0x1d48] sm:$0xf]  ;;  %v12995_v11 = vld [vmem:[#allocation7 + $0x1d68] sm:$0xf0]  ;;  %v8326_v46 = vadd.f32 %v15683_v28, %v15657_v51 }
 0x651   :  { %v6775_v32 = vpop.f32.mrf.mxu3  ;;  %v14276_v60 = vld [vmem:[#allocation7 + $0x1d64] sm:$0xf0] }
 0x652   :  { %7800 = vmatpush.bf16.msrb.mxu2 %v12786_v63  ;;  %9082 = vmatpush.msrb.mxu0 %v8931_v20  ;;  %v6337_v63 = vadd.f32 %v15667_v2, %v15638_v12  ;;  %v8322_v12 = vadd.f32 %v15669_v15, %v15641_v62  ;;  %v8829_v2 = vperm.slane %v15693_v36, 0  ;;  %v8925_v62 = vld [vmem:[#allocation10 + $0x200] sm:$0xff]  ;;  %v12994_v44 = vor.u32 %v14276_v60, %v12993_v49  ;;  %v14286_v49 = vld [vmem:[#allocation7 + $0x1db4] sm:$0xf0]  ;;  %v14282_v60 = vld [vmem:[#allocation7 + $0x1d9c] sm:$0xf] }
 0x653   :  { %7813 = vmatpush.bf16.msrb.mxu3 %v12790_v57  ;;  %8783 = vmatpush.bf16.msra.mxu1 %v13230_v21  ;;  %v6762_v57 = vpop.f32.mrf.mxu2  ;;  %v8928_v21 = vld [vmem:[#allocation10 + $0x218] sm:$0xff]  ;;  %v13025_v20 = vld [vmem:[#allocation7 + $0x1d88] sm:$0xf] }
 0x654   :  { %9083 = vmatpush.msrb.mxu0 %v8930_v4  ;;  %v15697_v14 = vadd.f32 %v6762_v57, %v6336_v54  ;;  %v15699_v7 = vadd.f32 %v6775_v32, %v6337_v63  ;;  %v13026_v5 = vor.u32 %v14284_v9, %v13025_v20  ;;  %v14268_v54 = vld [vmem:[#allocation7 + $0x1d24] sm:$0xf0]  ;;  %v14264_v63 = vld [vmem:[#allocation7 + $0x1d0c] sm:$0xf] }
 0x655   :  { %v12963_v57 = vld [vmem:[#allocation7 + $0x1d28] sm:$0xf0] }
 0x656   :  { %7801 = vmatpush.bf16.msrb.mxu2 %v12754_v58  ;;  %9084 = vmatpush.msrb.mxu0 %v8929_v52  ;;  %v12626_v58 = vor.u32 %v14182_v55, %v12625_v6  ;;  %v8724_v22 = vpop.f32.mrf.mxu0  ;;  %v12961_v52 = vld [vmem:[#allocation7 + $0x1d08] sm:$0xf]  ;;  %v12966_v6 = vor.u32 %v14264_v63, %v12963_v57  ;;  %v14256_v32 = vld [vmem:[#allocation7 + $0x1ccc] sm:$0xf]  ;;  %v13011_v63 = vld [vmem:[#allocation7 + $0x1d78] sm:$0xf0] }
 0x657   :  { %7814 = vmatpush.bf16.msrb.mxu3 %v12758_v1  ;;  %8784 = vmatpush.bf16.msra.mxu1 %v13198_v18  ;;  %v12630_v1 = vor.u32 %v14178_v13, %v12627_v50  ;;  %v8926_v18 = vld [vmem:[#allocation10 + $0x208] sm:$0xff]  ;;  %v8819_v45 = vadd.f32 %v8724_v22, %v8322_v12  ;;  %v12929_v55 = vld [vmem:[#allocation7 + $0x1cc8] sm:$0xf]  ;;  %v8892_v57 = vld [vmem:[#allocation10 + $0xf8] sm:$0xff] }
 0x658   :  { %9085 = vmatpush.msrb.mxu0 %v8928_v21  ;;  %v14260_v21 = vld [vmem:[#allocation7 + $0x1ce4] sm:$0xf0] }
 0x659   :  { %v8845_v15 = vadd.f32 %v8829_v2, %v8819_v45  ;;  %v6777_v26 = vpop.f32.mrf.mxu3  ;;  %v14252_v12 = vld [vmem:[#allocation7 + $0x1ca4] sm:$0xf0]  ;;  %v14248_v2 = vld [vmem:[#allocation7 + $0x1c8c] sm:$0xf] }
 0x65a   :  { %7802 = vmatpush.bf16.msrb.mxu2 %v12722_v53  ;;  %9086 = vmatpush.msrb.mxu0 %v8927_v16  ;;  %v13059_v53 = vld [vmem:[#allocation7 + $0x1de8] sm:$0xf0]  ;;  %v12897_v16 = vld [vmem:[#allocation7 + $0x1c88] sm:$0xf]  ;;  %v14294_v26 = vld [vmem:[#allocation7 + $0x1df4] sm:$0xf0] }
 0x65b   :  { %7815 = vmatpush.bf16.msrb.mxu3 %v12726_v29  ;;  %8785 = vmatpush.bf16.msra.mxu1 %v13166_v10  ;;  %v12594_v29 = vor.u32 %v14174_v30, %v12593_v37  ;;  %v6764_v17 = vpop.f32.mrf.mxu2  ;;  %v8853_v10 = vmax.f32 %v8845_v15, 0.0  ;;  %v13062_v31 = vor.u32 %v14288_v39, %v13059_v53  ;;  %v14244_v30 = vld [vmem:[#allocation7 + $0x1c64] sm:$0xf0]  ;;  %v14240_v45 = vld [vmem:[#allocation7 + $0x1c4c] sm:$0xf]  ;;  %v8833_v39 = vperm.slane %v15693_v36, 4 }
 0x65c   :  { %9087 = vmatpush.msrb.mxu0 %v8926_v18  ;;  %v12870_v15 = vor.u32 %v14240_v45, %v12867_v47  ;;  %v14236_v17 = vld [vmem:[#allocation7 + $0x1c24] sm:$0xf0]  ;;  %v12913_v47 = vld [vmem:[#allocation7 + $0x1c98] sm:$0xf] }
 0x65d   :  { %9009 = vmatmul.f32.vlgmr.msra.gmra.mxu0 %v8853_v10  ;;  %v13073_v10 = vld [vmem:[#allocation7 + $0x1dd8] sm:$0xf] }
 0x65e   :  { %7803 = vmatpush.bf16.msrb.mxu2 %v12690_v3  ;;  %9088 = vmatpush.msrb.mxu0 %v8925_v62  ;;  %v13027_v3 = vld [vmem:[#allocation7 + $0x1da8] sm:$0xf0]  ;;  %v8726_v4 = vpop.f32.mrf.mxu0 }
 0x65f   :  { %7816 = vmatpush.bf16.msrb.mxu3 %v12694_v43  ;;  %8786 = vmatpush.bf16.msra.mxu1 %v13134_v56  ;;  %v13030_v43 = vor.u32 %v14280_v40, %v13027_v3  ;;  %v14272_v56 = vld [vmem:[#allocation7 + $0x1d4c] sm:$0xf]  ;;  %v13074_v40 = vor.u32 %v14294_v26, %v13073_v10  ;;  %v14242_v10 = vld [vmem:[#allocation7 + $0x1c5c] sm:$0xf] }
 0x660   :  { %v12998_v61 = vor.u32 %v14272_v56, %v12995_v11  ;;  %v13043_v56 = vld [vmem:[#allocation7 + $0x1db8] sm:$0xf0] }
 0x662   :  { %7804 = vmatpush.bf16.msrb.mxu2 %v12658_v8 }
 0x663   :  { %7817 = vmatpush.bf16.msrb.mxu3 %v12662_v25  ;;  %8787 = vmatpush.bf16.msra.mxu1 %v13102_v0  ;;  %v7795_v42 = vpop.f32.mrf.mxu1  ;;  %v12962_v25 = vor.u32 %v14268_v54, %v12961_v52  ;;  %v12930_v0 = vor.u32 %v14260_v21, %v12929_v55  ;;  %v14278_v52 = vld [vmem:[#allocation7 + $0x1d74] sm:$0xf0]  ;;  %v14274_v54 = vld [vmem:[#allocation7 + $0x1d5c] sm:$0xf] }
 0x664   :  { %v15708_v8 = vadd.f32 %v7795_v42, %v15675_v33  ;;  %v12899_v33 = vld [vmem:[#allocation7 + $0x1ca8] sm:$0xf0]  ;;  %v13046_v42 = vor.u32 %v14282_v60, %v13043_v56  ;;  %v13014_v55 = vor.u32 %v14274_v54, %v13011_v63  ;;  %v12977_v21 = vld [vmem:[#allocation7 + $0x1d18] sm:$0xf] }
 0x665   :  { %v12902_v22 = vor.u32 %v14248_v2, %v12899_v33  ;;  %v12945_v2 = vld [vmem:[#allocation7 + $0x1cd8] sm:$0xf]  ;;  %v14352_v56 = vld [vmem:[#allocation7 + $0x1fcc] sm:$0xf] }
 0x666   :  { %7805 = vmatpush.bf16.msrb.mxu2 %v12626_v58  ;;  %8788 = vmatmul.bf16.vlgmr.msra.gmra.mxu1 %v15631_v23  ;;  %v12898_v58 = vor.u32 %v14252_v12, %v12897_v16  ;;  %v14262_v33 = vld [vmem:[#allocation7 + $0x1cf4] sm:$0xf0] }
 0x667   :  { %7818 = vmatpush.bf16.msrb.mxu3 %v12630_v1  ;;  %v12865_v1 = vld [vmem:[#allocation7 + $0x1c48] sm:$0xf]  ;;  %9013 = vmatpush.msrb.mxu1 %v8892_v57  ;;  %v8883_v60 = vld [vmem:[#allocation10 + $0xb0] sm:$0xff] }
 0x668   :  { %v12866_v53 = vor.u32 %v14244_v30, %v12865_v1  ;;  %v8888_v1 = vld [vmem:[#allocation10 + $0xd8] sm:$0xff]  ;;  %v12946_v30 = vor.u32 %v14262_v33, %v12945_v2  ;;  %v13281_v57 = vld [vmem:[#allocation7 + $0x1f88] sm:$0xf]  ;;  %v14336_v2 = vld [vmem:[#allocation7 + $0x1f4c] sm:$0xf] }
 0x669   :  { %v13251_v33 = vld [vmem:[#allocation7 + $0x1f68] sm:$0xf0] }
 0x66a   :  { %7806 = vmatpush.bf16.msrb.mxu2 %v12594_v29  ;;  %v12833_v29 = vld [vmem:[#allocation7 + $0x1c08] sm:$0xf] }
 0x66b   :  { %7819 = vmatpush.bf16.msrb.mxu3 %v12598_v27  ;;  %v7797_v13 = vpop.f32.mrf.mxu1  ;;  %v12834_v9 = vor.u32 %v14236_v17, %v12833_v29  ;;  %v8886_v29 = vld [vmem:[#allocation10 + $0xc8] sm:$0xff] }
 0x66c   :  { %v8891_v13 = vld [vmem:[#allocation10 + $0xf0] sm:$0xff] }
 0x66d   :  { %7807 = vmatmul.bf16.vlgmr.msrb.gmra.mxu2 %v15557_v59  ;;  %9014 = vmatpush.msrb.mxu1 %v8891_v13 }
 0x66e   :  { %8244 = vmatpush.bf16.msra.mxu2 %v13058_v19  ;;  %7820 = vmatmul.bf16.vlgmr.msrb.gmra.mxu3 %v15557_v59  ;;  %v12931_v59 = vld [vmem:[#allocation7 + $0x1ce8] sm:$0xf0] }
 0x66f   :  { %8257 = vmatpush.bf16.msra.mxu3 %v13062_v31  ;;  %v12934_v50 = vor.u32 %v14256_v32, %v12931_v59  ;;  %v12835_v19 = vld [vmem:[#allocation7 + $0x1c28] sm:$0xf0]  ;;  %v14290_v31 = vld [vmem:[#allocation7 + $0x1ddc] sm:$0xf]  ;;  %v14270_v32 = vld [vmem:[#allocation7 + $0x1d34] sm:$0xf0] }
 0x670   :  { %v6814_v37 = vpop.f32.mrf.mxu2  ;;  %v14266_v59 = vld [vmem:[#allocation7 + $0x1d1c] sm:$0xf]  ;;  %v12978_v16 = vor.u32 %v14270_v32, %v12977_v21  ;;  %v14344_v21 = vld [vmem:[#allocation7 + $0x1f8c] sm:$0xf] }
 0x671   :  { %v15711_v35 = vadd.f32 %v6814_v37, %v15678_v41  ;;  %v6827_v18 = vpop.f32.mrf.mxu3  ;;  %v14232_v41 = vld [vmem:[#allocation7 + $0x1c0c] sm:$0xf]  ;;  %v12947_v37 = vld [vmem:[#allocation7 + $0x1cf8] sm:$0xf0] }
 0x672   :  { %8245 = vmatpush.bf16.msra.mxu2 %v13026_v5  ;;  %v15714_v24 = vadd.f32 %v6827_v18, %v15681_v34  ;;  %v13075_v34 = vld [vmem:[#allocation7 + $0x1df8] sm:$0xf0]  ;;  %v12838_v28 = vor.u32 %v14232_v41, %v12835_v19  ;;  %v14246_v19 = vld [vmem:[#allocation7 + $0x1c74] sm:$0xf0]  ;;  %v13283_v32 = vld [vmem:[#allocation7 + $0x1fa8] sm:$0xf0] }
 0x673   :  { %8258 = vmatpush.bf16.msra.mxu3 %v13030_v43  ;;  %v13078_v5 = vor.u32 %v14290_v31, %v13075_v34  ;;  %v13041_v43 = vld [vmem:[#allocation7 + $0x1d98] sm:$0xf]  ;;  %v12883_v34 = vld [vmem:[#allocation7 + $0x1c78] sm:$0xf0]  ;;  %v13286_v13 = vor.u32 %v14344_v21, %v13283_v32  ;;  %v13091_v21 = vld [vmem:[#allocation7 + $0x1e28] sm:$0xf0] }
 0x674   :  { %v14358_v32 = vld [vmem:[#allocation7 + $0x1ff4] sm:$0xf0] }
 0x675   :  { %v8776_v62 = vpop.f32.mrf.mxu0 }
 0x676   :  { %8246 = vmatpush.bf16.msra.mxu2 %v12994_v44  ;;  %v8823_v27 = vadd.f32 %v8776_v62, %v8326_v46  ;;  %v13042_v44 = vor.u32 %v14286_v49, %v13041_v43  ;;  %v14254_v46 = vld [vmem:[#allocation7 + $0x1cb4] sm:$0xf0]  ;;  %v12851_v43 = vld [vmem:[#allocation7 + $0x1c38] sm:$0xf0]  ;;  %v13313_v49 = vld [vmem:[#allocation7 + $0x1fc8] sm:$0xf] }
 0x677   :  { %8259 = vmatpush.bf16.msra.mxu3 %v12998_v61  ;;  %v13009_v61 = vld [vmem:[#allocation7 + $0x1d58] sm:$0xf] }
 0x678   :  { %v8849_v20 = vadd.f32 %v8833_v39, %v8823_v27  ;;  %v6816_v51 = vpop.f32.mrf.mxu2  ;;  %v14250_v39 = vld [vmem:[#allocation7 + $0x1c9c] sm:$0xf]  ;;  %v12881_v27 = vld [vmem:[#allocation7 + $0x1c58] sm:$0xf] }
 0x679   :  { %v6829_v4 = vpop.f32.mrf.mxu3  ;;  %v8887_v62 = vld [vmem:[#allocation10 + $0xd0] sm:$0xff] }
 0x67a   :  { %8247 = vmatpush.bf16.msra.mxu2 %v12962_v25  ;;  %v8857_v3 = vmax.f32 %v8849_v20, 0.0  ;;  %v13010_v25 = vor.u32 %v14278_v52, %v13009_v61  ;;  %v8885_v20 = vld [vmem:[#allocation10 + $0xc0] sm:$0xff]  ;;  %v14238_v4 = vld [vmem:[#allocation7 + $0x1c34] sm:$0xf0] }
 0x67b   :  { %8260 = vmatpush.bf16.msra.mxu3 %v12966_v6 }
 0x67c   :  { %9089 = vmatmul.f32.vlgmr.msrb.gmra.mxu0 %v8857_v3  ;;  %v12886_v3 = vor.u32 %v14242_v10, %v12883_v34 }
 0x67d   :  { %v8778_v11 = vpop.f32.mrf.mxu0 }
 0x67e   :  { %8248 = vmatpush.bf16.msra.mxu2 %v12930_v0  ;;  %v12979_v0 = vld [vmem:[#allocation7 + $0x1d38] sm:$0xf0]  ;;  %v13315_v11 = vld [vmem:[#allocation7 + $0x1fe8] sm:$0xf0] }
 0x67f   :  { %8261 = vmatpush.bf16.msra.mxu3 %v12934_v50  ;;  %v8890_v50 = vld [vmem:[#allocation10 + $0xe8] sm:$0xff]  ;;  %v12982_v12 = vor.u32 %v14266_v59, %v12979_v0  ;;  %v13318_v63 = vor.u32 %v14352_v56, %v13315_v11  ;;  %v8880_v59 = vld [vmem:[#allocation10 + $0x98] sm:$0xff] }
 0x680   :  { %9015 = vmatpush.msrb.mxu1 %v8890_v50  ;;  %v13249_v50 = vld [vmem:[#allocation7 + $0x1f48] sm:$0xf] }
 0x682   :  { %8249 = vmatpush.bf16.msra.mxu2 %v12898_v58  ;;  %v14258_v58 = vld [vmem:[#allocation7 + $0x1cdc] sm:$0xf] }
 0x683   :  { %8262 = vmatpush.bf16.msra.mxu3 %v12902_v22  ;;  %v15721_v6 = vpop.f32.mrf.mxu1  ;;  %v8889_v22 = vld [vmem:[#allocation10 + $0xe0] sm:$0xff]  ;;  %v12950_v45 = vor.u32 %v14258_v58, %v12947_v37  ;;  %v8878_v58 = vld [vmem:[#allocation10 + $0x88] sm:$0xff] }
 0x684   :  { %9016 = vmatpush.msrb.mxu1 %v8889_v22 }
 0x686   :  { %8250 = vmatpush.bf16.msra.mxu2 %v12866_v53  ;;  %9017 = vmatpush.msrb.mxu1 %v8888_v1  ;;  %v12915_v53 = vld [vmem:[#allocation7 + $0x1cb8] sm:$0xf0]  ;;  %v13254_v1 = vor.u32 %v14336_v2, %v13251_v33 }
 0x687   :  { %8263 = vmatpush.bf16.msra.mxu3 %v12870_v15  ;;  %v12914_v15 = vor.u32 %v14254_v46, %v12913_v47  ;;  %v12918_v41 = vor.u32 %v14250_v39, %v12915_v53  ;;  %v14328_v47 = vld [vmem:[#allocation7 + $0x1f0c] sm:$0xf]  ;;  %v8956_v39 = vld [vmem:[#allocation10 + $0x2f8] sm:$0xff] }
 0x688   :  { %9018 = vmatpush.msrb.mxu1 %v8887_v62  ;;  %v13219_v46 = vld [vmem:[#allocation7 + $0x1f28] sm:$0xf0] }
 0x689   :  { %v13222_v62 = vor.u32 %v14328_v47, %v13219_v46  ;;  %v8945_v47 = vld [vmem:[#allocation10 + $0x2a0] sm:$0xff] }
 0x68a   :  { %8251 = vmatpush.bf16.msra.mxu2 %v12834_v9  ;;  %9019 = vmatpush.msrb.mxu1 %v8886_v29  ;;  %v8884_v9 = vld [vmem:[#allocation10 + $0xb8] sm:$0xff]  ;;  %v14324_v29 = vld [vmem:[#allocation7 + $0x1ee4] sm:$0xf0] }
 0x68b   :  { %8264 = vmatpush.bf16.msra.mxu3 %v12838_v28  ;;  %v8242_v18 = vpop.f32.mrf.mxu1  ;;  %v12882_v28 = vor.u32 %v14246_v19, %v12881_v27  ;;  %v8954_v27 = vld [vmem:[#allocation10 + $0x2e8] sm:$0xff]  ;;  %v8953_v19 = vld [vmem:[#allocation10 + $0x2e0] sm:$0xff] }
 0x68c   :  { %9020 = vmatpush.msrb.mxu1 %v8885_v20  ;;  %v14332_v18 = vld [vmem:[#allocation7 + $0x1f24] sm:$0xf0] }
 0x68d   :  { %8252 = vmatmul.bf16.vlgmr.msra.gmra.mxu2 %v15592_v38  ;;  %v13153_v20 = vld [vmem:[#allocation7 + $0x1e88] sm:$0xf] }
 0x68e   :  { %8296 = vmatpush.bf16.msrb.mxu2 %v13074_v40  ;;  %8265 = vmatmul.bf16.vlgmr.msra.gmra.mxu3 %v15592_v38  ;;  %v12849_v40 = vld [vmem:[#allocation7 + $0x1c18] sm:$0xf] }
 0x68f   :  { %8309 = vmatpush.bf16.msrb.mxu3 %v13078_v5  ;;  %v14234_v5 = vld [vmem:[#allocation7 + $0x1c1c] sm:$0xf]  ;;  %9021 = vmatpush.msrb.mxu1 %v8884_v9  ;;  %v14316_v9 = vld [vmem:[#allocation7 + $0x1ea4] sm:$0xf0] }
 0x690   :  { %v7259_v17 = vpop.f32.mrf.mxu2  ;;  %v12854_v61 = vor.u32 %v14234_v5, %v12851_v43  ;;  %v8951_v5 = vld [vmem:[#allocation10 + $0x2d0] sm:$0xff] }
 0x691   :  { %v15724_v26 = vadd.f32 %v7259_v17, %v15697_v14  ;;  %v7272_v31 = vpop.f32.mrf.mxu3  ;;  %v14356_v14 = vld [vmem:[#allocation7 + $0x1fe4] sm:$0xf0]  ;;  %9022 = vmatpush.msrb.mxu1 %v8883_v60  ;;  %v14320_v17 = vld [vmem:[#allocation7 + $0x1ecc] sm:$0xf] }
 0x692   :  { %8297 = vmatpush.bf16.msrb.mxu2 %v13042_v44  ;;  %v15727_v51 = vadd.f32 %v7272_v31, %v15699_v7  ;;  %v8882_v44 = vld [vmem:[#allocation10 + $0xa8] sm:$0xff]  ;;  %v12850_v7 = vor.u32 %v14238_v4, %v12849_v40  ;;  %v13314_v52 = vor.u32 %v14356_v14, %v13313_v49  ;;  %v13155_v40 = vld [vmem:[#allocation7 + $0x1ea8] sm:$0xf0]  ;;  %v13154_v4 = vor.u32 %v14316_v9, %v13153_v20  ;;  %v13121_v14 = vld [vmem:[#allocation7 + $0x1e48] sm:$0xf] }
 0x693   :  { %8310 = vmatpush.bf16.msrb.mxu3 %v13046_v42  ;;  %9023 = vmatpush.msrb.mxu1 %v8882_v44  ;;  %v14308_v60 = vld [vmem:[#allocation7 + $0x1e64] sm:$0xf0]  ;;  %v14304_v44 = vld [vmem:[#allocation7 + $0x1e4c] sm:$0xf]  ;;  %v14334_v20 = vld [vmem:[#allocation7 + $0x1f34] sm:$0xf0] }
 0x694   :  { %v8942_v9 = vld [vmem:[#allocation10 + $0x288] sm:$0xff] }
 0x696   :  { %8298 = vmatpush.bf16.msrb.mxu2 %v13010_v25  ;;  %v14348_v25 = vld [vmem:[#allocation7 + $0x1fa4] sm:$0xf0] }
 0x697   :  { %8311 = vmatpush.bf16.msrb.mxu3 %v13014_v55  ;;  %v8881_v55 = vld [vmem:[#allocation10 + $0xa0] sm:$0xff]  ;;  %v13282_v0 = vor.u32 %v14348_v25, %v13281_v57 }
 0x698   :  { %v7261_v42 = vpop.f32.mrf.mxu2  ;;  %9024 = vmatpush.msrb.mxu1 %v8881_v55  ;;  %v14300_v25 = vld [vmem:[#allocation7 + $0x1e24] sm:$0xf0]  ;;  %v14296_v55 = vld [vmem:[#allocation7 + $0x1e0c] sm:$0xf] }
 0x699   :  { %v7274_v54 = vpop.f32.mrf.mxu3  ;;  %v8950_v42 = vld [vmem:[#allocation10 + $0x2c8] sm:$0xff] }
 0x69a   :  { %8299 = vmatpush.bf16.msrb.mxu2 %v12978_v16  ;;  %v14340_v16 = vld [vmem:[#allocation7 + $0x1f64] sm:$0xf0]  ;;  %9025 = vmatpush.msrb.mxu1 %v8880_v59  ;;  %v13122_v54 = vor.u32 %v14308_v60, %v13121_v14  ;;  %v8948_v59 = vld [vmem:[#allocation10 + $0x2b8] sm:$0xff]  ;;  %v14322_v60 = vld [vmem:[#allocation7 + $0x1edc] sm:$0xf] }
 0x69b   :  { %8312 = vmatpush.bf16.msrb.mxu3 %v12982_v12  ;;  %v8879_v12 = vld [vmem:[#allocation10 + $0x90] sm:$0xff]  ;;  %v13250_v37 = vor.u32 %v14340_v16, %v13249_v50 }
 0x69c   :  { %9026 = vmatpush.msrb.mxu1 %v8879_v12  ;;  %v8947_v50 = vld [vmem:[#allocation10 + $0x2b0] sm:$0xff]  ;;  %v13094_v12 = vor.u32 %v14296_v55, %v13091_v21 }
 0x69e   :  { %8300 = vmatpush.bf16.msrb.mxu2 %v12946_v30  ;;  %v13217_v30 = vld [vmem:[#allocation7 + $0x1f08] sm:$0xf]  ;;  %9027 = vmatpush.msrb.mxu1 %v8878_v58 }
 0x69f   :  { %8313 = vmatpush.bf16.msrb.mxu3 %v12950_v45  ;;  %v8877_v45 = vld [vmem:[#allocation10 + $0x80] sm:$0xff]  ;;  %v13218_v53 = vor.u32 %v14332_v18, %v13217_v30  ;;  %v8946_v30 = vld [vmem:[#allocation10 + $0x2a8] sm:$0xff]  ;;  %v14346_v18 = vld [vmem:[#allocation7 + $0x1f9c] sm:$0xf] }
 0x6a0   :  { %9028 = vmatpush.msrb.mxu1 %v8877_v45  ;;  %v13299_v45 = vld [vmem:[#allocation7 + $0x1fb8] sm:$0xf0] }
 0x6a2   :  { %8301 = vmatpush.bf16.msrb.mxu2 %v12914_v15  ;;  %9093 = vmatpush.msra.mxu1 %v8956_v39  ;;  %v13185_v15 = vld [vmem:[#allocation7 + $0x1ec8] sm:$0xf]  ;;  %v13302_v39 = vor.u32 %v14346_v18, %v13299_v45  ;;  %v8834_v45 = vperm.slane %v15693_v36, 5 }
 0x6a3   :  { %8314 = vmatpush.bf16.msrb.mxu3 %v12918_v41  ;;  %v15731_v22 = vpop.f32.mrf.mxu1  ;;  %v13187_v41 = vld [vmem:[#allocation7 + $0x1ee8] sm:$0xf0]  ;;  %v13186_v10 = vor.u32 %v14324_v29, %v13185_v15  ;;  %v14338_v15 = vld [vmem:[#allocation7 + $0x1f5c] sm:$0xf] }
 0x6a4   :  { %v13190_v34 = vor.u32 %v14320_v17, %v13187_v41  ;;  %v13267_v29 = vld [vmem:[#allocation7 + $0x1f78] sm:$0xf0]  ;;  %v8323_v41 = vadd.f32 %v15721_v6, %v15689_v48  ;;  %v13201_v6 = vld [vmem:[#allocation7 + $0x1ed8] sm:$0xf] }
 0x6a5   :  { %v8943_v17 = vld [vmem:[#allocation10 + $0x290] sm:$0xff] }
 0x6a6   :  { %8302 = vmatpush.bf16.msrb.mxu2 %v12882_v28  ;;  %v14312_v28 = vld [vmem:[#allocation7 + $0x1e8c] sm:$0xf] }
 0x6a7   :  { %8315 = vmatpush.bf16.msrb.mxu3 %v12886_v3  ;;  %v8952_v3 = vld [vmem:[#allocation10 + $0x2d8] sm:$0xff]  ;;  %v13158_v49 = vor.u32 %v14312_v28, %v13155_v40  ;;  %v14330_v40 = vld [vmem:[#allocation7 + $0x1f1c] sm:$0xf] }
 0x6aa   :  { %8303 = vmatpush.bf16.msrb.mxu2 %v12850_v7  ;;  %v13123_v7 = vld [vmem:[#allocation7 + $0x1e68] sm:$0xf0] }
 0x6ab   :  { %8316 = vmatpush.bf16.msrb.mxu3 %v12854_v61  ;;  %v8294_v31 = vpop.f32.mrf.mxu1  ;;  %v13126_v57 = vor.u32 %v14304_v44, %v13123_v7 }
 0x6ac   :  { %v13270_v31 = vor.u32 %v14338_v15, %v13267_v29 }
 0x6ad   :  { %8304 = vmatmul.bf16.vlgmr.msrb.gmra.mxu2 %v15592_v38 }
 0x6ae   :  { %8741 = vmatpush.bf16.msra.mxu2 %v13314_v52  ;;  %8317 = vmatmul.bf16.vlgmr.msrb.gmra.mxu3 %v15592_v38  ;;  %v8955_v38 = vld [vmem:[#allocation10 + $0x2f0] sm:$0xff]  ;;  %v8949_v52 = vld [vmem:[#allocation10 + $0x2c0] sm:$0xff] }
 0x6af   :  { %8754 = vmatpush.bf16.msra.mxu3 %v13318_v63  ;;  %9094 = vmatpush.msra.mxu1 %v8955_v38  ;;  %v13089_v63 = vld [vmem:[#allocation7 + $0x1e08] sm:$0xf]  ;;  %v14342_v38 = vld [vmem:[#allocation7 + $0x1f74] sm:$0xf0] }
 0x6b0   :  { %v7311_v43 = vpop.f32.mrf.mxu2 }
 0x6b1   :  { %9095 = vmatpush.msra.mxu1 %v8954_v27  ;;  %v15734_v56 = vadd.f32 %v7311_v43, %v15711_v35  ;;  %v7324_v11 = vpop.f32.mrf.mxu3  ;;  %v13329_v35 = vld [vmem:[#allocation7 + $0x1fd8] sm:$0xf]  ;;  %v8830_v27 = vperm.slane %v15693_v36, 1 }
 0x6b2   :  { %8742 = vmatpush.bf16.msra.mxu2 %v13282_v0  ;;  %v15737_v61 = vadd.f32 %v7324_v11, %v15714_v24  ;;  %v14354_v0 = vld [vmem:[#allocation7 + $0x1fdc] sm:$0xf]  ;;  %v13090_v24 = vor.u32 %v14300_v25, %v13089_v63  ;;  %v13330_v2 = vor.u32 %v14358_v32, %v13329_v35  ;;  %v13137_v35 = vld [vmem:[#allocation7 + $0x1e58] sm:$0xf] }
 0x6b3   :  { %8755 = vmatpush.bf16.msra.mxu3 %v13286_v13  ;;  %9096 = vmatpush.msra.mxu1 %v8953_v19  ;;  %v13331_v13 = vld [vmem:[#allocation7 + $0x1ff8] sm:$0xf0]  ;;  %v14310_v32 = vld [vmem:[#allocation7 + $0x1e74] sm:$0xf0] }
 0x6b4   :  { %v13334_v58 = vor.u32 %v14354_v0, %v13331_v13  ;;  %v13203_v11 = vld [vmem:[#allocation7 + $0x1ef8] sm:$0xf0] }
 0x6b5   :  { %9097 = vmatpush.msra.mxu1 %v8952_v3  ;;  %v13235_v3 = vld [vmem:[#allocation7 + $0x1f38] sm:$0xf0] }
 0x6b6   :  { %8743 = vmatpush.bf16.msra.mxu2 %v13250_v37  ;;  %v13297_v37 = vld [vmem:[#allocation7 + $0x1f98] sm:$0xf]  ;;  %v13238_v48 = vor.u32 %v14330_v40, %v13235_v3  ;;  %v14314_v63 = vld [vmem:[#allocation7 + $0x1e9c] sm:$0xf] }
 0x6b7   :  { %8756 = vmatpush.bf16.msra.mxu3 %v13254_v1  ;;  %9098 = vmatpush.msra.mxu1 %v8951_v5  ;;  %v14350_v1 = vld [vmem:[#allocation7 + $0x1fb4] sm:$0xf0]  ;;  %v14306_v13 = vld [vmem:[#allocation7 + $0x1e5c] sm:$0xf] }
 0x6b8   :  { %v7313_v16 = vpop.f32.mrf.mxu2  ;;  %v13298_v46 = vor.u32 %v14350_v1, %v13297_v37  ;;  %v13107_v37 = vld [vmem:[#allocation7 + $0x1e38] sm:$0xf0] }
 0x6b9   :  { %9099 = vmatpush.msra.mxu1 %v8950_v42  ;;  %v7326_v33 = vpop.f32.mrf.mxu3  ;;  %v13206_v42 = vor.u32 %v14322_v60, %v13203_v11  ;;  %v13138_v16 = vor.u32 %v14310_v32, %v13137_v35  ;;  %v8903_v40 = vld [vmem:[#allocation10 + $0x150] sm:$0xff]  ;;  %v8910_v35 = vld [vmem:[#allocation10 + $0x188] sm:$0xff] }
 0x6ba   :  { %8744 = vmatpush.bf16.msra.mxu2 %v13218_v53  ;;  %v13265_v53 = vld [vmem:[#allocation7 + $0x1f58] sm:$0xf] }
 0x6bb   :  { %8757 = vmatpush.bf16.msra.mxu3 %v13222_v62  ;;  %9100 = vmatpush.msra.mxu1 %v8949_v52  ;;  %v8944_v62 = vld [vmem:[#allocation10 + $0x298] sm:$0xff]  ;;  %v13266_v19 = vor.u32 %v14342_v38, %v13265_v53  ;;  %v13169_v52 = vld [vmem:[#allocation7 + $0x1e98] sm:$0xf] }
 0x6bc   :  { %v14302_v33 = vld [vmem:[#allocation7 + $0x1e34] sm:$0xf0] }
 0x6bd   :  { %9101 = vmatpush.msra.mxu1 %v8948_v59  ;;  %v8919_v3 = vld [vmem:[#allocation10 + $0x1d0] sm:$0xff] }
 0x6be   :  { %8745 = vmatpush.bf16.msra.mxu2 %v13186_v10  ;;  %v8899_v60 = vld [vmem:[#allocation10 + $0x130] sm:$0xff] }
 0x6bf   :  { %8758 = vmatpush.bf16.msra.mxu3 %v13190_v34  ;;  %9102 = vmatpush.msra.mxu1 %v8947_v50  ;;  %v13233_v34 = vld [vmem:[#allocation7 + $0x1f18] sm:$0xf]  ;;  %v13139_v50 = vld [vmem:[#allocation7 + $0x1e78] sm:$0xf0] }
 0x6c0   :  { %v13234_v43 = vor.u32 %v14334_v20, %v13233_v34  ;;  %v8922_v34 = vld [vmem:[#allocation10 + $0x1e8] sm:$0xff]  ;;  %v8904_v20 = vld [vmem:[#allocation10 + $0x158] sm:$0xff]  ;;  %v8915_v11 = vld [vmem:[#allocation10 + $0x1b0] sm:$0xff] }
 0x6c1   :  { %9103 = vmatpush.msra.mxu1 %v8946_v30 }
 0x6c2   :  { %8746 = vmatpush.bf16.msra.mxu2 %v13154_v4  ;;  %v8941_v4 = vld [vmem:[#allocation10 + $0x280] sm:$0xff] }
 0x6c3   :  { %8759 = vmatpush.bf16.msra.mxu3 %v13158_v49  ;;  %9104 = vmatpush.msra.mxu1 %v8945_v47  ;;  %v8737_v10 = vpop.f32.mrf.mxu1  ;;  %v14326_v49 = vld [vmem:[#allocation7 + $0x1ef4] sm:$0xf0] }
 0x6c4   :  { %v8820_v28 = vadd.f32 %v8737_v10, %v8323_v41  ;;  %v13202_v44 = vor.u32 %v14326_v49, %v13201_v6  ;;  %v8917_v6 = vld [vmem:[#allocation10 + $0x1c0] sm:$0xff]  ;;  %v8900_v49 = vld [vmem:[#allocation10 + $0x138] sm:$0xff] }
 0x6c5   :  { %9105 = vmatpush.msra.mxu1 %v8944_v62 }
 0x6c6   :  { %8747 = vmatpush.bf16.msra.mxu2 %v13122_v54  ;;  %v8846_v5 = vadd.f32 %v8830_v27, %v8820_v28  ;;  %v14318_v54 = vld [vmem:[#allocation7 + $0x1eb4] sm:$0xf0]  ;;  %v8908_v27 = vld [vmem:[#allocation10 + $0x178] sm:$0xff] }
 0x6c7   :  { %8760 = vmatpush.bf16.msra.mxu3 %v13126_v57  ;;  %9106 = vmatpush.msra.mxu1 %v8943_v17  ;;  %v13171_v57 = vld [vmem:[#allocation7 + $0x1eb8] sm:$0xf0]  ;;  %v13170_v25 = vor.u32 %v14318_v54, %v13169_v52  ;;  %v8913_v52 = vld [vmem:[#allocation10 + $0x1a0] sm:$0xff]  ;;  %v8896_v54 = vld [vmem:[#allocation10 + $0x118] sm:$0xff] }
 0x6c8   :  { %v8854_v14 = vmax.f32 %v8846_v5, 0.0  ;;  %v13174_v21 = vor.u32 %v14314_v63, %v13171_v57  ;;  %v8902_v5 = vld [vmem:[#allocation10 + $0x148] sm:$0xff]  ;;  %v8912_v63 = vld [vmem:[#allocation10 + $0x198] sm:$0xff]  ;;  %v8895_v57 = vld [vmem:[#allocation10 + $0x110] sm:$0xff] }
 0x6c9   :  { %9107 = vmatpush.msra.mxu1 %v8942_v9  ;;  %v8920_v9 = vld [vmem:[#allocation10 + $0x1d8] sm:$0xff] }
 0x6ca   :  { %8748 = vmatpush.bf16.msra.mxu2 %v13090_v24  ;;  %9029 = vmatmul.f32.vlgmr.msrb.gmra.mxu1 %v8854_v14  ;;  %v8916_v14 = vld [vmem:[#allocation10 + $0x1b8] sm:$0xff] }
 0x6cb   :  { %8761 = vmatpush.bf16.msra.mxu3 %v13094_v12  ;;  %9108 = vmatpush.msra.mxu1 %v8941_v4  ;;  %v8739_v7 = vpop.f32.mrf.mxu1  ;;  %v13142_v12 = vor.u32 %v14306_v13, %v13139_v50  ;;  %v8909_v13 = vld [vmem:[#allocation10 + $0x180] sm:$0xff]  ;;  %v8972_v50 = vld [vmem:[#allocation10 + $0x378] sm:$0xff] }
 0x6cc   :  { %v8914_v7 = vld [vmem:[#allocation10 + $0x1a8] sm:$0xff] }
 0x6cd   :  { %8749 = vmatmul.bf16.vlgmr.msra.gmra.mxu2 %v15631_v23 }
 0x6ce   :  { %8793 = vmatpush.bf16.msrb.mxu2 %v13330_v2  ;;  %8762 = vmatmul.bf16.vlgmr.msra.gmra.mxu3 %v15631_v23  ;;  %v13105_v2 = vld [vmem:[#allocation7 + $0x1e18] sm:$0xf] }
 0x6cf   :  { %8806 = vmatpush.bf16.msrb.mxu3 %v13334_v58  ;;  %v14298_v58 = vld [vmem:[#allocation7 + $0x1e1c] sm:$0xf]  ;;  %v13106_v1 = vor.u32 %v14302_v33, %v13105_v2  ;;  %v8970_v33 = vld [vmem:[#allocation10 + $0x368] sm:$0xff] }
 0x6d0   :  { %v7756_v55 = vpop.f32.mrf.mxu2  ;;  %v8987_v2 = vld [vmem:[#allocation10 + $0x3f0] sm:$0xff] }
 0x6d1   :  { %v15745_v59 = vadd.f32 %v7756_v55, %v15724_v26  ;;  %v7769_v0 = vpop.f32.mrf.mxu3  ;;  %v13110_v26 = vor.u32 %v14298_v58, %v13107_v37  ;;  %v8986_v58 = vld [vmem:[#allocation10 + $0x3e8] sm:$0xff]  ;;  %v8969_v37 = vld [vmem:[#allocation10 + $0x360] sm:$0xff] }
 0x6d2   :  { %8794 = vmatpush.bf16.msrb.mxu2 %v13298_v46  ;;  %v15748_v24 = vadd.f32 %v7769_v0, %v15727_v51  ;;  %v8327_v51 = vadd.f32 %v15731_v22, %v15708_v8  ;;  %v8924_v8 = vld [vmem:[#allocation10 + $0x1f8] sm:$0xff]  ;;  %v8907_v22 = vld [vmem:[#allocation10 + $0x170] sm:$0xff]  ;;  %v8893_v0 = vld [vmem:[#allocation10 + $0x100] sm:$0xff] }
 0x6d3   :  { %8807 = vmatpush.bf16.msrb.mxu3 %v13302_v39 }
 0x6d6   :  { %8795 = vmatpush.bf16.msrb.mxu2 %v13266_v19  ;;  %v8923_v19 = vld [vmem:[#allocation10 + $0x1f0] sm:$0xff] }
 0x6d7   :  { %8808 = vmatpush.bf16.msrb.mxu3 %v13270_v31  ;;  %v8906_v31 = vld [vmem:[#allocation10 + $0x168] sm:$0xff] }
 0x6d8   :  { %v7758_v30 = vpop.f32.mrf.mxu2 }
 0x6d9   :  { %v7771_v18 = vpop.f32.mrf.mxu3 }
 0x6da   :  { %8796 = vmatpush.bf16.msrb.mxu2 %v13234_v43  ;;  %v8918_v43 = vld [vmem:[#allocation10 + $0x1c8] sm:$0xff]  ;;  %v8968_v18 = vld [vmem:[#allocation10 + $0x358] sm:$0xff] }
 0x6db   :  { %8809 = vmatpush.bf16.msrb.mxu3 %v13238_v48  ;;  %v8901_v48 = vld [vmem:[#allocation10 + $0x140] sm:$0xff] }
 0x6de   :  { %8797 = vmatpush.bf16.msrb.mxu2 %v13202_v44  ;;  %v8898_v44 = vld [vmem:[#allocation10 + $0x128] sm:$0xff] }
 0x6df   :  { %8810 = vmatpush.bf16.msrb.mxu3 %v13206_v42  ;;  %v8897_v42 = vld [vmem:[#allocation10 + $0x120] sm:$0xff] }
 0x6e2   :  { %8798 = vmatpush.bf16.msrb.mxu2 %v13170_v25  ;;  %v8911_v25 = vld [vmem:[#allocation10 + $0x190] sm:$0xff] }
 0x6e3   :  { %8811 = vmatpush.bf16.msrb.mxu3 %v13174_v21  ;;  %v8789_v47 = vpop.f32.mrf.mxu1  ;;  %v8894_v21 = vld [vmem:[#allocation10 + $0x108] sm:$0xff] }
 0x6e4   :  { %v8824_v46 = vadd.f32 %v8789_v47, %v8327_v51  ;;  %v8984_v51 = vld [vmem:[#allocation10 + $0x3d8] sm:$0xff]  ;;  %v8983_v47 = vld [vmem:[#allocation10 + $0x3d0] sm:$0xff] }
 0x6e6   :  { %8799 = vmatpush.bf16.msrb.mxu2 %v13138_v16  ;;  %v8850_v39 = vadd.f32 %v8834_v45, %v8824_v46  ;;  %v8988_v16 = vld [vmem:[#allocation10 + $0x3f8] sm:$0xff]  ;;  %v8967_v45 = vld [vmem:[#allocation10 + $0x350] sm:$0xff]  ;;  %v8966_v46 = vld [vmem:[#allocation10 + $0x348] sm:$0xff] }
 0x6e7   :  { %8812 = vmatpush.bf16.msrb.mxu3 %v13142_v12  ;;  %v8971_v12 = vld [vmem:[#allocation10 + $0x370] sm:$0xff] }
 0x6e8   :  { %v8858_v53 = vmax.f32 %v8850_v39, 0.0  ;;  %v8982_v39 = vld [vmem:[#allocation10 + $0x3c8] sm:$0xff] }
 0x6ea   :  { %8800 = vmatpush.bf16.msrb.mxu2 %v13106_v1  ;;  %9109 = vmatmul.f32.vlgmr.msra.gmra.mxu1 %v8858_v53  ;;  %v8985_v1 = vld [vmem:[#allocation10 + $0x3e0] sm:$0xff] }
 0x6eb   :  { %8813 = vmatpush.bf16.msrb.mxu3 %v13110_v26  ;;  %v8791_v38 = vpop.f32.mrf.mxu1  ;;  %v8965_v53 = vld [vmem:[#allocation10 + $0x340] sm:$0xff] }
 0x6ec   :  { %v8981_v38 = vld [vmem:[#allocation10 + $0x3c0] sm:$0xff] }
 0x6ed   :  { %8801 = vmatmul.bf16.vlgmr.msrb.gmra.mxu2 %v15631_v23 }
 0x6ee   :  { %8814 = vmatmul.bf16.vlgmr.msrb.gmra.mxu3 %v15631_v23  ;;  %9033 = vmatpush.msra.mxu2 %v8908_v27  ;;  %v8962_v27 = vld [vmem:[#allocation10 + $0x328] sm:$0xff] }
 0x6ef   :  { %9053 = vmatpush.msra.mxu3 %v8924_v8  ;;  %v8978_v8 = vld [vmem:[#allocation10 + $0x3a8] sm:$0xff] }
 0x6f0   :  { %v7808_v62 = vpop.f32.mrf.mxu2  ;;  %9034 = vmatpush.msra.mxu2 %v8907_v22  ;;  %v8961_v22 = vld [vmem:[#allocation10 + $0x320] sm:$0xff] }
 0x6f1   :  { %v15756_v15 = vadd.f32 %v7808_v62, %v15734_v56  ;;  %v7821_v29 = vpop.f32.mrf.mxu3  ;;  %9054 = vmatpush.msra.mxu3 %v8923_v19  ;;  %v8905_v56 = vld [vmem:[#allocation10 + $0x160] sm:$0xff]  ;;  %v8964_v62 = vld [vmem:[#allocation10 + $0x338] sm:$0xff] }
 0x6f2   :  { %v15759_v17 = vadd.f32 %v7821_v29, %v15737_v61  ;;  %9035 = vmatpush.msra.mxu2 %v8906_v31  ;;  %v8921_v61 = vld [vmem:[#allocation10 + $0x1e0] sm:$0xff]  ;;  %v8980_v29 = vld [vmem:[#allocation10 + $0x3b8] sm:$0xff] }
 0x6f3   :  { %9055 = vmatpush.msra.mxu3 %v8922_v34  ;;  %v8977_v19 = vld [vmem:[#allocation10 + $0x3a0] sm:$0xff]  ;;  %v8960_v31 = vld [vmem:[#allocation10 + $0x318] sm:$0xff] }
 0x6f4   :  { %9036 = vmatpush.msra.mxu2 %v8905_v56  ;;  %v8976_v34 = vld [vmem:[#allocation10 + $0x398] sm:$0xff] }
 0x6f5   :  { %9056 = vmatpush.msra.mxu3 %v8921_v61  ;;  %v14378_v61 = vld [vmem:[#allocation8] sm:$0xff] }
 0x6f6   :  { %9037 = vmatpush.msra.mxu2 %v8904_v20  ;;  %v8831_v20 = vperm.slane %v14378_v61, 2 }
 0x6f7   :  { %9057 = vmatpush.msra.mxu3 %v8920_v9 }
 0x6f8   :  { %v7810_v23 = vpop.f32.mrf.mxu2  ;;  %9038 = vmatpush.msra.mxu2 %v8903_v40  ;;  %v8832_v40 = vperm.slane %v14378_v61, 3 }
 0x6f9   :  { %v7823_v41 = vpop.f32.mrf.mxu3  ;;  %9058 = vmatpush.msra.mxu3 %v8919_v3  ;;  %v8963_v23 = vld [vmem:[#allocation10 + $0x330] sm:$0xff] }
 0x6fa   :  { %9039 = vmatpush.msra.mxu2 %v8902_v5  ;;  %v8979_v41 = vld [vmem:[#allocation10 + $0x3b0] sm:$0xff] }
 0x6fb   :  { %9059 = vmatpush.msra.mxu3 %v8918_v43  ;;  %v8959_v3 = vld [vmem:[#allocation10 + $0x310] sm:$0xff] }
 0x6fc   :  { %9040 = vmatpush.msra.mxu2 %v8901_v48 }
 0x6fd   :  { %9060 = vmatpush.msra.mxu3 %v8917_v6  ;;  %v8958_v6 = vld [vmem:[#allocation10 + $0x308] sm:$0xff] }
 0x6fe   :  { %9041 = vmatpush.msra.mxu2 %v8900_v49  ;;  %v8974_v49 = vld [vmem:[#allocation10 + $0x388] sm:$0xff] }
 0x6ff   :  { %9061 = vmatpush.msra.mxu3 %v8916_v14 }
 0x700   :  { %9042 = vmatpush.msra.mxu2 %v8899_v60 }
 0x701   :  { %9062 = vmatpush.msra.mxu3 %v8915_v11 }
 0x702   :  { %9043 = vmatpush.msra.mxu2 %v8898_v44 }
 0x703   :  { %9063 = vmatpush.msra.mxu3 %v8914_v7 }
 0x704   :  { %9044 = vmatpush.msra.mxu2 %v8897_v42  ;;  %v8835_v42 = vperm.slane %v14378_v61, 6 }
 0x705   :  { %9064 = vmatpush.msra.mxu3 %v8913_v52 }
 0x706   :  { %9045 = vmatpush.msra.mxu2 %v8896_v54 }
 0x707   :  { %9065 = vmatpush.msra.mxu3 %v8912_v63  ;;  %v8836_v63 = vperm.slane %v14378_v61, 7 }
 0x708   :  { %9046 = vmatpush.msra.mxu2 %v8895_v57 }
 0x709   :  { %9066 = vmatpush.msra.mxu3 %v8911_v25 }
 0x70a   :  { %9047 = vmatpush.msra.mxu2 %v8894_v21 }
 0x70b   :  { %9067 = vmatpush.msra.mxu3 %v8910_v35 }
 0x70c   :  { %9048 = vmatpush.msra.mxu2 %v8893_v0 }
 0x70d   :  { %9068 = vmatpush.msra.mxu3 %v8909_v13 }
 0x70e   :  { %9113 = vmatpush.msrb.mxu2 %v8972_v50 }
 0x70f   :  { %9133 = vmatpush.msrb.mxu3 %v8988_v16 }
 0x710   :  { %v15761_v36 = vpop.f32.mrf.mxu2  ;;  %9114 = vmatpush.msrb.mxu2 %v8971_v12 }
 0x711   :  { %v15763_v10 = vpop.f32.mrf.mxu3  ;;  %9134 = vmatpush.msrb.mxu3 %v8987_v2  ;;  %v8324_v56 = vadd.f32 %v15761_v36, %v15745_v59  ;;  %v8957_v59 = vld [vmem:[#allocation10 + $0x300] sm:$0xff] }
 0x712   :  { %9115 = vmatpush.msrb.mxu2 %v8970_v33  ;;  %v8325_v9 = vadd.f32 %v15763_v10, %v15748_v24  ;;  %v8973_v36 = vld [vmem:[#allocation10 + $0x380] sm:$0xff]  ;;  %v9010_v33 = vpop.f32.mrf.mxu0 }
 0x713   :  { %9135 = vmatpush.msrb.mxu3 %v8986_v58  ;;  %v14371_v2 = vld [vmem:[#allocation11] ss:$0 sm:$0xff] }
 0x714   :  { %9116 = vmatpush.msrb.mxu2 %v8969_v37 }
 0x715   :  { %9136 = vmatpush.msrb.mxu3 %v8985_v1 }
 0x716   :  { %9117 = vmatpush.msrb.mxu2 %v8968_v18 }
 0x717   :  { %9137 = vmatpush.msrb.mxu3 %v8984_v51 }
 0x718   :  { %v8255_v28 = vpop.f32.mrf.mxu2  ;;  %9118 = vmatpush.msrb.mxu2 %v8967_v45 }
 0x719   :  { %v8268_v4 = vpop.f32.mrf.mxu3  ;;  %9138 = vmatpush.msrb.mxu3 %v8983_v47 }
 0x71a   :  { %9119 = vmatpush.msrb.mxu2 %v8966_v46  ;;  %v8975_v4 = vld [vmem:[#allocation10 + $0x390] sm:$0xff] }
 0x71b   :  { %9139 = vmatpush.msrb.mxu3 %v8982_v39 }
 0x71c   :  { %9120 = vmatpush.msrb.mxu2 %v8965_v53 }
 0x71d   :  { %9140 = vmatpush.msrb.mxu3 %v8981_v38 }
 0x71e   :  { %9121 = vmatpush.msrb.mxu2 %v8964_v62 }
 0x71f   :  { %9141 = vmatpush.msrb.mxu3 %v8980_v29 }
 0x720   :  { %9122 = vmatpush.msrb.mxu2 %v8963_v23 }
 0x721   :  { %9142 = vmatpush.msrb.mxu3 %v8979_v41 }
 0x722   :  { %9123 = vmatpush.msrb.mxu2 %v8962_v27 }
 0x723   :  { %9143 = vmatpush.msrb.mxu3 %v8978_v8 }
 0x724   :  { %9124 = vmatpush.msrb.mxu2 %v8961_v22 }
 0x725   :  { %9144 = vmatpush.msrb.mxu3 %v8977_v19 }
 0x726   :  { %9125 = vmatpush.msrb.mxu2 %v8960_v31 }
 0x727   :  { %9145 = vmatpush.msrb.mxu3 %v8976_v34 }
 0x728   :  { %9126 = vmatpush.msrb.mxu2 %v8959_v3 }
 0x729   :  { %9146 = vmatpush.msrb.mxu3 %v8975_v4 }
 0x72a   :  { %9127 = vmatpush.msrb.mxu2 %v8958_v6 }
 0x72b   :  { %9147 = vmatpush.msrb.mxu3 %v8974_v49 }
 0x72c   :  { %9128 = vmatpush.msrb.mxu2 %v8957_v59 }
 0x72d   :  { %9148 = vmatpush.msrb.mxu3 %v8973_v36 }
 0x730   :  { %v15765_v55 = vpop.f32.mrf.mxu2 }
 0x731   :  { %v15767_v32 = vpop.f32.mrf.mxu3  ;;  %v8328_v7 = vadd.f32 %v15765_v55, %v15756_v15  ;;  %v9011_v55 = vadd.f32 %v14371_v2, %v9010_v33 }
 0x732   :  { %v8329_v52 = vadd.f32 %v15767_v32, %v15759_v17 }
 0x738   :  { %v8307_v30 = vpop.f32.mrf.mxu2 }
 0x739   :  { %v8320_v26 = vpop.f32.mrf.mxu3  ;;  %v9090_v30 = vpop.f32.mrf.mxu0 }
 0x747   :  { %v9030_v15 = vpop.f32.mrf.mxu1 }
 0x748   :  { %v9031_v37 = vadd.f32 %v9030_v15, %v9011_v55 }
 0x750   :  { %v8750_v28 = vpop.f32.mrf.mxu2 }
 0x751   :  { %v8821_v5 = vadd.f32 %v8750_v28, %v8324_v56  ;;  %v8763_v43 = vpop.f32.mrf.mxu3 }
 0x752   :  { %v8822_v48 = vadd.f32 %v8763_v43, %v8325_v9 }
 0x753   :  { %v8847_v14 = vadd.f32 %v8831_v20, %v8821_v5 }
 0x754   :  { %v8848_v60 = vadd.f32 %v8832_v40, %v8822_v48 }
 0x755   :  { %v8855_v11 = vmax.f32 %v8847_v14, 0.0 }
 0x756   :  { %v8856_v24 = vmax.f32 %v8848_v60, 0.0 }
 0x757   :  { %9049 = vmatmul.f32.vlgmr.msra.gmra.mxu2 %v8855_v11 }
 0x758   :  { %9069 = vmatmul.f32.vlgmr.msra.gmra.mxu3 %v8856_v24  ;;  %v8752_v10 = vpop.f32.mrf.mxu2 }
 0x759   :  { %v8765_v44 = vpop.f32.mrf.mxu3 }
 0x767   :  { %v9110_v18 = vpop.f32.mrf.mxu1 }
 0x770   :  { %v8802_v54 = vpop.f32.mrf.mxu2 }
 0x771   :  { %v8825_v57 = vadd.f32 %v8802_v54, %v8328_v7  ;;  %v8815_v25 = vpop.f32.mrf.mxu3 }
 0x772   :  { %v8826_v21 = vadd.f32 %v8815_v25, %v8329_v52 }
 0x773   :  { %v8851_v35 = vadd.f32 %v8835_v42, %v8825_v57 }
 0x774   :  { %v8852_v0 = vadd.f32 %v8836_v63, %v8826_v21 }
 0x775   :  { %v8859_v13 = vmax.f32 %v8851_v35, 0.0 }
 0x776   :  { %v8860_v50 = vmax.f32 %v8852_v0, 0.0 }
 0x777   :  { %9129 = vmatmul.f32.vlgmr.msrb.gmra.mxu2 %v8859_v13 }
 0x778   :  { %9149 = vmatmul.f32.vlgmr.msrb.gmra.mxu3 %v8860_v50  ;;  %v8804_v16 = vpop.f32.mrf.mxu2 }
 0x779   :  { %v8817_v12 = vpop.f32.mrf.mxu3 }
 0x7da   :  { %v9050_v58 = vpop.f32.mrf.mxu2 }
 0x7db   :  { %v9051_v17 = vadd.f32 %v9050_v58, %v9031_v37  ;;  %v9070_v32 = vpop.f32.mrf.mxu3 }
 0x7dd   :  { %v9071_v1 = vadd.f32 %v9070_v32, %v9051_v17 }
 0x7df   :  { %v9091_v26 = vadd.f32 %v9090_v30, %v9071_v1 }
 0x7e1   :  { %v9111_v51 = vadd.f32 %v9110_v18, %v9091_v26 }
 0x7fa   :  { %v9130_v45 = vpop.f32.mrf.mxu2 }
 0x7fb   :  { %v9131_v47 = vadd.f32 %v9130_v45, %v9111_v51  ;;  %v9150_v46 = vpop.f32.mrf.mxu3 }
 0x7fd   :  { %v9151_v39 = vadd.f32 %v9150_v46, %v9131_v47 }
 0x7ff   :  { %9153 = vst [vmem:[#allocation13] sm:$0xff] %v9151_v39 }
 0x800   :  { %9164 = dma.vmem_to_hbm [thread:$0]  %s9160_s10, 128, %s9162_s6, [#allocation4]  }
 0x801   :  { %14555 = dma.done.wait [#allocation4], 128  }
 0x802   :  { %14556 = vsyncadd [#allocation4], 4294967168 }
 0x803   :  { %9169 = vsyncpa [#allocation3], 1 }
 0x804   :  { %9170 = vsyncpa [#allocation6], 1 }
 0x805   :  { %9171 = vsyncpa [#allocation9], 1 }
 0x806   :  { %9172 = vsyncpa [#allocation12], 1 }
 0x807   :  { %9173 = vsyncpa [#allocation4], 1 }

</bundles_post_ra>
